<compile_context>
chip_gen: v7x
topology: tpu7x:2x2x1
jax: 0.10.0
libtpu: 0.0.40
codegen_flags: <defaults>
</compile_context>

<pallas_src>
import numpy as np
import jax
import jax.numpy as jnp
from jax.experimental import pallas as pl
from jax.experimental.pallas import tpu as pltpu


K1_PAD = 32   # conv1's 25 im2col taps padded to a sublane-aligned contraction size


# --------------------------------------------------------------------------
# conv1 im2col (wrapper-side, layout-only, 1-channel input)
# --------------------------------------------------------------------------
def conv1_im2col_patches(x_nhwc):
    """5x5 / pad-2 im2col of the single-channel input, built in XLA.

    Returns (N*H*W, K1_PAD) f32, tap order kh*5+kw, columns 25.. are zero."""
    N, H, W, _ = x_nhwc.shape
    xp = jnp.pad(x_nhwc[..., 0], ((0, 0), (2, 2), (2, 2)))          # (N, H+4, W+4)
    cols = [xp[:, i:i + H, j:j + W] for i in range(5) for j in range(5)]
    patches = jnp.stack(cols, axis=-1).reshape(N * H * W, 25)
    return jnp.pad(patches, ((0, 0), (0, K1_PAD - 25)))


# --------------------------------------------------------------------------
# Fused conv1..conv4 Pallas kernel
# --------------------------------------------------------------------------
def super_resolution_pallas(patches, params, N, H, W, grid_steps=None):
    """patches: (N*H*W, K1_PAD) conv1 im2col.  Returns conv4 output (N*H*W, r*r)."""
    HW = H * W
    if grid_steps is None:
        # 2 "parallel" steps keep both v7x TensorCores busy; on v5e/v6e (1 TC) the
        # extra step only costs ~0.35us -- pass grid_steps=1 there to collapse.
        grid_steps = 2 if (N % 2 == 0 and N >= 2) else 1
    assert N % grid_steps == 0
    NB = N // grid_steps          # images per grid step
    MB = NB * HW                  # GEMM rows per grid step

    w1, w2, w3, w4 = (p["w_flat"] for p in params)   # (K, Cout) matmul layouts
    b1, b2, b3, b4 = (p["b2d"] for p in params)      # (1, Cout)
    w1 = jnp.pad(w1, ((0, K1_PAD - w1.shape[0]), (0, 0)))           # (32, 64)
    C1, C2, C3, C4 = w1.shape[1], w2.shape[1], w3.shape[1], w4.shape[1]
    CMAX = max(C1, C2, C3)        # widest 3x3 input channel count (64)

    def kernel(x_ref, w1_ref, b1_ref, w2_ref, b2_ref, w3_ref, b3_ref,
               w4_ref, b4_ref, o_ref, padc_ref, acc_ref):
        f32 = jnp.float32

        # Zero only the 1-pixel halo perimeter of the shared padded scratch.
        # The interior is fully overwritten by every layer; the perimeter is never
        # written again, so it stays zero across conv2/3/4.  Done every grid step
        # (never gated on program_id) => megacore-"parallel" safe.
        padc_ref[:, 0:1, :, :] = jnp.zeros((NB, 1, W + 2, CMAX), f32)
        padc_ref[:, H + 1:H + 2, :, :] = jnp.zeros((NB, 1, W + 2, CMAX), f32)
        padc_ref[:, :, 0:1, :] = jnp.zeros((NB, H + 2, 1, CMAX), f32)
        padc_ref[:, :, W + 1:W + 2, :] = jnp.zeros((NB, H + 2, 1, CMAX), f32)

        # ---- conv1: 5x5, 1 -> 64, pad 2, ReLU: one MXU matmul on the im2col ----
        y1 = jnp.dot(x_ref[...], w1_ref[...], preferred_element_type=f32)
        y1 = jnp.maximum(y1 + b1_ref[...], 0.0)                 # (MB, 64)

        # ---- generic 3x3 conv: 9 accumulated per-tap MXU matmuls ----
        def conv3x3(act_flat, cin, cout, w_ref, b_ref, relu):
            # Stage activation into the zero-haloed scratch interior.  Channels
            # cin..CMAX may hold stale data from a previous layer but are never
            # read (all reads below slice 0:cin).
            padc_ref[:, 1:1 + H, 1:1 + W, 0:cin] = act_flat.reshape(NB, H, W, cin)
            # Bias-initialised accumulator in VMEM (bounds vreg live ranges).
            acc_ref[:, 0:cout] = jnp.broadcast_to(b_ref[...], (MB, cout))
            for kh in range(3):
                for kw in range(3):
                    tap = kh * 3 + kw
                    win = padc_ref[:, kh:kh + H, kw:kw + W, 0:cin]
                    acc_ref[:, 0:cout] += jnp.dot(
                        win.reshape(MB, cin),
                        w_ref[tap * cin:(tap + 1) * cin, :],
                        preferred_element_type=f32)
            y = acc_ref[:, 0:cout]
            return jnp.maximum(y, 0.0) if relu else y

        y2 = conv3x3(y1, C1, C2, w2_ref, b2_ref, True)          # (MB, 64)
        y3 = conv3x3(y2, C2, C3, w3_ref, b3_ref, True)          # (MB, 32)
        y4 = conv3x3(y3, C3, C4, w4_ref, b4_ref, False)         # (MB, r*r)

        o_ref[...] = y4.astype(o_ref.dtype)

    const = lambda g: (0, 0)
    return pl.pallas_call(
        kernel,
        out_shape=jax.ShapeDtypeStruct((N * HW, C4), patches.dtype),
        grid=(grid_steps,),
        in_specs=[
            pl.BlockSpec((MB, K1_PAD), lambda g: (g, 0)),
            pl.BlockSpec(w1.shape, const), pl.BlockSpec(b1.shape, const),
            pl.BlockSpec(w2.shape, const), pl.BlockSpec(b2.shape, const),
            pl.BlockSpec(w3.shape, const), pl.BlockSpec(b3.shape, const),
            pl.BlockSpec(w4.shape, const), pl.BlockSpec(b4.shape, const),
        ],
        out_specs=pl.BlockSpec((MB, C4), lambda g: (g, 0)),
        scratch_shapes=[
            pltpu.VMEM((NB, H + 2, W + 2, CMAX), jnp.float32),  # shared 3x3 halo
            pltpu.VMEM((MB, CMAX), jnp.float32),                # per-layer accumulator
        ],
        compiler_params=pltpu.CompilerParams(
            dimension_semantics=("parallel",)),
    )(patches, w1, b1, w2, b2, w3, b3, w4, b4)


# --------------------------------------------------------------------------
# Parameter init (deterministic, mirrors torch.nn.init.orthogonal_)
# --------------------------------------------------------------------------
def orthogonal_init(key, shape_oihw, gain=1.0):
    rows = shape_oihw[0]
    cols = int(np.prod(shape_oihw[1:]))
    a = jax.random.normal(key, (max(rows, cols), min(rows, cols)), jnp.float32)
    q, r = jnp.linalg.qr(a)
    q = q * jnp.sign(jnp.diagonal(r))
    if rows < cols:
        q = q.T
    w = gain * q[:rows, :cols]
    return w.reshape(shape_oihw)


def make_params(key, upscale_factor):
    gain_relu = float(np.sqrt(2.0))  # init.calculate_gain('relu')
    specs = [
        # (Cout, Cin, KH, KW, pad, relu, gain)
        (64, 1, 5, 5, 2, True, gain_relu),
        (64, 64, 3, 3, 1, True, gain_relu),
        (32, 64, 3, 3, 1, True, gain_relu),
        (upscale_factor ** 2, 32, 3, 3, 1, False, 1.0),
    ]
    params = []
    for (cout, cin, kh, kw, pad, relu, gain) in specs:
        key, wkey, bkey = jax.random.split(key, 3)
        w_oihw = orthogonal_init(wkey, (cout, cin, kh, kw), gain=gain)
        # Conv2d default bias init: U(-1/sqrt(fan_in), 1/sqrt(fan_in))
        bound = 1.0 / np.sqrt(cin * kh * kw)
        b = jax.random.uniform(bkey, (cout,), jnp.float32, -bound, bound)
        w_hwio = jnp.transpose(w_oihw, (2, 3, 1, 0))          # (KH, KW, Cin, Cout)
        w_flat = w_hwio.reshape(kh * kw * cin, cout)          # per-tap matmul layout
        params.append(dict(w_hwio=w_hwio, w_flat=w_flat,
                           b=b, b2d=b.reshape(1, cout),
                           pad=pad, relu=relu))
    return params


# --------------------------------------------------------------------------
# Forward pass (NCHW in / NCHW out, matching the PyTorch module)
# --------------------------------------------------------------------------
def pixel_shuffle_nhwc(x_nhwc, r):
    # (N, H, W, r*r) -> (N, H*r, W*r, 1); channel index = i*r + j (PyTorch order)
    N, H, W, C = x_nhwc.shape
    assert C == r * r
    x = x_nhwc.reshape(N, H, W, r, r)
    x = jnp.transpose(x, (0, 1, 3, 2, 4))
    return x.reshape(N, H * r, W * r, 1)


def super_resolution_forward(x_nchw, params, upscale_factor):
    N, _, H, W = x_nchw.shape
    x = jnp.transpose(x_nchw, (0, 2, 3, 1))         # NCHW -> NHWC (N, H, W, 1)
    patches = conv1_im2col_patches(x)               # (N*H*W, 32)
    y = super_resolution_pallas(patches, params, N, H, W)   # (N*H*W, r*r)
    y = y.reshape(N, H, W, -1)                      # free layout reshape
    y = pixel_shuffle_nhwc(y, upscale_factor)
    return jnp.transpose(y, (0, 3, 1, 2))           # NHWC -> NCHW


# --------------------------------------------------------------------------
# Pure-JAX reference (for correctness check)
# --------------------------------------------------------------------------
def reference_forward(x_nchw, params, upscale_factor):
    x = jnp.transpose(x_nchw, (0, 2, 3, 1))
    for p in params:
        x = jax.lax.conv_general_dilated(
            x, p["w_hwio"], window_strides=(1, 1),
            padding=[(p["pad"], p["pad"])] * 2,
            dimension_numbers=("NHWC", "HWIO", "NHWC"),
            precision=jax.lax.Precision.HIGHEST)
        x = x + p["b"][None, None, None, :]
        if p["relu"]:
            x = jnp.maximum(x, 0.0)
    x = pixel_shuffle_nhwc(x, upscale_factor)
    return jnp.transpose(x, (0, 3, 1, 2))


if __name__ == "__main__":
    upscale_factor = 3
    key = jax.random.PRNGKey(0)
    key, xk, pk = jax.random.split(key, 3)

    # Input matches nn.Conv2d(1, 64, ...): single input channel, NCHW.
    x = jax.random.normal(xk, (2, 1, 16, 16), jnp.float32)
    params = make_params(pk, upscale_factor)

    fwd = jax.jit(super_resolution_forward, static_argnums=2)
    out = jax.block_until_ready(fwd(x, params, upscale_factor))
    assert out.shape == (2, 1, 16 * upscale_factor, 16 * upscale_factor), out.shape

    ref = jax.block_until_ready(reference_forward(x, params, upscale_factor))
    # MXU f32 matmuls may run at reduced operand precision by default on TPU;
    # 1e-2 leaves headroom for that while still catching any real indexing /
    # layout bug (those produce O(1) errors).
    np.testing.assert_allclose(np.asarray(out), np.asarray(ref),
                               rtol=1e-2, atol=1e-2)

    print("KERNEL_OK")
</pallas_src>

<mosaic_0001>
module attributes {stable_mosaic.version = 11 : i64} {
  func.func @kernel(%arg0: i32, %arg1: memref<256x32xf32, #tpu.memory_space<vmem>>, %arg2: memref<32x64xf32, #tpu.memory_space<vmem>>, %arg3: memref<1x64xf32, #tpu.memory_space<vmem>>, %arg4: memref<576x64xf32, #tpu.memory_space<vmem>>, %arg5: memref<1x64xf32, #tpu.memory_space<vmem>>, %arg6: memref<576x32xf32, #tpu.memory_space<vmem>>, %arg7: memref<1x32xf32, #tpu.memory_space<vmem>>, %arg8: memref<288x9xf32, #tpu.memory_space<vmem>>, %arg9: memref<1x9xf32, #tpu.memory_space<vmem>>, %arg10: memref<256x9xf32, #tpu.memory_space<vmem>>, %arg11: memref<1x18x18x64xf32, #tpu.memory_space<vmem>>, %arg12: memref<256x64xf32, #tpu.memory_space<vmem>>) attributes {dimension_semantics = [#tpu.dimension_semantics<parallel>], iteration_bounds = array<i64: 2>, scalar_prefetch = 0 : i64, scratch_operands = 2 : i64, tpu.core_type = #tpu.core_type<tc>, window_params = [{transform_indices = @transform_0, window_bounds = array<i64: 256, 32>}, {pipeline_mode = #tpu.pipeline_mode<synchronous>, transform_indices = @transform_1, window_bounds = array<i64: 32, 64>}, {pipeline_mode = #tpu.pipeline_mode<synchronous>, transform_indices = @transform_2, window_bounds = array<i64: 1, 64>}, {pipeline_mode = #tpu.pipeline_mode<synchronous>, transform_indices = @transform_3, window_bounds = array<i64: 576, 64>}, {pipeline_mode = #tpu.pipeline_mode<synchronous>, transform_indices = @transform_4, window_bounds = array<i64: 1, 64>}, {pipeline_mode = #tpu.pipeline_mode<synchronous>, transform_indices = @transform_5, window_bounds = array<i64: 576, 32>}, {pipeline_mode = #tpu.pipeline_mode<synchronous>, transform_indices = @transform_6, window_bounds = array<i64: 1, 32>}, {pipeline_mode = #tpu.pipeline_mode<synchronous>, transform_indices = @transform_7, window_bounds = array<i64: 288, 9>}, {pipeline_mode = #tpu.pipeline_mode<synchronous>, transform_indices = @transform_8, window_bounds = array<i64: 1, 9>}, {transform_indices = @transform_9, window_bounds = array<i64: 256, 9>}]} {
    %cst = arith.constant 0.000000e+00 : f32
    %0 = vector.broadcast %cst : f32 to vector<1x1x18x64xf32>
    %c0 = arith.constant 0 : index
    %c0_0 = arith.constant 0 : index
    %c0_1 = arith.constant 0 : index
    %c0_2 = arith.constant 0 : index
    %1 = vector.load %arg11[%c0, %c0_0, %c0_1, %c0_2] : memref<1x18x18x64xf32, #tpu.memory_space<vmem>>, vector<1x1x18x64xf32>
    tpu.vector_store %arg11[%c0, %c0_0, %c0_1, %c0_2], %0 {strides = array<i32>} : memref<1x18x18x64xf32, #tpu.memory_space<vmem>>, vector<1x1x18x64xf32>,
    %cst_3 = arith.constant 0.000000e+00 : f32
    %2 = vector.broadcast %cst_3 : f32 to vector<1x1x18x64xf32>
    %c0_4 = arith.constant 0 : index
    %c17 = arith.constant 17 : index
    %c0_5 = arith.constant 0 : index
    %c0_6 = arith.constant 0 : index
    %3 = vector.load %arg11[%c0_4, %c17, %c0_5, %c0_6] : memref<1x18x18x64xf32, #tpu.memory_space<vmem>>, vector<1x1x18x64xf32>
    tpu.vector_store %arg11[%c0_4, %c17, %c0_5, %c0_6], %2 {strides = array<i32>} : memref<1x18x18x64xf32, #tpu.memory_space<vmem>>, vector<1x1x18x64xf32>,
    %cst_7 = arith.constant 0.000000e+00 : f32
    %4 = vector.broadcast %cst_7 : f32 to vector<1x18x1x64xf32>
    %c0_8 = arith.constant 0 : index
    %c0_9 = arith.constant 0 : index
    %c0_10 = arith.constant 0 : index
    %c0_11 = arith.constant 0 : index
    %5 = vector.load %arg11[%c0_8, %c0_9, %c0_10, %c0_11] : memref<1x18x18x64xf32, #tpu.memory_space<vmem>>, vector<1x18x1x64xf32>
    tpu.vector_store %arg11[%c0_8, %c0_9, %c0_10, %c0_11], %4 {strides = array<i32>} : memref<1x18x18x64xf32, #tpu.memory_space<vmem>>, vector<1x18x1x64xf32>,
    %cst_12 = arith.constant 0.000000e+00 : f32
    %6 = vector.broadcast %cst_12 : f32 to vector<1x18x1x64xf32>
    %c0_13 = arith.constant 0 : index
    %c0_14 = arith.constant 0 : index
    %c17_15 = arith.constant 17 : index
    %c0_16 = arith.constant 0 : index
    %7 = vector.load %arg11[%c0_13, %c0_14, %c17_15, %c0_16] : memref<1x18x18x64xf32, #tpu.memory_space<vmem>>, vector<1x18x1x64xf32>
    tpu.vector_store %arg11[%c0_13, %c0_14, %c17_15, %c0_16], %6 {strides = array<i32>} : memref<1x18x18x64xf32, #tpu.memory_space<vmem>>, vector<1x18x1x64xf32>,
    %c0_17 = arith.constant 0 : index
    %c0_18 = arith.constant 0 : index
    %8 = vector.load %arg1[%c0_17, %c0_18] : memref<256x32xf32, #tpu.memory_space<vmem>>, vector<256x32xf32>
    %c0_19 = arith.constant 0 : index
    %c0_20 = arith.constant 0 : index
    %9 = vector.load %arg2[%c0_19, %c0_20] : memref<32x64xf32, #tpu.memory_space<vmem>>, vector<32x64xf32>
    %cst_21 = arith.constant dense<0.000000e+00> : vector<256x64xf32>
    %10 = tpu.matmul %8, %9, %cst_21 {dimension_numbers = #tpu.dot_dimension_numbers<[1], [0], [0], [1], [0, 0, 1, 1], [], []>} : vector<256x32xf32>, vector<32x64xf32>, vector<256x64xf32> -> vector<256x64xf32>
    %c0_22 = arith.constant 0 : index
    %c0_23 = arith.constant 0 : index
    %11 = vector.load %arg3[%c0_22, %c0_23] : memref<1x64xf32, #tpu.memory_space<vmem>>, vector<1x64xf32>
    %12 = vector.broadcast %11 : vector<1x64xf32> to vector<256x64xf32>
    %13 = arith.addf %10, %12 : vector<256x64xf32>
    %cst_24 = arith.constant 0.000000e+00 : f32
    %14 = vector.broadcast %cst_24 : f32 to vector<256x64xf32>
    %15 = arith.maximumf %13, %14 : vector<256x64xf32>
    %16 = vector.shape_cast %15 : vector<256x64xf32> to vector<1x16x16x64xf32>
    %c0_25 = arith.constant 0 : index
    %c1 = arith.constant 1 : index
    %c1_26 = arith.constant 1 : index
    %c0_27 = arith.constant 0 : index
    %17 = vector.load %arg11[%c0_25, %c1, %c1_26, %c0_27] : memref<1x18x18x64xf32, #tpu.memory_space<vmem>>, vector<1x16x16x64xf32>
    tpu.vector_store %arg11[%c0_25, %c1, %c1_26, %c0_27], %16 {strides = array<i32>} : memref<1x18x18x64xf32, #tpu.memory_space<vmem>>, vector<1x16x16x64xf32>,
    %c0_28 = arith.constant 0 : index
    %c0_29 = arith.constant 0 : index
    %18 = vector.load %arg5[%c0_28, %c0_29] : memref<1x64xf32, #tpu.memory_space<vmem>>, vector<1x64xf32>
    %19 = vector.shape_cast %18 : vector<1x64xf32> to vector<1x64xf32>
    %20 = vector.broadcast %19 : vector<1x64xf32> to vector<256x64xf32>
    %c0_30 = arith.constant 0 : index
    %c0_31 = arith.constant 0 : index
    %21 = vector.load %arg12[%c0_30, %c0_31] : memref<256x64xf32, #tpu.memory_space<vmem>>, vector<256x64xf32>
    tpu.vector_store %arg12[%c0_30, %c0_31], %20 {strides = array<i32>} : memref<256x64xf32, #tpu.memory_space<vmem>>, vector<256x64xf32>,
    %c0_32 = arith.constant 0 : index
    %c0_33 = arith.constant 0 : index
    %c0_34 = arith.constant 0 : index
    %c0_35 = arith.constant 0 : index
    %22 = vector.load %arg11[%c0_32, %c0_33, %c0_34, %c0_35] : memref<1x18x18x64xf32, #tpu.memory_space<vmem>>, vector<1x16x16x64xf32>
    %c0_36 = arith.constant 0 : index
    %c0_37 = arith.constant 0 : index
    %23 = vector.load %arg12[%c0_36, %c0_37] : memref<256x64xf32, #tpu.memory_space<vmem>>, vector<256x64xf32>
    %24 = vector.shape_cast %22 : vector<1x16x16x64xf32> to vector<256x64xf32>
    %c0_38 = arith.constant 0 : index
    %c0_39 = arith.constant 0 : index
    %25 = vector.load %arg4[%c0_38, %c0_39] : memref<576x64xf32, #tpu.memory_space<vmem>>, vector<64x64xf32>
    %cst_40 = arith.constant dense<0.000000e+00> : vector<256x64xf32>
    %26 = tpu.matmul %24, %25, %cst_40 {dimension_numbers = #tpu.dot_dimension_numbers<[1], [0], [0], [1], [0, 0, 1, 1], [], []>} : vector<256x64xf32>, vector<64x64xf32>, vector<256x64xf32> -> vector<256x64xf32>
    %27 = arith.addf %23, %26 : vector<256x64xf32>
    %c0_41 = arith.constant 0 : index
    %c0_42 = arith.constant 0 : index
    %28 = vector.load %arg12[%c0_41, %c0_42] : memref<256x64xf32, #tpu.memory_space<vmem>>, vector<256x64xf32>
    tpu.vector_store %arg12[%c0_41, %c0_42], %27 {strides = array<i32>} : memref<256x64xf32, #tpu.memory_space<vmem>>, vector<256x64xf32>,
    %c0_43 = arith.constant 0 : index
    %c0_44 = arith.constant 0 : index
    %c1_45 = arith.constant 1 : index
    %c0_46 = arith.constant 0 : index
    %29 = vector.load %arg11[%c0_43, %c0_44, %c1_45, %c0_46] : memref<1x18x18x64xf32, #tpu.memory_space<vmem>>, vector<1x16x16x64xf32>
    %c0_47 = arith.constant 0 : index
    %c0_48 = arith.constant 0 : index
    %30 = vector.load %arg12[%c0_47, %c0_48] : memref<256x64xf32, #tpu.memory_space<vmem>>, vector<256x64xf32>
    %31 = vector.shape_cast %29 : vector<1x16x16x64xf32> to vector<256x64xf32>
    %c64 = arith.constant 64 : index
    %c0_49 = arith.constant 0 : index
    %32 = vector.load %arg4[%c64, %c0_49] : memref<576x64xf32, #tpu.memory_space<vmem>>, vector<64x64xf32>
    %cst_50 = arith.constant dense<0.000000e+00> : vector<256x64xf32>
    %33 = tpu.matmul %31, %32, %cst_50 {dimension_numbers = #tpu.dot_dimension_numbers<[1], [0], [0], [1], [0, 0, 1, 1], [], []>} : vector<256x64xf32>, vector<64x64xf32>, vector<256x64xf32> -> vector<256x64xf32>
    %34 = arith.addf %30, %33 : vector<256x64xf32>
    %c0_51 = arith.constant 0 : index
    %c0_52 = arith.constant 0 : index
    %35 = vector.load %arg12[%c0_51, %c0_52] : memref<256x64xf32, #tpu.memory_space<vmem>>, vector<256x64xf32>
    tpu.vector_store %arg12[%c0_51, %c0_52], %34 {strides = array<i32>} : memref<256x64xf32, #tpu.memory_space<vmem>>, vector<256x64xf32>,
    %c0_53 = arith.constant 0 : index
    %c0_54 = arith.constant 0 : index
    %c2 = arith.constant 2 : index
    %c0_55 = arith.constant 0 : index
    %36 = vector.load %arg11[%c0_53, %c0_54, %c2, %c0_55] : memref<1x18x18x64xf32, #tpu.memory_space<vmem>>, vector<1x16x16x64xf32>
    %c0_56 = arith.constant 0 : index
    %c0_57 = arith.constant 0 : index
    %37 = vector.load %arg12[%c0_56, %c0_57] : memref<256x64xf32, #tpu.memory_space<vmem>>, vector<256x64xf32>
    %38 = vector.shape_cast %36 : vector<1x16x16x64xf32> to vector<256x64xf32>
    %c128 = arith.constant 128 : index
    %c0_58 = arith.constant 0 : index
    %39 = vector.load %arg4[%c128, %c0_58] : memref<576x64xf32, #tpu.memory_space<vmem>>, vector<64x64xf32>
    %cst_59 = arith.constant dense<0.000000e+00> : vector<256x64xf32>
    %40 = tpu.matmul %38, %39, %cst_59 {dimension_numbers = #tpu.dot_dimension_numbers<[1], [0], [0], [1], [0, 0, 1, 1], [], []>} : vector<256x64xf32>, vector<64x64xf32>, vector<256x64xf32> -> vector<256x64xf32>
    %41 = arith.addf %37, %40 : vector<256x64xf32>
    %c0_60 = arith.constant 0 : index
    %c0_61 = arith.constant 0 : index
    %42 = vector.load %arg12[%c0_60, %c0_61] : memref<256x64xf32, #tpu.memory_space<vmem>>, vector<256x64xf32>
    tpu.vector_store %arg12[%c0_60, %c0_61], %41 {strides = array<i32>} : memref<256x64xf32, #tpu.memory_space<vmem>>, vector<256x64xf32>,
    %c0_62 = arith.constant 0 : index
    %c1_63 = arith.constant 1 : index
    %c0_64 = arith.constant 0 : index
    %c0_65 = arith.constant 0 : index
    %43 = vector.load %arg11[%c0_62, %c1_63, %c0_64, %c0_65] : memref<1x18x18x64xf32, #tpu.memory_space<vmem>>, vector<1x16x16x64xf32>
    %c0_66 = arith.constant 0 : index
    %c0_67 = arith.constant 0 : index
    %44 = vector.load %arg12[%c0_66, %c0_67] : memref<256x64xf32, #tpu.memory_space<vmem>>, vector<256x64xf32>
    %45 = vector.shape_cast %43 : vector<1x16x16x64xf32> to vector<256x64xf32>
    %c192 = arith.constant 192 : index
    %c0_68 = arith.constant 0 : index
    %46 = vector.load %arg4[%c192, %c0_68] : memref<576x64xf32, #tpu.memory_space<vmem>>, vector<64x64xf32>
    %cst_69 = arith.constant dense<0.000000e+00> : vector<256x64xf32>
    %47 = tpu.matmul %45, %46, %cst_69 {dimension_numbers = #tpu.dot_dimension_numbers<[1], [0], [0], [1], [0, 0, 1, 1], [], []>} : vector<256x64xf32>, vector<64x64xf32>, vector<256x64xf32> -> vector<256x64xf32>
    %48 = arith.addf %44, %47 : vector<256x64xf32>
    %c0_70 = arith.constant 0 : index
    %c0_71 = arith.constant 0 : index
    %49 = vector.load %arg12[%c0_70, %c0_71] : memref<256x64xf32, #tpu.memory_space<vmem>>, vector<256x64xf32>
    tpu.vector_store %arg12[%c0_70, %c0_71], %48 {strides = array<i32>} : memref<256x64xf32, #tpu.memory_space<vmem>>, vector<256x64xf32>,
    %c0_72 = arith.constant 0 : index
    %c1_73 = arith.constant 1 : index
    %c1_74 = arith.constant 1 : index
    %c0_75 = arith.constant 0 : index
    %50 = vector.load %arg11[%c0_72, %c1_73, %c1_74, %c0_75] : memref<1x18x18x64xf32, #tpu.memory_space<vmem>>, vector<1x16x16x64xf32>
    %c0_76 = arith.constant 0 : index
    %c0_77 = arith.constant 0 : index
    %51 = vector.load %arg12[%c0_76, %c0_77] : memref<256x64xf32, #tpu.memory_space<vmem>>, vector<256x64xf32>
    %52 = vector.shape_cast %50 : vector<1x16x16x64xf32> to vector<256x64xf32>
    %c256 = arith.constant 256 : index
    %c0_78 = arith.constant 0 : index
    %53 = vector.load %arg4[%c256, %c0_78] : memref<576x64xf32, #tpu.memory_space<vmem>>, vector<64x64xf32>
    %cst_79 = arith.constant dense<0.000000e+00> : vector<256x64xf32>
    %54 = tpu.matmul %52, %53, %cst_79 {dimension_numbers = #tpu.dot_dimension_numbers<[1], [0], [0], [1], [0, 0, 1, 1], [], []>} : vector<256x64xf32>, vector<64x64xf32>, vector<256x64xf32> -> vector<256x64xf32>
    %55 = arith.addf %51, %54 : vector<256x64xf32>
    %c0_80 = arith.constant 0 : index
    %c0_81 = arith.constant 0 : index
    %56 = vector.load %arg12[%c0_80, %c0_81] : memref<256x64xf32, #tpu.memory_space<vmem>>, vector<256x64xf32>
    tpu.vector_store %arg12[%c0_80, %c0_81], %55 {strides = array<i32>} : memref<256x64xf32, #tpu.memory_space<vmem>>, vector<256x64xf32>,
    %c0_82 = arith.constant 0 : index
    %c1_83 = arith.constant 1 : index
    %c2_84 = arith.constant 2 : index
    %c0_85 = arith.constant 0 : index
    %57 = vector.load %arg11[%c0_82, %c1_83, %c2_84, %c0_85] : memref<1x18x18x64xf32, #tpu.memory_space<vmem>>, vector<1x16x16x64xf32>
    %c0_86 = arith.constant 0 : index
    %c0_87 = arith.constant 0 : index
    %58 = vector.load %arg12[%c0_86, %c0_87] : memref<256x64xf32, #tpu.memory_space<vmem>>, vector<256x64xf32>
    %59 = vector.shape_cast %57 : vector<1x16x16x64xf32> to vector<256x64xf32>
    %c320 = arith.constant 320 : index
    %c0_88 = arith.constant 0 : index
    %60 = vector.load %arg4[%c320, %c0_88] : memref<576x64xf32, #tpu.memory_space<vmem>>, vector<64x64xf32>
    %cst_89 = arith.constant dense<0.000000e+00> : vector<256x64xf32>
    %61 = tpu.matmul %59, %60, %cst_89 {dimension_numbers = #tpu.dot_dimension_numbers<[1], [0], [0], [1], [0, 0, 1, 1], [], []>} : vector<256x64xf32>, vector<64x64xf32>, vector<256x64xf32> -> vector<256x64xf32>
    %62 = arith.addf %58, %61 : vector<256x64xf32>
    %c0_90 = arith.constant 0 : index
    %c0_91 = arith.constant 0 : index
    %63 = vector.load %arg12[%c0_90, %c0_91] : memref<256x64xf32, #tpu.memory_space<vmem>>, vector<256x64xf32>
    tpu.vector_store %arg12[%c0_90, %c0_91], %62 {strides = array<i32>} : memref<256x64xf32, #tpu.memory_space<vmem>>, vector<256x64xf32>,
    %c0_92 = arith.constant 0 : index
    %c2_93 = arith.constant 2 : index
    %c0_94 = arith.constant 0 : index
    %c0_95 = arith.constant 0 : index
    %64 = vector.load %arg11[%c0_92, %c2_93, %c0_94, %c0_95] : memref<1x18x18x64xf32, #tpu.memory_space<vmem>>, vector<1x16x16x64xf32>
    %c0_96 = arith.constant 0 : index
    %c0_97 = arith.constant 0 : index
    %65 = vector.load %arg12[%c0_96, %c0_97] : memref<256x64xf32, #tpu.memory_space<vmem>>, vector<256x64xf32>
    %66 = vector.shape_cast %64 : vector<1x16x16x64xf32> to vector<256x64xf32>
    %c384 = arith.constant 384 : index
    %c0_98 = arith.constant 0 : index
    %67 = vector.load %arg4[%c384, %c0_98] : memref<576x64xf32, #tpu.memory_space<vmem>>, vector<64x64xf32>
    %cst_99 = arith.constant dense<0.000000e+00> : vector<256x64xf32>
    %68 = tpu.matmul %66, %67, %cst_99 {dimension_numbers = #tpu.dot_dimension_numbers<[1], [0], [0], [1], [0, 0, 1, 1], [], []>} : vector<256x64xf32>, vector<64x64xf32>, vector<256x64xf32> -> vector<256x64xf32>
    %69 = arith.addf %65, %68 : vector<256x64xf32>
    %c0_100 = arith.constant 0 : index
    %c0_101 = arith.constant 0 : index
    %70 = vector.load %arg12[%c0_100, %c0_101] : memref<256x64xf32, #tpu.memory_space<vmem>>, vector<256x64xf32>
    tpu.vector_store %arg12[%c0_100, %c0_101], %69 {strides = array<i32>} : memref<256x64xf32, #tpu.memory_space<vmem>>, vector<256x64xf32>,
    %c0_102 = arith.constant 0 : index
    %c2_103 = arith.constant 2 : index
    %c1_104 = arith.constant 1 : index
    %c0_105 = arith.constant 0 : index
    %71 = vector.load %arg11[%c0_102, %c2_103, %c1_104, %c0_105] : memref<1x18x18x64xf32, #tpu.memory_space<vmem>>, vector<1x16x16x64xf32>
    %c0_106 = arith.constant 0 : index
    %c0_107 = arith.constant 0 : index
    %72 = vector.load %arg12[%c0_106, %c0_107] : memref<256x64xf32, #tpu.memory_space<vmem>>, vector<256x64xf32>
    %73 = vector.shape_cast %71 : vector<1x16x16x64xf32> to vector<256x64xf32>
    %c448 = arith.constant 448 : index
    %c0_108 = arith.constant 0 : index
    %74 = vector.load %arg4[%c448, %c0_108] : memref<576x64xf32, #tpu.memory_space<vmem>>, vector<64x64xf32>
    %cst_109 = arith.constant dense<0.000000e+00> : vector<256x64xf32>
    %75 = tpu.matmul %73, %74, %cst_109 {dimension_numbers = #tpu.dot_dimension_numbers<[1], [0], [0], [1], [0, 0, 1, 1], [], []>} : vector<256x64xf32>, vector<64x64xf32>, vector<256x64xf32> -> vector<256x64xf32>
    %76 = arith.addf %72, %75 : vector<256x64xf32>
    %c0_110 = arith.constant 0 : index
    %c0_111 = arith.constant 0 : index
    %77 = vector.load %arg12[%c0_110, %c0_111] : memref<256x64xf32, #tpu.memory_space<vmem>>, vector<256x64xf32>
    tpu.vector_store %arg12[%c0_110, %c0_111], %76 {strides = array<i32>} : memref<256x64xf32, #tpu.memory_space<vmem>>, vector<256x64xf32>,
    %c0_112 = arith.constant 0 : index
    %c2_113 = arith.constant 2 : index
    %c2_114 = arith.constant 2 : index
    %c0_115 = arith.constant 0 : index
    %78 = vector.load %arg11[%c0_112, %c2_113, %c2_114, %c0_115] : memref<1x18x18x64xf32, #tpu.memory_space<vmem>>, vector<1x16x16x64xf32>
    %c0_116 = arith.constant 0 : index
    %c0_117 = arith.constant 0 : index
    %79 = vector.load %arg12[%c0_116, %c0_117] : memref<256x64xf32, #tpu.memory_space<vmem>>, vector<256x64xf32>
    %80 = vector.shape_cast %78 : vector<1x16x16x64xf32> to vector<256x64xf32>
    %c512 = arith.constant 512 : index
    %c0_118 = arith.constant 0 : index
    %81 = vector.load %arg4[%c512, %c0_118] : memref<576x64xf32, #tpu.memory_space<vmem>>, vector<64x64xf32>
    %cst_119 = arith.constant dense<0.000000e+00> : vector<256x64xf32>
    %82 = tpu.matmul %80, %81, %cst_119 {dimension_numbers = #tpu.dot_dimension_numbers<[1], [0], [0], [1], [0, 0, 1, 1], [], []>} : vector<256x64xf32>, vector<64x64xf32>, vector<256x64xf32> -> vector<256x64xf32>
    %83 = arith.addf %79, %82 : vector<256x64xf32>
    %c0_120 = arith.constant 0 : index
    %c0_121 = arith.constant 0 : index
    %84 = vector.load %arg12[%c0_120, %c0_121] : memref<256x64xf32, #tpu.memory_space<vmem>>, vector<256x64xf32>
    tpu.vector_store %arg12[%c0_120, %c0_121], %83 {strides = array<i32>} : memref<256x64xf32, #tpu.memory_space<vmem>>, vector<256x64xf32>,
    %c0_122 = arith.constant 0 : index
    %c0_123 = arith.constant 0 : index
    %85 = vector.load %arg12[%c0_122, %c0_123] : memref<256x64xf32, #tpu.memory_space<vmem>>, vector<256x64xf32>
    %cst_124 = arith.constant 0.000000e+00 : f32
    %86 = vector.broadcast %cst_124 : f32 to vector<256x64xf32>
    %87 = arith.maximumf %85, %86 : vector<256x64xf32>
    %88 = vector.shape_cast %87 : vector<256x64xf32> to vector<1x16x16x64xf32>
    %c0_125 = arith.constant 0 : index
    %c1_126 = arith.constant 1 : index
    %c1_127 = arith.constant 1 : index
    %c0_128 = arith.constant 0 : index
    %89 = vector.load %arg11[%c0_125, %c1_126, %c1_127, %c0_128] : memref<1x18x18x64xf32, #tpu.memory_space<vmem>>, vector<1x16x16x64xf32>
    tpu.vector_store %arg11[%c0_125, %c1_126, %c1_127, %c0_128], %88 {strides = array<i32>} : memref<1x18x18x64xf32, #tpu.memory_space<vmem>>, vector<1x16x16x64xf32>,
    %c0_129 = arith.constant 0 : index
    %c0_130 = arith.constant 0 : index
    %90 = vector.load %arg7[%c0_129, %c0_130] : memref<1x32xf32, #tpu.memory_space<vmem>>, vector<1x32xf32>
    %91 = vector.shape_cast %90 : vector<1x32xf32> to vector<1x32xf32>
    %92 = vector.broadcast %91 : vector<1x32xf32> to vector<256x32xf32>
    %c0_131 = arith.constant 0 : index
    %c0_132 = arith.constant 0 : index
    %93 = vector.load %arg12[%c0_131, %c0_132] : memref<256x64xf32, #tpu.memory_space<vmem>>, vector<256x32xf32>
    tpu.vector_store %arg12[%c0_131, %c0_132], %92 {strides = array<i32>} : memref<256x64xf32, #tpu.memory_space<vmem>>, vector<256x32xf32>,
    %c0_133 = arith.constant 0 : index
    %c0_134 = arith.constant 0 : index
    %c0_135 = arith.constant 0 : index
    %c0_136 = arith.constant 0 : index
    %94 = vector.load %arg11[%c0_133, %c0_134, %c0_135, %c0_136] : memref<1x18x18x64xf32, #tpu.memory_space<vmem>>, vector<1x16x16x64xf32>
    %c0_137 = arith.constant 0 : index
    %c0_138 = arith.constant 0 : index
    %95 = vector.load %arg12[%c0_137, %c0_138] : memref<256x64xf32, #tpu.memory_space<vmem>>, vector<256x32xf32>
    %96 = vector.shape_cast %94 : vector<1x16x16x64xf32> to vector<256x64xf32>
    %c0_139 = arith.constant 0 : index
    %c0_140 = arith.constant 0 : index
    %97 = vector.load %arg6[%c0_139, %c0_140] : memref<576x32xf32, #tpu.memory_space<vmem>>, vector<64x32xf32>
    %cst_141 = arith.constant dense<0.000000e+00> : vector<256x32xf32>
    %98 = tpu.matmul %96, %97, %cst_141 {dimension_numbers = #tpu.dot_dimension_numbers<[1], [0], [0], [1], [0, 0, 1, 1], [], []>} : vector<256x64xf32>, vector<64x32xf32>, vector<256x32xf32> -> vector<256x32xf32>
    %99 = arith.addf %95, %98 : vector<256x32xf32>
    %c0_142 = arith.constant 0 : index
    %c0_143 = arith.constant 0 : index
    %100 = vector.load %arg12[%c0_142, %c0_143] : memref<256x64xf32, #tpu.memory_space<vmem>>, vector<256x32xf32>
    tpu.vector_store %arg12[%c0_142, %c0_143], %99 {strides = array<i32>} : memref<256x64xf32, #tpu.memory_space<vmem>>, vector<256x32xf32>,
    %c0_144 = arith.constant 0 : index
    %c0_145 = arith.constant 0 : index
    %c1_146 = arith.constant 1 : index
    %c0_147 = arith.constant 0 : index
    %101 = vector.load %arg11[%c0_144, %c0_145, %c1_146, %c0_147] : memref<1x18x18x64xf32, #tpu.memory_space<vmem>>, vector<1x16x16x64xf32>
    %c0_148 = arith.constant 0 : index
    %c0_149 = arith.constant 0 : index
    %102 = vector.load %arg12[%c0_148, %c0_149] : memref<256x64xf32, #tpu.memory_space<vmem>>, vector<256x32xf32>
    %103 = vector.shape_cast %101 : vector<1x16x16x64xf32> to vector<256x64xf32>
    %c64_150 = arith.constant 64 : index
    %c0_151 = arith.constant 0 : index
    %104 = vector.load %arg6[%c64_150, %c0_151] : memref<576x32xf32, #tpu.memory_space<vmem>>, vector<64x32xf32>
    %cst_152 = arith.constant dense<0.000000e+00> : vector<256x32xf32>
    %105 = tpu.matmul %103, %104, %cst_152 {dimension_numbers = #tpu.dot_dimension_numbers<[1], [0], [0], [1], [0, 0, 1, 1], [], []>} : vector<256x64xf32>, vector<64x32xf32>, vector<256x32xf32> -> vector<256x32xf32>
    %106 = arith.addf %102, %105 : vector<256x32xf32>
    %c0_153 = arith.constant 0 : index
    %c0_154 = arith.constant 0 : index
    %107 = vector.load %arg12[%c0_153, %c0_154] : memref<256x64xf32, #tpu.memory_space<vmem>>, vector<256x32xf32>
    tpu.vector_store %arg12[%c0_153, %c0_154], %106 {strides = array<i32>} : memref<256x64xf32, #tpu.memory_space<vmem>>, vector<256x32xf32>,
    %c0_155 = arith.constant 0 : index
    %c0_156 = arith.constant 0 : index
    %c2_157 = arith.constant 2 : index
    %c0_158 = arith.constant 0 : index
    %108 = vector.load %arg11[%c0_155, %c0_156, %c2_157, %c0_158] : memref<1x18x18x64xf32, #tpu.memory_space<vmem>>, vector<1x16x16x64xf32>
    %c0_159 = arith.constant 0 : index
    %c0_160 = arith.constant 0 : index
    %109 = vector.load %arg12[%c0_159, %c0_160] : memref<256x64xf32, #tpu.memory_space<vmem>>, vector<256x32xf32>
    %110 = vector.shape_cast %108 : vector<1x16x16x64xf32> to vector<256x64xf32>
    %c128_161 = arith.constant 128 : index
    %c0_162 = arith.constant 0 : index
    %111 = vector.load %arg6[%c128_161, %c0_162] : memref<576x32xf32, #tpu.memory_space<vmem>>, vector<64x32xf32>
    %cst_163 = arith.constant dense<0.000000e+00> : vector<256x32xf32>
    %112 = tpu.matmul %110, %111, %cst_163 {dimension_numbers = #tpu.dot_dimension_numbers<[1], [0], [0], [1], [0, 0, 1, 1], [], []>} : vector<256x64xf32>, vector<64x32xf32>, vector<256x32xf32> -> vector<256x32xf32>
    %113 = arith.addf %109, %112 : vector<256x32xf32>
    %c0_164 = arith.constant 0 : index
    %c0_165 = arith.constant 0 : index
    %114 = vector.load %arg12[%c0_164, %c0_165] : memref<256x64xf32, #tpu.memory_space<vmem>>, vector<256x32xf32>
    tpu.vector_store %arg12[%c0_164, %c0_165], %113 {strides = array<i32>} : memref<256x64xf32, #tpu.memory_space<vmem>>, vector<256x32xf32>,
    %c0_166 = arith.constant 0 : index
    %c1_167 = arith.constant 1 : index
    %c0_168 = arith.constant 0 : index
    %c0_169 = arith.constant 0 : index
    %115 = vector.load %arg11[%c0_166, %c1_167, %c0_168, %c0_169] : memref<1x18x18x64xf32, #tpu.memory_space<vmem>>, vector<1x16x16x64xf32>
    %c0_170 = arith.constant 0 : index
    %c0_171 = arith.constant 0 : index
    %116 = vector.load %arg12[%c0_170, %c0_171] : memref<256x64xf32, #tpu.memory_space<vmem>>, vector<256x32xf32>
    %117 = vector.shape_cast %115 : vector<1x16x16x64xf32> to vector<256x64xf32>
    %c192_172 = arith.constant 192 : index
    %c0_173 = arith.constant 0 : index
    %118 = vector.load %arg6[%c192_172, %c0_173] : memref<576x32xf32, #tpu.memory_space<vmem>>, vector<64x32xf32>
    %cst_174 = arith.constant dense<0.000000e+00> : vector<256x32xf32>
    %119 = tpu.matmul %117, %118, %cst_174 {dimension_numbers = #tpu.dot_dimension_numbers<[1], [0], [0], [1], [0, 0, 1, 1], [], []>} : vector<256x64xf32>, vector<64x32xf32>, vector<256x32xf32> -> vector<256x32xf32>
    %120 = arith.addf %116, %119 : vector<256x32xf32>
    %c0_175 = arith.constant 0 : index
    %c0_176 = arith.constant 0 : index
    %121 = vector.load %arg12[%c0_175, %c0_176] : memref<256x64xf32, #tpu.memory_space<vmem>>, vector<256x32xf32>
    tpu.vector_store %arg12[%c0_175, %c0_176], %120 {strides = array<i32>} : memref<256x64xf32, #tpu.memory_space<vmem>>, vector<256x32xf32>,
    %c0_177 = arith.constant 0 : index
    %c1_178 = arith.constant 1 : index
    %c1_179 = arith.constant 1 : index
    %c0_180 = arith.constant 0 : index
    %122 = vector.load %arg11[%c0_177, %c1_178, %c1_179, %c0_180] : memref<1x18x18x64xf32, #tpu.memory_space<vmem>>, vector<1x16x16x64xf32>
    %c0_181 = arith.constant 0 : index
    %c0_182 = arith.constant 0 : index
    %123 = vector.load %arg12[%c0_181, %c0_182] : memref<256x64xf32, #tpu.memory_space<vmem>>, vector<256x32xf32>
    %124 = vector.shape_cast %122 : vector<1x16x16x64xf32> to vector<256x64xf32>
    %c256_183 = arith.constant 256 : index
    %c0_184 = arith.constant 0 : index
    %125 = vector.load %arg6[%c256_183, %c0_184] : memref<576x32xf32, #tpu.memory_space<vmem>>, vector<64x32xf32>
    %cst_185 = arith.constant dense<0.000000e+00> : vector<256x32xf32>
    %126 = tpu.matmul %124, %125, %cst_185 {dimension_numbers = #tpu.dot_dimension_numbers<[1], [0], [0], [1], [0, 0, 1, 1], [], []>} : vector<256x64xf32>, vector<64x32xf32>, vector<256x32xf32> -> vector<256x32xf32>
    %127 = arith.addf %123, %126 : vector<256x32xf32>
    %c0_186 = arith.constant 0 : index
    %c0_187 = arith.constant 0 : index
    %128 = vector.load %arg12[%c0_186, %c0_187] : memref<256x64xf32, #tpu.memory_space<vmem>>, vector<256x32xf32>
    tpu.vector_store %arg12[%c0_186, %c0_187], %127 {strides = array<i32>} : memref<256x64xf32, #tpu.memory_space<vmem>>, vector<256x32xf32>,
    %c0_188 = arith.constant 0 : index
    %c1_189 = arith.constant 1 : index
    %c2_190 = arith.constant 2 : index
    %c0_191 = arith.constant 0 : index
    %129 = vector.load %arg11[%c0_188, %c1_189, %c2_190, %c0_191] : memref<1x18x18x64xf32, #tpu.memory_space<vmem>>, vector<1x16x16x64xf32>
    %c0_192 = arith.constant 0 : index
    %c0_193 = arith.constant 0 : index
    %130 = vector.load %arg12[%c0_192, %c0_193] : memref<256x64xf32, #tpu.memory_space<vmem>>, vector<256x32xf32>
    %131 = vector.shape_cast %129 : vector<1x16x16x64xf32> to vector<256x64xf32>
    %c320_194 = arith.constant 320 : index
    %c0_195 = arith.constant 0 : index
    %132 = vector.load %arg6[%c320_194, %c0_195] : memref<576x32xf32, #tpu.memory_space<vmem>>, vector<64x32xf32>
    %cst_196 = arith.constant dense<0.000000e+00> : vector<256x32xf32>
    %133 = tpu.matmul %131, %132, %cst_196 {dimension_numbers = #tpu.dot_dimension_numbers<[1], [0], [0], [1], [0, 0, 1, 1], [], []>} : vector<256x64xf32>, vector<64x32xf32>, vector<256x32xf32> -> vector<256x32xf32>
    %134 = arith.addf %130, %133 : vector<256x32xf32>
    %c0_197 = arith.constant 0 : index
    %c0_198 = arith.constant 0 : index
    %135 = vector.load %arg12[%c0_197, %c0_198] : memref<256x64xf32, #tpu.memory_space<vmem>>, vector<256x32xf32>
    tpu.vector_store %arg12[%c0_197, %c0_198], %134 {strides = array<i32>} : memref<256x64xf32, #tpu.memory_space<vmem>>, vector<256x32xf32>,
    %c0_199 = arith.constant 0 : index
    %c2_200 = arith.constant 2 : index
    %c0_201 = arith.constant 0 : index
    %c0_202 = arith.constant 0 : index
    %136 = vector.load %arg11[%c0_199, %c2_200, %c0_201, %c0_202] : memref<1x18x18x64xf32, #tpu.memory_space<vmem>>, vector<1x16x16x64xf32>
    %c0_203 = arith.constant 0 : index
    %c0_204 = arith.constant 0 : index
    %137 = vector.load %arg12[%c0_203, %c0_204] : memref<256x64xf32, #tpu.memory_space<vmem>>, vector<256x32xf32>
    %138 = vector.shape_cast %136 : vector<1x16x16x64xf32> to vector<256x64xf32>
    %c384_205 = arith.constant 384 : index
    %c0_206 = arith.constant 0 : index
    %139 = vector.load %arg6[%c384_205, %c0_206] : memref<576x32xf32, #tpu.memory_space<vmem>>, vector<64x32xf32>
    %cst_207 = arith.constant dense<0.000000e+00> : vector<256x32xf32>
    %140 = tpu.matmul %138, %139, %cst_207 {dimension_numbers = #tpu.dot_dimension_numbers<[1], [0], [0], [1], [0, 0, 1, 1], [], []>} : vector<256x64xf32>, vector<64x32xf32>, vector<256x32xf32> -> vector<256x32xf32>
    %141 = arith.addf %137, %140 : vector<256x32xf32>
    %c0_208 = arith.constant 0 : index
    %c0_209 = arith.constant 0 : index
    %142 = vector.load %arg12[%c0_208, %c0_209] : memref<256x64xf32, #tpu.memory_space<vmem>>, vector<256x32xf32>
    tpu.vector_store %arg12[%c0_208, %c0_209], %141 {strides = array<i32>} : memref<256x64xf32, #tpu.memory_space<vmem>>, vector<256x32xf32>,
    %c0_210 = arith.constant 0 : index
    %c2_211 = arith.constant 2 : index
    %c1_212 = arith.constant 1 : index
    %c0_213 = arith.constant 0 : index
    %143 = vector.load %arg11[%c0_210, %c2_211, %c1_212, %c0_213] : memref<1x18x18x64xf32, #tpu.memory_space<vmem>>, vector<1x16x16x64xf32>
    %c0_214 = arith.constant 0 : index
    %c0_215 = arith.constant 0 : index
    %144 = vector.load %arg12[%c0_214, %c0_215] : memref<256x64xf32, #tpu.memory_space<vmem>>, vector<256x32xf32>
    %145 = vector.shape_cast %143 : vector<1x16x16x64xf32> to vector<256x64xf32>
    %c448_216 = arith.constant 448 : index
    %c0_217 = arith.constant 0 : index
    %146 = vector.load %arg6[%c448_216, %c0_217] : memref<576x32xf32, #tpu.memory_space<vmem>>, vector<64x32xf32>
    %cst_218 = arith.constant dense<0.000000e+00> : vector<256x32xf32>
    %147 = tpu.matmul %145, %146, %cst_218 {dimension_numbers = #tpu.dot_dimension_numbers<[1], [0], [0], [1], [0, 0, 1, 1], [], []>} : vector<256x64xf32>, vector<64x32xf32>, vector<256x32xf32> -> vector<256x32xf32>
    %148 = arith.addf %144, %147 : vector<256x32xf32>
    %c0_219 = arith.constant 0 : index
    %c0_220 = arith.constant 0 : index
    %149 = vector.load %arg12[%c0_219, %c0_220] : memref<256x64xf32, #tpu.memory_space<vmem>>, vector<256x32xf32>
    tpu.vector_store %arg12[%c0_219, %c0_220], %148 {strides = array<i32>} : memref<256x64xf32, #tpu.memory_space<vmem>>, vector<256x32xf32>,
    %c0_221 = arith.constant 0 : index
    %c2_222 = arith.constant 2 : index
    %c2_223 = arith.constant 2 : index
    %c0_224 = arith.constant 0 : index
    %150 = vector.load %arg11[%c0_221, %c2_222, %c2_223, %c0_224] : memref<1x18x18x64xf32, #tpu.memory_space<vmem>>, vector<1x16x16x64xf32>
    %c0_225 = arith.constant 0 : index
    %c0_226 = arith.constant 0 : index
    %151 = vector.load %arg12[%c0_225, %c0_226] : memref<256x64xf32, #tpu.memory_space<vmem>>, vector<256x32xf32>
    %152 = vector.shape_cast %150 : vector<1x16x16x64xf32> to vector<256x64xf32>
    %c512_227 = arith.constant 512 : index
    %c0_228 = arith.constant 0 : index
    %153 = vector.load %arg6[%c512_227, %c0_228] : memref<576x32xf32, #tpu.memory_space<vmem>>, vector<64x32xf32>
    %cst_229 = arith.constant dense<0.000000e+00> : vector<256x32xf32>
    %154 = tpu.matmul %152, %153, %cst_229 {dimension_numbers = #tpu.dot_dimension_numbers<[1], [0], [0], [1], [0, 0, 1, 1], [], []>} : vector<256x64xf32>, vector<64x32xf32>, vector<256x32xf32> -> vector<256x32xf32>
    %155 = arith.addf %151, %154 : vector<256x32xf32>
    %c0_230 = arith.constant 0 : index
    %c0_231 = arith.constant 0 : index
    %156 = vector.load %arg12[%c0_230, %c0_231] : memref<256x64xf32, #tpu.memory_space<vmem>>, vector<256x32xf32>
    tpu.vector_store %arg12[%c0_230, %c0_231], %155 {strides = array<i32>} : memref<256x64xf32, #tpu.memory_space<vmem>>, vector<256x32xf32>,
    %c0_232 = arith.constant 0 : index
    %c0_233 = arith.constant 0 : index
    %157 = vector.load %arg12[%c0_232, %c0_233] : memref<256x64xf32, #tpu.memory_space<vmem>>, vector<256x32xf32>
    %cst_234 = arith.constant 0.000000e+00 : f32
    %158 = vector.broadcast %cst_234 : f32 to vector<256x32xf32>
    %159 = arith.maximumf %157, %158 : vector<256x32xf32>
    %160 = vector.shape_cast %159 : vector<256x32xf32> to vector<1x16x16x32xf32>
    %c0_235 = arith.constant 0 : index
    %c1_236 = arith.constant 1 : index
    %c1_237 = arith.constant 1 : index
    %c0_238 = arith.constant 0 : index
    %161 = vector.load %arg11[%c0_235, %c1_236, %c1_237, %c0_238] : memref<1x18x18x64xf32, #tpu.memory_space<vmem>>, vector<1x16x16x32xf32>
    tpu.vector_store %arg11[%c0_235, %c1_236, %c1_237, %c0_238], %160 {strides = array<i32>} : memref<1x18x18x64xf32, #tpu.memory_space<vmem>>, vector<1x16x16x32xf32>,
    %c0_239 = arith.constant 0 : index
    %c0_240 = arith.constant 0 : index
    %162 = vector.load %arg9[%c0_239, %c0_240] : memref<1x9xf32, #tpu.memory_space<vmem>>, vector<1x9xf32>
    %163 = vector.shape_cast %162 : vector<1x9xf32> to vector<1x9xf32>
    %164 = vector.broadcast %163 : vector<1x9xf32> to vector<256x9xf32>
    %c0_241 = arith.constant 0 : index
    %c0_242 = arith.constant 0 : index
    %165 = vector.load %arg12[%c0_241, %c0_242] : memref<256x64xf32, #tpu.memory_space<vmem>>, vector<256x9xf32>
    tpu.vector_store %arg12[%c0_241, %c0_242], %164 {strides = array<i32>} : memref<256x64xf32, #tpu.memory_space<vmem>>, vector<256x9xf32>,
    %c0_243 = arith.constant 0 : index
    %c0_244 = arith.constant 0 : index
    %c0_245 = arith.constant 0 : index
    %c0_246 = arith.constant 0 : index
    %166 = vector.load %arg11[%c0_243, %c0_244, %c0_245, %c0_246] : memref<1x18x18x64xf32, #tpu.memory_space<vmem>>, vector<1x16x16x32xf32>
    %c0_247 = arith.constant 0 : index
    %c0_248 = arith.constant 0 : index
    %167 = vector.load %arg12[%c0_247, %c0_248] : memref<256x64xf32, #tpu.memory_space<vmem>>, vector<256x9xf32>
    %168 = vector.shape_cast %166 : vector<1x16x16x32xf32> to vector<256x32xf32>
    %c0_249 = arith.constant 0 : index
    %c0_250 = arith.constant 0 : index
    %169 = vector.load %arg8[%c0_249, %c0_250] : memref<288x9xf32, #tpu.memory_space<vmem>>, vector<32x9xf32>
    %cst_251 = arith.constant dense<0.000000e+00> : vector<256x9xf32>
    %170 = tpu.matmul %168, %169, %cst_251 {dimension_numbers = #tpu.dot_dimension_numbers<[1], [0], [0], [1], [0, 0, 1, 1], [], []>} : vector<256x32xf32>, vector<32x9xf32>, vector<256x9xf32> -> vector<256x9xf32>
    %171 = arith.addf %167, %170 : vector<256x9xf32>
    %c0_252 = arith.constant 0 : index
    %c0_253 = arith.constant 0 : index
    %172 = vector.load %arg12[%c0_252, %c0_253] : memref<256x64xf32, #tpu.memory_space<vmem>>, vector<256x9xf32>
    tpu.vector_store %arg12[%c0_252, %c0_253], %171 {strides = array<i32>} : memref<256x64xf32, #tpu.memory_space<vmem>>, vector<256x9xf32>,
    %c0_254 = arith.constant 0 : index
    %c0_255 = arith.constant 0 : index
    %c1_256 = arith.constant 1 : index
    %c0_257 = arith.constant 0 : index
    %173 = vector.load %arg11[%c0_254, %c0_255, %c1_256, %c0_257] : memref<1x18x18x64xf32, #tpu.memory_space<vmem>>, vector<1x16x16x32xf32>
    %c0_258 = arith.constant 0 : index
    %c0_259 = arith.constant 0 : index
    %174 = vector.load %arg12[%c0_258, %c0_259] : memref<256x64xf32, #tpu.memory_space<vmem>>, vector<256x9xf32>
    %175 = vector.shape_cast %173 : vector<1x16x16x32xf32> to vector<256x32xf32>
    %c32 = arith.constant 32 : index
    %c0_260 = arith.constant 0 : index
    %176 = vector.load %arg8[%c32, %c0_260] : memref<288x9xf32, #tpu.memory_space<vmem>>, vector<32x9xf32>
    %cst_261 = arith.constant dense<0.000000e+00> : vector<256x9xf32>
    %177 = tpu.matmul %175, %176, %cst_261 {dimension_numbers = #tpu.dot_dimension_numbers<[1], [0], [0], [1], [0, 0, 1, 1], [], []>} : vector<256x32xf32>, vector<32x9xf32>, vector<256x9xf32> -> vector<256x9xf32>
    %178 = arith.addf %174, %177 : vector<256x9xf32>
    %c0_262 = arith.constant 0 : index
    %c0_263 = arith.constant 0 : index
    %179 = vector.load %arg12[%c0_262, %c0_263] : memref<256x64xf32, #tpu.memory_space<vmem>>, vector<256x9xf32>
    tpu.vector_store %arg12[%c0_262, %c0_263], %178 {strides = array<i32>} : memref<256x64xf32, #tpu.memory_space<vmem>>, vector<256x9xf32>,
    %c0_264 = arith.constant 0 : index
    %c0_265 = arith.constant 0 : index
    %c2_266 = arith.constant 2 : index
    %c0_267 = arith.constant 0 : index
    %180 = vector.load %arg11[%c0_264, %c0_265, %c2_266, %c0_267] : memref<1x18x18x64xf32, #tpu.memory_space<vmem>>, vector<1x16x16x32xf32>
    %c0_268 = arith.constant 0 : index
    %c0_269 = arith.constant 0 : index
    %181 = vector.load %arg12[%c0_268, %c0_269] : memref<256x64xf32, #tpu.memory_space<vmem>>, vector<256x9xf32>
    %182 = vector.shape_cast %180 : vector<1x16x16x32xf32> to vector<256x32xf32>
    %c64_270 = arith.constant 64 : index
    %c0_271 = arith.constant 0 : index
    %183 = vector.load %arg8[%c64_270, %c0_271] : memref<288x9xf32, #tpu.memory_space<vmem>>, vector<32x9xf32>
    %cst_272 = arith.constant dense<0.000000e+00> : vector<256x9xf32>
    %184 = tpu.matmul %182, %183, %cst_272 {dimension_numbers = #tpu.dot_dimension_numbers<[1], [0], [0], [1], [0, 0, 1, 1], [], []>} : vector<256x32xf32>, vector<32x9xf32>, vector<256x9xf32> -> vector<256x9xf32>
    %185 = arith.addf %181, %184 : vector<256x9xf32>
    %c0_273 = arith.constant 0 : index
    %c0_274 = arith.constant 0 : index
    %186 = vector.load %arg12[%c0_273, %c0_274] : memref<256x64xf32, #tpu.memory_space<vmem>>, vector<256x9xf32>
    tpu.vector_store %arg12[%c0_273, %c0_274], %185 {strides = array<i32>} : memref<256x64xf32, #tpu.memory_space<vmem>>, vector<256x9xf32>,
    %c0_275 = arith.constant 0 : index
    %c1_276 = arith.constant 1 : index
    %c0_277 = arith.constant 0 : index
    %c0_278 = arith.constant 0 : index
    %187 = vector.load %arg11[%c0_275, %c1_276, %c0_277, %c0_278] : memref<1x18x18x64xf32, #tpu.memory_space<vmem>>, vector<1x16x16x32xf32>
    %c0_279 = arith.constant 0 : index
    %c0_280 = arith.constant 0 : index
    %188 = vector.load %arg12[%c0_279, %c0_280] : memref<256x64xf32, #tpu.memory_space<vmem>>, vector<256x9xf32>
    %189 = vector.shape_cast %187 : vector<1x16x16x32xf32> to vector<256x32xf32>
    %c96 = arith.constant 96 : index
    %c0_281 = arith.constant 0 : index
    %190 = vector.load %arg8[%c96, %c0_281] : memref<288x9xf32, #tpu.memory_space<vmem>>, vector<32x9xf32>
    %cst_282 = arith.constant dense<0.000000e+00> : vector<256x9xf32>
    %191 = tpu.matmul %189, %190, %cst_282 {dimension_numbers = #tpu.dot_dimension_numbers<[1], [0], [0], [1], [0, 0, 1, 1], [], []>} : vector<256x32xf32>, vector<32x9xf32>, vector<256x9xf32> -> vector<256x9xf32>
    %192 = arith.addf %188, %191 : vector<256x9xf32>
    %c0_283 = arith.constant 0 : index
    %c0_284 = arith.constant 0 : index
    %193 = vector.load %arg12[%c0_283, %c0_284] : memref<256x64xf32, #tpu.memory_space<vmem>>, vector<256x9xf32>
    tpu.vector_store %arg12[%c0_283, %c0_284], %192 {strides = array<i32>} : memref<256x64xf32, #tpu.memory_space<vmem>>, vector<256x9xf32>,
    %c0_285 = arith.constant 0 : index
    %c1_286 = arith.constant 1 : index
    %c1_287 = arith.constant 1 : index
    %c0_288 = arith.constant 0 : index
    %194 = vector.load %arg11[%c0_285, %c1_286, %c1_287, %c0_288] : memref<1x18x18x64xf32, #tpu.memory_space<vmem>>, vector<1x16x16x32xf32>
    %c0_289 = arith.constant 0 : index
    %c0_290 = arith.constant 0 : index
    %195 = vector.load %arg12[%c0_289, %c0_290] : memref<256x64xf32, #tpu.memory_space<vmem>>, vector<256x9xf32>
    %196 = vector.shape_cast %194 : vector<1x16x16x32xf32> to vector<256x32xf32>
    %c128_291 = arith.constant 128 : index
    %c0_292 = arith.constant 0 : index
    %197 = vector.load %arg8[%c128_291, %c0_292] : memref<288x9xf32, #tpu.memory_space<vmem>>, vector<32x9xf32>
    %cst_293 = arith.constant dense<0.000000e+00> : vector<256x9xf32>
    %198 = tpu.matmul %196, %197, %cst_293 {dimension_numbers = #tpu.dot_dimension_numbers<[1], [0], [0], [1], [0, 0, 1, 1], [], []>} : vector<256x32xf32>, vector<32x9xf32>, vector<256x9xf32> -> vector<256x9xf32>
    %199 = arith.addf %195, %198 : vector<256x9xf32>
    %c0_294 = arith.constant 0 : index
    %c0_295 = arith.constant 0 : index
    %200 = vector.load %arg12[%c0_294, %c0_295] : memref<256x64xf32, #tpu.memory_space<vmem>>, vector<256x9xf32>
    tpu.vector_store %arg12[%c0_294, %c0_295], %199 {strides = array<i32>} : memref<256x64xf32, #tpu.memory_space<vmem>>, vector<256x9xf32>,
    %c0_296 = arith.constant 0 : index
    %c1_297 = arith.constant 1 : index
    %c2_298 = arith.constant 2 : index
    %c0_299 = arith.constant 0 : index
    %201 = vector.load %arg11[%c0_296, %c1_297, %c2_298, %c0_299] : memref<1x18x18x64xf32, #tpu.memory_space<vmem>>, vector<1x16x16x32xf32>
    %c0_300 = arith.constant 0 : index
    %c0_301 = arith.constant 0 : index
    %202 = vector.load %arg12[%c0_300, %c0_301] : memref<256x64xf32, #tpu.memory_space<vmem>>, vector<256x9xf32>
    %203 = vector.shape_cast %201 : vector<1x16x16x32xf32> to vector<256x32xf32>
    %c160 = arith.constant 160 : index
    %c0_302 = arith.constant 0 : index
    %204 = vector.load %arg8[%c160, %c0_302] : memref<288x9xf32, #tpu.memory_space<vmem>>, vector<32x9xf32>
    %cst_303 = arith.constant dense<0.000000e+00> : vector<256x9xf32>
    %205 = tpu.matmul %203, %204, %cst_303 {dimension_numbers = #tpu.dot_dimension_numbers<[1], [0], [0], [1], [0, 0, 1, 1], [], []>} : vector<256x32xf32>, vector<32x9xf32>, vector<256x9xf32> -> vector<256x9xf32>
    %206 = arith.addf %202, %205 : vector<256x9xf32>
    %c0_304 = arith.constant 0 : index
    %c0_305 = arith.constant 0 : index
    %207 = vector.load %arg12[%c0_304, %c0_305] : memref<256x64xf32, #tpu.memory_space<vmem>>, vector<256x9xf32>
    tpu.vector_store %arg12[%c0_304, %c0_305], %206 {strides = array<i32>} : memref<256x64xf32, #tpu.memory_space<vmem>>, vector<256x9xf32>,
    %c0_306 = arith.constant 0 : index
    %c2_307 = arith.constant 2 : index
    %c0_308 = arith.constant 0 : index
    %c0_309 = arith.constant 0 : index
    %208 = vector.load %arg11[%c0_306, %c2_307, %c0_308, %c0_309] : memref<1x18x18x64xf32, #tpu.memory_space<vmem>>, vector<1x16x16x32xf32>
    %c0_310 = arith.constant 0 : index
    %c0_311 = arith.constant 0 : index
    %209 = vector.load %arg12[%c0_310, %c0_311] : memref<256x64xf32, #tpu.memory_space<vmem>>, vector<256x9xf32>
    %210 = vector.shape_cast %208 : vector<1x16x16x32xf32> to vector<256x32xf32>
    %c192_312 = arith.constant 192 : index
    %c0_313 = arith.constant 0 : index
    %211 = vector.load %arg8[%c192_312, %c0_313] : memref<288x9xf32, #tpu.memory_space<vmem>>, vector<32x9xf32>
    %cst_314 = arith.constant dense<0.000000e+00> : vector<256x9xf32>
    %212 = tpu.matmul %210, %211, %cst_314 {dimension_numbers = #tpu.dot_dimension_numbers<[1], [0], [0], [1], [0, 0, 1, 1], [], []>} : vector<256x32xf32>, vector<32x9xf32>, vector<256x9xf32> -> vector<256x9xf32>
    %213 = arith.addf %209, %212 : vector<256x9xf32>
    %c0_315 = arith.constant 0 : index
    %c0_316 = arith.constant 0 : index
    %214 = vector.load %arg12[%c0_315, %c0_316] : memref<256x64xf32, #tpu.memory_space<vmem>>, vector<256x9xf32>
    tpu.vector_store %arg12[%c0_315, %c0_316], %213 {strides = array<i32>} : memref<256x64xf32, #tpu.memory_space<vmem>>, vector<256x9xf32>,
    %c0_317 = arith.constant 0 : index
    %c2_318 = arith.constant 2 : index
    %c1_319 = arith.constant 1 : index
    %c0_320 = arith.constant 0 : index
    %215 = vector.load %arg11[%c0_317, %c2_318, %c1_319, %c0_320] : memref<1x18x18x64xf32, #tpu.memory_space<vmem>>, vector<1x16x16x32xf32>
    %c0_321 = arith.constant 0 : index
    %c0_322 = arith.constant 0 : index
    %216 = vector.load %arg12[%c0_321, %c0_322] : memref<256x64xf32, #tpu.memory_space<vmem>>, vector<256x9xf32>
    %217 = vector.shape_cast %215 : vector<1x16x16x32xf32> to vector<256x32xf32>
    %c224 = arith.constant 224 : index
    %c0_323 = arith.constant 0 : index
    %218 = vector.load %arg8[%c224, %c0_323] : memref<288x9xf32, #tpu.memory_space<vmem>>, vector<32x9xf32>
    %cst_324 = arith.constant dense<0.000000e+00> : vector<256x9xf32>
    %219 = tpu.matmul %217, %218, %cst_324 {dimension_numbers = #tpu.dot_dimension_numbers<[1], [0], [0], [1], [0, 0, 1, 1], [], []>} : vector<256x32xf32>, vector<32x9xf32>, vector<256x9xf32> -> vector<256x9xf32>
    %220 = arith.addf %216, %219 : vector<256x9xf32>
    %c0_325 = arith.constant 0 : index
    %c0_326 = arith.constant 0 : index
    %221 = vector.load %arg12[%c0_325, %c0_326] : memref<256x64xf32, #tpu.memory_space<vmem>>, vector<256x9xf32>
    tpu.vector_store %arg12[%c0_325, %c0_326], %220 {strides = array<i32>} : memref<256x64xf32, #tpu.memory_space<vmem>>, vector<256x9xf32>,
    %c0_327 = arith.constant 0 : index
    %c2_328 = arith.constant 2 : index
    %c2_329 = arith.constant 2 : index
    %c0_330 = arith.constant 0 : index
    %222 = vector.load %arg11[%c0_327, %c2_328, %c2_329, %c0_330] : memref<1x18x18x64xf32, #tpu.memory_space<vmem>>, vector<1x16x16x32xf32>
    %c0_331 = arith.constant 0 : index
    %c0_332 = arith.constant 0 : index
    %223 = vector.load %arg12[%c0_331, %c0_332] : memref<256x64xf32, #tpu.memory_space<vmem>>, vector<256x9xf32>
    %224 = vector.shape_cast %222 : vector<1x16x16x32xf32> to vector<256x32xf32>
    %c256_333 = arith.constant 256 : index
    %c0_334 = arith.constant 0 : index
    %225 = vector.load %arg8[%c256_333, %c0_334] : memref<288x9xf32, #tpu.memory_space<vmem>>, vector<32x9xf32>
    %cst_335 = arith.constant dense<0.000000e+00> : vector<256x9xf32>
    %226 = tpu.matmul %224, %225, %cst_335 {dimension_numbers = #tpu.dot_dimension_numbers<[1], [0], [0], [1], [0, 0, 1, 1], [], []>} : vector<256x32xf32>, vector<32x9xf32>, vector<256x9xf32> -> vector<256x9xf32>
    %227 = arith.addf %223, %226 : vector<256x9xf32>
    %c0_336 = arith.constant 0 : index
    %c0_337 = arith.constant 0 : index
    %228 = vector.load %arg12[%c0_336, %c0_337] : memref<256x64xf32, #tpu.memory_space<vmem>>, vector<256x9xf32>
    tpu.vector_store %arg12[%c0_336, %c0_337], %227 {strides = array<i32>} : memref<256x64xf32, #tpu.memory_space<vmem>>, vector<256x9xf32>,
    %c0_338 = arith.constant 0 : index
    %c0_339 = arith.constant 0 : index
    %229 = vector.load %arg12[%c0_338, %c0_339] : memref<256x64xf32, #tpu.memory_space<vmem>>, vector<256x9xf32>
    %c0_340 = arith.constant 0 : index
    %c0_341 = arith.constant 0 : index
    %230 = vector.load %arg10[%c0_340, %c0_341] : memref<256x9xf32, #tpu.memory_space<vmem>>, vector<256x9xf32>
    tpu.vector_store %arg10[%c0_340, %c0_341], %229 {strides = array<i32>} : memref<256x9xf32, #tpu.memory_space<vmem>>, vector<256x9xf32>,
    return
  }
  func.func @transform_0(%arg0: i32) -> (i32, i32) {
    %c0_i32 = arith.constant 0 : i32
    %c0_i32_0 = arith.constant 0 : i32
    return %arg0, %c0_i32 : i32, i32
  }
  func.func @transform_1(%arg0: i32) -> (i32, i32) {
    %c0_i32 = arith.constant 0 : i32
    %c0_i32_0 = arith.constant 0 : i32
    %c0_i32_1 = arith.constant 0 : i32
    return %c0_i32, %c0_i32_0 : i32, i32
  }
  func.func @transform_2(%arg0: i32) -> (i32, i32) {
    %c0_i32 = arith.constant 0 : i32
    %c0_i32_0 = arith.constant 0 : i32
    %c0_i32_1 = arith.constant 0 : i32
    return %c0_i32, %c0_i32_0 : i32, i32
  }
  func.func @transform_3(%arg0: i32) -> (i32, i32) {
    %c0_i32 = arith.constant 0 : i32
    %c0_i32_0 = arith.constant 0 : i32
    %c0_i32_1 = arith.constant 0 : i32
    return %c0_i32, %c0_i32_0 : i32, i32
  }
  func.func @transform_4(%arg0: i32) -> (i32, i32) {
    %c0_i32 = arith.constant 0 : i32
    %c0_i32_0 = arith.constant 0 : i32
    %c0_i32_1 = arith.constant 0 : i32
    return %c0_i32, %c0_i32_0 : i32, i32
  }
  func.func @transform_5(%arg0: i32) -> (i32, i32) {
    %c0_i32 = arith.constant 0 : i32
    %c0_i32_0 = arith.constant 0 : i32
    %c0_i32_1 = arith.constant 0 : i32
    return %c0_i32, %c0_i32_0 : i32, i32
  }
  func.func @transform_6(%arg0: i32) -> (i32, i32) {
    %c0_i32 = arith.constant 0 : i32
    %c0_i32_0 = arith.constant 0 : i32
    %c0_i32_1 = arith.constant 0 : i32
    return %c0_i32, %c0_i32_0 : i32, i32
  }
  func.func @transform_7(%arg0: i32) -> (i32, i32) {
    %c0_i32 = arith.constant 0 : i32
    %c0_i32_0 = arith.constant 0 : i32
    %c0_i32_1 = arith.constant 0 : i32
    return %c0_i32, %c0_i32_0 : i32, i32
  }
  func.func @transform_8(%arg0: i32) -> (i32, i32) {
    %c0_i32 = arith.constant 0 : i32
    %c0_i32_0 = arith.constant 0 : i32
    %c0_i32_1 = arith.constant 0 : i32
    return %c0_i32, %c0_i32_0 : i32, i32
  }
  func.func @transform_9(%arg0: i32) -> (i32, i32) {
    %c0_i32 = arith.constant 0 : i32
    %c0_i32_0 = arith.constant 0 : i32
    return %arg0, %c0_i32 : i32, i32
  }
}

</mosaic_0001>

<bundles_post_ra>
// kernel: super_resolution_forward.1
= control target key start
LH: loop header
LB: loop body
LE: loop exit
PB: predicated region body
PF: predicated region fallthrough
CT: control target
= control target key end

     0   :  { %s17689_s30 = smov 0   ;;  %s21678_s0 = inlined_call_operand.vmem [shape: f32[512,32], index: 0, kind: input, shape index: {}]   ;;  %s21679_s1 = inlined_call_operand.vmem [shape: f32[32,64], index: 1, kind: input, shape index: {}]   ;;  %s21680_s2 = inlined_call_operand.vmem [shape: f32[1,64], index: 2, kind: input, shape index: {}]   ;;  %s21681_s3 = inlined_call_operand.vmem [shape: f32[576,64], index: 3, kind: input, shape index: {}]   ;;  %s21682_s4 = inlined_call_operand.vmem [shape: f32[1,64], index: 4, kind: input, shape index: {}]   ;;  %s21683_s5 = inlined_call_operand.vmem [shape: f32[576,32], index: 5, kind: input, shape index: {}]   ;;  %s21684_s6 = inlined_call_operand.vmem [shape: f32[1,32], index: 6, kind: input, shape index: {}]   ;;  %s21685_s7 = inlined_call_operand.vmem [shape: f32[288,9], index: 7, kind: input, shape index: {}]   ;;  %s21686_s8 = inlined_call_operand.vmem [shape: f32[1,9], index: 8, kind: input, shape index: {}]   ;;  %s21687_s9 = inlined_call_operand.vmem [shape: f32[512,9], index: 9, kind: output, shape index: {}]  }
   0x1 LB: > { %s13546_s10 = sadd.s32 4294967295, %s17636_s30   ;;  %p13550_p0 = scmp.ge.s32.totalorder %s17636_s30, 1  ;;  %s17636_s30 = sphi %s17689_s30, %s19_s30  }
   0x2   : > { %p288_p1 = scmp.lt.s32.totalorder %s17636_s30, 3 }
   0x4   : > { %p289_p2 = pnand %p13550_p0, %p288_p1 }
   0x6   : > { %292 = sbr.rel (%p289_p2) target bundleno = 1756 (0x6dc), region = 56 }
   0xd   : > { %v414_v0 = vld [vmem:[%s21679_s1] sm:$0xff]  ;;  %v415_v1 = vld [vmem:[%s21679_s1 + $0x8] sm:$0xff]  ;;  %v416_v2 = vld [vmem:[%s21679_s1 + $0x10] sm:$0xff]  ;;  %s13551_s17 = sshll.u32 %s13546_s10, 5  ;;  %vm425_vm0 = vcmask 261120   ;;  %vm336_vm1 = vcmask 523264  }
   0xe   : > { %v17249_v3 = vpack.c.bf16 %v415_v1, %v414_v0  ;;  %v417_v4 = vld [vmem:[%s21679_s1 + $0x18] sm:$0xff]  ;;  %p325_p3 = scmp.lt.s32.totalorder %s13551_s17, 63  ;;  %v915_v5 = vld [vmem:[%s21681_s3] sm:$0xff]  ;;  %v916_v6 = vld [vmem:[%s21681_s3 + $0x8] sm:$0xff]  ;;  %v17638_v55 = vmov 0.0   ;;  %vm345_vm2 = vcmask 516096  }
   0xf   : > { %v17253_v7 = vpack.c.bf16 %v417_v4, %v416_v2  ;;  %v17257_v8 = vpack.c.bf16 %v916_v6, %v915_v5  ;;  %v1372_v9 = vld [vmem:[%s21681_s3 + $0x40] sm:$0xff]  ;;  %v1373_v10 = vld [vmem:[%s21681_s3 + $0x48] sm:$0xff]  ;;  %v917_v11 = vld [vmem:[%s21681_s3 + $0x10] sm:$0xff]  ;;  %337 = vst.msk [vmem:[#allocation2] sm:$0xff] %vm336_vm1, %v17638_v55  ;;  %vm339_vm3 = vcmask 517120   ;;  %vm9316_vm4 = vcmask 72704  }
  0x10   : > { %17250 = vmatprep.subr.bf16.mxu0 %v17249_v3  ;;  %s21767_s17 = smov (!%p325_p3, %s13551_s17), 63  ;;  %v918_v12 = vld [vmem:[%s21681_s3 + $0x18] sm:$0xff]  ;;  %v17273_v14 = vpack.c.bf16 %v1373_v10, %v1372_v9  ;;  %v1374_v15 = vld [vmem:[%s21681_s3 + $0x50] sm:$0xff]  ;;  %v919_v50 = vld [vmem:[%s21681_s3 + $0x20] sm:$0xff]  ;;  %338 = vst.msk [vmem:[#allocation2 + $0x8] sm:$0xff] %vm336_vm1, %v17638_v55 }
  0x11   : > { %17252 = vmatpush3.bf16.msra.mxu0 %v17249_v3  ;;  %17258 = vmatprep.subr.bf16.mxu1 %v17257_v8  ;;  %v17261_v13 = vpack.c.bf16 %v918_v12, %v917_v11  ;;  %s13552_s12 = sshll.u32 %s21767_s17, 3  ;;  %v1375_v16 = vld [vmem:[%s21681_s3 + $0x58] sm:$0xff]  ;;  %v920_v51 = vld [vmem:[%s21681_s3 + $0x28] sm:$0xff]  ;;  %v1376_v53 = vld [vmem:[%s21681_s3 + $0x60] sm:$0xff]  ;;  %342 = vst.msk [vmem:[#allocation2 + $0x198] sm:$0xff] %vm336_vm1, %v17638_v55 }
  0x12   : > { %17254 = vmatprep.subr.bf16.mxu0 %v17253_v7  ;;  %17260 = vmatpush3.bf16.msra.mxu1 %v17257_v8  ;;  %s17735_s15 = scalar_lea.vmem %s21678_s0, %s13552_s12  ;;  %v17277_v20 = vpack.c.bf16 %v1375_v16, %v1374_v15  ;;  %v17265_v52 = vpack.c.bf16 %v920_v51, %v919_v50  ;;  %v1377_v54 = vld [vmem:[%s21681_s3 + $0x68] sm:$0xff]  ;;  %343 = vst.msk [vmem:[#allocation2 + $0x1a0] sm:$0xff] %vm336_vm1, %v17638_v55  ;;  %v921_v57 = vld [vmem:[%s21681_s3 + $0x30] sm:$0xff]  ;;  %v922_v58 = vld [vmem:[%s21681_s3 + $0x38] sm:$0xff]  ;;  %s21580_s14 = scalar_lea.vmem %s21687_s9, %s13552_s12 }
  0x13   : > { %17262 = vmatprep.subr.bf16.mxu1 %v17261_v13  ;;  %v382_v17 = vld [vmem:[%s17735_s15] sm:$0xff]  ;;  %v383_v18 = vld [vmem:[%s17735_s15 + $0x8] sm:$0xff]  ;;  %v384_v19 = vld [vmem:[%s17735_s15 + $0x10] sm:$0xff]  ;;  %v17281_v56 = vpack.c.bf16 %v1377_v54, %v1376_v53  ;;  %346 = vst.msk [vmem:[#allocation2] sm:$0x1] %vm345_vm2, %v17638_v55  ;;  %v17269_v59 = vpack.c.bf16 %v922_v58, %v921_v57 }
  0x14   : > { %15545 = vmatprep.mubr.msk.f32.mxu0 %vm425_vm0, %v382_v17  ;;  %v385_v21 = vld [vmem:[%s17735_s15 + $0x18] sm:$0xff]  ;;  %v386_v22 = vld [vmem:[%s17735_s15 + $0x20] sm:$0xff]  ;;  %v387_v23 = vld [vmem:[%s17735_s15 + $0x28] sm:$0xff]  ;;  %347 = vst.msk [vmem:[#allocation2 + $0x18] sm:$0x1] %vm345_vm2, %v17638_v55 }
  0x15   : > { %17256 = vmatpush3.bf16.msra.mxu0 %v17253_v7  ;;  %v388_v24 = vld [vmem:[%s17735_s15 + $0x30] sm:$0xff]  ;;  %v389_v25 = vld [vmem:[%s17735_s15 + $0x38] sm:$0xff]  ;;  %v390_v26 = vld [vmem:[%s17735_s15 + $0x40] sm:$0xff]  ;;  %348 = vst.msk [vmem:[#allocation2 + $0x30] sm:$0x1] %vm345_vm2, %v17638_v55 }
  0x16   : > { %17274 = vmatprep.subr.bf16.mxu0 %v17273_v14  ;;  %17264 = vmatpush3.bf16.msra.mxu1 %v17261_v13  ;;  %v391_v27 = vld [vmem:[%s17735_s15 + $0x48] sm:$0xff]  ;;  %v392_v28 = vld [vmem:[%s17735_s15 + $0x50] sm:$0xff]  ;;  %v393_v29 = vld [vmem:[%s17735_s15 + $0x58] sm:$0xff]  ;;  %349 = vst.msk [vmem:[#allocation2 + $0x48] sm:$0x1] %vm345_vm2, %v17638_v55 }
  0x17   : > { %v394_v30 = vld [vmem:[%s17735_s15 + $0x60] sm:$0xff]  ;;  %v395_v31 = vld [vmem:[%s17735_s15 + $0x68] sm:$0xff]  ;;  %v396_v32 = vld [vmem:[%s17735_s15 + $0x70] sm:$0xff]  ;;  %350 = vst.msk [vmem:[#allocation2 + $0x60] sm:$0x1] %vm345_vm2, %v17638_v55  ;;  %17266 = vmatprep.subr.bf16.mxu1 %v17265_v52 }
  0x18   : > { %15546 = vmatmul.mubr.msk.f32.vlgmr.msra.gmra.mrb[0].mxu0 %vm425_vm0, %v383_v18  ;;  %v397_v33 = vld [vmem:[%s17735_s15 + $0x78] sm:$0xff]  ;;  %v398_v34 = vld [vmem:[%s17735_s15 + $0x80] sm:$0xff]  ;;  %v399_v35 = vld [vmem:[%s17735_s15 + $0x88] sm:$0xff]  ;;  %351 = vst.msk [vmem:[#allocation2 + $0x78] sm:$0x1] %vm345_vm2, %v17638_v55 }
  0x19   : > { %15548 = vmatprep.mubr.msk.f32.mxu0 %vm425_vm0, %v384_v19  ;;  %17276 = vmatpush3.bf16.msra.mxu0 %v17273_v14  ;;  %v400_v36 = vld [vmem:[%s17735_s15 + $0x90] sm:$0xff]  ;;  %v401_v37 = vld [vmem:[%s17735_s15 + $0x98] sm:$0xff]  ;;  %v402_v38 = vld [vmem:[%s17735_s15 + $0xa0] sm:$0xff]  ;;  %352 = vst.msk [vmem:[#allocation2 + $0x90] sm:$0x1] %vm345_vm2, %v17638_v55 }
  0x1a   : > { %17278 = vmatprep.subr.bf16.mxu0 %v17277_v20  ;;  %v403_v39 = vld [vmem:[%s17735_s15 + $0xa8] sm:$0xff]  ;;  %v404_v40 = vld [vmem:[%s17735_s15 + $0xb0] sm:$0xff]  ;;  %v405_v41 = vld [vmem:[%s17735_s15 + $0xb8] sm:$0xff]  ;;  %353 = vst.msk [vmem:[#allocation2 + $0xa8] sm:$0x1] %vm345_vm2, %v17638_v55  ;;  %17268 = vmatpush3.bf16.msra.mxu1 %v17265_v52 }
  0x1b   : > { %v406_v42 = vld [vmem:[%s17735_s15 + $0xc0] sm:$0xff]  ;;  %v407_v43 = vld [vmem:[%s17735_s15 + $0xc8] sm:$0xff]  ;;  %v408_v44 = vld [vmem:[%s17735_s15 + $0xd0] sm:$0xff]  ;;  %354 = vst.msk [vmem:[#allocation2 + $0xc0] sm:$0x1] %vm345_vm2, %v17638_v55  ;;  %17270 = vmatprep.subr.bf16.mxu1 %v17269_v59 }
  0x1c   : > { %15549 = vmatmul.mubr.msk.f32.gmra.mrb[2].mxu0 %vm425_vm0, %v385_v21  ;;  %v409_v45 = vld [vmem:[%s17735_s15 + $0xd8] sm:$0xff]  ;;  %v410_v46 = vld [vmem:[%s17735_s15 + $0xe0] sm:$0xff]  ;;  %v411_v47 = vld [vmem:[%s17735_s15 + $0xe8] sm:$0xff]  ;;  %355 = vst.msk [vmem:[#allocation2 + $0xd8] sm:$0x1] %vm345_vm2, %v17638_v55 }
  0x1d   : > { %15551 = vmatprep.mubr.msk.f32.mxu0 %vm425_vm0, %v386_v22  ;;  %17280 = vmatpush3.bf16.msra.mxu0 %v17277_v20  ;;  %v412_v48 = vld [vmem:[%s17735_s15 + $0xf0] sm:$0xff]  ;;  %v413_v49 = vld [vmem:[%s17735_s15 + $0xf8] sm:$0xff]  ;;  %356 = vst.msk [vmem:[#allocation2 + $0xf0] sm:$0x1] %vm345_vm2, %v17638_v55  ;;  %357 = vst.msk [vmem:[#allocation2 + $0x108] sm:$0x1] %vm345_vm2, %v17638_v55 }
  0x1e   : > { %358 = vst.msk [vmem:[#allocation2 + $0x120] sm:$0x1] %vm345_vm2, %v17638_v55  ;;  %359 = vst.msk [vmem:[#allocation2 + $0x138] sm:$0x1] %vm345_vm2, %v17638_v55  ;;  %17282 = vmatprep.subr.bf16.mxu0 %v17281_v56  ;;  %v1378_v60 = vld [vmem:[%s21681_s3 + $0x70] sm:$0xff]  ;;  %v1379_v61 = vld [vmem:[%s21681_s3 + $0x78] sm:$0xff]  ;;  %17272 = vmatpush3.bf16.msra.mxu1 %v17269_v59 }
  0x1f   : > { %360 = vst.msk [vmem:[#allocation2 + $0x150] sm:$0x1] %vm345_vm2, %v17638_v55  ;;  %361 = vst.msk [vmem:[#allocation2 + $0x168] sm:$0x1] %vm345_vm2, %v17638_v55  ;;  %v17285_v62 = vpack.c.bf16 %v1379_v61, %v1378_v60  ;;  %v851_v63 = vld [vmem:[#allocation2] sm:$0xff]  ;;  %v852_v0 = vld [vmem:[#allocation2 + $0x8] sm:$0xff] }
  0x20   : > { %15552 = vmatmul.mubr.msk.f32.gmra.mrb[4].mxu0 %vm425_vm0, %v387_v23  ;;  %362 = vst.msk [vmem:[#allocation2 + $0x180] sm:$0x1] %vm345_vm2, %v17638_v55  ;;  %365 = vst.msk [vmem:[#allocation2 + $0x29] sm:$0x1] %vm345_vm2, %v17638_v55  ;;  %15609 = vmatprep.mubr.msk.f32.mxu1 %vm336_vm1, %v851_v63  ;;  %v1308_v1 = vld [vmem:[#allocation2 + $0x1] sm:$0xff]  ;;  %v1831_v6 = vld [vmem:[%s21681_s3 + $0x90] sm:$0xff] }
  0x21   : > { %15554 = vmatprep.mubr.msk.f32.mxu0 %vm425_vm0, %v388_v24  ;;  %366 = vst.msk [vmem:[#allocation2 + $0x41] sm:$0x1] %vm345_vm2, %v17638_v55  ;;  %367 = vst.msk [vmem:[#allocation2 + $0x59] sm:$0x1] %vm345_vm2, %v17638_v55  ;;  %17284 = vmatpush3.bf16.msra.mxu0 %v17281_v56  ;;  %v1829_v3 = vld [vmem:[%s21681_s3 + $0x80] sm:$0xff]  ;;  %v1830_v4 = vld [vmem:[%s21681_s3 + $0x88] sm:$0xff] }
  0x22   : > { %368 = vst.msk [vmem:[#allocation2 + $0x71] sm:$0x1] %vm345_vm2, %v17638_v55  ;;  %369 = vst.msk [vmem:[#allocation2 + $0x89] sm:$0x1] %vm345_vm2, %v17638_v55  ;;  %17286 = vmatprep.subr.bf16.mxu0 %v17285_v62  ;;  %15610 = vmatmul.mubr.msk.f32.vlgmr.msra.gmra.mrb[0].mxu1 %vm336_vm1, %v852_v0  ;;  %v17289_v5 = vpack.c.bf16 %v1830_v4, %v1829_v3  ;;  %v1832_v7 = vld [vmem:[%s21681_s3 + $0x98] sm:$0xff]  ;;  %v1833_v9 = vld [vmem:[%s21681_s3 + $0xa0] sm:$0xff] }
  0x23   : > { %370 = vst.msk [vmem:[#allocation2 + $0xa1] sm:$0x1] %vm345_vm2, %v17638_v55  ;;  %371 = vst.msk [vmem:[#allocation2 + $0xb9] sm:$0x1] %vm345_vm2, %v17638_v55  ;;  %v17293_v8 = vpack.c.bf16 %v1832_v7, %v1831_v6  ;;  %v1834_v10 = vld [vmem:[%s21681_s3 + $0xa8] sm:$0xff]  ;;  %v2286_v12 = vld [vmem:[%s21681_s3 + $0xc0] sm:$0xff] }
  0x24   : > { %15555 = vmatmul.mubr.msk.f32.gmra.mrb[6].mxu0 %vm425_vm0, %v389_v25  ;;  %372 = vst.msk [vmem:[#allocation2 + $0xd1] sm:$0x1] %vm345_vm2, %v17638_v55  ;;  %373 = vst.msk [vmem:[#allocation2 + $0xe9] sm:$0x1] %vm345_vm2, %v17638_v55  ;;  %17290 = vmatprep.subr.bf16.mxu1 %v17289_v5  ;;  %v17297_v11 = vpack.c.bf16 %v1834_v10, %v1833_v9  ;;  %v2287_v13 = vld [vmem:[%s21681_s3 + $0xc8] sm:$0xff]  ;;  %v2288_v15 = vld [vmem:[%s21681_s3 + $0xd0] sm:$0xff] }
  0x25   : > { %15557 = vmatprep.mubr.msk.f32.mxu0 %vm425_vm0, %v390_v26  ;;  %374 = vst.msk [vmem:[#allocation2 + $0x101] sm:$0x1] %vm345_vm2, %v17638_v55  ;;  %375 = vst.msk [vmem:[#allocation2 + $0x119] sm:$0x1] %vm345_vm2, %v17638_v55  ;;  %17288 = vmatpush3.bf16.msra.mxu0 %v17285_v62  ;;  %v17305_v14 = vpack.c.bf16 %v2287_v13, %v2286_v12  ;;  %v2289_v16 = vld [vmem:[%s21681_s3 + $0xd8] sm:$0xff]  ;;  %v1835_v18 = vld [vmem:[%s21681_s3 + $0xb0] sm:$0xff] }
  0x26   : > { %376 = vst.msk [vmem:[#allocation2 + $0x131] sm:$0x1] %vm345_vm2, %v17638_v55  ;;  %377 = vst.msk [vmem:[#allocation2 + $0x149] sm:$0x1] %vm345_vm2, %v17638_v55  ;;  %17292 = vmatpush3.bf16.msra.mxu1 %v17289_v5  ;;  %v17309_v17 = vpack.c.bf16 %v2289_v16, %v2288_v15  ;;  %v1836_v19 = vld [vmem:[%s21681_s3 + $0xb8] sm:$0xff]  ;;  %v2290_v21 = vld [vmem:[%s21681_s3 + $0xe0] sm:$0xff] }
  0x27   : > { %378 = vst.msk [vmem:[#allocation2 + $0x161] sm:$0x1] %vm345_vm2, %v17638_v55  ;;  %379 = vst.msk [vmem:[#allocation2 + $0x179] sm:$0x1] %vm345_vm2, %v17638_v55  ;;  %17294 = vmatprep.subr.bf16.mxu1 %v17293_v8  ;;  %17306 = vmatprep.subr.bf16.mxu0 %v17305_v14  ;;  %v17301_v20 = vpack.c.bf16 %v1836_v19, %v1835_v18  ;;  %v2291_v22 = vld [vmem:[%s21681_s3 + $0xe8] sm:$0xff]  ;;  %v2292_v24 = vld [vmem:[%s21681_s3 + $0xf0] sm:$0xff] }
  0x28   : > { %15558 = vmatmul.mubr.msk.f32.gmra.mrb[8].mxu0 %vm425_vm0, %v391_v27  ;;  %380 = vst.msk [vmem:[#allocation2 + $0x191] sm:$0x1] %vm345_vm2, %v17638_v55  ;;  %363 = vst.msk [vmem:[#allocation2 + $0x198] sm:$0x1] %vm345_vm2, %v17638_v55  ;;  %v17313_v23 = vpack.c.bf16 %v2291_v22, %v2290_v21  ;;  %v2293_v25 = vld [vmem:[%s21681_s3 + $0xf8] sm:$0xff]  ;;  %v2743_v27 = vld [vmem:[%s21681_s3 + $0x100] sm:$0xff] }
  0x29   : > { %15560 = vmatprep.mubr.msk.f32.mxu0 %vm425_vm0, %v392_v28  ;;  %340 = vst.msk [vmem:[#allocation2 + $0x10] sm:$0x3] %vm339_vm3, %v17638_v55  ;;  %344 = vst.msk [vmem:[#allocation2 + $0x1a8] sm:$0x3] %vm339_vm3, %v17638_v55  ;;  %v17317_v26 = vpack.c.bf16 %v2293_v25, %v2292_v24  ;;  %v2744_v28 = vld [vmem:[%s21681_s3 + $0x108] sm:$0xff] }
  0x2a   : > { %364 = vst.msk [vmem:[#allocation2 + $0x11] sm:$0x1] %vm345_vm2, %v17638_v55  ;;  %381 = vst.msk [vmem:[#allocation2 + $0x1a9] sm:$0x1] %vm345_vm2, %v17638_v55  ;;  %17296 = vmatpush3.bf16.msra.mxu1 %v17293_v8 }
  0x2b   : > { %17298 = vmatprep.subr.bf16.mxu1 %v17297_v11 }
  0x2c   : > { %15561 = vmatmul.mubr.msk.f32.gmra.mrb[10].mxu0 %vm425_vm0, %v393_v29  ;;  %v17929_v29 = vpack.c.bf16 %v2744_v28, %v2743_v27 }
  0x2d   : > { %15563 = vmatprep.mubr.msk.f32.mxu0 %vm425_vm0, %v394_v30  ;;  %v3200_v30 = vld [vmem:[%s21681_s3 + $0x140] sm:$0xff] }
  0x2e   : > { %17300 = vmatpush3.bf16.msra.mxu1 %v17297_v11 }
  0x2f   : > { %17302 = vmatprep.subr.bf16.mxu1 %v17301_v20 }
  0x30   : > { %15564 = vmatmul.mubr.msk.f32.gmra.mrb[12].mxu0 %vm425_vm0, %v395_v31  ;;  %v1309_v2 = vld [vmem:[#allocation2 + $0x9] sm:$0xff] }
  0x31   : > { %15566 = vmatprep.mubr.msk.f32.mxu0 %vm425_vm0, %v396_v32  ;;  %v3201_v31 = vld [vmem:[%s21681_s3 + $0x148] sm:$0xff] }
  0x32   : > { %17304 = vmatpush3.bf16.msra.mxu1 %v17301_v20  ;;  %v17938_v32 = vpack.c.bf16 %v3201_v31, %v3200_v30 }
  0x33   : > { %17322 = vmatprep.subr.bf16.mxu1 %v17929_v29 }
  0x34   : > { %15567 = vmatmul.mubr.msk.f32.gmra.mrb[14].mxu0 %vm425_vm0, %v397_v33  ;;  %v17944_v33 = vld [vmem:[%s21680_s2] ss:$0 sm:$0xff] }
  0x35   : > { %15569 = vmatprep.mubr.msk.f32.mxu0 %vm425_vm0, %v398_v34 }
  0x38   : > { %15570 = vmatmul.mubr.msk.f32.gmra.mrb[16].mxu0 %vm425_vm0, %v399_v35 }
  0x39   : > { %15572 = vmatprep.mubr.msk.f32.mxu0 %vm425_vm0, %v400_v36 }
  0x3c   : > { %15573 = vmatmul.mubr.msk.f32.gmra.mrb[18].mxu0 %vm425_vm0, %v401_v37 }
  0x3d   : > { %15575 = vmatprep.mubr.msk.f32.mxu0 %vm425_vm0, %v402_v38 }
  0x40   : > { %15576 = vmatmul.mubr.msk.f32.gmra.mrb[20].mxu0 %vm425_vm0, %v403_v39 }
  0x41   : > { %15578 = vmatprep.mubr.msk.f32.mxu0 %vm425_vm0, %v404_v40 }
  0x44   : > { %15579 = vmatmul.mubr.msk.f32.gmra.mrb[22].mxu0 %vm425_vm0, %v405_v41 }
  0x45   : > { %15581 = vmatprep.mubr.msk.f32.mxu0 %vm425_vm0, %v406_v42 }
  0x48   : > { %15582 = vmatmul.mubr.msk.f32.gmra.mrb[24].mxu0 %vm425_vm0, %v407_v43 }
  0x49   : > { %15584 = vmatprep.mubr.msk.f32.mxu0 %vm425_vm0, %v408_v44 }
  0x4c   : > { %15585 = vmatmul.mubr.msk.f32.gmra.mrb[26].mxu0 %vm425_vm0, %v409_v45 }
  0x4d   : > { %15587 = vmatprep.mubr.msk.f32.mxu0 %vm425_vm0, %v410_v46 }
  0x50   : > { %15588 = vmatmul.mubr.msk.f32.gmra.mrb[28].mxu0 %vm425_vm0, %v411_v47 }
  0x51   : > { %15590 = vmatprep.mubr.msk.f32.mxu0 %vm425_vm0, %v412_v48 }
  0x54   : > { %15591 = vmatmul.mubr.msk.f32.gmra.mrb[30].mxu0 %vm425_vm0, %v413_v49 }
  0x55   : > { %15673 = vmatprep.mubr.msk.f32.mxu0 %vm336_vm1, %v1308_v1 }
  0x58   : > { %15674 = vmatmul.mubr.msk.f32.vlgmr.msra.gmra.mrb[32].mxu0 %vm336_vm1, %v1309_v2 }
  0x59   : > { %17308 = vmatpush3.bf16.msra.mxu0 %v17305_v14 }
  0x5a   : > { %17310 = vmatprep.subr.bf16.mxu0 %v17309_v17 }
  0x5d   : > { %17312 = vmatpush3.bf16.msra.mxu0 %v17309_v17 }
  0x5e   : > { %17314 = vmatprep.subr.bf16.mxu0 %v17313_v23 }
  0x61   : > { %17316 = vmatpush3.bf16.msra.mxu0 %v17313_v23 }
  0x62   : > { %17318 = vmatprep.subr.bf16.mxu0 %v17317_v26 }
  0x65   : > { %17320 = vmatpush3.bf16.msra.mxu0 %v17317_v26 }
  0x66   : > { %17338 = vmatprep.subr.bf16.mxu0 %v17938_v32 }
  0xeb   : > { %v15547_v34 = vpop.f32.mrb[0].mxu0 }
  0xec   : > { %v594_v35 = vadd.f32 %v15547_v34, %v17944_v33  ;;  %v588_v36 = vpop.f32.mrb[1].mxu0 }
  0xed   : > { %v589_v37 = vadd.f32 %v17944_v33, %v588_v36 }
  0xee   : > { %v748_v38 = vmax.f32 %v594_v35, 0.0 }
  0xef   : > { %v747_v39 = vmax.f32 %v589_v37, 0.0  ;;  %v15550_v40 = vpop.f32.mrb[2].mxu0 }
  0xf0   : > { %781 = vst.msk [vmem:[#allocation2 + $0x21] sm:$0xff] %vm336_vm1, %v748_v38  ;;  %v604_v41 = vadd.f32 %v15550_v40, %v17944_v33  ;;  %v598_v42 = vpop.f32.mrb[3].mxu0 }
  0xf1   : > { %780 = vst.msk [vmem:[#allocation2 + $0x19] sm:$0xff] %vm336_vm1, %v747_v39  ;;  %v599_v43 = vadd.f32 %v17944_v33, %v598_v42 }
  0xf2   : > { %v750_v44 = vmax.f32 %v604_v41, 0.0 }
  0xf3   : > { %v749_v45 = vmax.f32 %v599_v43, 0.0  ;;  %v15553_v46 = vpop.f32.mrb[4].mxu0 }
  0xf4   : > { %783 = vst.msk [vmem:[#allocation2 + $0x39] sm:$0xff] %vm336_vm1, %v750_v44  ;;  %v614_v47 = vadd.f32 %v15553_v46, %v17944_v33  ;;  %v608_v48 = vpop.f32.mrb[5].mxu0 }
  0xf5   : > { %782 = vst.msk [vmem:[#allocation2 + $0x31] sm:$0xff] %vm336_vm1, %v749_v45  ;;  %v609_v49 = vadd.f32 %v17944_v33, %v608_v48 }
  0xf6   : > { %v752_v50 = vmax.f32 %v614_v47, 0.0 }
  0xf7   : > { %v751_v51 = vmax.f32 %v609_v49, 0.0  ;;  %v15556_v52 = vpop.f32.mrb[6].mxu0  ;;  %v17970_v59 = vld [vmem:[#allocation2 + $0x21] sm:$0xff] }
  0xf8   : > { %785 = vst.msk [vmem:[#allocation2 + $0x51] sm:$0xff] %vm336_vm1, %v752_v50  ;;  %v624_v53 = vadd.f32 %v15556_v52, %v17944_v33  ;;  %v618_v54 = vpop.f32.mrb[7].mxu0  ;;  %v17958_v55 = vld [vmem:[#allocation2 + $0x18] sm:$0xff]  ;;  %v17962_v57 = vld [vmem:[#allocation2 + $0x20] sm:$0xff] }
  0xf9   : > { %v17960_v56 = vld [vmem:[#allocation2 + $0x19] sm:$0xff]  ;;  %784 = vst.msk [vmem:[#allocation2 + $0x49] sm:$0xff] %vm336_vm1, %v751_v51  ;;  %v619_v58 = vadd.f32 %v17944_v33, %v618_v54  ;;  %15612 = vmatprep.mubr.msk.f32.mxu1 %vm336_vm1, %v17958_v55 }
  0xfa   : > { %15676 = vmatprep.mubr.msk.f32.mxu0 %vm336_vm1, %v17960_v56  ;;  %v754_v60 = vmax.f32 %v624_v53, 0.0  ;;  %15613 = vmatmul.mubr.msk.f32.gmra.mrb[2].mxu1 %vm336_vm1, %v17962_v57 }
  0xfb   : > { %15677 = vmatmul.mubr.msk.f32.gmra.mrb[34].mxu0 %vm336_vm1, %v17970_v59  ;;  %v753_v61 = vmax.f32 %v619_v58, 0.0  ;;  %v15559_v62 = vpop.f32.mrb[8].mxu0  ;;  %v17990_v5 = vld [vmem:[#allocation2 + $0x39] sm:$0xff] }
  0xfc   : > { %787 = vst.msk [vmem:[#allocation2 + $0x69] sm:$0xff] %vm336_vm1, %v754_v60  ;;  %v634_v63 = vadd.f32 %v15559_v62, %v17944_v33  ;;  %v628_v0 = vpop.f32.mrb[9].mxu0  ;;  %v17978_v1 = vld [vmem:[#allocation2 + $0x30] sm:$0xff]  ;;  %v17982_v3 = vld [vmem:[#allocation2 + $0x38] sm:$0xff] }
  0xfd   : > { %v17980_v2 = vld [vmem:[#allocation2 + $0x31] sm:$0xff]  ;;  %786 = vst.msk [vmem:[#allocation2 + $0x61] sm:$0xff] %vm336_vm1, %v753_v61  ;;  %v629_v4 = vadd.f32 %v17944_v33, %v628_v0  ;;  %15615 = vmatprep.mubr.msk.f32.mxu1 %vm336_vm1, %v17978_v1 }
  0xfe   : > { %15679 = vmatprep.mubr.msk.f32.mxu0 %vm336_vm1, %v17980_v2  ;;  %v756_v6 = vmax.f32 %v634_v63, 0.0  ;;  %15616 = vmatmul.mubr.msk.f32.gmra.mrb[4].mxu1 %vm336_vm1, %v17982_v3 }
  0xff   : > { %15680 = vmatmul.mubr.msk.f32.gmra.mrb[36].mxu0 %vm336_vm1, %v17990_v5  ;;  %v755_v7 = vmax.f32 %v629_v4, 0.0  ;;  %v15562_v8 = vpop.f32.mrb[10].mxu0  ;;  %v18010_v15 = vld [vmem:[#allocation2 + $0x51] sm:$0xff] }
 0x100   : > { %789 = vst.msk [vmem:[#allocation2 + $0x81] sm:$0xff] %vm336_vm1, %v756_v6  ;;  %v644_v9 = vadd.f32 %v15562_v8, %v17944_v33  ;;  %v638_v10 = vpop.f32.mrb[11].mxu0  ;;  %v17998_v11 = vld [vmem:[#allocation2 + $0x48] sm:$0xff]  ;;  %v18002_v13 = vld [vmem:[#allocation2 + $0x50] sm:$0xff] }
 0x101   : > { %v18000_v12 = vld [vmem:[#allocation2 + $0x49] sm:$0xff]  ;;  %788 = vst.msk [vmem:[#allocation2 + $0x79] sm:$0xff] %vm336_vm1, %v755_v7  ;;  %v639_v14 = vadd.f32 %v17944_v33, %v638_v10  ;;  %15618 = vmatprep.mubr.msk.f32.mxu1 %vm336_vm1, %v17998_v11 }
 0x102   : > { %15682 = vmatprep.mubr.msk.f32.mxu0 %vm336_vm1, %v18000_v12  ;;  %v758_v16 = vmax.f32 %v644_v9, 0.0  ;;  %15619 = vmatmul.mubr.msk.f32.gmra.mrb[6].mxu1 %vm336_vm1, %v18002_v13 }
 0x103   : > { %15683 = vmatmul.mubr.msk.f32.gmra.mrb[38].mxu0 %vm336_vm1, %v18010_v15  ;;  %v757_v17 = vmax.f32 %v639_v14, 0.0  ;;  %v15565_v18 = vpop.f32.mrb[12].mxu0  ;;  %v18030_v25 = vld [vmem:[#allocation2 + $0x69] sm:$0xff] }
 0x104   : > { %791 = vst.msk [vmem:[#allocation2 + $0x99] sm:$0xff] %vm336_vm1, %v758_v16  ;;  %v654_v19 = vadd.f32 %v15565_v18, %v17944_v33  ;;  %v648_v20 = vpop.f32.mrb[13].mxu0  ;;  %v18018_v21 = vld [vmem:[#allocation2 + $0x60] sm:$0xff]  ;;  %v18022_v23 = vld [vmem:[#allocation2 + $0x68] sm:$0xff] }
 0x105   : > { %v18020_v22 = vld [vmem:[#allocation2 + $0x61] sm:$0xff]  ;;  %790 = vst.msk [vmem:[#allocation2 + $0x91] sm:$0xff] %vm336_vm1, %v757_v17  ;;  %v649_v24 = vadd.f32 %v17944_v33, %v648_v20  ;;  %15621 = vmatprep.mubr.msk.f32.mxu1 %vm336_vm1, %v18018_v21 }
 0x106   : > { %15685 = vmatprep.mubr.msk.f32.mxu0 %vm336_vm1, %v18020_v22  ;;  %v760_v26 = vmax.f32 %v654_v19, 0.0  ;;  %15622 = vmatmul.mubr.msk.f32.gmra.mrb[8].mxu1 %vm336_vm1, %v18022_v23 }
 0x107   : > { %15686 = vmatmul.mubr.msk.f32.gmra.mrb[40].mxu0 %vm336_vm1, %v18030_v25  ;;  %v759_v27 = vmax.f32 %v649_v24, 0.0  ;;  %v15568_v28 = vpop.f32.mrb[14].mxu0  ;;  %v18050_v38 = vld [vmem:[#allocation2 + $0x81] sm:$0xff] }
 0x108   : > { %793 = vst.msk [vmem:[#allocation2 + $0xb1] sm:$0xff] %vm336_vm1, %v760_v26  ;;  %v664_v30 = vadd.f32 %v15568_v28, %v17944_v33  ;;  %v658_v31 = vpop.f32.mrb[15].mxu0  ;;  %v18038_v34 = vld [vmem:[#allocation2 + $0x78] sm:$0xff]  ;;  %v18042_v36 = vld [vmem:[#allocation2 + $0x80] sm:$0xff] }
 0x109   : > { %v18040_v35 = vld [vmem:[#allocation2 + $0x79] sm:$0xff]  ;;  %792 = vst.msk [vmem:[#allocation2 + $0xa9] sm:$0xff] %vm336_vm1, %v759_v27  ;;  %v659_v37 = vadd.f32 %v17944_v33, %v658_v31  ;;  %15624 = vmatprep.mubr.msk.f32.mxu1 %vm336_vm1, %v18038_v34 }
 0x10a   : > { %15688 = vmatprep.mubr.msk.f32.mxu0 %vm336_vm1, %v18040_v35  ;;  %v762_v39 = vmax.f32 %v664_v30, 0.0  ;;  %15625 = vmatmul.mubr.msk.f32.gmra.mrb[10].mxu1 %vm336_vm1, %v18042_v36 }
 0x10b   : > { %15689 = vmatmul.mubr.msk.f32.gmra.mrb[42].mxu0 %vm336_vm1, %v18050_v38  ;;  %v761_v40 = vmax.f32 %v659_v37, 0.0  ;;  %v15571_v41 = vpop.f32.mrb[16].mxu0  ;;  %v18070_v48 = vld [vmem:[#allocation2 + $0x99] sm:$0xff] }
 0x10c   : > { %795 = vst.msk [vmem:[#allocation2 + $0xc9] sm:$0xff] %vm336_vm1, %v762_v39  ;;  %v674_v42 = vadd.f32 %v15571_v41, %v17944_v33  ;;  %v668_v43 = vpop.f32.mrb[17].mxu0  ;;  %v18058_v44 = vld [vmem:[#allocation2 + $0x90] sm:$0xff]  ;;  %v18062_v46 = vld [vmem:[#allocation2 + $0x98] sm:$0xff] }
 0x10d   : > { %v18060_v45 = vld [vmem:[#allocation2 + $0x91] sm:$0xff]  ;;  %794 = vst.msk [vmem:[#allocation2 + $0xc1] sm:$0xff] %vm336_vm1, %v761_v40  ;;  %v669_v47 = vadd.f32 %v17944_v33, %v668_v43  ;;  %15627 = vmatprep.mubr.msk.f32.mxu1 %vm336_vm1, %v18058_v44 }
 0x10e   : > { %15691 = vmatprep.mubr.msk.f32.mxu0 %vm336_vm1, %v18060_v45  ;;  %v764_v49 = vmax.f32 %v674_v42, 0.0  ;;  %15628 = vmatmul.mubr.msk.f32.gmra.mrb[12].mxu1 %vm336_vm1, %v18062_v46 }
 0x10f   : > { %15692 = vmatmul.mubr.msk.f32.gmra.mrb[44].mxu0 %vm336_vm1, %v18070_v48  ;;  %v763_v50 = vmax.f32 %v669_v47, 0.0  ;;  %v15574_v51 = vpop.f32.mrb[18].mxu0  ;;  %v18090_v62 = vld [vmem:[#allocation2 + $0xb1] sm:$0xff] }
 0x110   : > { %797 = vst.msk [vmem:[#allocation2 + $0xe1] sm:$0xff] %vm336_vm1, %v764_v49  ;;  %v684_v52 = vadd.f32 %v15574_v51, %v17944_v33  ;;  %v678_v53 = vpop.f32.mrb[19].mxu0  ;;  %v18078_v54 = vld [vmem:[#allocation2 + $0xa8] sm:$0xff]  ;;  %v18082_v60 = vld [vmem:[#allocation2 + $0xb0] sm:$0xff] }
 0x111   : > { %v18080_v58 = vld [vmem:[#allocation2 + $0xa9] sm:$0xff]  ;;  %796 = vst.msk [vmem:[#allocation2 + $0xd9] sm:$0xff] %vm336_vm1, %v763_v50  ;;  %v679_v61 = vadd.f32 %v17944_v33, %v678_v53  ;;  %15630 = vmatprep.mubr.msk.f32.mxu1 %vm336_vm1, %v18078_v54 }
 0x112   : > { %15694 = vmatprep.mubr.msk.f32.mxu0 %vm336_vm1, %v18080_v58  ;;  %v766_v63 = vmax.f32 %v684_v52, 0.0  ;;  %15631 = vmatmul.mubr.msk.f32.gmra.mrb[14].mxu1 %vm336_vm1, %v18082_v60 }
 0x113   : > { %15695 = vmatmul.mubr.msk.f32.gmra.mrb[46].mxu0 %vm336_vm1, %v18090_v62  ;;  %v765_v0 = vmax.f32 %v679_v61, 0.0  ;;  %v15577_v4 = vpop.f32.mrb[20].mxu0  ;;  %v18110_v16 = vld [vmem:[#allocation2 + $0xc9] sm:$0xff] }
 0x114   : > { %799 = vst.msk [vmem:[#allocation2 + $0xf9] sm:$0xff] %vm336_vm1, %v766_v63  ;;  %v694_v6 = vadd.f32 %v15577_v4, %v17944_v33  ;;  %v688_v7 = vpop.f32.mrb[21].mxu0  ;;  %v18098_v8 = vld [vmem:[#allocation2 + $0xc0] sm:$0xff]  ;;  %v18102_v10 = vld [vmem:[#allocation2 + $0xc8] sm:$0xff] }
 0x115   : > { %v18100_v9 = vld [vmem:[#allocation2 + $0xc1] sm:$0xff]  ;;  %798 = vst.msk [vmem:[#allocation2 + $0xf1] sm:$0xff] %vm336_vm1, %v765_v0  ;;  %v689_v14 = vadd.f32 %v17944_v33, %v688_v7  ;;  %15633 = vmatprep.mubr.msk.f32.mxu1 %vm336_vm1, %v18098_v8 }
 0x116   : > { %15697 = vmatprep.mubr.msk.f32.mxu0 %vm336_vm1, %v18100_v9  ;;  %v768_v17 = vmax.f32 %v694_v6, 0.0  ;;  %15634 = vmatmul.mubr.msk.f32.gmra.mrb[16].mxu1 %vm336_vm1, %v18102_v10 }
 0x117   : > { %15698 = vmatmul.mubr.msk.f32.gmra.mrb[48].mxu0 %vm336_vm1, %v18110_v16  ;;  %v767_v18 = vmax.f32 %v689_v14, 0.0  ;;  %v15580_v19 = vpop.f32.mrb[22].mxu0  ;;  %v18130_v31 = vld [vmem:[#allocation2 + $0xe1] sm:$0xff] }
 0x118   : > { %801 = vst.msk [vmem:[#allocation2 + $0x111] sm:$0xff] %vm336_vm1, %v768_v17  ;;  %v704_v20 = vadd.f32 %v15580_v19, %v17944_v33  ;;  %v698_v24 = vpop.f32.mrb[23].mxu0  ;;  %v18118_v26 = vld [vmem:[#allocation2 + $0xd8] sm:$0xff]  ;;  %v18122_v28 = vld [vmem:[#allocation2 + $0xe0] sm:$0xff] }
 0x119   : > { %v18120_v27 = vld [vmem:[#allocation2 + $0xd9] sm:$0xff]  ;;  %800 = vst.msk [vmem:[#allocation2 + $0x109] sm:$0xff] %vm336_vm1, %v767_v18  ;;  %v699_v30 = vadd.f32 %v17944_v33, %v698_v24  ;;  %15636 = vmatprep.mubr.msk.f32.mxu1 %vm336_vm1, %v18118_v26 }
 0x11a   : > { %15700 = vmatprep.mubr.msk.f32.mxu0 %vm336_vm1, %v18120_v27  ;;  %v770_v37 = vmax.f32 %v704_v20, 0.0  ;;  %15637 = vmatmul.mubr.msk.f32.gmra.mrb[18].mxu1 %vm336_vm1, %v18122_v28 }
 0x11b   : > { %15701 = vmatmul.mubr.msk.f32.gmra.mrb[50].mxu0 %vm336_vm1, %v18130_v31  ;;  %v769_v39 = vmax.f32 %v699_v30, 0.0  ;;  %v15583_v40 = vpop.f32.mrb[24].mxu0  ;;  %v18150_v51 = vld [vmem:[#allocation2 + $0xf9] sm:$0xff] }
 0x11c   : > { %803 = vst.msk [vmem:[#allocation2 + $0x129] sm:$0xff] %vm336_vm1, %v770_v37  ;;  %v714_v41 = vadd.f32 %v15583_v40, %v17944_v33  ;;  %v708_v42 = vpop.f32.mrb[25].mxu0  ;;  %v18138_v43 = vld [vmem:[#allocation2 + $0xf0] sm:$0xff]  ;;  %v18142_v49 = vld [vmem:[#allocation2 + $0xf8] sm:$0xff] }
 0x11d   : > { %v18140_v47 = vld [vmem:[#allocation2 + $0xf1] sm:$0xff]  ;;  %802 = vst.msk [vmem:[#allocation2 + $0x121] sm:$0xff] %vm336_vm1, %v769_v39  ;;  %v709_v50 = vadd.f32 %v17944_v33, %v708_v42  ;;  %15639 = vmatprep.mubr.msk.f32.mxu1 %vm336_vm1, %v18138_v43 }
 0x11e   : > { %15703 = vmatprep.mubr.msk.f32.mxu0 %vm336_vm1, %v18140_v47  ;;  %v772_v52 = vmax.f32 %v714_v41, 0.0  ;;  %15640 = vmatmul.mubr.msk.f32.gmra.mrb[20].mxu1 %vm336_vm1, %v18142_v49 }
 0x11f   : > { %15704 = vmatmul.mubr.msk.f32.gmra.mrb[52].mxu0 %vm336_vm1, %v18150_v51  ;;  %v771_v53 = vmax.f32 %v709_v50, 0.0  ;;  %v15586_v61 = vpop.f32.mrb[26].mxu0  ;;  %v18170_v17 = vld [vmem:[#allocation2 + $0x111] sm:$0xff] }
 0x120   : > { %805 = vst.msk [vmem:[#allocation2 + $0x141] sm:$0xff] %vm336_vm1, %v772_v52  ;;  %v724_v63 = vadd.f32 %v15586_v61, %v17944_v33  ;;  %v718_v0 = vpop.f32.mrb[27].mxu0  ;;  %v18158_v4 = vld [vmem:[#allocation2 + $0x108] sm:$0xff]  ;;  %v18162_v7 = vld [vmem:[#allocation2 + $0x110] sm:$0xff] }
 0x121   : > { %v18160_v6 = vld [vmem:[#allocation2 + $0x109] sm:$0xff]  ;;  %804 = vst.msk [vmem:[#allocation2 + $0x139] sm:$0xff] %vm336_vm1, %v771_v53  ;;  %v719_v14 = vadd.f32 %v17944_v33, %v718_v0  ;;  %15642 = vmatprep.mubr.msk.f32.mxu1 %vm336_vm1, %v18158_v4 }
 0x122   : > { %15706 = vmatprep.mubr.msk.f32.mxu0 %vm336_vm1, %v18160_v6  ;;  %v774_v18 = vmax.f32 %v724_v63, 0.0  ;;  %15643 = vmatmul.mubr.msk.f32.gmra.mrb[22].mxu1 %vm336_vm1, %v18162_v7 }
 0x123   : > { %15707 = vmatmul.mubr.msk.f32.gmra.mrb[54].mxu0 %vm336_vm1, %v18170_v17  ;;  %v773_v19 = vmax.f32 %v719_v14, 0.0  ;;  %v15589_v20 = vpop.f32.mrb[28].mxu0  ;;  %v18190_v42 = vld [vmem:[#allocation2 + $0x129] sm:$0xff] }
 0x124   : > { %807 = vst.msk [vmem:[#allocation2 + $0x159] sm:$0xff] %vm336_vm1, %v774_v18  ;;  %v734_v24 = vadd.f32 %v15589_v20, %v17944_v33  ;;  %v728_v30 = vpop.f32.mrb[29].mxu0  ;;  %v18178_v37 = vld [vmem:[#allocation2 + $0x120] sm:$0xff]  ;;  %v18182_v40 = vld [vmem:[#allocation2 + $0x128] sm:$0xff]  ;;  %21714 = vst [vmem:[#allocation4_spill] sm:$0xff] %v18190_v42 }
 0x125   : > { %v18180_v39 = vld [vmem:[#allocation2 + $0x121] sm:$0xff]  ;;  %806 = vst.msk [vmem:[#allocation2 + $0x151] sm:$0xff] %vm336_vm1, %v773_v19  ;;  %v729_v41 = vadd.f32 %v17944_v33, %v728_v30  ;;  %15645 = vmatprep.mubr.msk.f32.mxu1 %vm336_vm1, %v18178_v37 }
 0x126   : > { %15709 = vmatprep.mubr.msk.f32.mxu0 %vm336_vm1, %v18180_v39  ;;  %v776_v50 = vmax.f32 %v734_v24, 0.0  ;;  %15646 = vmatmul.mubr.msk.f32.gmra.mrb[24].mxu1 %vm336_vm1, %v18182_v40 }
 0x127   : > { %15710 = vmatmul.mubr.msk.f32.gmra.mrb[56].mxu0 %vm336_vm1, %v18190_v42  ;;  %v775_v52 = vmax.f32 %v729_v41, 0.0  ;;  %v15592_v53 = vpop.f32.mrb[30].mxu0  ;;  %v18209_v19 = vld [vmem:[#allocation2 + $0x141] sm:$0xff]  ;;  %v3207_v42 = vld [vmem:[%s21681_s3 + $0x178] sm:$0xff] }
 0x128   : > { %809 = vst.msk [vmem:[#allocation2 + $0x171] sm:$0xff] %vm336_vm1, %v776_v50  ;;  %v18197_v61 = vld [vmem:[#allocation2 + $0x138] sm:$0xff]  ;;  %v18201_v0 = vld [vmem:[#allocation2 + $0x140] sm:$0xff]  ;;  %v744_v14 = vadd.f32 %v15592_v53, %v17944_v33  ;;  %v738_v18 = vpop.f32.mrb[31].mxu0  ;;  %21716 = vst [vmem:[#allocation6_spill] sm:$0xff] %v18209_v19 }
 0x129   : > { %v18199_v63 = vld [vmem:[#allocation2 + $0x139] sm:$0xff]  ;;  %808 = vst.msk [vmem:[#allocation2 + $0x169] sm:$0xff] %vm336_vm1, %v775_v52  ;;  %15648 = vmatprep.mubr.msk.f32.mxu1 %vm336_vm1, %v18197_v61  ;;  %v739_v20 = vadd.f32 %v17944_v33, %v738_v18  ;;  %v1765_v53 = vld [vmem:[#allocation2 + $0x2] sm:$0xff] }
 0x12a   : > { %21715 = vst [vmem:[#allocation5_spill] sm:$0xff] %v18199_v63  ;;  %15712 = vmatprep.mubr.msk.f32.mxu0 %vm336_vm1, %v18199_v63  ;;  %15649 = vmatmul.mubr.msk.f32.gmra.mrb[26].mxu1 %vm336_vm1, %v18201_v0  ;;  %v778_v24 = vmax.f32 %v744_v14, 0.0  ;;  %v3203_v63 = vld [vmem:[%s21681_s3 + $0x158] sm:$0xff] }
 0x12b   : > { %15713 = vmatmul.mubr.msk.f32.gmra.mrb[58].mxu0 %vm336_vm1, %v18209_v19  ;;  %v777_v30 = vmax.f32 %v739_v20, 0.0  ;;  %v18227_v33 = vld [vmem:[#allocation2 + $0x159] sm:$0xff]  ;;  %v3202_v19 = vld [vmem:[%s21681_s3 + $0x150] sm:$0xff] }
 0x12c   : > { %v18216_v41 = vld [vmem:[#allocation2 + $0x150] sm:$0xff]  ;;  %v18220_v52 = vld [vmem:[#allocation2 + $0x158] sm:$0xff]  ;;  %811 = vst.msk [vmem:[#allocation2 + $0x189] sm:$0xff] %vm336_vm1, %v778_v24  ;;  %21718 = vst [vmem:[#allocation8_spill] sm:$0xff] %v18227_v33 }
 0x12d   : > { %v18218_v50 = vld [vmem:[#allocation2 + $0x151] sm:$0xff]  ;;  %15651 = vmatprep.mubr.msk.f32.mxu1 %vm336_vm1, %v18216_v41  ;;  %810 = vst.msk [vmem:[#allocation2 + $0x181] sm:$0xff] %vm336_vm1, %v777_v30 }
 0x12e   : > { %21717 = vst [vmem:[#allocation7_spill] sm:$0xff] %v18218_v50  ;;  %15715 = vmatprep.mubr.msk.f32.mxu0 %vm336_vm1, %v18218_v50  ;;  %15652 = vmatmul.mubr.msk.f32.gmra.mrb[28].mxu1 %vm336_vm1, %v18220_v52  ;;  %v2745_v30 = vld [vmem:[%s21681_s3 + $0x110] sm:$0xff] }
 0x12f   : > { %15716 = vmatmul.mubr.msk.f32.gmra.mrb[60].mxu0 %vm336_vm1, %v18227_v33  ;;  %v18244_v24 = vld [vmem:[#allocation2 + $0x171] sm:$0xff] }
 0x130   : > { %v18234_v14 = vld [vmem:[#allocation2 + $0x168] sm:$0xff]  ;;  %v18238_v20 = vld [vmem:[#allocation2 + $0x170] sm:$0xff]  ;;  %21720 = vst [vmem:[#allocation10_spill] sm:$0xff] %v18244_v24  ;;  %v2746_v33 = vld [vmem:[%s21681_s3 + $0x118] sm:$0xff] }
 0x131   : > { %v18236_v18 = vld [vmem:[#allocation2 + $0x169] sm:$0xff]  ;;  %15654 = vmatprep.mubr.msk.f32.mxu1 %vm336_vm1, %v18234_v14  ;;  %v17325_v50 = vpack.c.bf16 %v2746_v33, %v2745_v30  ;;  %v3204_v30 = vld [vmem:[%s21681_s3 + $0x160] sm:$0xff] }
 0x132   : > { %21719 = vst [vmem:[#allocation9_spill] sm:$0xff] %v18236_v18  ;;  %15718 = vmatprep.mubr.msk.f32.mxu0 %vm336_vm1, %v18236_v18  ;;  %15655 = vmatmul.mubr.msk.f32.gmra.mrb[30].mxu1 %vm336_vm1, %v18238_v20  ;;  %v1766_v18 = vld [vmem:[#allocation2 + $0xa] sm:$0xff] }
 0x133   : > { %15719 = vmatmul.mubr.msk.f32.gmra.mrb[62].mxu0 %vm336_vm1, %v18244_v24  ;;  %15737 = vmatprep.mubr.msk.f32.mxu1 %vm336_vm1, %v1765_v53  ;;  %v18268_v24 = vld [vmem:[#allocation2 + $0x1a] sm:$0xff]  ;;  %v2748_v33 = vld [vmem:[%s21681_s3 + $0x128] sm:$0xff] }
 0x134   : > { %15801 = vmatprep.mubr.msk.f32.mxu0 %vm336_vm1, %v17958_v55  ;;  %v2747_v55 = vld [vmem:[%s21681_s3 + $0x120] sm:$0xff] }
 0x135   : > { %v18281_v53 = vld [vmem:[#allocation2 + $0x22] sm:$0xff] }
 0x136   : > { %15738 = vmatmul.mubr.msk.f32.vlgmr.msra.gmra.mrb[32].mxu1 %vm336_vm1, %v1766_v18  ;;  %v17329_v18 = vpack.c.bf16 %v2748_v33, %v2747_v55  ;;  %v3206_v33 = vld [vmem:[%s21681_s3 + $0x170] sm:$0xff] }
 0x137   : > { %15802 = vmatmul.mubr.msk.f32.vlgmr.msra.gmra.mrb[64].mxu0 %vm336_vm1, %v17962_v57  ;;  %17324 = vmatpush3.bf16.msra.mxu1 %v17929_v29  ;;  %v17341_v57 = vpack.c.bf16 %v3203_v63, %v3202_v19  ;;  %v3205_v29 = vld [vmem:[%s21681_s3 + $0x168] sm:$0xff]  ;;  %v2750_v63 = vld [vmem:[%s21681_s3 + $0x138] sm:$0xff] }
 0x138   : > { %15740 = vmatprep.mubr.msk.f32.mxu1 %vm336_vm1, %v18268_v24  ;;  %15804 = vmatprep.mubr.msk.f32.mxu0 %vm336_vm1, %v17978_v1  ;;  %v18294_v1 = vld [vmem:[#allocation2 + $0x32] sm:$0xff]  ;;  %v17345_v19 = vpack.c.bf16 %v3205_v29, %v3204_v30  ;;  %v17349_v30 = vpack.c.bf16 %v3207_v42, %v3206_v33 }
 0x139   : > { %17326 = vmatprep.subr.bf16.mxu1 %v17325_v50  ;;  %17340 = vmatpush3.bf16.msra.mxu0 %v17938_v32  ;;  %v2749_v32 = vld [vmem:[%s21681_s3 + $0x130] sm:$0xff] }
 0x13a   : > { %15741 = vmatmul.mubr.msk.f32.gmra.mrb[34].mxu1 %vm336_vm1, %v18281_v53  ;;  %17342 = vmatprep.subr.bf16.mxu0 %v17341_v57  ;;  %v17333_v55 = vpack.c.bf16 %v2750_v63, %v2749_v32  ;;  %v4115_v32 = vld [vmem:[%s21681_s3 + $0x1c0] sm:$0xff]  ;;  %v4116_v63 = vld [vmem:[%s21681_s3 + $0x1c8] sm:$0xff] }
 0x13b   : > { %15805 = vmatmul.mubr.msk.f32.gmra.mrb[66].mxu0 %vm336_vm1, %v17982_v3  ;;  %15743 = vmatprep.mubr.msk.f32.mxu1 %vm336_vm1, %v18294_v1  ;;  %v18306_v3 = vld [vmem:[#allocation2 + $0x3a] sm:$0xff]  ;;  %v18350_v42 = vpack.c.bf16 %v4116_v63, %v4115_v32 }
 0x13c   : > { %15807 = vmatprep.mubr.msk.f32.mxu0 %vm336_vm1, %v17998_v11  ;;  %17328 = vmatpush3.bf16.msra.mxu1 %v17325_v50  ;;  %v18318_v11 = vld [vmem:[#allocation2 + $0x4a] sm:$0xff]  ;;  %v3658_v50 = vld [vmem:[%s21681_s3 + $0x180] sm:$0xff] }
 0x13d   : > { %17330 = vmatprep.subr.bf16.mxu1 %v17329_v18  ;;  %17344 = vmatpush3.bf16.msra.mxu0 %v17341_v57  ;;  %v3659_v57 = vld [vmem:[%s21681_s3 + $0x188] sm:$0xff]  ;;  %v18413_v32 = vld [vmem:[#allocation2 + $0x9a] sm:$0xff] }
 0x13e   : > { %15744 = vmatmul.mubr.msk.f32.gmra.mrb[36].mxu1 %vm336_vm1, %v18306_v3  ;;  %17346 = vmatprep.subr.bf16.mxu0 %v17345_v19  ;;  %v18332_v29 = vpack.c.bf16 %v3659_v57, %v3658_v50  ;;  %v15675_v50 = vpop.f32.mrb[32].mxu0 }
 0x13f   : > { %15808 = vmatmul.mubr.msk.f32.gmra.mrb[68].mxu0 %vm336_vm1, %v18002_v13  ;;  %15746 = vmatprep.mubr.msk.f32.mxu1 %vm336_vm1, %v18318_v11  ;;  %v18330_v13 = vld [vmem:[#allocation2 + $0x52] sm:$0xff] }
 0x140   : > { %15810 = vmatprep.mubr.msk.f32.mxu0 %vm336_vm1, %v18018_v21  ;;  %17332 = vmatpush3.bf16.msra.mxu1 %v17329_v18  ;;  %v18344_v21 = vld [vmem:[#allocation2 + $0x62] sm:$0xff]  ;;  %v13588_v18 = vld [vmem:[%s21682_s4] ss:$0 sm:$0xff] }
 0x141   : > { %17334 = vmatprep.subr.bf16.mxu1 %v17333_v55  ;;  %17348 = vmatpush3.bf16.msra.mxu0 %v17345_v19  ;;  %v18355_v19 = vld [vmem:[#allocation2 + $0x6a] sm:$0xff]  ;;  %820 = vst.msk [vmem:[#allocation3 + $0x8] sm:$0xff] %vm336_vm1, %v13588_v18  ;;  %819 = vst.msk [vmem:[#allocation3] sm:$0xff] %vm336_vm1, %v13588_v18 }
 0x142   : > { %15747 = vmatmul.mubr.msk.f32.gmra.mrb[38].mxu1 %vm336_vm1, %v18330_v13  ;;  %17350 = vmatprep.subr.bf16.mxu0 %v17349_v30  ;;  %821 = vst.msk [vmem:[#allocation3 + $0x10] sm:$0xff] %vm336_vm1, %v13588_v18  ;;  %822 = vst.msk [vmem:[#allocation3 + $0x18] sm:$0xff] %vm336_vm1, %v13588_v18 }
 0x143   : > { %15811 = vmatmul.mubr.msk.f32.gmra.mrb[70].mxu0 %vm336_vm1, %v18022_v23  ;;  %15749 = vmatprep.mubr.msk.f32.mxu1 %vm336_vm1, %v18344_v21  ;;  %823 = vst.msk [vmem:[#allocation3 + $0x20] sm:$0xff] %vm336_vm1, %v13588_v18  ;;  %824 = vst.msk [vmem:[#allocation3 + $0x28] sm:$0xff] %vm336_vm1, %v13588_v18  ;;  %v18394_v23 = vld [vmem:[#allocation2 + $0x7a] sm:$0xff] }
 0x144   : > { %15813 = vmatprep.mubr.msk.f32.mxu0 %vm336_vm1, %v18038_v34  ;;  %17336 = vmatpush3.bf16.msra.mxu1 %v17333_v55  ;;  %825 = vst.msk [vmem:[#allocation3 + $0x30] sm:$0xff] %vm336_vm1, %v13588_v18  ;;  %826 = vst.msk [vmem:[#allocation3 + $0x38] sm:$0xff] %vm336_vm1, %v13588_v18  ;;  %v15611_v34 = vpop.f32.mrb[0].mxu1  ;;  %v18401_v55 = vld [vmem:[#allocation2 + $0x82] sm:$0xff] }
 0x145   : > { %17352 = vmatpush3.bf16.msra.mxu0 %v17349_v30  ;;  %17354 = vmatprep.subr.bf16.mxu1 %v18332_v29  ;;  %827 = vst.msk [vmem:[#allocation3 + $0x40] sm:$0xff] %vm336_vm1, %v13588_v18  ;;  %828 = vst.msk [vmem:[#allocation3 + $0x48] sm:$0xff] %vm336_vm1, %v13588_v18  ;;  %v1085_v33 = vpop.f32.mrb[1].mxu1 }
 0x146   : > { %829 = vst.msk [vmem:[#allocation3 + $0x50] sm:$0xff] %vm336_vm1, %v13588_v18  ;;  %830 = vst.msk [vmem:[#allocation3 + $0x58] sm:$0xff] %vm336_vm1, %v13588_v18  ;;  %15750 = vmatmul.mubr.msk.f32.gmra.mrb[40].mxu1 %vm336_vm1, %v18355_v19  ;;  %17370 = vmatprep.subr.bf16.mxu0 %v18350_v42 }
 0x147   : > { %831 = vst.msk [vmem:[#allocation3 + $0x60] sm:$0xff] %vm336_vm1, %v13588_v18  ;;  %832 = vst.msk [vmem:[#allocation3 + $0x68] sm:$0xff] %vm336_vm1, %v13588_v18  ;;  %15814 = vmatmul.mubr.msk.f32.gmra.mrb[72].mxu0 %vm336_vm1, %v18042_v36  ;;  %15752 = vmatprep.mubr.msk.f32.mxu1 %vm336_vm1, %v18394_v23  ;;  %v18407_v36 = vld [vmem:[#allocation2 + $0x92] sm:$0xff] }
 0x148   : > { %833 = vst.msk [vmem:[#allocation3 + $0x70] sm:$0xff] %vm336_vm1, %v13588_v18  ;;  %834 = vst.msk [vmem:[#allocation3 + $0x78] sm:$0xff] %vm336_vm1, %v13588_v18  ;;  %15816 = vmatprep.mubr.msk.f32.mxu0 %vm336_vm1, %v18058_v44  ;;  %v1542_v44 = vpop.f32.mrb[33].mxu0  ;;  %v884_v57 = vld [vmem:[#allocation3 + $0x8] sm:$0xff]  ;;  %v883_v30 = vld [vmem:[#allocation3] sm:$0xff] }
 0x149   : > { %835 = vst.msk [vmem:[#allocation3 + $0x80] sm:$0xff] %vm336_vm1, %v13588_v18  ;;  %836 = vst.msk [vmem:[#allocation3 + $0x88] sm:$0xff] %vm336_vm1, %v13588_v18  ;;  %v1245_v63 = vadd.f32 %v15611_v34, %v884_v57  ;;  %v18445_v34 = vld [vmem:[#allocation2 + $0xda] sm:$0xff] }
 0x14a   : > { %837 = vst.msk [vmem:[#allocation3 + $0x90] sm:$0xff] %vm336_vm1, %v13588_v18  ;;  %838 = vst.msk [vmem:[#allocation3 + $0x98] sm:$0xff] %vm336_vm1, %v13588_v18  ;;  %15753 = vmatmul.mubr.msk.f32.gmra.mrb[42].mxu1 %vm336_vm1, %v18401_v55 }
 0x14b   : > { %839 = vst.msk [vmem:[#allocation3 + $0xa0] sm:$0xff] %vm336_vm1, %v13588_v18  ;;  %840 = vst.msk [vmem:[#allocation3 + $0xa8] sm:$0xff] %vm336_vm1, %v13588_v18  ;;  %15817 = vmatmul.mubr.msk.f32.gmra.mrb[74].mxu0 %vm336_vm1, %v18062_v46  ;;  %15755 = vmatprep.mubr.msk.f32.mxu1 %vm336_vm1, %v18407_v36  ;;  %v18419_v46 = vld [vmem:[#allocation2 + $0xaa] sm:$0xff] }
 0x14c   : > { %841 = vst.msk [vmem:[#allocation3 + $0xb0] sm:$0xff] %vm336_vm1, %v13588_v18  ;;  %842 = vst.msk [vmem:[#allocation3 + $0xb8] sm:$0xff] %vm336_vm1, %v13588_v18  ;;  %15819 = vmatprep.mubr.msk.f32.mxu0 %vm336_vm1, %v18078_v54  ;;  %v18427_v54 = vld [vmem:[#allocation2 + $0xb2] sm:$0xff] }
 0x14d   : > { %843 = vst.msk [vmem:[#allocation3 + $0xc0] sm:$0xff] %vm336_vm1, %v13588_v18  ;;  %844 = vst.msk [vmem:[#allocation3 + $0xc8] sm:$0xff] %vm336_vm1, %v13588_v18 }
 0x14e   : > { %845 = vst.msk [vmem:[#allocation3 + $0xd0] sm:$0xff] %vm336_vm1, %v13588_v18  ;;  %846 = vst.msk [vmem:[#allocation3 + $0xd8] sm:$0xff] %vm336_vm1, %v13588_v18  ;;  %15756 = vmatmul.mubr.msk.f32.gmra.mrb[44].mxu1 %vm336_vm1, %v18413_v32 }
 0x14f   : > { %847 = vst.msk [vmem:[#allocation3 + $0xe0] sm:$0xff] %vm336_vm1, %v13588_v18  ;;  %848 = vst.msk [vmem:[#allocation3 + $0xe8] sm:$0xff] %vm336_vm1, %v13588_v18  ;;  %15820 = vmatmul.mubr.msk.f32.gmra.mrb[76].mxu0 %vm336_vm1, %v18082_v60  ;;  %15758 = vmatprep.mubr.msk.f32.mxu1 %vm336_vm1, %v18419_v46  ;;  %v18433_v60 = vld [vmem:[#allocation2 + $0xc2] sm:$0xff] }
 0x150   : > { %849 = vst.msk [vmem:[#allocation3 + $0xf0] sm:$0xff] %vm336_vm1, %v13588_v18  ;;  %850 = vst.msk [vmem:[#allocation3 + $0xf8] sm:$0xff] %vm336_vm1, %v13588_v18  ;;  %v1244_v18 = vadd.f32 %v1085_v33, %v883_v30  ;;  %15822 = vmatprep.mubr.msk.f32.mxu0 %vm336_vm1, %v18098_v8  ;;  %v18439_v8 = vld [vmem:[#allocation2 + $0xca] sm:$0xff]  ;;  %v18451_v30 = vld [vmem:[#allocation2 + $0xe2] sm:$0xff] }
 0x151   : > { %1277 = vst.msk [vmem:[#allocation3 + $0x8] sm:$0xff] %vm336_vm1, %v1245_v63  ;;  %v3660_v63 = vld [vmem:[%s21681_s3 + $0x190] sm:$0xff] }
 0x152   : > { %1276 = vst.msk [vmem:[#allocation3] sm:$0xff] %vm336_vm1, %v1244_v18  ;;  %15759 = vmatmul.mubr.msk.f32.gmra.mrb[46].mxu1 %vm336_vm1, %v18427_v54 }
 0x153   : > { %15823 = vmatmul.mubr.msk.f32.gmra.mrb[78].mxu0 %vm336_vm1, %v18102_v10  ;;  %15761 = vmatprep.mubr.msk.f32.mxu1 %vm336_vm1, %v18433_v60 }
 0x154   : > { %15825 = vmatprep.mubr.msk.f32.mxu0 %vm336_vm1, %v18118_v26 }
 0x156   : > { %15762 = vmatmul.mubr.msk.f32.gmra.mrb[48].mxu1 %vm336_vm1, %v18439_v8 }
 0x157   : > { %15826 = vmatmul.mubr.msk.f32.gmra.mrb[80].mxu0 %vm336_vm1, %v18122_v28  ;;  %15764 = vmatprep.mubr.msk.f32.mxu1 %vm336_vm1, %v18445_v34  ;;  %v18459_v28 = vld [vmem:[#allocation2 + $0xf2] sm:$0xff] }
 0x158   : > { %v1341_v33 = vld [vmem:[#allocation3 + $0x8] sm:$0xff]  ;;  %15828 = vmatprep.mubr.msk.f32.mxu0 %vm336_vm1, %v18138_v43 }
 0x159   : > { %v1340_v10 = vld [vmem:[#allocation3] sm:$0xff]  ;;  %v1702_v57 = vadd.f32 %v15675_v50, %v1341_v33  ;;  %v18465_v43 = vld [vmem:[#allocation2 + $0xfa] sm:$0xff] }
 0x15a   : > { %v1701_v26 = vadd.f32 %v1542_v44, %v1340_v10  ;;  %15765 = vmatmul.mubr.msk.f32.gmra.mrb[50].mxu1 %vm336_vm1, %v18451_v30  ;;  %v18471_v50 = vld [vmem:[#allocation2 + $0x10a] sm:$0xff]  ;;  %v18515_v44 = vld [vmem:[#allocation2 + $0x15a] sm:$0xff] }
 0x15b   : > { %1734 = vst.msk [vmem:[#allocation3 + $0x8] sm:$0xff] %vm336_vm1, %v1702_v57  ;;  %15829 = vmatmul.mubr.msk.f32.gmra.mrb[82].mxu0 %vm336_vm1, %v18142_v49  ;;  %15767 = vmatprep.mubr.msk.f32.mxu1 %vm336_vm1, %v18459_v28  ;;  %v18477_v49 = vld [vmem:[#allocation2 + $0x112] sm:$0xff] }
 0x15c   : > { %1733 = vst.msk [vmem:[#allocation3] sm:$0xff] %vm336_vm1, %v1701_v26  ;;  %15831 = vmatprep.mubr.msk.f32.mxu0 %vm336_vm1, %v18158_v4  ;;  %v18483_v4 = vld [vmem:[#allocation2 + $0x122] sm:$0xff]  ;;  %v4117_v33 = vld [vmem:[%s21681_s3 + $0x1d0] sm:$0xff]  ;;  %v4118_v10 = vld [vmem:[%s21681_s3 + $0x1d8] sm:$0xff] }
 0x15d   : > { %v4120_v26 = vld [vmem:[%s21681_s3 + $0x1e8] sm:$0xff] }
 0x15e   : > { %15768 = vmatmul.mubr.msk.f32.gmra.mrb[52].mxu1 %vm336_vm1, %v18465_v43 }
 0x15f   : > { %15832 = vmatmul.mubr.msk.f32.gmra.mrb[84].mxu0 %vm336_vm1, %v18162_v7  ;;  %15770 = vmatprep.mubr.msk.f32.mxu1 %vm336_vm1, %v18471_v50  ;;  %v18489_v7 = vld [vmem:[#allocation2 + $0x12a] sm:$0xff] }
 0x160   : > { %15834 = vmatprep.mubr.msk.f32.mxu0 %vm336_vm1, %v18178_v37  ;;  %v18495_v37 = vld [vmem:[#allocation2 + $0x13a] sm:$0xff] }
 0x162   : > { %15771 = vmatmul.mubr.msk.f32.gmra.mrb[54].mxu1 %vm336_vm1, %v18477_v49 }
 0x163   : > { %15835 = vmatmul.mubr.msk.f32.gmra.mrb[86].mxu0 %vm336_vm1, %v18182_v40  ;;  %15773 = vmatprep.mubr.msk.f32.mxu1 %vm336_vm1, %v18483_v4  ;;  %v18501_v40 = vld [vmem:[#allocation2 + $0x142] sm:$0xff] }
 0x164   : > { %15837 = vmatprep.mubr.msk.f32.mxu0 %vm336_vm1, %v18197_v61  ;;  %v18507_v61 = vld [vmem:[#allocation2 + $0x152] sm:$0xff] }
 0x166   : > { %15774 = vmatmul.mubr.msk.f32.gmra.mrb[56].mxu1 %vm336_vm1, %v18489_v7 }
 0x167   : > { %15838 = vmatmul.mubr.msk.f32.gmra.mrb[88].mxu0 %vm336_vm1, %v18201_v0  ;;  %15776 = vmatprep.mubr.msk.f32.mxu1 %vm336_vm1, %v18495_v37  ;;  %v18513_v0 = vld [vmem:[#allocation2 + $0x180] sm:$0xff] }
 0x168   : > { %15840 = vmatprep.mubr.msk.f32.mxu0 %vm336_vm1, %v18216_v41  ;;  %v18521_v41 = vld [vmem:[#allocation2 + $0x16a] sm:$0xff] }
 0x16a   : > { %15777 = vmatmul.mubr.msk.f32.gmra.mrb[58].mxu1 %vm336_vm1, %v18501_v40 }
 0x16b   : > { %15841 = vmatmul.mubr.msk.f32.gmra.mrb[90].mxu0 %vm336_vm1, %v18220_v52  ;;  %15779 = vmatprep.mubr.msk.f32.mxu1 %vm336_vm1, %v18507_v61  ;;  %v18527_v52 = vld [vmem:[#allocation2 + $0x188] sm:$0xff] }
 0x16c   : > { %15843 = vmatprep.mubr.msk.f32.mxu0 %vm336_vm1, %v18234_v14  ;;  %v18529_v14 = vld [vmem:[#allocation2 + $0x172] sm:$0xff] }
 0x16e   : > { %15780 = vmatmul.mubr.msk.f32.gmra.mrb[60].mxu1 %vm336_vm1, %v18515_v44 }
 0x16f   : > { %15844 = vmatmul.mubr.msk.f32.gmra.mrb[92].mxu0 %vm336_vm1, %v18238_v20  ;;  %15782 = vmatprep.mubr.msk.f32.mxu1 %vm336_vm1, %v18521_v41  ;;  %v3661_v20 = vld [vmem:[%s21681_s3 + $0x198] sm:$0xff] }
 0x170   : > { %15846 = vmatprep.mubr.msk.f32.mxu0 %vm336_vm1, %v18513_v0  ;;  %v17357_v18 = vpack.c.bf16 %v3661_v20, %v3660_v63  ;;  %v4061_v63 = vld [vmem:[#allocation2 + $0xa9] sm:$0xff] }
 0x171   : > { %v3605_v20 = vld [vmem:[#allocation2 + $0xb0] sm:$0xff] }
 0x172   : > { %15783 = vmatmul.mubr.msk.f32.gmra.mrb[62].mxu1 %vm336_vm1, %v18529_v14 }
 0x173   : > { %15847 = vmatmul.mubr.msk.f32.gmra.mrb[94].mxu0 %vm336_vm1, %v18527_v52  ;;  %15865 = vmatprep.mubr.msk.f32.mxu1 %vm336_vm1, %v17960_v56  ;;  %v3662_v56 = vld [vmem:[%s21681_s3 + $0x1a0] sm:$0xff] }
 0x174   : > { %15929 = vmatprep.mubr.msk.f32.mxu0 %vm336_vm1, %v18268_v24  ;;  %v3663_v24 = vld [vmem:[%s21681_s3 + $0x1a8] sm:$0xff] }
 0x175   : > { %v17361_v57 = vpack.c.bf16 %v3663_v24, %v3662_v56  ;;  %v886_v56 = vld [vmem:[#allocation3 + $0x18] sm:$0xff]  ;;  %v885_v24 = vld [vmem:[#allocation3 + $0x10] sm:$0xff] }
 0x176   : > { %15866 = vmatmul.mubr.msk.f32.vlgmr.msra.gmra.mrb[64].mxu1 %vm336_vm1, %v17970_v59  ;;  %v17373_v59 = vpack.c.bf16 %v4118_v10, %v4117_v33  ;;  %v3606_v33 = vld [vmem:[#allocation2 + $0xc0] sm:$0xff] }
 0x177   : > { %15930 = vmatmul.mubr.msk.f32.vlgmr.msra.gmra.mrb[96].mxu0 %vm336_vm1, %v18281_v53  ;;  %17356 = vmatpush3.bf16.msra.mxu1 %v18332_v29  ;;  %v4119_v53 = vld [vmem:[%s21681_s3 + $0x1e0] sm:$0xff] }
 0x178   : > { %15868 = vmatprep.mubr.msk.f32.mxu1 %vm336_vm1, %v17980_v2  ;;  %15932 = vmatprep.mubr.msk.f32.mxu0 %vm336_vm1, %v18294_v1  ;;  %v3664_v2 = vld [vmem:[%s21681_s3 + $0x1b0] sm:$0xff]  ;;  %v3665_v1 = vld [vmem:[%s21681_s3 + $0x1b8] sm:$0xff]  ;;  %v4063_v10 = vld [vmem:[#allocation2 + $0xc1] sm:$0xff] }
 0x179   : > { %17358 = vmatprep.subr.bf16.mxu1 %v17357_v18  ;;  %17372 = vmatpush3.bf16.msra.mxu0 %v18350_v42  ;;  %v17365_v29 = vpack.c.bf16 %v3665_v1, %v3664_v2  ;;  %v4122_v42 = vld [vmem:[%s21681_s3 + $0x1f8] sm:$0xff] }
 0x17a   : > { %15869 = vmatmul.mubr.msk.f32.gmra.mrb[66].mxu1 %vm336_vm1, %v17990_v5  ;;  %17374 = vmatprep.subr.bf16.mxu0 %v17373_v59  ;;  %v17377_v5 = vpack.c.bf16 %v4120_v26, %v4119_v53  ;;  %v3607_v53 = vld [vmem:[#allocation2 + $0xc8] sm:$0xff] }
 0x17b   : > { %15933 = vmatmul.mubr.msk.f32.gmra.mrb[98].mxu0 %vm336_vm1, %v18306_v3  ;;  %15871 = vmatprep.mubr.msk.f32.mxu1 %vm336_vm1, %v18000_v12  ;;  %v4121_v3 = vld [vmem:[%s21681_s3 + $0x1f0] sm:$0xff]  ;;  %v4572_v12 = vld [vmem:[%s21681_s3 + $0x200] sm:$0xff] }
 0x17c   : > { %15935 = vmatprep.mubr.msk.f32.mxu0 %vm336_vm1, %v18318_v11  ;;  %17360 = vmatpush3.bf16.msra.mxu1 %v17357_v18  ;;  %v4573_v11 = vld [vmem:[%s21681_s3 + $0x208] sm:$0xff]  ;;  %v4062_v18 = vld [vmem:[#allocation2 + $0xb1] sm:$0xff] }
 0x17d   : > { %17362 = vmatprep.subr.bf16.mxu1 %v17361_v57  ;;  %17376 = vmatpush3.bf16.msra.mxu0 %v17373_v59  ;;  %v4064_v26 = vld [vmem:[#allocation2 + $0xc9] sm:$0xff] }
 0x17e   : > { %15872 = vmatmul.mubr.msk.f32.gmra.mrb[68].mxu1 %vm336_vm1, %v18010_v15  ;;  %17378 = vmatprep.subr.bf16.mxu0 %v17377_v5  ;;  %v17381_v15 = vpack.c.bf16 %v4122_v42, %v4121_v3  ;;  %v4065_v3 = vld [vmem:[#allocation2 + $0xd9] sm:$0xff] }
 0x17f   : > { %15936 = vmatmul.mubr.msk.f32.gmra.mrb[100].mxu0 %vm336_vm1, %v18330_v13  ;;  %15874 = vmatprep.mubr.msk.f32.mxu1 %vm336_vm1, %v18020_v22  ;;  %v18607_v13 = vpack.c.bf16 %v4573_v11, %v4572_v12  ;;  %v21721_v22 = vld [vmem:[#allocation4_spill] sm:$0xff]  ;;  %v888_v12 = vld [vmem:[#allocation3 + $0x28] sm:$0xff] }
 0x180   : > { %15938 = vmatprep.mubr.msk.f32.mxu0 %vm336_vm1, %v18344_v21  ;;  %17364 = vmatpush3.bf16.msra.mxu1 %v17361_v57  ;;  %v4052_v21 = vld [vmem:[#allocation2 + $0x39] sm:$0xff]  ;;  %v887_v11 = vld [vmem:[#allocation3 + $0x20] sm:$0xff] }
 0x181   : > { %17366 = vmatprep.subr.bf16.mxu1 %v17365_v29  ;;  %17380 = vmatpush3.bf16.msra.mxu0 %v17377_v5 }
 0x182   : > { %15875 = vmatmul.mubr.msk.f32.gmra.mrb[70].mxu1 %vm336_vm1, %v18030_v25  ;;  %17382 = vmatprep.subr.bf16.mxu0 %v17381_v15  ;;  %v21722_v25 = vld [vmem:[#allocation5_spill] sm:$0xff] }
 0x183   : > { %15939 = vmatmul.mubr.msk.f32.gmra.mrb[102].mxu0 %vm336_vm1, %v18355_v19  ;;  %15877 = vmatprep.mubr.msk.f32.mxu1 %vm336_vm1, %v18040_v35  ;;  %v21723_v35 = vld [vmem:[#allocation6_spill] sm:$0xff]  ;;  %v3596_v19 = vld [vmem:[#allocation2 + $0x48] sm:$0xff] }
 0x184   : > { %15941 = vmatprep.mubr.msk.f32.mxu0 %vm336_vm1, %v18394_v23  ;;  %17368 = vmatpush3.bf16.msra.mxu1 %v17365_v29  ;;  %v4576_v23 = vld [vmem:[%s21681_s3 + $0x220] sm:$0xff]  ;;  %v3608_v29 = vld [vmem:[#allocation2 + $0xd8] sm:$0xff] }
 0x185   : > { %17384 = vmatpush3.bf16.msra.mxu0 %v17381_v15  ;;  %17386 = vmatprep.subr.bf16.mxu1 %v18607_v13 }
 0x186   : > { %15878 = vmatmul.mubr.msk.f32.gmra.mrb[72].mxu1 %vm336_vm1, %v18050_v38  ;;  %v21724_v38 = vld [vmem:[#allocation7_spill] sm:$0xff] }
 0x187   : > { %15942 = vmatmul.mubr.msk.f32.gmra.mrb[104].mxu0 %vm336_vm1, %v18401_v55  ;;  %15880 = vmatprep.mubr.msk.f32.mxu1 %vm336_vm1, %v18060_v45  ;;  %v21725_v45 = vld [vmem:[#allocation8_spill] sm:$0xff]  ;;  %v4577_v55 = vld [vmem:[%s21681_s3 + $0x228] sm:$0xff] }
 0x188   : > { %15944 = vmatprep.mubr.msk.f32.mxu0 %vm336_vm1, %v18407_v36  ;;  %v4053_v36 = vld [vmem:[#allocation2 + $0x49] sm:$0xff] }
 0x18a   : > { %15881 = vmatmul.mubr.msk.f32.gmra.mrb[74].mxu1 %vm336_vm1, %v18070_v48  ;;  %v21726_v48 = vld [vmem:[#allocation9_spill] sm:$0xff] }
 0x18b   : > { %15945 = vmatmul.mubr.msk.f32.gmra.mrb[106].mxu0 %vm336_vm1, %v18413_v32  ;;  %15883 = vmatprep.mubr.msk.f32.mxu1 %vm336_vm1, %v18080_v58  ;;  %v21727_v58 = vld [vmem:[#allocation10_spill] sm:$0xff]  ;;  %v3597_v32 = vld [vmem:[#allocation2 + $0x50] sm:$0xff] }
 0x18c   : > { %15947 = vmatprep.mubr.msk.f32.mxu0 %vm336_vm1, %v18419_v46  ;;  %v4054_v46 = vld [vmem:[#allocation2 + $0x51] sm:$0xff] }
 0x18e   : > { %15884 = vmatmul.mubr.msk.f32.gmra.mrb[76].mxu1 %vm336_vm1, %v18090_v62  ;;  %v18702_v62 = vld [vmem:[#allocation2 + $0x181] sm:$0xff] }
 0x18f   : > { %15948 = vmatmul.mubr.msk.f32.gmra.mrb[108].mxu0 %vm336_vm1, %v18427_v54  ;;  %15886 = vmatprep.mubr.msk.f32.mxu1 %vm336_vm1, %v18100_v9  ;;  %v3166_v9 = vld [vmem:[#allocation2 + $0x182] sm:$0xff] }
 0x190   : > { %15950 = vmatprep.mubr.msk.f32.mxu0 %vm336_vm1, %v18433_v60  ;;  %v3598_v54 = vld [vmem:[#allocation2 + $0x60] sm:$0xff]  ;;  %v17393_v60 = vpack.c.bf16 %v4577_v55, %v4576_v23  ;;  %v3612_v23 = vld [vmem:[#allocation2 + $0x108] sm:$0xff] }
 0x191   : > { %v4069_v55 = vld [vmem:[#allocation2 + $0x109] sm:$0xff] }
 0x192   : > { %15887 = vmatmul.mubr.msk.f32.gmra.mrb[78].mxu1 %vm336_vm1, %v18110_v16  ;;  %v18707_v16 = vld [vmem:[#allocation2 + $0x189] sm:$0xff] }
 0x193   : > { %15951 = vmatmul.mubr.msk.f32.gmra.mrb[110].mxu0 %vm336_vm1, %v18439_v8  ;;  %15889 = vmatprep.mubr.msk.f32.mxu1 %vm336_vm1, %v18120_v27  ;;  %v3167_v27 = vld [vmem:[#allocation2 + $0x18a] sm:$0xff]  ;;  %v4055_v8 = vld [vmem:[#allocation2 + $0x61] sm:$0xff] }
 0x194   : > { %15953 = vmatprep.mubr.msk.f32.mxu0 %vm336_vm1, %v18445_v34  ;;  %v4578_v34 = vld [vmem:[%s21681_s3 + $0x230] sm:$0xff] }
 0x196   : > { %15890 = vmatmul.mubr.msk.f32.gmra.mrb[80].mxu1 %vm336_vm1, %v18130_v31  ;;  %v4574_v31 = vld [vmem:[%s21681_s3 + $0x210] sm:$0xff] }
 0x197   : > { %15954 = vmatmul.mubr.msk.f32.gmra.mrb[112].mxu0 %vm336_vm1, %v18451_v30  ;;  %15892 = vmatprep.mubr.msk.f32.mxu1 %vm336_vm1, %v18140_v47  ;;  %v4575_v47 = vld [vmem:[%s21681_s3 + $0x218] sm:$0xff] }
 0x198   : > { %15956 = vmatprep.mubr.msk.f32.mxu0 %vm336_vm1, %v18459_v28  ;;  %v4579_v30 = vld [vmem:[%s21681_s3 + $0x238] sm:$0xff]  ;;  %v3599_v28 = vld [vmem:[#allocation2 + $0x68] sm:$0xff] }
 0x19a   : > { %15893 = vmatmul.mubr.msk.f32.gmra.mrb[82].mxu1 %vm336_vm1, %v18150_v51  ;;  %v3594_v51 = vld [vmem:[#allocation2 + $0x30] sm:$0xff] }
 0x19b   : > { %15957 = vmatmul.mubr.msk.f32.gmra.mrb[114].mxu0 %vm336_vm1, %v18465_v43  ;;  %15895 = vmatprep.mubr.msk.f32.mxu1 %vm336_vm1, %v18160_v6  ;;  %v4051_v6 = vld [vmem:[#allocation2 + $0x31] sm:$0xff]  ;;  %v4056_v43 = vld [vmem:[#allocation2 + $0x69] sm:$0xff] }
 0x19c   : > { %15959 = vmatprep.mubr.msk.f32.mxu0 %vm336_vm1, %v18471_v50  ;;  %v17397_v50 = vpack.c.bf16 %v4579_v30, %v4578_v34 }
 0x19e   : > { %15896 = vmatmul.mubr.msk.f32.gmra.mrb[84].mxu1 %vm336_vm1, %v18170_v17  ;;  %v17389_v17 = vpack.c.bf16 %v4575_v47, %v4574_v31  ;;  %v889_v31 = vld [vmem:[#allocation3 + $0x30] sm:$0xff] }
 0x19f   : > { %15960 = vmatmul.mubr.msk.f32.gmra.mrb[116].mxu0 %vm336_vm1, %v18477_v49  ;;  %15898 = vmatprep.mubr.msk.f32.mxu1 %vm336_vm1, %v18180_v39  ;;  %v3595_v39 = vld [vmem:[#allocation2 + $0x38] sm:$0xff] }
 0x1a0   : > { %15962 = vmatprep.mubr.msk.f32.mxu0 %vm336_vm1, %v18483_v4  ;;  %v3600_v49 = vld [vmem:[#allocation2 + $0x78] sm:$0xff] }
 0x1a1   : > { %v4057_v4 = vld [vmem:[#allocation2 + $0x79] sm:$0xff] }
 0x1a2   : > { %15899 = vmatmul.mubr.msk.f32.gmra.mrb[86].mxu1 %vm336_vm1, %v21721_v22  ;;  %v3609_v22 = vld [vmem:[#allocation2 + $0xe0] sm:$0xff] }
 0x1a3   : > { %15963 = vmatmul.mubr.msk.f32.gmra.mrb[118].mxu0 %vm336_vm1, %v18489_v7  ;;  %15901 = vmatprep.mubr.msk.f32.mxu1 %vm336_vm1, %v21722_v25  ;;  %v3601_v7 = vld [vmem:[#allocation2 + $0x80] sm:$0xff] }
 0x1a4   : > { %15965 = vmatprep.mubr.msk.f32.mxu0 %vm336_vm1, %v18495_v37  ;;  %v4058_v37 = vld [vmem:[#allocation2 + $0x81] sm:$0xff] }
 0x1a5   : > { %v4066_v25 = vld [vmem:[#allocation2 + $0xe1] sm:$0xff] }
 0x1a6   : > { %15902 = vmatmul.mubr.msk.f32.gmra.mrb[88].mxu1 %vm336_vm1, %v21723_v35 }
 0x1a7   : > { %15966 = vmatmul.mubr.msk.f32.gmra.mrb[120].mxu0 %vm336_vm1, %v18501_v40  ;;  %15904 = vmatprep.mubr.msk.f32.mxu1 %vm336_vm1, %v21724_v38  ;;  %v3602_v40 = vld [vmem:[#allocation2 + $0x90] sm:$0xff] }
 0x1a8   : > { %15968 = vmatprep.mubr.msk.f32.mxu0 %vm336_vm1, %v18507_v61  ;;  %v4059_v61 = vld [vmem:[#allocation2 + $0x91] sm:$0xff] }
 0x1aa   : > { %15905 = vmatmul.mubr.msk.f32.gmra.mrb[90].mxu1 %vm336_vm1, %v21725_v45 }
 0x1ab   : > { %15969 = vmatmul.mubr.msk.f32.gmra.mrb[122].mxu0 %vm336_vm1, %v18515_v44  ;;  %15907 = vmatprep.mubr.msk.f32.mxu1 %vm336_vm1, %v21726_v48  ;;  %v3603_v44 = vld [vmem:[#allocation2 + $0x98] sm:$0xff]  ;;  %v3610_v48 = vld [vmem:[#allocation2 + $0xf0] sm:$0xff] }
 0x1ac   : > { %15971 = vmatprep.mubr.msk.f32.mxu0 %vm336_vm1, %v18521_v41  ;;  %v4060_v41 = vld [vmem:[#allocation2 + $0x99] sm:$0xff] }
 0x1ae   : > { %15908 = vmatmul.mubr.msk.f32.gmra.mrb[92].mxu1 %vm336_vm1, %v21727_v58  ;;  %v4067_v58 = vld [vmem:[#allocation2 + $0xf1] sm:$0xff] }
 0x1af   : > { %15972 = vmatmul.mubr.msk.f32.gmra.mrb[124].mxu0 %vm336_vm1, %v18529_v14  ;;  %15910 = vmatprep.mubr.msk.f32.mxu1 %vm336_vm1, %v18702_v62  ;;  %v3604_v14 = vld [vmem:[#allocation2 + $0xa8] sm:$0xff] }
 0x1b0   : > { %15974 = vmatprep.mubr.msk.f32.mxu0 %vm336_vm1, %v3166_v9 }
 0x1b2   : > { %15911 = vmatmul.mubr.msk.f32.gmra.mrb[94].mxu1 %vm336_vm1, %v18707_v16 }
 0x1b3   : > { %15975 = vmatmul.mubr.msk.f32.gmra.mrb[126].mxu0 %vm336_vm1, %v3167_v27  ;;  %15993 = vmatprep.mubr.msk.f32.mxu1 %vm336_vm1, %v3594_v51  ;;  %v890_v27 = vld [vmem:[#allocation3 + $0x38] sm:$0xff] }
 0x1b4   : > { %16057 = vmatprep.mubr.msk.f32.mxu0 %vm336_vm1, %v4051_v6  ;;  %v3611_v6 = vld [vmem:[#allocation2 + $0xf8] sm:$0xff] }
 0x1b6   : > { %15994 = vmatmul.mubr.msk.f32.vlgmr.msra.gmra.mrb[96].mxu1 %vm336_vm1, %v3595_v39 }
 0x1b7   : > { %16058 = vmatmul.mubr.msk.f32.vlgmr.msra.gmra.mrb[128].mxu0 %vm336_vm1, %v4052_v21  ;;  %17388 = vmatpush3.bf16.msra.mxu1 %v18607_v13 }
 0x1b8   : > { %15996 = vmatprep.mubr.msk.f32.mxu1 %vm336_vm1, %v3596_v19  ;;  %16060 = vmatprep.mubr.msk.f32.mxu0 %vm336_vm1, %v4053_v36 }
 0x1b9   : > { %17390 = vmatprep.subr.bf16.mxu1 %v17389_v17 }
 0x1ba   : > { %15997 = vmatmul.mubr.msk.f32.gmra.mrb[98].mxu1 %vm336_vm1, %v3597_v32 }
 0x1bb   : > { %16061 = vmatmul.mubr.msk.f32.gmra.mrb[130].mxu0 %vm336_vm1, %v4054_v46  ;;  %15999 = vmatprep.mubr.msk.f32.mxu1 %vm336_vm1, %v3598_v54  ;;  %v892_v46 = vld [vmem:[#allocation3 + $0x48] sm:$0xff] }
 0x1bc   : > { %16063 = vmatprep.mubr.msk.f32.mxu0 %vm336_vm1, %v4055_v8  ;;  %17392 = vmatpush3.bf16.msra.mxu1 %v17389_v17  ;;  %v4068_v17 = vld [vmem:[#allocation2 + $0xf9] sm:$0xff]  ;;  %v891_v8 = vld [vmem:[#allocation3 + $0x40] sm:$0xff] }
 0x1bd   : > { %17394 = vmatprep.subr.bf16.mxu1 %v17393_v60 }
 0x1be   : > { %16000 = vmatmul.mubr.msk.f32.gmra.mrb[100].mxu1 %vm336_vm1, %v3599_v28 }
 0x1bf   : > { %16064 = vmatmul.mubr.msk.f32.gmra.mrb[132].mxu0 %vm336_vm1, %v4056_v43  ;;  %16002 = vmatprep.mubr.msk.f32.mxu1 %vm336_vm1, %v3600_v49  ;;  %v3613_v43 = vld [vmem:[#allocation2 + $0x110] sm:$0xff] }
 0x1c0   : > { %16066 = vmatprep.mubr.msk.f32.mxu0 %vm336_vm1, %v4057_v4  ;;  %17396 = vmatpush3.bf16.msra.mxu1 %v17393_v60 }
 0x1c1   : > { %17398 = vmatprep.subr.bf16.mxu1 %v17397_v50 }
 0x1c2   : > { %16003 = vmatmul.mubr.msk.f32.gmra.mrb[102].mxu1 %vm336_vm1, %v3601_v7 }
 0x1c3   : > { %16067 = vmatmul.mubr.msk.f32.gmra.mrb[134].mxu0 %vm336_vm1, %v4058_v37  ;;  %16005 = vmatprep.mubr.msk.f32.mxu1 %vm336_vm1, %v3602_v40  ;;  %v3614_v37 = vld [vmem:[#allocation2 + $0x120] sm:$0xff] }
 0x1c4   : > { %16069 = vmatprep.mubr.msk.f32.mxu0 %vm336_vm1, %v4059_v61  ;;  %17400 = vmatpush3.bf16.msra.mxu1 %v17397_v50  ;;  %v4070_v50 = vld [vmem:[#allocation2 + $0x111] sm:$0xff]  ;;  %v4071_v40 = vld [vmem:[#allocation2 + $0x121] sm:$0xff] }
 0x1c6   : > { %16006 = vmatmul.mubr.msk.f32.gmra.mrb[104].mxu1 %vm336_vm1, %v3603_v44 }
 0x1c7   : > { %16070 = vmatmul.mubr.msk.f32.gmra.mrb[136].mxu0 %vm336_vm1, %v4060_v41  ;;  %16008 = vmatprep.mubr.msk.f32.mxu1 %vm336_vm1, %v3604_v14  ;;  %v894_v41 = vld [vmem:[#allocation3 + $0x58] sm:$0xff] }
 0x1c8   : > { %16072 = vmatprep.mubr.msk.f32.mxu0 %vm336_vm1, %v4061_v63 }
 0x1ca   : > { %16009 = vmatmul.mubr.msk.f32.gmra.mrb[106].mxu1 %vm336_vm1, %v3605_v20  ;;  %v893_v20 = vld [vmem:[#allocation3 + $0x50] sm:$0xff] }
 0x1cb   : > { %16073 = vmatmul.mubr.msk.f32.gmra.mrb[138].mxu0 %vm336_vm1, %v4062_v18  ;;  %16011 = vmatprep.mubr.msk.f32.mxu1 %vm336_vm1, %v3606_v33 }
 0x1cc   : > { %16075 = vmatprep.mubr.msk.f32.mxu0 %vm336_vm1, %v4063_v10 }
 0x1cd   : > { %v15614_v59 = vpop.f32.mrb[2].mxu1 }
 0x1ce   : > { %v15678_v57 = vpop.f32.mrb[34].mxu0  ;;  %v1247_v2 = vadd.f32 %v15614_v59, %v886_v56  ;;  %v1095_v1 = vpop.f32.mrb[3].mxu1  ;;  %16012 = vmatmul.mubr.msk.f32.gmra.mrb[108].mxu1 %vm336_vm1, %v3607_v53  ;;  %v3615_v56 = vld [vmem:[#allocation2 + $0x128] sm:$0xff] }
 0x1cf   : > { %v1552_v5 = vpop.f32.mrb[35].mxu0  ;;  %16076 = vmatmul.mubr.msk.f32.gmra.mrb[140].mxu0 %vm336_vm1, %v4064_v26  ;;  %v1246_v42 = vadd.f32 %v1095_v1, %v885_v24  ;;  %16014 = vmatprep.mubr.msk.f32.mxu1 %vm336_vm1, %v3608_v29  ;;  %v4072_v24 = vld [vmem:[#allocation2 + $0x129] sm:$0xff]  ;;  %v3616_v26 = vld [vmem:[#allocation2 + $0x138] sm:$0xff] }
 0x1d0   : > { %16078 = vmatprep.mubr.msk.f32.mxu0 %vm336_vm1, %v4065_v3  ;;  %1279 = vst.msk [vmem:[#allocation3 + $0x18] sm:$0xff] %vm336_vm1, %v1247_v2  ;;  %v4073_v2 = vld [vmem:[#allocation2 + $0x139] sm:$0xff] }
 0x1d1   : > { %1278 = vst.msk [vmem:[#allocation3 + $0x10] sm:$0xff] %vm336_vm1, %v1246_v42  ;;  %v15617_v15 = vpop.f32.mrb[4].mxu1  ;;  %v896_v29 = vld [vmem:[#allocation3 + $0x68] sm:$0xff] }
 0x1d2   : > { %v15681_v13 = vpop.f32.mrb[36].mxu0  ;;  %v1249_v35 = vadd.f32 %v15617_v15, %v888_v12  ;;  %v1105_v38 = vpop.f32.mrb[5].mxu1  ;;  %16015 = vmatmul.mubr.msk.f32.gmra.mrb[110].mxu1 %vm336_vm1, %v3609_v22  ;;  %v895_v12 = vld [vmem:[#allocation3 + $0x60] sm:$0xff]  ;;  %v3617_v22 = vld [vmem:[#allocation2 + $0x140] sm:$0xff] }
 0x1d3   : > { %v1562_v45 = vpop.f32.mrb[37].mxu0  ;;  %16079 = vmatmul.mubr.msk.f32.gmra.mrb[142].mxu0 %vm336_vm1, %v4066_v25  ;;  %v1248_v9 = vadd.f32 %v1105_v38, %v887_v11  ;;  %16017 = vmatprep.mubr.msk.f32.mxu1 %vm336_vm1, %v3610_v48  ;;  %v4074_v25 = vld [vmem:[#allocation2 + $0x141] sm:$0xff]  ;;  %v3618_v48 = vld [vmem:[#allocation2 + $0x150] sm:$0xff] }
 0x1d4   : > { %16081 = vmatprep.mubr.msk.f32.mxu0 %vm336_vm1, %v4067_v58  ;;  %1281 = vst.msk [vmem:[#allocation3 + $0x28] sm:$0xff] %vm336_vm1, %v1249_v35  ;;  %v4075_v58 = vld [vmem:[#allocation2 + $0x151] sm:$0xff] }
 0x1d5   : > { %1280 = vst.msk [vmem:[#allocation3 + $0x20] sm:$0xff] %vm336_vm1, %v1248_v9  ;;  %v15620_v47 = vpop.f32.mrb[6].mxu1 }
 0x1d6   : > { %v18769_v51 = vpop.f32.mrb[38].mxu0  ;;  %v1251_v39 = vadd.f32 %v15620_v47, %v890_v27  ;;  %v1115_v21 = vpop.f32.mrb[7].mxu1  ;;  %16018 = vmatmul.mubr.msk.f32.gmra.mrb[112].mxu1 %vm336_vm1, %v3611_v6  ;;  %v897_v6 = vld [vmem:[#allocation3 + $0x70] sm:$0xff] }
 0x1d7   : > { %v1572_v19 = vpop.f32.mrb[39].mxu0  ;;  %16082 = vmatmul.mubr.msk.f32.gmra.mrb[144].mxu0 %vm336_vm1, %v4068_v17  ;;  %v1343_v36 = vld [vmem:[#allocation3 + $0x18] sm:$0xff]  ;;  %v1250_v32 = vadd.f32 %v1115_v21, %v889_v31  ;;  %16020 = vmatprep.mubr.msk.f32.mxu1 %vm336_vm1, %v3612_v23  ;;  %v4076_v23 = vld [vmem:[#allocation2 + $0x159] sm:$0xff] }
 0x1d8   : > { %16084 = vmatprep.mubr.msk.f32.mxu0 %vm336_vm1, %v4069_v55  ;;  %v1704_v54 = vadd.f32 %v15678_v57, %v1343_v36  ;;  %v1342_v60 = vld [vmem:[#allocation3 + $0x10] sm:$0xff]  ;;  %1283 = vst.msk [vmem:[#allocation3 + $0x38] sm:$0xff] %vm336_vm1, %v1251_v39  ;;  %v898_v31 = vld [vmem:[#allocation3 + $0x78] sm:$0xff] }
 0x1d9   : > { %v1703_v34 = vadd.f32 %v1552_v5, %v1342_v60  ;;  %1282 = vst.msk [vmem:[#allocation3 + $0x30] sm:$0xff] %vm336_vm1, %v1250_v32  ;;  %v15623_v30 = vpop.f32.mrb[8].mxu1 }
 0x1da   : > { %v18777_v28 = vpop.f32.mrb[40].mxu0  ;;  %1736 = vst.msk [vmem:[#allocation3 + $0x18] sm:$0xff] %vm336_vm1, %v1704_v54  ;;  %v1253_v49 = vadd.f32 %v15623_v30, %v892_v46  ;;  %v1125_v4 = vpop.f32.mrb[9].mxu1  ;;  %16021 = vmatmul.mubr.msk.f32.gmra.mrb[114].mxu1 %vm336_vm1, %v3613_v43  ;;  %v3620_v46 = vld [vmem:[#allocation2 + $0x168] sm:$0xff]  ;;  %v899_v43 = vld [vmem:[#allocation3 + $0x80] sm:$0xff] }
 0x1db   : > { %v18780_v7 = vpop.f32.mrb[41].mxu0  ;;  %16085 = vmatmul.mubr.msk.f32.gmra.mrb[146].mxu0 %vm336_vm1, %v4070_v50  ;;  %1735 = vst.msk [vmem:[#allocation3 + $0x10] sm:$0xff] %vm336_vm1, %v1703_v34  ;;  %v1345_v61 = vld [vmem:[#allocation3 + $0x28] sm:$0xff]  ;;  %v1252_v44 = vadd.f32 %v1125_v4, %v891_v8  ;;  %16023 = vmatprep.mubr.msk.f32.mxu1 %vm336_vm1, %v3614_v37  ;;  %v4077_v54 = vld [vmem:[#allocation2 + $0x169] sm:$0xff] }
 0x1dc   : > { %16087 = vmatprep.mubr.msk.f32.mxu0 %vm336_vm1, %v4071_v40  ;;  %v1706_v14 = vadd.f32 %v15681_v13, %v1345_v61  ;;  %v1344_v63 = vld [vmem:[#allocation3 + $0x20] sm:$0xff]  ;;  %1285 = vst.msk [vmem:[#allocation3 + $0x48] sm:$0xff] %vm336_vm1, %v1253_v49  ;;  %v900_v34 = vld [vmem:[#allocation3 + $0x88] sm:$0xff] }
 0x1dd   : > { %v1705_v18 = vadd.f32 %v1562_v45, %v1344_v63  ;;  %1284 = vst.msk [vmem:[#allocation3 + $0x40] sm:$0xff] %vm336_vm1, %v1252_v44  ;;  %v15626_v33 = vpop.f32.mrb[10].mxu1  ;;  %v4078_v37 = vld [vmem:[#allocation2 + $0x171] sm:$0xff]  ;;  %v902_v63 = vld [vmem:[#allocation3 + $0x98] sm:$0xff] }
 0x1de   : > { %v18789_v10 = vpop.f32.mrb[42].mxu0  ;;  %1738 = vst.msk [vmem:[#allocation3 + $0x28] sm:$0xff] %vm336_vm1, %v1706_v14  ;;  %v1255_v59 = vadd.f32 %v15626_v33, %v894_v41  ;;  %v1135_v57 = vpop.f32.mrb[11].mxu1  ;;  %16024 = vmatmul.mubr.msk.f32.gmra.mrb[116].mxu1 %vm336_vm1, %v3615_v56  ;;  %v4081_v56 = vld [vmem:[#allocation2 + $0x199] sm:$0xff] }
 0x1df   : > { %v18792_v53 = vpop.f32.mrb[43].mxu0  ;;  %16088 = vmatmul.mubr.msk.f32.gmra.mrb[148].mxu0 %vm336_vm1, %v4072_v24  ;;  %1737 = vst.msk [vmem:[#allocation3 + $0x20] sm:$0xff] %vm336_vm1, %v1705_v18  ;;  %v1347_v1 = vld [vmem:[#allocation3 + $0x38] sm:$0xff]  ;;  %v1254_v5 = vadd.f32 %v1135_v57, %v893_v20  ;;  %16026 = vmatprep.mubr.msk.f32.mxu1 %vm336_vm1, %v3616_v26  ;;  %v901_v20 = vld [vmem:[#allocation3 + $0x90] sm:$0xff]  ;;  %v904_v26 = vld [vmem:[#allocation3 + $0xa8] sm:$0xff] }
 0x1e0   : > { %16090 = vmatprep.mubr.msk.f32.mxu0 %vm336_vm1, %v4073_v2  ;;  %v1708_v3 = vadd.f32 %v18769_v51, %v1347_v1  ;;  %v1346_v42 = vld [vmem:[#allocation3 + $0x30] sm:$0xff]  ;;  %1287 = vst.msk [vmem:[#allocation3 + $0x58] sm:$0xff] %vm336_vm1, %v1255_v59 }
 0x1e1   : > { %v1707_v11 = vadd.f32 %v1572_v19, %v1346_v42  ;;  %1286 = vst.msk [vmem:[#allocation3 + $0x50] sm:$0xff] %vm336_vm1, %v1254_v5  ;;  %v15629_v15 = vpop.f32.mrb[12].mxu1  ;;  %v3619_v19 = vld [vmem:[#allocation2 + $0x158] sm:$0xff]  ;;  %v3625_v5 = vld [vmem:[#allocation2 + $0x1a0] sm:$0xff] }
 0x1e2   : > { %v18802_v13 = vpop.f32.mrb[44].mxu0  ;;  %1740 = vst.msk [vmem:[#allocation3 + $0x38] sm:$0xff] %vm336_vm1, %v1708_v3  ;;  %v1257_v35 = vadd.f32 %v15629_v15, %v896_v29  ;;  %v1145_v38 = vpop.f32.mrb[13].mxu1  ;;  %16027 = vmatmul.mubr.msk.f32.gmra.mrb[118].mxu1 %vm336_vm1, %v3617_v22  ;;  %v4082_v29 = vld [vmem:[#allocation2 + $0x1a1] sm:$0xff] }
 0x1e3   : > { %v18805_v45 = vpop.f32.mrb[45].mxu0  ;;  %16091 = vmatmul.mubr.msk.f32.gmra.mrb[150].mxu0 %vm336_vm1, %v4074_v25  ;;  %1739 = vst.msk [vmem:[#allocation3 + $0x30] sm:$0xff] %vm336_vm1, %v1707_v11  ;;  %v1349_v9 = vld [vmem:[#allocation3 + $0x48] sm:$0xff]  ;;  %v1256_v27 = vadd.f32 %v1145_v38, %v895_v12  ;;  %16029 = vmatprep.mubr.msk.f32.mxu1 %vm336_vm1, %v3618_v48 }
 0x1e4   : > { %16093 = vmatprep.mubr.msk.f32.mxu0 %vm336_vm1, %v4075_v58  ;;  %v1710_v47 = vadd.f32 %v18777_v28, %v1349_v9  ;;  %v1348_v51 = vld [vmem:[#allocation3 + $0x40] sm:$0xff]  ;;  %1289 = vst.msk [vmem:[#allocation3 + $0x68] sm:$0xff] %vm336_vm1, %v1257_v35  ;;  %v905_v9 = vld [vmem:[#allocation3 + $0xb0] sm:$0xff] }
 0x1e5   : > { %v1709_v17 = vadd.f32 %v18780_v7, %v1348_v51  ;;  %1288 = vst.msk [vmem:[#allocation3 + $0x60] sm:$0xff] %vm336_vm1, %v1256_v27  ;;  %v15632_v39 = vpop.f32.mrb[14].mxu1  ;;  %v3621_v7 = vld [vmem:[#allocation2 + $0x170] sm:$0xff]  ;;  %v4509_v51 = vld [vmem:[#allocation2 + $0x3a] sm:$0xff] }
 0x1e6   : > { %v18816_v21 = vpop.f32.mrb[46].mxu0  ;;  %1742 = vst.msk [vmem:[#allocation3 + $0x48] sm:$0xff] %vm336_vm1, %v1710_v47  ;;  %v1259_v55 = vadd.f32 %v15632_v39, %v898_v31  ;;  %v1155_v36 = vpop.f32.mrb[15].mxu1  ;;  %16030 = vmatmul.mubr.msk.f32.gmra.mrb[120].mxu1 %vm336_vm1, %v3619_v19  ;;  %v4508_v25 = vld [vmem:[#allocation2 + $0x32] sm:$0xff] }
 0x1e7   : > { %v1612_v32 = vpop.f32.mrb[47].mxu0  ;;  %16094 = vmatmul.mubr.msk.f32.gmra.mrb[152].mxu0 %vm336_vm1, %v4076_v23  ;;  %1741 = vst.msk [vmem:[#allocation3 + $0x40] sm:$0xff] %vm336_vm1, %v1709_v17  ;;  %v1351_v60 = vld [vmem:[#allocation3 + $0x58] sm:$0xff]  ;;  %v1258_v8 = vadd.f32 %v1155_v36, %v897_v6  ;;  %16032 = vmatprep.mubr.msk.f32.mxu1 %vm336_vm1, %v3620_v46  ;;  %v907_v46 = vld [vmem:[#allocation3 + $0xc0] sm:$0xff] }
 0x1e8   : > { %16096 = vmatprep.mubr.msk.f32.mxu0 %vm336_vm1, %v4077_v54  ;;  %v1712_v30 = vadd.f32 %v18789_v10, %v1351_v60  ;;  %v1350_v28 = vld [vmem:[#allocation3 + $0x50] sm:$0xff]  ;;  %1291 = vst.msk [vmem:[#allocation3 + $0x78] sm:$0xff] %vm336_vm1, %v1259_v55  ;;  %v3624_v10 = vld [vmem:[#allocation2 + $0x198] sm:$0xff] }
 0x1e9   : > { %v1711_v50 = vadd.f32 %v18792_v53, %v1350_v28  ;;  %1290 = vst.msk [vmem:[#allocation3 + $0x70] sm:$0xff] %vm336_vm1, %v1258_v8  ;;  %v15635_v49 = vpop.f32.mrb[16].mxu1  ;;  %v908_v55 = vld [vmem:[#allocation3 + $0xc8] sm:$0xff] }
 0x1ea   : > { %v15699_v4 = vpop.f32.mrb[48].mxu0  ;;  %1744 = vst.msk [vmem:[#allocation3 + $0x58] sm:$0xff] %vm336_vm1, %v1712_v30  ;;  %v1261_v40 = vadd.f32 %v15635_v49, %v900_v34  ;;  %v1165_v61 = vpop.f32.mrb[17].mxu1  ;;  %16033 = vmatmul.mubr.msk.f32.gmra.mrb[122].mxu1 %vm336_vm1, %v3621_v7  ;;  %v4511_v34 = vld [vmem:[#allocation2 + $0x52] sm:$0xff]  ;;  %v910_v7 = vld [vmem:[#allocation3 + $0xd8] sm:$0xff] }
 0x1eb   : > { %v1622_v44 = vpop.f32.mrb[49].mxu0  ;;  %16097 = vmatmul.mubr.msk.f32.gmra.mrb[154].mxu0 %vm336_vm1, %v4078_v37  ;;  %1743 = vst.msk [vmem:[#allocation3 + $0x50] sm:$0xff] %vm336_vm1, %v1711_v50  ;;  %v1353_v41 = vld [vmem:[#allocation3 + $0x68] sm:$0xff]  ;;  %v1260_v14 = vadd.f32 %v1165_v61, %v899_v43  ;;  %16035 = vmatprep.mubr.msk.f32.mxu1 %vm336_vm1, %v18513_v0  ;;  %v4512_v50 = vld [vmem:[#allocation2 + $0x62] sm:$0xff] }
 0x1ec   : > { %16099 = vmatprep.mubr.msk.f32.mxu0 %vm336_vm1, %v18702_v62  ;;  %v1714_v18 = vadd.f32 %v18802_v13, %v1353_v41  ;;  %v1352_v33 = vld [vmem:[#allocation3 + $0x60] sm:$0xff]  ;;  %1293 = vst.msk [vmem:[#allocation3 + $0x88] sm:$0xff] %vm336_vm1, %v1261_v40  ;;  %v909_v61 = vld [vmem:[#allocation3 + $0xd0] sm:$0xff] }
 0x1ed   : > { %v1713_v24 = vadd.f32 %v18805_v45, %v1352_v33  ;;  %1292 = vst.msk [vmem:[#allocation3 + $0x80] sm:$0xff] %vm336_vm1, %v1260_v14  ;;  %v15638_v59 = vpop.f32.mrb[18].mxu1  ;;  %v906_v45 = vld [vmem:[#allocation3 + $0xb8] sm:$0xff] }
 0x1ee   : > { %v15702_v57 = vpop.f32.mrb[50].mxu0  ;;  %1746 = vst.msk [vmem:[#allocation3 + $0x68] sm:$0xff] %vm336_vm1, %v1714_v18  ;;  %v1263_v0 = vadd.f32 %v15638_v59, %v902_v63  ;;  %v1175_v53 = vpop.f32.mrb[19].mxu1  ;;  %16036 = vmatmul.mubr.msk.f32.gmra.mrb[124].mxu1 %vm336_vm1, %v18527_v52  ;;  %v903_v52 = vld [vmem:[#allocation3 + $0xa0] sm:$0xff]  ;;  %v912_v59 = vld [vmem:[#allocation3 + $0xe8] sm:$0xff] }
 0x1ef   : > { %v1632_v62 = vpop.f32.mrb[51].mxu0  ;;  %16100 = vmatmul.mubr.msk.f32.gmra.mrb[156].mxu0 %vm336_vm1, %v18707_v16  ;;  %1745 = vst.msk [vmem:[#allocation3 + $0x60] sm:$0xff] %vm336_vm1, %v1713_v24  ;;  %v1355_v2 = vld [vmem:[#allocation3 + $0x78] sm:$0xff]  ;;  %v1262_v1 = vadd.f32 %v1175_v53, %v901_v20  ;;  %16038 = vmatprep.mubr.msk.f32.mxu1 %vm336_vm1, %v3624_v10  ;;  %v4514_v10 = vld [vmem:[#allocation2 + $0x7a] sm:$0xff]  ;;  %v911_v53 = vld [vmem:[#allocation3 + $0xe0] sm:$0xff] }
 0x1f0   : > { %16102 = vmatprep.mubr.msk.f32.mxu0 %vm336_vm1, %v4081_v56  ;;  %v1716_v3 = vadd.f32 %v18816_v21, %v1355_v2  ;;  %v1354_v42 = vld [vmem:[#allocation3 + $0x70] sm:$0xff]  ;;  %1295 = vst.msk [vmem:[#allocation3 + $0x98] sm:$0xff] %vm336_vm1, %v1263_v0  ;;  %v4510_v21 = vld [vmem:[#allocation2 + $0x4a] sm:$0xff] }
 0x1f1   : > { %v1715_v12 = vadd.f32 %v1612_v32, %v1354_v42  ;;  %1294 = vst.msk [vmem:[#allocation3 + $0x90] sm:$0xff] %vm336_vm1, %v1262_v1  ;;  %v15641_v16 = vpop.f32.mrb[20].mxu1  ;;  %v4513_v63 = vld [vmem:[#allocation2 + $0x6a] sm:$0xff]  ;;  %v4515_v1 = vld [vmem:[#allocation2 + $0x82] sm:$0xff]  ;;  %v4516_v42 = vld [vmem:[#allocation2 + $0x92] sm:$0xff] }
 0x1f2   : > { %v15705_v11 = vpop.f32.mrb[52].mxu0  ;;  %1748 = vst.msk [vmem:[#allocation3 + $0x78] sm:$0xff] %vm336_vm1, %v1716_v3  ;;  %v1265_v15 = vadd.f32 %v15641_v16, %v904_v26  ;;  %v1185_v13 = vpop.f32.mrb[21].mxu1  ;;  %16039 = vmatmul.mubr.msk.f32.gmra.mrb[126].mxu1 %vm336_vm1, %v3625_v5  ;;  %v914_v16 = vld [vmem:[#allocation3 + $0xf8] sm:$0xff] }
 0x1f3   : > { %v1642_v22 = vpop.f32.mrb[53].mxu0  ;;  %16103 = vmatmul.mubr.msk.f32.gmra.mrb[158].mxu0 %vm336_vm1, %v4082_v29  ;;  %1747 = vst.msk [vmem:[#allocation3 + $0x70] sm:$0xff] %vm336_vm1, %v1715_v12  ;;  %v1357_v35 = vld [vmem:[#allocation3 + $0x88] sm:$0xff]  ;;  %v1264_v38 = vadd.f32 %v1185_v13, %v903_v52  ;;  %16121 = vmatprep.mubr.msk.f32.mxu1 %vm336_vm1, %v4508_v25  ;;  %v913_v13 = vld [vmem:[#allocation3 + $0xf0] sm:$0xff] }
 0x1f4   : > { %v1718_v48 = vadd.f32 %v15699_v4, %v1357_v35  ;;  %v1356_v58 = vld [vmem:[#allocation3 + $0x80] sm:$0xff]  ;;  %1297 = vst.msk [vmem:[#allocation3 + $0xa8] sm:$0xff] %vm336_vm1, %v1265_v15 }
 0x1f5   : > { %v1717_v27 = vadd.f32 %v1622_v44, %v1356_v58  ;;  %1296 = vst.msk [vmem:[#allocation3 + $0xa0] sm:$0xff] %vm336_vm1, %v1264_v38  ;;  %v15644_v31 = vpop.f32.mrb[22].mxu1  ;;  %v4517_v38 = vld [vmem:[#allocation2 + $0x9a] sm:$0xff] }
 0x1f6   : > { %v15708_v47 = vpop.f32.mrb[54].mxu0  ;;  %1750 = vst.msk [vmem:[#allocation3 + $0x88] sm:$0xff] %vm336_vm1, %v1718_v48  ;;  %v1267_v6 = vadd.f32 %v15644_v31, %v906_v45  ;;  %v1195_v17 = vpop.f32.mrb[23].mxu1  ;;  %16122 = vmatmul.mubr.msk.f32.vlgmr.msra.gmra.mrb[128].mxu1 %vm336_vm1, %v4509_v51 }
 0x1f7   : > { %v1652_v39 = vpop.f32.mrb[55].mxu0  ;;  %1749 = vst.msk [vmem:[#allocation3 + $0x80] sm:$0xff] %vm336_vm1, %v1717_v27  ;;  %v1359_v19 = vld [vmem:[#allocation3 + $0x98] sm:$0xff]  ;;  %v1266_v23 = vadd.f32 %v1195_v17, %v905_v9  ;;  %16124 = vmatprep.mubr.msk.f32.mxu1 %vm336_vm1, %v4510_v21  ;;  %v1798_v17 = vld [vmem:[#allocation3 + $0x8] sm:$0xff] }
 0x1f8   : > { %v1720_v36 = vadd.f32 %v15702_v57, %v1359_v19  ;;  %v1358_v32 = vld [vmem:[#allocation3 + $0x90] sm:$0xff]  ;;  %1299 = vst.msk [vmem:[#allocation3 + $0xb8] sm:$0xff] %vm336_vm1, %v1267_v6  ;;  %v4518_v9 = vld [vmem:[#allocation2 + $0xaa] sm:$0xff]  ;;  %v4519_v19 = vld [vmem:[#allocation2 + $0xb2] sm:$0xff] }
 0x1f9   : > { %v1719_v54 = vadd.f32 %v1632_v62, %v1358_v32  ;;  %1298 = vst.msk [vmem:[#allocation3 + $0xb0] sm:$0xff] %vm336_vm1, %v1266_v23  ;;  %v15647_v60 = vpop.f32.mrb[24].mxu1 }
 0x1fa   : > { %v15711_v8 = vpop.f32.mrb[56].mxu0  ;;  %1752 = vst.msk [vmem:[#allocation3 + $0x98] sm:$0xff] %vm336_vm1, %v1720_v36  ;;  %v1269_v30 = vadd.f32 %v15647_v60, %v908_v55  ;;  %v1205_v28 = vpop.f32.mrb[25].mxu1  ;;  %16125 = vmatmul.mubr.msk.f32.gmra.mrb[130].mxu1 %vm336_vm1, %v4511_v34  ;;  %v1797_v55 = vld [vmem:[#allocation3] sm:$0xff] }
 0x1fb   : > { %v1662_v43 = vpop.f32.mrb[57].mxu0  ;;  %1751 = vst.msk [vmem:[#allocation3 + $0x90] sm:$0xff] %vm336_vm1, %v1719_v54  ;;  %v1361_v49 = vld [vmem:[#allocation3 + $0xa8] sm:$0xff]  ;;  %v1268_v4 = vadd.f32 %v1205_v28, %v907_v46  ;;  %16127 = vmatprep.mubr.msk.f32.mxu1 %vm336_vm1, %v4512_v50  ;;  %v4520_v46 = vld [vmem:[#allocation2 + $0xc2] sm:$0xff] }
 0x1fc   : > { %v1722_v37 = vadd.f32 %v15705_v11, %v1361_v49  ;;  %v1360_v40 = vld [vmem:[#allocation3 + $0xa0] sm:$0xff]  ;;  %1301 = vst.msk [vmem:[#allocation3 + $0xc8] sm:$0xff] %vm336_vm1, %v1269_v30  ;;  %v1800_v28 = vld [vmem:[#allocation3 + $0x18] sm:$0xff] }
 0x1fd   : > { %v1721_v44 = vadd.f32 %v1642_v22, %v1360_v40  ;;  %1300 = vst.msk [vmem:[#allocation3 + $0xc0] sm:$0xff] %vm336_vm1, %v1268_v4  ;;  %v15650_v41 = vpop.f32.mrb[26].mxu1  ;;  %v4521_v49 = vld [vmem:[#allocation2 + $0xca] sm:$0xff] }
 0x1fe   : > { %v15714_v14 = vpop.f32.mrb[58].mxu0  ;;  %1754 = vst.msk [vmem:[#allocation3 + $0xa8] sm:$0xff] %vm336_vm1, %v1722_v37  ;;  %v1271_v20 = vadd.f32 %v15650_v41, %v910_v7  ;;  %v1215_v18 = vpop.f32.mrb[27].mxu1  ;;  %16128 = vmatmul.mubr.msk.f32.gmra.mrb[132].mxu1 %vm336_vm1, %v4513_v63  ;;  %v1799_v7 = vld [vmem:[#allocation3 + $0x10] sm:$0xff] }
 0x1ff   : > { %v1672_v33 = vpop.f32.mrb[59].mxu0  ;;  %1753 = vst.msk [vmem:[#allocation3 + $0xa0] sm:$0xff] %vm336_vm1, %v1721_v44  ;;  %v1363_v56 = vld [vmem:[#allocation3 + $0xb8] sm:$0xff]  ;;  %v1270_v24 = vadd.f32 %v1215_v18, %v909_v61  ;;  %16130 = vmatprep.mubr.msk.f32.mxu1 %vm336_vm1, %v4514_v10  ;;  %v4522_v61 = vld [vmem:[#allocation2 + $0xda] sm:$0xff] }
 0x200   : > { %v1724_v57 = vadd.f32 %v15708_v47, %v1363_v56  ;;  %v1362_v0 = vld [vmem:[#allocation3 + $0xb0] sm:$0xff]  ;;  %1303 = vst.msk [vmem:[#allocation3 + $0xd8] sm:$0xff] %vm336_vm1, %v1271_v20  ;;  %v1802_v18 = vld [vmem:[#allocation3 + $0x28] sm:$0xff] }
 0x201   : > { %v1723_v62 = vadd.f32 %v1652_v39, %v1362_v0  ;;  %1302 = vst.msk [vmem:[#allocation3 + $0xd0] sm:$0xff] %vm336_vm1, %v1270_v24  ;;  %v15653_v26 = vpop.f32.mrb[28].mxu1  ;;  %v4523_v56 = vld [vmem:[#allocation2 + $0xe2] sm:$0xff] }
 0x202   : > { %v15717_v2 = vpop.f32.mrb[60].mxu0  ;;  %1756 = vst.msk [vmem:[#allocation3 + $0xb8] sm:$0xff] %vm336_vm1, %v1724_v57  ;;  %v1273_v5 = vadd.f32 %v15653_v26, %v912_v59  ;;  %v1225_v29 = vpop.f32.mrb[29].mxu1  ;;  %16131 = vmatmul.mubr.msk.f32.gmra.mrb[134].mxu1 %vm336_vm1, %v4515_v1  ;;  %v1801_v59 = vld [vmem:[#allocation3 + $0x20] sm:$0xff] }
 0x203   : > { %v1682_v3 = vpop.f32.mrb[61].mxu0  ;;  %1755 = vst.msk [vmem:[#allocation3 + $0xb0] sm:$0xff] %vm336_vm1, %v1723_v62  ;;  %v1365_v52 = vld [vmem:[#allocation3 + $0xc8] sm:$0xff]  ;;  %v1272_v12 = vadd.f32 %v1225_v29, %v911_v53  ;;  %16133 = vmatprep.mubr.msk.f32.mxu1 %vm336_vm1, %v4516_v42  ;;  %v1804_v29 = vld [vmem:[#allocation3 + $0x38] sm:$0xff] }
 0x204   : > { %v1726_v11 = vadd.f32 %v15711_v8, %v1365_v52  ;;  %v1364_v15 = vld [vmem:[#allocation3 + $0xc0] sm:$0xff]  ;;  %1305 = vst.msk [vmem:[#allocation3 + $0xe8] sm:$0xff] %vm336_vm1, %v1273_v5  ;;  %v4525_v52 = vld [vmem:[#allocation2 + $0xfa] sm:$0xff] }
 0x205   : > { %v1725_v22 = vadd.f32 %v1662_v43, %v1364_v15  ;;  %1304 = vst.msk [vmem:[#allocation3 + $0xe0] sm:$0xff] %vm336_vm1, %v1272_v12  ;;  %v15656_v25 = vpop.f32.mrb[30].mxu1  ;;  %v4524_v53 = vld [vmem:[#allocation2 + $0xf2] sm:$0xff] }
 0x206   : > { %v15720_v35 = vpop.f32.mrb[62].mxu0  ;;  %1758 = vst.msk [vmem:[#allocation3 + $0xc8] sm:$0xff] %vm336_vm1, %v1726_v11  ;;  %v1275_v45 = vadd.f32 %v15656_v25, %v914_v16  ;;  %v1235_v48 = vpop.f32.mrb[31].mxu1  ;;  %16134 = vmatmul.mubr.msk.f32.gmra.mrb[136].mxu1 %vm336_vm1, %v4517_v38  ;;  %v1803_v16 = vld [vmem:[#allocation3 + $0x30] sm:$0xff] }
 0x207   : > { %v1692_v58 = vpop.f32.mrb[63].mxu0  ;;  %1757 = vst.msk [vmem:[#allocation3 + $0xc0] sm:$0xff] %vm336_vm1, %v1725_v22  ;;  %v1367_v27 = vld [vmem:[#allocation3 + $0xd8] sm:$0xff]  ;;  %v1274_v31 = vadd.f32 %v1235_v48, %v913_v13  ;;  %16136 = vmatprep.mubr.msk.f32.mxu1 %vm336_vm1, %v4518_v9  ;;  %v1806_v48 = vld [vmem:[#allocation3 + $0x48] sm:$0xff] }
 0x208   : > { %v1728_v47 = vadd.f32 %v15714_v14, %v1367_v27  ;;  %v1366_v51 = vld [vmem:[#allocation3 + $0xd0] sm:$0xff]  ;;  %1307 = vst.msk [vmem:[#allocation3 + $0xf8] sm:$0xff] %vm336_vm1, %v1275_v45  ;;  %v4526_v13 = vld [vmem:[#allocation2 + $0x10a] sm:$0xff]  ;;  %v4527_v27 = vld [vmem:[#allocation2 + $0x112] sm:$0xff] }
 0x209   : > { %v1727_v6 = vadd.f32 %v1672_v33, %v1366_v51  ;;  %1306 = vst.msk [vmem:[#allocation3 + $0xf0] sm:$0xff] %vm336_vm1, %v1274_v31  ;;  %v15739_v39 = vpop.f32.mrb[32].mxu1 }
 0x20a   : > { %v15803_v21 = vpop.f32.mrb[64].mxu0  ;;  %1760 = vst.msk [vmem:[#allocation3 + $0xd8] sm:$0xff] %vm336_vm1, %v1728_v47  ;;  %v2159_v23 = vadd.f32 %v15739_v39, %v1798_v17  ;;  %v1999_v36 = vpop.f32.mrb[33].mxu1  ;;  %16137 = vmatmul.mubr.msk.f32.gmra.mrb[138].mxu1 %vm336_vm1, %v4519_v19  ;;  %v1805_v47 = vld [vmem:[#allocation3 + $0x40] sm:$0xff]  ;;  %v4528_v17 = vld [vmem:[#allocation2 + $0x122] sm:$0xff] }
 0x20b   : > { %v2456_v32 = vpop.f32.mrb[65].mxu0  ;;  %1759 = vst.msk [vmem:[#allocation3 + $0xd0] sm:$0xff] %vm336_vm1, %v1727_v6  ;;  %v1369_v54 = vld [vmem:[#allocation3 + $0xe8] sm:$0xff]  ;;  %v2158_v60 = vadd.f32 %v1999_v36, %v1797_v55  ;;  %16139 = vmatprep.mubr.msk.f32.mxu1 %vm336_vm1, %v4520_v46  ;;  %v1808_v36 = vld [vmem:[#allocation3 + $0x58] sm:$0xff] }
 0x20c   : > { %v1730_v8 = vadd.f32 %v15717_v2, %v1369_v54  ;;  %v1368_v34 = vld [vmem:[#allocation3 + $0xe0] sm:$0xff]  ;;  %2191 = vst.msk [vmem:[#allocation3 + $0x8] sm:$0xff] %vm336_vm1, %v2159_v23 }
 0x20d   : > { %v1729_v30 = vadd.f32 %v1682_v3, %v1368_v34  ;;  %2190 = vst.msk [vmem:[#allocation3] sm:$0xff] %vm336_vm1, %v2158_v60  ;;  %v15742_v43 = vpop.f32.mrb[34].mxu1  ;;  %v4529_v54 = vld [vmem:[#allocation2 + $0x12a] sm:$0xff] }
 0x20e   : > { %v15806_v50 = vpop.f32.mrb[66].mxu0  ;;  %1762 = vst.msk [vmem:[#allocation3 + $0xe8] sm:$0xff] %vm336_vm1, %v1730_v8  ;;  %v2161_v4 = vadd.f32 %v15742_v43, %v1800_v28  ;;  %v2009_v37 = vpop.f32.mrb[35].mxu1  ;;  %16140 = vmatmul.mubr.msk.f32.gmra.mrb[140].mxu1 %vm336_vm1, %v4521_v49  ;;  %v1807_v8 = vld [vmem:[#allocation3 + $0x50] sm:$0xff] }
 0x20f   : > { %v2466_v40 = vpop.f32.mrb[67].mxu0  ;;  %1761 = vst.msk [vmem:[#allocation3 + $0xe0] sm:$0xff] %vm336_vm1, %v1729_v30  ;;  %v1371_v44 = vld [vmem:[#allocation3 + $0xf8] sm:$0xff]  ;;  %v2160_v41 = vadd.f32 %v2009_v37, %v1799_v7  ;;  %16142 = vmatprep.mubr.msk.f32.mxu1 %vm336_vm1, %v4522_v61  ;;  %v4530_v28 = vld [vmem:[#allocation2 + $0x13a] sm:$0xff] }
 0x210   : > { %v1732_v14 = vadd.f32 %v15720_v35, %v1371_v44  ;;  %v1370_v63 = vld [vmem:[#allocation3 + $0xf0] sm:$0xff]  ;;  %2193 = vst.msk [vmem:[#allocation3 + $0x18] sm:$0xff] %vm336_vm1, %v2161_v4  ;;  %v1810_v37 = vld [vmem:[#allocation3 + $0x68] sm:$0xff] }
 0x211   : > { %v1731_v20 = vadd.f32 %v1692_v58, %v1370_v63  ;;  %2192 = vst.msk [vmem:[#allocation3 + $0x10] sm:$0xff] %vm336_vm1, %v2160_v41  ;;  %v15745_v33 = vpop.f32.mrb[36].mxu1  ;;  %v4531_v44 = vld [vmem:[#allocation2 + $0x142] sm:$0xff] }
 0x212   : > { %v15809_v10 = vpop.f32.mrb[68].mxu0  ;;  %1764 = vst.msk [vmem:[#allocation3 + $0xf8] sm:$0xff] %vm336_vm1, %v1732_v14  ;;  %v2163_v24 = vadd.f32 %v15745_v33, %v1802_v18  ;;  %v2019_v57 = vpop.f32.mrb[37].mxu1  ;;  %16143 = vmatmul.mubr.msk.f32.gmra.mrb[142].mxu1 %vm336_vm1, %v4523_v56  ;;  %v1809_v14 = vld [vmem:[#allocation3 + $0x60] sm:$0xff] }
 0x213   : > { %v2476_v0 = vpop.f32.mrb[69].mxu0  ;;  %1763 = vst.msk [vmem:[#allocation3 + $0xf0] sm:$0xff] %vm336_vm1, %v1731_v20  ;;  %v2255_v62 = vld [vmem:[#allocation3 + $0x8] sm:$0xff]  ;;  %v2162_v26 = vadd.f32 %v2019_v57, %v1801_v59  ;;  %16145 = vmatprep.mubr.msk.f32.mxu1 %vm336_vm1, %v4524_v53  ;;  %v1812_v57 = vld [vmem:[#allocation3 + $0x78] sm:$0xff] }
 0x214   : > { %v2616_v2 = vadd.f32 %v15803_v21, %v2255_v62  ;;  %v2254_v1 = vld [vmem:[#allocation3] sm:$0xff]  ;;  %2195 = vst.msk [vmem:[#allocation3 + $0x28] sm:$0xff] %vm336_vm1, %v2163_v24  ;;  %v4533_v62 = vld [vmem:[#allocation2 + $0x15a] sm:$0xff] }
 0x215   : > { %v2615_v5 = vadd.f32 %v2456_v32, %v2254_v1  ;;  %2194 = vst.msk [vmem:[#allocation3 + $0x20] sm:$0xff] %vm336_vm1, %v2162_v26  ;;  %v15748_v3 = vpop.f32.mrb[38].mxu1  ;;  %v4532_v18 = vld [vmem:[#allocation2 + $0x152] sm:$0xff] }
 0x216   : > { %v15812_v42 = vpop.f32.mrb[70].mxu0  ;;  %2648 = vst.msk [vmem:[#allocation3 + $0x8] sm:$0xff] %vm336_vm1, %v2616_v2  ;;  %v2165_v12 = vadd.f32 %v15748_v3, %v1804_v29  ;;  %v2029_v11 = vpop.f32.mrb[39].mxu1  ;;  %16146 = vmatmul.mubr.msk.f32.gmra.mrb[144].mxu1 %vm336_vm1, %v4525_v52  ;;  %v1811_v2 = vld [vmem:[#allocation3 + $0x70] sm:$0xff]  ;;  %v4534_v29 = vld [vmem:[#allocation2 + $0x16a] sm:$0xff] }
 0x217   : > { %v2486_v15 = vpop.f32.mrb[71].mxu0  ;;  %2647 = vst.msk [vmem:[#allocation3] sm:$0xff] %vm336_vm1, %v2615_v5  ;;  %v2257_v22 = vld [vmem:[#allocation3 + $0x18] sm:$0xff]  ;;  %v2164_v25 = vadd.f32 %v2029_v11, %v1803_v16  ;;  %16148 = vmatprep.mubr.msk.f32.mxu1 %vm336_vm1, %v4526_v13  ;;  %v5164_v52 = vld [vmem:[%s21683_s5] sm:$0xff] }
 0x218   : > { %v2618_v35 = vadd.f32 %v15806_v50, %v2257_v22  ;;  %v2256_v38 = vld [vmem:[#allocation3 + $0x10] sm:$0xff]  ;;  %2197 = vst.msk [vmem:[#allocation3 + $0x38] sm:$0xff] %vm336_vm1, %v2165_v12  ;;  %v5165_v12 = vld [vmem:[%s21683_s5 + $0x8] sm:$0xff]  ;;  %v1814_v22 = vld [vmem:[#allocation3 + $0x88] sm:$0xff] }
 0x219   : > { %v2617_v45 = vadd.f32 %v2466_v40, %v2256_v38  ;;  %2196 = vst.msk [vmem:[#allocation3 + $0x30] sm:$0xff] %vm336_vm1, %v2164_v25  ;;  %v15751_v58 = vpop.f32.mrb[40].mxu1  ;;  %v4535_v38 = vld [vmem:[#allocation2 + $0x172] sm:$0xff] }
 0x21a   : > { %v15815_v9 = vpop.f32.mrb[72].mxu0  ;;  %2650 = vst.msk [vmem:[#allocation3 + $0x18] sm:$0xff] %vm336_vm1, %v2618_v35  ;;  %v2167_v31 = vadd.f32 %v15751_v58, %v1806_v48  ;;  %v2039_v51 = vpop.f32.mrb[41].mxu1  ;;  %16149 = vmatmul.mubr.msk.f32.gmra.mrb[146].mxu1 %vm336_vm1, %v4527_v27  ;;  %v1813_v48 = vld [vmem:[#allocation3 + $0x80] sm:$0xff]  ;;  %v4536_v27 = vld [vmem:[#allocation2 + $0x182] sm:$0xff] }
 0x21b   : > { %v2496_v6 = vpop.f32.mrb[73].mxu0  ;;  %2649 = vst.msk [vmem:[#allocation3 + $0x10] sm:$0xff] %vm336_vm1, %v2617_v45  ;;  %v2259_v39 = vld [vmem:[#allocation3 + $0x28] sm:$0xff]  ;;  %v2166_v21 = vadd.f32 %v2039_v51, %v1805_v47  ;;  %16151 = vmatprep.mubr.msk.f32.mxu1 %vm336_vm1, %v4528_v17 }
 0x21c   : > { %v2620_v19 = vadd.f32 %v15809_v10, %v2259_v39  ;;  %v2258_v23 = vld [vmem:[#allocation3 + $0x20] sm:$0xff]  ;;  %2199 = vst.msk [vmem:[#allocation3 + $0x48] sm:$0xff] %vm336_vm1, %v2167_v31  ;;  %v4538_v17 = vld [vmem:[#allocation2 + $0x19a] sm:$0xff] }
 0x21d   : > { %v2619_v55 = vadd.f32 %v2476_v0, %v2258_v23  ;;  %2198 = vst.msk [vmem:[#allocation3 + $0x40] sm:$0xff] %vm336_vm1, %v2166_v21  ;;  %v15754_v32 = vpop.f32.mrb[42].mxu1  ;;  %v1816_v21 = vld [vmem:[#allocation3 + $0x98] sm:$0xff] }
 0x21e   : > { %v15818_v46 = vpop.f32.mrb[74].mxu0  ;;  %2652 = vst.msk [vmem:[#allocation3 + $0x28] sm:$0xff] %vm336_vm1, %v2620_v19  ;;  %v2169_v60 = vadd.f32 %v15754_v32, %v1808_v36  ;;  %v2049_v34 = vpop.f32.mrb[43].mxu1  ;;  %16152 = vmatmul.mubr.msk.f32.gmra.mrb[148].mxu1 %vm336_vm1, %v4529_v54  ;;  %v1815_v32 = vld [vmem:[#allocation3 + $0x90] sm:$0xff] }
 0x21f   : > { %v2506_v30 = vpop.f32.mrb[75].mxu0  ;;  %2651 = vst.msk [vmem:[#allocation3 + $0x20] sm:$0xff] %vm336_vm1, %v2619_v55  ;;  %v2261_v43 = vld [vmem:[#allocation3 + $0x38] sm:$0xff]  ;;  %v2168_v50 = vadd.f32 %v2049_v34, %v1807_v8  ;;  %16154 = vmatprep.mubr.msk.f32.mxu1 %vm336_vm1, %v4530_v28 }
 0x220   : > { %v2622_v49 = vadd.f32 %v15812_v42, %v2261_v43  ;;  %v2260_v4 = vld [vmem:[#allocation3 + $0x30] sm:$0xff]  ;;  %2201 = vst.msk [vmem:[#allocation3 + $0x58] sm:$0xff] %vm336_vm1, %v2169_v60  ;;  %v4537_v55 = vld [vmem:[#allocation2 + $0x18a] sm:$0xff] }
 0x221   : > { %v2621_v7 = vadd.f32 %v2486_v15, %v2260_v4  ;;  %2200 = vst.msk [vmem:[#allocation3 + $0x50] sm:$0xff] %vm336_vm1, %v2168_v50  ;;  %v15757_v40 = vpop.f32.mrb[44].mxu1  ;;  %v17401_v15 = vpack.c.bf16 %v5165_v12, %v5164_v52  ;;  %v4539_v34 = vld [vmem:[#allocation2 + $0x1a2] sm:$0xff]  ;;  %v1818_v50 = vld [vmem:[#allocation3 + $0xa8] sm:$0xff] }
 0x222   : > { %v15821_v61 = vpop.f32.mrb[76].mxu0  ;;  %2654 = vst.msk [vmem:[#allocation3 + $0x38] sm:$0xff] %vm336_vm1, %v2622_v49  ;;  %v2171_v41 = vadd.f32 %v15757_v40, %v1810_v37  ;;  %v2059_v63 = vpop.f32.mrb[45].mxu1  ;;  %16155 = vmatmul.mubr.msk.f32.gmra.mrb[150].mxu1 %vm336_vm1, %v4531_v44  ;;  %v1817_v37 = vld [vmem:[#allocation3 + $0xa0] sm:$0xff] }
 0x223   : > { %v2516_v20 = vpop.f32.mrb[77].mxu0  ;;  %2653 = vst.msk [vmem:[#allocation3 + $0x30] sm:$0xff] %vm336_vm1, %v2621_v7  ;;  %v2263_v33 = vld [vmem:[#allocation3 + $0x48] sm:$0xff]  ;;  %v2170_v10 = vadd.f32 %v2059_v63, %v1809_v14  ;;  %16157 = vmatprep.mubr.msk.f32.mxu1 %vm336_vm1, %v4532_v18  ;;  %17402 = vmatprep.subr.bf16.mxu0 %v17401_v15  ;;  %v1820_v18 = vld [vmem:[#allocation3 + $0xb8] sm:$0xff] }
 0x224   : > { %v2624_v56 = vadd.f32 %v15815_v9, %v2263_v33  ;;  %v2262_v24 = vld [vmem:[#allocation3 + $0x40] sm:$0xff]  ;;  %2203 = vst.msk [vmem:[#allocation3 + $0x68] sm:$0xff] %vm336_vm1, %v2171_v41  ;;  %17404 = vmatpush3.bf16.msra.mxu0 %v17401_v15 }
 0x225   : > { %v2623_v59 = vadd.f32 %v2496_v6, %v2262_v24  ;;  %2202 = vst.msk [vmem:[#allocation3 + $0x60] sm:$0xff] %vm336_vm1, %v2170_v10  ;;  %v15760_v0 = vpop.f32.mrb[46].mxu1  ;;  %v1819_v24 = vld [vmem:[#allocation3 + $0xb0] sm:$0xff] }
 0x226   : > { %v15824_v53 = vpop.f32.mrb[78].mxu0  ;;  %2656 = vst.msk [vmem:[#allocation3 + $0x48] sm:$0xff] %vm336_vm1, %v2624_v56  ;;  %v2173_v26 = vadd.f32 %v15760_v0, %v1812_v57  ;;  %v2069_v1 = vpop.f32.mrb[47].mxu1  ;;  %16158 = vmatmul.mubr.msk.f32.gmra.mrb[152].mxu1 %vm336_vm1, %v4533_v62  ;;  %v5166_v62 = vld [vmem:[%s21683_s5 + $0x10] sm:$0xff] }
 0x227   : > { %v2526_v5 = vpop.f32.mrb[79].mxu0  ;;  %2655 = vst.msk [vmem:[#allocation3 + $0x40] sm:$0xff] %vm336_vm1, %v2623_v59  ;;  %v2265_v3 = vld [vmem:[#allocation3 + $0x58] sm:$0xff]  ;;  %v2172_v42 = vadd.f32 %v2069_v1, %v1811_v2  ;;  %16160 = vmatprep.mubr.msk.f32.mxu1 %vm336_vm1, %v4534_v29 }
 0x228   : > { %v2626_v16 = vadd.f32 %v15818_v46, %v2265_v3  ;;  %v2264_v11 = vld [vmem:[#allocation3 + $0x50] sm:$0xff]  ;;  %2205 = vst.msk [vmem:[#allocation3 + $0x78] sm:$0xff] %vm336_vm1, %v2173_v26  ;;  %v5167_v26 = vld [vmem:[%s21683_s5 + $0x18] sm:$0xff] }
 0x229   : > { %v2625_v13 = vadd.f32 %v2506_v30, %v2264_v11  ;;  %2204 = vst.msk [vmem:[#allocation3 + $0x70] sm:$0xff] %vm336_vm1, %v2172_v42  ;;  %v15763_v25 = vpop.f32.mrb[48].mxu1  ;;  %v1822_v3 = vld [vmem:[#allocation3 + $0xc8] sm:$0xff] }
 0x22a   : > { %v15827_v35 = vpop.f32.mrb[80].mxu0  ;;  %2658 = vst.msk [vmem:[#allocation3 + $0x58] sm:$0xff] %vm336_vm1, %v2626_v16  ;;  %v2175_v45 = vadd.f32 %v15763_v25, %v1814_v22  ;;  %v2079_v58 = vpop.f32.mrb[49].mxu1  ;;  %16161 = vmatmul.mubr.msk.f32.gmra.mrb[154].mxu1 %vm336_vm1, %v4535_v38  ;;  %v1821_v16 = vld [vmem:[#allocation3 + $0xc0] sm:$0xff] }
 0x22b   : > { %v2536_v9 = vpop.f32.mrb[81].mxu0  ;;  %2657 = vst.msk [vmem:[#allocation3 + $0x50] sm:$0xff] %vm336_vm1, %v2625_v13  ;;  %v2267_v31 = vld [vmem:[#allocation3 + $0x68] sm:$0xff]  ;;  %v2174_v47 = vadd.f32 %v2079_v58, %v1813_v48  ;;  %16163 = vmatprep.mubr.msk.f32.mxu1 %vm336_vm1, %v4536_v27  ;;  %v1823_v27 = vld [vmem:[#allocation3 + $0xd0] sm:$0xff] }
 0x22c   : > { %v2628_v51 = vadd.f32 %v15821_v61, %v2267_v31  ;;  %v2266_v6 = vld [vmem:[#allocation3 + $0x60] sm:$0xff]  ;;  %2207 = vst.msk [vmem:[#allocation3 + $0x88] sm:$0xff] %vm336_vm1, %v2175_v45  ;;  %v1824_v45 = vld [vmem:[#allocation3 + $0xd8] sm:$0xff] }
 0x22d   : > { %v2627_v39 = vadd.f32 %v2516_v20, %v2266_v6  ;;  %2206 = vst.msk [vmem:[#allocation3 + $0x80] sm:$0xff] %vm336_vm1, %v2174_v47  ;;  %v15766_v19 = vpop.f32.mrb[50].mxu1 }
 0x22e   : > { %v15830_v23 = vpop.f32.mrb[82].mxu0  ;;  %2660 = vst.msk [vmem:[#allocation3 + $0x68] sm:$0xff] %vm336_vm1, %v2628_v51  ;;  %v2177_v36 = vadd.f32 %v15766_v19, %v1816_v21  ;;  %v2089_v46 = vpop.f32.mrb[51].mxu1  ;;  %16164 = vmatmul.mubr.msk.f32.gmra.mrb[156].mxu1 %vm336_vm1, %v4537_v55  ;;  %v1826_v19 = vld [vmem:[#allocation3 + $0xe8] sm:$0xff] }
 0x22f   : > { %v2546_v54 = vpop.f32.mrb[83].mxu0  ;;  %2659 = vst.msk [vmem:[#allocation3 + $0x60] sm:$0xff] %vm336_vm1, %v2627_v39  ;;  %v2269_v60 = vld [vmem:[#allocation3 + $0x78] sm:$0xff]  ;;  %v2176_v8 = vadd.f32 %v2089_v46, %v1815_v32  ;;  %16166 = vmatprep.mubr.msk.f32.mxu1 %vm336_vm1, %v4538_v17  ;;  %v1825_v32 = vld [vmem:[#allocation3 + $0xe0] sm:$0xff] }
 0x230   : > { %v2630_v30 = vadd.f32 %v15824_v53, %v2269_v60  ;;  %v2268_v28 = vld [vmem:[#allocation3 + $0x70] sm:$0xff]  ;;  %2209 = vst.msk [vmem:[#allocation3 + $0x98] sm:$0xff] %vm336_vm1, %v2177_v36 }
 0x231   : > { %v2629_v43 = vadd.f32 %v2526_v5, %v2268_v28  ;;  %2208 = vst.msk [vmem:[#allocation3 + $0x90] sm:$0xff] %vm336_vm1, %v2176_v8  ;;  %v15769_v49 = vpop.f32.mrb[52].mxu1  ;;  %v17405_v5 = vpack.c.bf16 %v5167_v26, %v5166_v62 }
 0x232   : > { %v15833_v4 = vpop.f32.mrb[84].mxu0  ;;  %2662 = vst.msk [vmem:[#allocation3 + $0x78] sm:$0xff] %vm336_vm1, %v2630_v30  ;;  %v2179_v7 = vadd.f32 %v15769_v49, %v1818_v50  ;;  %v2099_v40 = vpop.f32.mrb[53].mxu1  ;;  %16167 = vmatmul.mubr.msk.f32.gmra.mrb[158].mxu1 %vm336_vm1, %v4539_v34 }
 0x233   : > { %v2556_v61 = vpop.f32.mrb[85].mxu0  ;;  %2661 = vst.msk [vmem:[#allocation3 + $0x70] sm:$0xff] %vm336_vm1, %v2629_v43  ;;  %v2271_v44 = vld [vmem:[#allocation3 + $0x88] sm:$0xff]  ;;  %v2178_v41 = vadd.f32 %v2099_v40, %v1817_v37  ;;  %17406 = vmatprep.subr.bf16.mxu0 %v17405_v5  ;;  %v1828_v43 = vld [vmem:[#allocation3 + $0xf8] sm:$0xff] }
 0x234   : > { %v2632_v14 = vadd.f32 %v15827_v35, %v2271_v44  ;;  %v2270_v63 = vld [vmem:[#allocation3 + $0x80] sm:$0xff]  ;;  %2211 = vst.msk [vmem:[#allocation3 + $0xa8] sm:$0xff] %vm336_vm1, %v2179_v7  ;;  %17408 = vmatpush3.bf16.msra.mxu0 %v17405_v5  ;;  %v1827_v7 = vld [vmem:[#allocation3 + $0xf0] sm:$0xff] }
 0x235   : > { %v2631_v20 = vadd.f32 %v2536_v9, %v2270_v63  ;;  %2210 = vst.msk [vmem:[#allocation3 + $0xa0] sm:$0xff] %vm336_vm1, %v2178_v41  ;;  %v15772_v33 = vpop.f32.mrb[54].mxu1  ;;  %v5168_v41 = vld [vmem:[%s21683_s5 + $0x20] sm:$0xff] }
 0x236   : > { %v15836_v10 = vpop.f32.mrb[86].mxu0  ;;  %2664 = vst.msk [vmem:[#allocation3 + $0x88] sm:$0xff] %vm336_vm1, %v2632_v14  ;;  %v2181_v56 = vadd.f32 %v15772_v33, %v1820_v18  ;;  %v2109_v59 = vpop.f32.mrb[55].mxu1  ;;  %v5169_v14 = vld [vmem:[%s21683_s5 + $0x28] sm:$0xff] }
 0x237   : > { %v2566_v57 = vpop.f32.mrb[87].mxu0  ;;  %2663 = vst.msk [vmem:[#allocation3 + $0x80] sm:$0xff] %vm336_vm1, %v2631_v20  ;;  %v2273_v0 = vld [vmem:[#allocation3 + $0x98] sm:$0xff]  ;;  %v2180_v53 = vadd.f32 %v2109_v59, %v1819_v24  ;;  %v17409_v18 = vpack.c.bf16 %v5169_v14, %v5168_v41  ;;  %v2719_v41 = vld [vmem:[#allocation3 + $0x40] sm:$0xff] }
 0x238   : > { %v2634_v2 = vadd.f32 %v15830_v23, %v2273_v0  ;;  %v2272_v1 = vld [vmem:[#allocation3 + $0x90] sm:$0xff]  ;;  %2213 = vst.msk [vmem:[#allocation3 + $0xb8] sm:$0xff] %vm336_vm1, %v2181_v56 }
 0x239   : > { %v2633_v29 = vadd.f32 %v2546_v54, %v2272_v1  ;;  %2212 = vst.msk [vmem:[#allocation3 + $0xb0] sm:$0xff] %vm336_vm1, %v2180_v53  ;;  %v15775_v42 = vpop.f32.mrb[56].mxu1  ;;  %17410 = vmatprep.subr.bf16.mxu0 %v17409_v18 }
 0x23a   : > { %v15839_v52 = vpop.f32.mrb[88].mxu0  ;;  %2666 = vst.msk [vmem:[#allocation3 + $0x98] sm:$0xff] %vm336_vm1, %v2634_v2  ;;  %v2183_v12 = vadd.f32 %v15775_v42, %v1822_v3  ;;  %v2119_v11 = vpop.f32.mrb[57].mxu1  ;;  %17412 = vmatpush3.bf16.msra.mxu0 %v17409_v18 }
 0x23b   : > { %v2576_v15 = vpop.f32.mrb[89].mxu0  ;;  %2665 = vst.msk [vmem:[#allocation3 + $0x90] sm:$0xff] %vm336_vm1, %v2633_v29  ;;  %v2275_v13 = vld [vmem:[#allocation3 + $0xa8] sm:$0xff]  ;;  %v2182_v22 = vadd.f32 %v2119_v11, %v1821_v16  ;;  %v2714_v29 = vld [vmem:[#allocation3 + $0x18] sm:$0xff] }
 0x23c   : > { %v2636_v25 = vadd.f32 %v15833_v4, %v2275_v13  ;;  %v2274_v35 = vld [vmem:[#allocation3 + $0xa0] sm:$0xff]  ;;  %2215 = vst.msk [vmem:[#allocation3 + $0xc8] sm:$0xff] %vm336_vm1, %v2183_v12  ;;  %v2713_v12 = vld [vmem:[#allocation3 + $0x10] sm:$0xff] }
 0x23d   : > { %v2635_v38 = vadd.f32 %v2556_v61, %v2274_v35  ;;  %2214 = vst.msk [vmem:[#allocation3 + $0xc0] sm:$0xff] %vm336_vm1, %v2182_v22  ;;  %v15778_v48 = vpop.f32.mrb[58].mxu1 }
 0x23e   : > { %v15842_v58 = vpop.f32.mrb[90].mxu0  ;;  %2668 = vst.msk [vmem:[#allocation3 + $0xa8] sm:$0xff] %vm336_vm1, %v2636_v25  ;;  %v2185_v9 = vadd.f32 %v15778_v48, %v1824_v45  ;;  %v2129_v31 = vpop.f32.mrb[59].mxu1 }
 0x23f   : > { %v2586_v47 = vpop.f32.mrb[91].mxu0  ;;  %2667 = vst.msk [vmem:[#allocation3 + $0xa0] sm:$0xff] %vm336_vm1, %v2635_v38  ;;  %v2277_v51 = vld [vmem:[#allocation3 + $0xb8] sm:$0xff]  ;;  %v2184_v6 = vadd.f32 %v2129_v31, %v1823_v27  ;;  %v2716_v38 = vld [vmem:[#allocation3 + $0x28] sm:$0xff] }
 0x240   : > { %v2638_v17 = vadd.f32 %v15836_v10, %v2277_v51  ;;  %v2276_v39 = vld [vmem:[#allocation3 + $0xb0] sm:$0xff]  ;;  %2217 = vst.msk [vmem:[#allocation3 + $0xd8] sm:$0xff] %vm336_vm1, %v2185_v9  ;;  %v2712_v10 = vld [vmem:[#allocation3 + $0x8] sm:$0xff]  ;;  %v2715_v9 = vld [vmem:[#allocation3 + $0x20] sm:$0xff] }
 0x241   : > { %v2637_v21 = vadd.f32 %v2566_v57, %v2276_v39  ;;  %2216 = vst.msk [vmem:[#allocation3 + $0xd0] sm:$0xff] %vm336_vm1, %v2184_v6  ;;  %v15781_v23 = vpop.f32.mrb[60].mxu1  ;;  %v2711_v57 = vld [vmem:[#allocation3] sm:$0xff] }
 0x242   : > { %v15845_v55 = vpop.f32.mrb[92].mxu0  ;;  %2670 = vst.msk [vmem:[#allocation3 + $0xb8] sm:$0xff] %vm336_vm1, %v2638_v17  ;;  %v2187_v36 = vadd.f32 %v15781_v23, %v1826_v19  ;;  %v2139_v46 = vpop.f32.mrb[61].mxu1 }
 0x243   : > { %v2596_v54 = vpop.f32.mrb[93].mxu0  ;;  %2669 = vst.msk [vmem:[#allocation3 + $0xb0] sm:$0xff] %vm336_vm1, %v2637_v21  ;;  %v2279_v60 = vld [vmem:[#allocation3 + $0xc8] sm:$0xff]  ;;  %v2186_v8 = vadd.f32 %v2139_v46, %v1825_v32  ;;  %v2718_v21 = vld [vmem:[#allocation3 + $0x38] sm:$0xff] }
 0x244   : > { %v2640_v34 = vadd.f32 %v15839_v52, %v2279_v60  ;;  %v2278_v30 = vld [vmem:[#allocation3 + $0xc0] sm:$0xff]  ;;  %2219 = vst.msk [vmem:[#allocation3 + $0xe8] sm:$0xff] %vm336_vm1, %v2187_v36  ;;  %v2717_v36 = vld [vmem:[#allocation3 + $0x30] sm:$0xff] }
 0x245   : > { %v2639_v28 = vadd.f32 %v2576_v15, %v2278_v30  ;;  %2218 = vst.msk [vmem:[#allocation3 + $0xe0] sm:$0xff] %vm336_vm1, %v2186_v8  ;;  %v15784_v50 = vpop.f32.mrb[62].mxu1  ;;  %v5170_v8 = vld [vmem:[%s21683_s5 + $0x30] sm:$0xff] }
 0x246   : > { %v15848_v49 = vpop.f32.mrb[94].mxu0  ;;  %2672 = vst.msk [vmem:[#allocation3 + $0xc8] sm:$0xff] %vm336_vm1, %v2640_v34  ;;  %v2189_v4 = vadd.f32 %v15784_v50, %v1828_v43  ;;  %v2149_v37 = vpop.f32.mrb[63].mxu1  ;;  %v5171_v34 = vld [vmem:[%s21683_s5 + $0x38] sm:$0xff]  ;;  %v5621_v50 = vld [vmem:[%s21683_s5 + $0x40] sm:$0xff] }
 0x247   : > { %v2606_v40 = vpop.f32.mrb[95].mxu0  ;;  %2671 = vst.msk [vmem:[#allocation3 + $0xc0] sm:$0xff] %vm336_vm1, %v2639_v28  ;;  %v2281_v61 = vld [vmem:[#allocation3 + $0xd8] sm:$0xff]  ;;  %v2188_v44 = vadd.f32 %v2149_v37, %v1827_v7  ;;  %v17413_v43 = vpack.c.bf16 %v5171_v34, %v5170_v8  ;;  %v2720_v7 = vld [vmem:[#allocation3 + $0x48] sm:$0xff] }
 0x248   : > { %v2642_v63 = vadd.f32 %v15842_v58, %v2281_v61  ;;  %v2280_v20 = vld [vmem:[#allocation3 + $0xd0] sm:$0xff]  ;;  %2221 = vst.msk [vmem:[#allocation3 + $0xf8] sm:$0xff] %vm336_vm1, %v2189_v4  ;;  %v5101_v8 = vld [vmem:[#allocation2 + $0x8] sm:$0xff] }
 0x249   : > { %v2641_v33 = vadd.f32 %v2586_v47, %v2280_v20  ;;  %2220 = vst.msk [vmem:[#allocation3 + $0xf0] sm:$0xff] %vm336_vm1, %v2188_v44  ;;  %v15867_v56 = vpop.f32.mrb[64].mxu1  ;;  %17414 = vmatprep.subr.bf16.mxu0 %v17413_v43 }
 0x24a   : > { %v15931_v24 = vpop.f32.mrb[96].mxu0  ;;  %2674 = vst.msk [vmem:[#allocation3 + $0xd8] sm:$0xff] %vm336_vm1, %v2642_v63  ;;  %v3073_v59 = vadd.f32 %v15867_v56, %v2712_v10  ;;  %v2913_v0 = vpop.f32.mrb[65].mxu1  ;;  %17416 = vmatpush3.bf16.msra.mxu0 %v17413_v43  ;;  %v5624_v10 = vld [vmem:[%s21683_s5 + $0x58] sm:$0xff]  ;;  %v6078_v43 = vld [vmem:[%s21683_s5 + $0x80] sm:$0xff] }
 0x24b   : > { %v3370_v53 = vpop.f32.mrb[97].mxu0  ;;  %2673 = vst.msk [vmem:[#allocation3 + $0xd0] sm:$0xff] %vm336_vm1, %v2641_v33  ;;  %v2283_v62 = vld [vmem:[#allocation3 + $0xe8] sm:$0xff]  ;;  %v3072_v26 = vadd.f32 %v2913_v0, %v2711_v57  ;;  %v5623_v33 = vld [vmem:[%s21683_s5 + $0x50] sm:$0xff]  ;;  %v2722_v0 = vld [vmem:[#allocation3 + $0x58] sm:$0xff] }
 0x24c   : > { %v2644_v2 = vadd.f32 %v15845_v55, %v2283_v62  ;;  %v2282_v1 = vld [vmem:[#allocation3 + $0xe0] sm:$0xff]  ;;  %3105 = vst.msk [vmem:[#allocation3 + $0x8] sm:$0xff] %vm336_vm1, %v3073_v59  ;;  %v17421_v59 = vpack.c.bf16 %v5624_v10, %v5623_v33 }
 0x24d   : > { %v2643_v5 = vadd.f32 %v2596_v54, %v2282_v1  ;;  %3104 = vst.msk [vmem:[#allocation3] sm:$0xff] %vm336_vm1, %v3072_v26  ;;  %v15870_v3 = vpop.f32.mrb[66].mxu1 }
 0x24e   : > { %v15934_v42 = vpop.f32.mrb[98].mxu0  ;;  %2676 = vst.msk [vmem:[#allocation3 + $0xe8] sm:$0xff] %vm336_vm1, %v2644_v2  ;;  %v3075_v52 = vadd.f32 %v15870_v3, %v2714_v29  ;;  %v2923_v16 = vpop.f32.mrb[67].mxu1  ;;  %v2721_v2 = vld [vmem:[#allocation3 + $0x50] sm:$0xff] }
 0x24f   : > { %v3380_v11 = vpop.f32.mrb[99].mxu0  ;;  %2675 = vst.msk [vmem:[#allocation3 + $0xe0] sm:$0xff] %vm336_vm1, %v2643_v5  ;;  %v2285_v15 = vld [vmem:[#allocation3 + $0xf8] sm:$0xff]  ;;  %v3074_v13 = vadd.f32 %v2923_v16, %v2713_v12 }
 0x250   : > { %v2646_v22 = vadd.f32 %v15848_v49, %v2285_v15  ;;  %v2284_v25 = vld [vmem:[#allocation3 + $0xf0] sm:$0xff]  ;;  %3107 = vst.msk [vmem:[#allocation3 + $0x18] sm:$0xff] %vm336_vm1, %v3075_v52  ;;  %v5622_v49 = vld [vmem:[%s21683_s5 + $0x48] sm:$0xff] }
 0x251   : > { %v2645_v35 = vadd.f32 %v2606_v40, %v2284_v25  ;;  %3106 = vst.msk [vmem:[#allocation3 + $0x10] sm:$0xff] %vm336_vm1, %v3074_v13  ;;  %v15873_v45 = vpop.f32.mrb[68].mxu1  ;;  %v17417_v61 = vpack.c.bf16 %v5622_v49, %v5621_v50  ;;  %v5626_v52 = vld [vmem:[%s21683_s5 + $0x68] sm:$0xff]  ;;  %v2724_v13 = vld [vmem:[#allocation3 + $0x68] sm:$0xff] }
 0x252   : > { %v15937_v48 = vpop.f32.mrb[100].mxu0  ;;  %2678 = vst.msk [vmem:[#allocation3 + $0xf8] sm:$0xff] %vm336_vm1, %v2646_v22  ;;  %v3077_v58 = vadd.f32 %v15873_v45, %v2716_v38  ;;  %v2933_v27 = vpop.f32.mrb[69].mxu1  ;;  %v2723_v38 = vld [vmem:[#allocation3 + $0x60] sm:$0xff]  ;;  %v2728_v49 = vld [vmem:[#allocation3 + $0x88] sm:$0xff] }
 0x253   : > { %v3390_v31 = vpop.f32.mrb[101].mxu0  ;;  %2677 = vst.msk [vmem:[#allocation3 + $0xf0] sm:$0xff] %vm336_vm1, %v2645_v35  ;;  %v3169_v47 = vld [vmem:[#allocation3 + $0x8] sm:$0xff]  ;;  %v3076_v51 = vadd.f32 %v2933_v27, %v2715_v9  ;;  %17418 = vmatprep.subr.bf16.mxu1 %v17417_v61  ;;  %v5627_v27 = vld [vmem:[%s21683_s5 + $0x70] sm:$0xff] }
 0x254   : > { %v3530_v6 = vadd.f32 %v15931_v24, %v3169_v47  ;;  %v3168_v17 = vld [vmem:[#allocation3] sm:$0xff]  ;;  %3109 = vst.msk [vmem:[#allocation3 + $0x28] sm:$0xff] %vm336_vm1, %v3077_v58  ;;  %17420 = vmatpush3.bf16.msra.mxu1 %v17417_v61 }
 0x255   : > { %v3529_v39 = vadd.f32 %v3370_v53, %v3168_v17  ;;  %3108 = vst.msk [vmem:[#allocation3 + $0x20] sm:$0xff] %vm336_vm1, %v3076_v51  ;;  %v15876_v19 = vpop.f32.mrb[70].mxu1  ;;  %17422 = vmatprep.subr.bf16.mxu1 %v17421_v59 }
 0x256   : > { %v15940_v23 = vpop.f32.mrb[102].mxu0  ;;  %3562 = vst.msk [vmem:[#allocation3 + $0x8] sm:$0xff] %vm336_vm1, %v3530_v6  ;;  %v3079_v55 = vadd.f32 %v15876_v19, %v2718_v21  ;;  %v2943_v32 = vpop.f32.mrb[71].mxu1 }
 0x257   : > { %v3400_v46 = vpop.f32.mrb[103].mxu0  ;;  %3561 = vst.msk [vmem:[#allocation3] sm:$0xff] %vm336_vm1, %v3529_v39  ;;  %v3171_v54 = vld [vmem:[#allocation3 + $0x18] sm:$0xff]  ;;  %v3078_v60 = vadd.f32 %v2943_v32, %v2717_v36 }
 0x258   : > { %v3532_v30 = vadd.f32 %v15934_v42, %v3171_v54  ;;  %v3170_v28 = vld [vmem:[#allocation3 + $0x10] sm:$0xff]  ;;  %3111 = vst.msk [vmem:[#allocation3 + $0x38] sm:$0xff] %vm336_vm1, %v3079_v55  ;;  %17424 = vmatpush3.bf16.msra.mxu1 %v17421_v59  ;;  %v2726_v39 = vld [vmem:[#allocation3 + $0x78] sm:$0xff] }
 0x259   : > { %v3531_v4 = vadd.f32 %v3380_v11, %v3170_v28  ;;  %3110 = vst.msk [vmem:[#allocation3 + $0x30] sm:$0xff] %vm336_vm1, %v3078_v60  ;;  %v15879_v37 = vpop.f32.mrb[72].mxu1  ;;  %v5625_v42 = vld [vmem:[%s21683_s5 + $0x60] sm:$0xff] }
 0x25a   : > { %v15943_v40 = vpop.f32.mrb[104].mxu0  ;;  %3564 = vst.msk [vmem:[#allocation3 + $0x18] sm:$0xff] %vm336_vm1, %v3532_v30  ;;  %v3081_v44 = vadd.f32 %v15879_v37, %v2720_v7  ;;  %v2953_v14 = vpop.f32.mrb[73].mxu1  ;;  %v17425_v11 = vpack.c.bf16 %v5626_v52, %v5625_v42  ;;  %v2725_v55 = vld [vmem:[#allocation3 + $0x70] sm:$0xff]  ;;  %v6079_v37 = vld [vmem:[%s21683_s5 + $0x88] sm:$0xff]  ;;  %v2732_v42 = vld [vmem:[#allocation3 + $0xa8] sm:$0xff] }
 0x25b   : > { %v3410_v63 = vpop.f32.mrb[105].mxu0  ;;  %3563 = vst.msk [vmem:[#allocation3 + $0x10] sm:$0xff] %vm336_vm1, %v3531_v4  ;;  %v3173_v20 = vld [vmem:[#allocation3 + $0x28] sm:$0xff]  ;;  %v3080_v18 = vadd.f32 %v2953_v14, %v2719_v41  ;;  %v5100_v60 = vld [vmem:[#allocation2] sm:$0xff] }
 0x25c   : > { %v3534_v56 = vadd.f32 %v15937_v48, %v3173_v20  ;;  %v3172_v24 = vld [vmem:[#allocation3 + $0x20] sm:$0xff]  ;;  %3113 = vst.msk [vmem:[#allocation3 + $0x48] sm:$0xff] %vm336_vm1, %v3081_v44  ;;  %17426 = vmatprep.subr.bf16.mxu1 %v17425_v11  ;;  %16185 = vmatprep.mubr.msk.f32.mxu0 %vm336_vm1, %v5100_v60  ;;  %v5557_v28 = vld [vmem:[#allocation2 + $0x1] sm:$0xff] }
 0x25d   : > { %v3533_v57 = vadd.f32 %v3390_v31, %v3172_v24  ;;  %3112 = vst.msk [vmem:[#allocation3 + $0x40] sm:$0xff] %vm336_vm1, %v3080_v18  ;;  %v15882_v53 = vpop.f32.mrb[74].mxu1  ;;  %v5628_v31 = vld [vmem:[%s21683_s5 + $0x78] sm:$0xff]  ;;  %17428 = vmatpush3.bf16.msra.mxu1 %v17425_v11  ;;  %16186 = vmatmul.mubr.msk.f32.vlgmr.msra.gmra.mrb[160].mxu0 %vm336_vm1, %v5101_v8  ;;  %v2727_v44 = vld [vmem:[#allocation3 + $0x80] sm:$0xff]  ;;  %v2730_v24 = vld [vmem:[#allocation3 + $0x98] sm:$0xff] }
 0x25e   : > { %v15946_v62 = vpop.f32.mrb[106].mxu0  ;;  %3566 = vst.msk [vmem:[#allocation3 + $0x28] sm:$0xff] %vm336_vm1, %v3534_v56  ;;  %v3083_v26 = vadd.f32 %v15882_v53, %v2722_v0  ;;  %v2963_v1 = vpop.f32.mrb[75].mxu1  ;;  %v17429_v6 = vpack.c.bf16 %v5628_v31, %v5627_v27  ;;  %16249 = vmatprep.mubr.msk.f32.mxu1 %vm336_vm1, %v5557_v28  ;;  %v2729_v53 = vld [vmem:[#allocation3 + $0x90] sm:$0xff]  ;;  %v2731_v11 = vld [vmem:[#allocation3 + $0xa0] sm:$0xff] }
 0x25f   : > { %v3420_v5 = vpop.f32.mrb[107].mxu0  ;;  %3565 = vst.msk [vmem:[#allocation3 + $0x20] sm:$0xff] %vm336_vm1, %v3533_v57  ;;  %v3175_v29 = vld [vmem:[#allocation3 + $0x38] sm:$0xff]  ;;  %v3082_v3 = vadd.f32 %v2963_v1, %v2721_v2  ;;  %v2733_v31 = vld [vmem:[#allocation3 + $0xb0] sm:$0xff]  ;;  %v2735_v8 = vld [vmem:[#allocation3 + $0xc0] sm:$0xff] }
 0x260   : > { %v3536_v12 = vadd.f32 %v15940_v23, %v3175_v29  ;;  %v3174_v16 = vld [vmem:[#allocation3 + $0x30] sm:$0xff]  ;;  %3115 = vst.msk [vmem:[#allocation3 + $0x58] sm:$0xff] %vm336_vm1, %v3083_v26  ;;  %17430 = vmatprep.subr.bf16.mxu1 %v17429_v6 }
 0x261   : > { %v3535_v15 = vadd.f32 %v3400_v46, %v3174_v16  ;;  %3114 = vst.msk [vmem:[#allocation3 + $0x50] sm:$0xff] %vm336_vm1, %v3082_v3  ;;  %v15885_v22 = vpop.f32.mrb[76].mxu1  ;;  %17432 = vmatpush3.bf16.msra.mxu1 %v17429_v6 }
 0x262   : > { %v15949_v25 = vpop.f32.mrb[108].mxu0  ;;  %3568 = vst.msk [vmem:[#allocation3 + $0x38] sm:$0xff] %vm336_vm1, %v3536_v12  ;;  %v3085_v35 = vadd.f32 %v15885_v22, %v2724_v13  ;;  %v2973_v45 = vpop.f32.mrb[77].mxu1 }
 0x263   : > { %v3430_v48 = vpop.f32.mrb[109].mxu0  ;;  %3567 = vst.msk [vmem:[#allocation3 + $0x30] sm:$0xff] %vm336_vm1, %v3535_v15  ;;  %v3177_v58 = vld [vmem:[#allocation3 + $0x48] sm:$0xff]  ;;  %v3084_v9 = vadd.f32 %v2973_v45, %v2723_v38 }
 0x264   : > { %v3538_v47 = vadd.f32 %v15943_v40, %v3177_v58  ;;  %v3176_v51 = vld [vmem:[#allocation3 + $0x40] sm:$0xff]  ;;  %3117 = vst.msk [vmem:[#allocation3 + $0x68] sm:$0xff] %vm336_vm1, %v3085_v35 }
 0x265   : > { %v3537_v17 = vadd.f32 %v3410_v63, %v3176_v51  ;;  %3116 = vst.msk [vmem:[#allocation3 + $0x60] sm:$0xff] %vm336_vm1, %v3084_v9  ;;  %v15888_v21 = vpop.f32.mrb[78].mxu1  ;;  %v5558_v40 = vld [vmem:[#allocation2 + $0x9] sm:$0xff]  ;;  %v17433_v63 = vpack.c.bf16 %v6079_v37, %v6078_v43 }
 0x266   : > { %v15952_v19 = vpop.f32.mrb[110].mxu0  ;;  %3570 = vst.msk [vmem:[#allocation3 + $0x48] sm:$0xff] %vm336_vm1, %v3538_v47  ;;  %v3087_v23 = vadd.f32 %v15888_v21, %v2726_v39  ;;  %v2983_v36 = vpop.f32.mrb[79].mxu1  ;;  %16250 = vmatmul.mubr.msk.f32.vlgmr.msra.gmra.mrb[160].mxu1 %vm336_vm1, %v5558_v40  ;;  %v6080_v39 = vld [vmem:[%s21683_s5 + $0x90] sm:$0xff]  ;;  %v6081_v21 = vld [vmem:[%s21683_s5 + $0x98] sm:$0xff] }
 0x267   : > { %v3440_v32 = vpop.f32.mrb[111].mxu0  ;;  %3569 = vst.msk [vmem:[#allocation3 + $0x40] sm:$0xff] %vm336_vm1, %v3537_v17  ;;  %v3179_v46 = vld [vmem:[#allocation3 + $0x58] sm:$0xff]  ;;  %v3086_v54 = vadd.f32 %v2983_v36, %v2725_v55  ;;  %17434 = vmatprep.subr.bf16.mxu0 %v17433_v63  ;;  %v17437_v55 = vpack.c.bf16 %v6081_v21, %v6080_v39 }
 0x268   : > { %v3540_v34 = vadd.f32 %v15946_v62, %v3179_v46  ;;  %v3178_v30 = vld [vmem:[#allocation3 + $0x50] sm:$0xff]  ;;  %3119 = vst.msk [vmem:[#allocation3 + $0x78] sm:$0xff] %vm336_vm1, %v3087_v23  ;;  %17436 = vmatpush3.bf16.msra.mxu0 %v17433_v63 }
 0x269   : > { %v3539_v50 = vadd.f32 %v3420_v5, %v3178_v30  ;;  %3118 = vst.msk [vmem:[#allocation3 + $0x70] sm:$0xff] %vm336_vm1, %v3086_v54  ;;  %v15891_v4 = vpop.f32.mrb[80].mxu1  ;;  %17438 = vmatprep.subr.bf16.mxu0 %v17437_v55 }
 0x26a   : > { %v15955_v7 = vpop.f32.mrb[112].mxu0  ;;  %3572 = vst.msk [vmem:[#allocation3 + $0x58] sm:$0xff] %vm336_vm1, %v3540_v34  ;;  %v3089_v61 = vadd.f32 %v15891_v4, %v2728_v49  ;;  %v2993_v41 = vpop.f32.mrb[81].mxu1 }
 0x26b   : > { %v3450_v14 = vpop.f32.mrb[113].mxu0  ;;  %3571 = vst.msk [vmem:[#allocation3 + $0x50] sm:$0xff] %vm336_vm1, %v3539_v50  ;;  %v3181_v20 = vld [vmem:[#allocation3 + $0x68] sm:$0xff]  ;;  %v3088_v18 = vadd.f32 %v2993_v41, %v2727_v44  ;;  %v2737_v44 = vld [vmem:[#allocation3 + $0xd0] sm:$0xff] }
 0x26c   : > { %v3542_v33 = vadd.f32 %v15949_v25, %v3181_v20  ;;  %v3180_v10 = vld [vmem:[#allocation3 + $0x60] sm:$0xff]  ;;  %3121 = vst.msk [vmem:[#allocation3 + $0x88] sm:$0xff] %vm336_vm1, %v3089_v61  ;;  %17440 = vmatpush3.bf16.msra.mxu0 %v17437_v55 }
 0x26d   : > { %v3541_v56 = vadd.f32 %v3430_v48, %v3180_v10  ;;  %3120 = vst.msk [vmem:[#allocation3 + $0x80] sm:$0xff] %vm336_vm1, %v3088_v18  ;;  %v15894_v59 = vpop.f32.mrb[82].mxu1  ;;  %v2734_v48 = vld [vmem:[#allocation3 + $0xb8] sm:$0xff] }
 0x26e   : > { %v15958_v57 = vpop.f32.mrb[114].mxu0  ;;  %3574 = vst.msk [vmem:[#allocation3 + $0x68] sm:$0xff] %vm336_vm1, %v3542_v33  ;;  %v3091_v0 = vadd.f32 %v15894_v59, %v2730_v24  ;;  %v3003_v62 = vpop.f32.mrb[83].mxu1 }
 0x26f   : > { %v3460_v26 = vpop.f32.mrb[115].mxu0  ;;  %3573 = vst.msk [vmem:[#allocation3 + $0x60] sm:$0xff] %vm336_vm1, %v3541_v56  ;;  %v3183_v2 = vld [vmem:[#allocation3 + $0x78] sm:$0xff]  ;;  %v3090_v1 = vadd.f32 %v3003_v62, %v2729_v53  ;;  %v2740_v56 = vld [vmem:[#allocation3 + $0xe8] sm:$0xff] }
 0x270   : > { %v3544_v5 = vadd.f32 %v15952_v19, %v3183_v2  ;;  %v3182_v29 = vld [vmem:[#allocation3 + $0x70] sm:$0xff]  ;;  %3123 = vst.msk [vmem:[#allocation3 + $0x98] sm:$0xff] %vm336_vm1, %v3091_v0  ;;  %v2739_v0 = vld [vmem:[#allocation3 + $0xe0] sm:$0xff] }
 0x271   : > { %v3543_v3 = vadd.f32 %v3440_v32, %v3182_v29  ;;  %3122 = vst.msk [vmem:[#allocation3 + $0x90] sm:$0xff] %vm336_vm1, %v3090_v1  ;;  %v15897_v52 = vpop.f32.mrb[84].mxu1  ;;  %v2736_v32 = vld [vmem:[#allocation3 + $0xc8] sm:$0xff] }
 0x272   : > { %v15961_v12 = vpop.f32.mrb[116].mxu0  ;;  %3576 = vst.msk [vmem:[#allocation3 + $0x78] sm:$0xff] %vm336_vm1, %v3544_v5  ;;  %v3093_v16 = vadd.f32 %v15897_v52, %v2732_v42  ;;  %v3013_v15 = vpop.f32.mrb[85].mxu1 }
 0x273   : > { %v3470_v13 = vpop.f32.mrb[117].mxu0  ;;  %3575 = vst.msk [vmem:[#allocation3 + $0x70] sm:$0xff] %vm336_vm1, %v3543_v3  ;;  %v3185_v22 = vld [vmem:[#allocation3 + $0x88] sm:$0xff]  ;;  %v3092_v25 = vadd.f32 %v3013_v15, %v2731_v11  ;;  %v2742_v3 = vld [vmem:[#allocation3 + $0xf8] sm:$0xff] }
 0x274   : > { %v3546_v35 = vadd.f32 %v15955_v7, %v3185_v22  ;;  %v3184_v38 = vld [vmem:[#allocation3 + $0x80] sm:$0xff]  ;;  %3125 = vst.msk [vmem:[#allocation3 + $0xa8] sm:$0xff] %vm336_vm1, %v3093_v16  ;;  %v2738_v7 = vld [vmem:[#allocation3 + $0xd8] sm:$0xff]  ;;  %v2741_v16 = vld [vmem:[#allocation3 + $0xf0] sm:$0xff] }
 0x275   : > { %v3545_v45 = vadd.f32 %v3450_v14, %v3184_v38  ;;  %3124 = vst.msk [vmem:[#allocation3 + $0xa0] sm:$0xff] %vm336_vm1, %v3092_v25  ;;  %v15900_v58 = vpop.f32.mrb[86].mxu1  ;;  %v6082_v25 = vld [vmem:[%s21683_s5 + $0xa0] sm:$0xff] }
 0x276   : > { %v15964_v9 = vpop.f32.mrb[118].mxu0  ;;  %3578 = vst.msk [vmem:[#allocation3 + $0x88] sm:$0xff] %vm336_vm1, %v3546_v35  ;;  %v3095_v27 = vadd.f32 %v15900_v58, %v2734_v48  ;;  %v3023_v47 = vpop.f32.mrb[87].mxu1  ;;  %v6083_v35 = vld [vmem:[%s21683_s5 + $0xa8] sm:$0xff] }
 0x277   : > { %v3480_v51 = vpop.f32.mrb[119].mxu0  ;;  %3577 = vst.msk [vmem:[#allocation3 + $0x80] sm:$0xff] %vm336_vm1, %v3545_v45  ;;  %v3187_v6 = vld [vmem:[#allocation3 + $0x98] sm:$0xff]  ;;  %v3094_v17 = vadd.f32 %v3023_v47, %v2733_v31  ;;  %v17441_v48 = vpack.c.bf16 %v6083_v35, %v6082_v25  ;;  %v3635_v35 = vld [vmem:[#allocation3 + $0x48] sm:$0xff] }
 0x278   : > { %v3548_v19 = vadd.f32 %v15958_v57, %v3187_v6  ;;  %v3186_v23 = vld [vmem:[#allocation3 + $0x90] sm:$0xff]  ;;  %3127 = vst.msk [vmem:[#allocation3 + $0xb8] sm:$0xff] %vm336_vm1, %v3095_v27 }
 0x279   : > { %v3547_v36 = vadd.f32 %v3460_v26, %v3186_v23  ;;  %3126 = vst.msk [vmem:[#allocation3 + $0xb0] sm:$0xff] %vm336_vm1, %v3094_v17  ;;  %v15903_v46 = vpop.f32.mrb[88].mxu1  ;;  %17442 = vmatprep.subr.bf16.mxu0 %v17441_v48 }
 0x27a   : > { %v15967_v54 = vpop.f32.mrb[120].mxu0  ;;  %3580 = vst.msk [vmem:[#allocation3 + $0x98] sm:$0xff] %vm336_vm1, %v3548_v19  ;;  %v3097_v60 = vadd.f32 %v15903_v46, %v2736_v32  ;;  %v3033_v34 = vpop.f32.mrb[89].mxu1  ;;  %17444 = vmatpush3.bf16.msra.mxu0 %v17441_v48  ;;  %v3634_v48 = vld [vmem:[#allocation3 + $0x40] sm:$0xff] }
 0x27b   : > { %v3490_v30 = vpop.f32.mrb[121].mxu0  ;;  %3579 = vst.msk [vmem:[#allocation3 + $0x90] sm:$0xff] %vm336_vm1, %v3547_v36  ;;  %v3189_v28 = vld [vmem:[#allocation3 + $0xa8] sm:$0xff]  ;;  %v3096_v43 = vadd.f32 %v3033_v34, %v2735_v8  ;;  %v3629_v36 = vld [vmem:[#allocation3 + $0x18] sm:$0xff] }
 0x27c   : > { %v3550_v50 = vadd.f32 %v15961_v12, %v3189_v28  ;;  %v3188_v49 = vld [vmem:[#allocation3 + $0xa0] sm:$0xff]  ;;  %3129 = vst.msk [vmem:[#allocation3 + $0xc8] sm:$0xff] %vm336_vm1, %v3097_v60  ;;  %v3628_v60 = vld [vmem:[#allocation3 + $0x10] sm:$0xff] }
 0x27d   : > { %v3549_v4 = vadd.f32 %v3470_v13, %v3188_v49  ;;  %3128 = vst.msk [vmem:[#allocation3 + $0xc0] sm:$0xff] %vm336_vm1, %v3096_v43  ;;  %v15906_v37 = vpop.f32.mrb[90].mxu1 }
 0x27e   : > { %v15970_v40 = vpop.f32.mrb[122].mxu0  ;;  %3582 = vst.msk [vmem:[#allocation3 + $0xa8] sm:$0xff] %vm336_vm1, %v3550_v50  ;;  %v3099_v61 = vadd.f32 %v15906_v37, %v2738_v7  ;;  %v3043_v41 = vpop.f32.mrb[91].mxu1 }
 0x27f   : > { %v3500_v14 = vpop.f32.mrb[123].mxu0  ;;  %3581 = vst.msk [vmem:[#allocation3 + $0xa0] sm:$0xff] %vm336_vm1, %v3549_v4  ;;  %v3191_v63 = vld [vmem:[#allocation3 + $0xb8] sm:$0xff]  ;;  %v3098_v20 = vadd.f32 %v3043_v41, %v2737_v44  ;;  %v3631_v4 = vld [vmem:[#allocation3 + $0x28] sm:$0xff] }
 0x280   : > { %v3552_v18 = vadd.f32 %v15964_v9, %v3191_v63  ;;  %v3190_v33 = vld [vmem:[#allocation3 + $0xb0] sm:$0xff]  ;;  %3131 = vst.msk [vmem:[#allocation3 + $0xd8] sm:$0xff] %vm336_vm1, %v3099_v61  ;;  %v3627_v9 = vld [vmem:[#allocation3 + $0x8] sm:$0xff]  ;;  %v3630_v61 = vld [vmem:[#allocation3 + $0x20] sm:$0xff] }
 0x281   : > { %v3551_v10 = vadd.f32 %v3480_v51, %v3190_v33  ;;  %3130 = vst.msk [vmem:[#allocation3 + $0xd0] sm:$0xff] %vm336_vm1, %v3098_v20  ;;  %v15909_v24 = vpop.f32.mrb[92].mxu1  ;;  %v3626_v51 = vld [vmem:[#allocation3] sm:$0xff] }
 0x282   : > { %v15973_v59 = vpop.f32.mrb[124].mxu0  ;;  %3584 = vst.msk [vmem:[#allocation3 + $0xb8] sm:$0xff] %vm336_vm1, %v3552_v18  ;;  %v3101_v57 = vadd.f32 %v15909_v24, %v2740_v56  ;;  %v3053_v53 = vpop.f32.mrb[93].mxu1  ;;  %v6084_v20 = vld [vmem:[%s21683_s5 + $0xb0] sm:$0xff]  ;;  %v6085_v18 = vld [vmem:[%s21683_s5 + $0xb8] sm:$0xff]  ;;  %v6535_v24 = vld [vmem:[%s21683_s5 + $0xc0] sm:$0xff] }
 0x283   : > { %v3510_v62 = vpop.f32.mrb[125].mxu0  ;;  %3583 = vst.msk [vmem:[#allocation3 + $0xb0] sm:$0xff] %vm336_vm1, %v3551_v10  ;;  %v3193_v26 = vld [vmem:[#allocation3 + $0xc8] sm:$0xff]  ;;  %v3100_v2 = vadd.f32 %v3053_v53, %v2739_v0  ;;  %v17445_v56 = vpack.c.bf16 %v6085_v18, %v6084_v20  ;;  %v3633_v0 = vld [vmem:[#allocation3 + $0x38] sm:$0xff] }
 0x284   : > { %v3554_v1 = vadd.f32 %v15967_v54, %v3193_v26  ;;  %v3192_v5 = vld [vmem:[#allocation3 + $0xc0] sm:$0xff]  ;;  %3133 = vst.msk [vmem:[#allocation3 + $0xe8] sm:$0xff] %vm336_vm1, %v3101_v57 }
 0x285   : > { %v3553_v29 = vadd.f32 %v3490_v30, %v3192_v5  ;;  %3132 = vst.msk [vmem:[#allocation3 + $0xe0] sm:$0xff] %vm336_vm1, %v3100_v2  ;;  %v15912_v42 = vpop.f32.mrb[94].mxu1  ;;  %v6537_v2 = vld [vmem:[%s21683_s5 + $0xd0] sm:$0xff]  ;;  %17446 = vmatprep.subr.bf16.mxu0 %v17445_v56 }
 0x286   : > { %v15976_v52 = vpop.f32.mrb[126].mxu0  ;;  %3586 = vst.msk [vmem:[#allocation3 + $0xc8] sm:$0xff] %vm336_vm1, %v3554_v1  ;;  %v3103_v12 = vadd.f32 %v15912_v42, %v2742_v3  ;;  %v3063_v11 = vpop.f32.mrb[95].mxu1  ;;  %v6538_v1 = vld [vmem:[%s21683_s5 + $0xd8] sm:$0xff]  ;;  %17448 = vmatpush3.bf16.msra.mxu0 %v17445_v56 }
 0x287   : > { %v3520_v15 = vpop.f32.mrb[127].mxu0  ;;  %3585 = vst.msk [vmem:[#allocation3 + $0xc0] sm:$0xff] %vm336_vm1, %v3553_v29  ;;  %v3195_v13 = vld [vmem:[#allocation3 + $0xd8] sm:$0xff]  ;;  %v3102_v22 = vadd.f32 %v3063_v11, %v2741_v16  ;;  %v3632_v29 = vld [vmem:[#allocation3 + $0x30] sm:$0xff] }
 0x288   : > { %v3556_v38 = vadd.f32 %v15970_v40, %v3195_v13  ;;  %v3194_v45 = vld [vmem:[#allocation3 + $0xd0] sm:$0xff]  ;;  %3135 = vst.msk [vmem:[#allocation3 + $0xf8] sm:$0xff] %vm336_vm1, %v3103_v12  ;;  %v6540_v16 = vld [vmem:[%s21683_s5 + $0xe8] sm:$0xff] }
 0x289   : > { %v3555_v58 = vadd.f32 %v3500_v14, %v3194_v45  ;;  %3134 = vst.msk [vmem:[#allocation3 + $0xf0] sm:$0xff] %vm336_vm1, %v3102_v22  ;;  %v15995_v27 = vpop.f32.mrb[96].mxu1  ;;  %v6539_v12 = vld [vmem:[%s21683_s5 + $0xe0] sm:$0xff] }
 0x28a   : > { %v16059_v31 = vpop.f32.mrb[128].mxu0  ;;  %3588 = vst.msk [vmem:[#allocation3 + $0xd8] sm:$0xff] %vm336_vm1, %v3556_v38  ;;  %v3988_v47 = vadd.f32 %v15995_v27, %v3627_v9  ;;  %v3828_v6 = vpop.f32.mrb[97].mxu1  ;;  %v6992_v9 = vld [vmem:[%s21683_s5 + $0x100] sm:$0xff] }
 0x28b   : > { %v4285_v17 = vpop.f32.mrb[129].mxu0  ;;  %3587 = vst.msk [vmem:[#allocation3 + $0xd0] sm:$0xff] %vm336_vm1, %v3555_v58  ;;  %v3197_v39 = vld [vmem:[#allocation3 + $0xe8] sm:$0xff]  ;;  %v3987_v21 = vadd.f32 %v3828_v6, %v3626_v51  ;;  %v17457_v58 = vpack.c.bf16 %v6540_v16, %v6539_v12  ;;  %v6541_v51 = vld [vmem:[%s21683_s5 + $0xf0] sm:$0xff] }
 0x28c   : > { %v3558_v19 = vadd.f32 %v15973_v59, %v3197_v39  ;;  %v3196_v23 = vld [vmem:[#allocation3 + $0xe0] sm:$0xff]  ;;  %4020 = vst.msk [vmem:[#allocation3 + $0x8] sm:$0xff] %vm336_vm1, %v3988_v47  ;;  %v6536_v59 = vld [vmem:[%s21683_s5 + $0xc8] sm:$0xff]  ;;  %v6542_v6 = vld [vmem:[%s21683_s5 + $0xf8] sm:$0xff] }
 0x28d   : > { %v3557_v55 = vadd.f32 %v3510_v62, %v3196_v23  ;;  %4019 = vst.msk [vmem:[#allocation3] sm:$0xff] %vm336_vm1, %v3987_v21  ;;  %v15998_v32 = vpop.f32.mrb[98].mxu1  ;;  %v17449_v26 = vpack.c.bf16 %v6536_v59, %v6535_v24  ;;  %v3641_v24 = vld [vmem:[#allocation3 + $0x78] sm:$0xff] }
 0x28e   : > { %v16062_v46 = vpop.f32.mrb[130].mxu0  ;;  %3590 = vst.msk [vmem:[#allocation3 + $0xe8] sm:$0xff] %vm336_vm1, %v3558_v19  ;;  %v3990_v54 = vadd.f32 %v15998_v32, %v3629_v36  ;;  %v3838_v8 = vpop.f32.mrb[99].mxu1  ;;  %v3637_v32 = vld [vmem:[#allocation3 + $0x58] sm:$0xff] }
 0x28f   : > { %v4295_v34 = vpop.f32.mrb[131].mxu0  ;;  %3589 = vst.msk [vmem:[#allocation3 + $0xe0] sm:$0xff] %vm336_vm1, %v3557_v55  ;;  %v3199_v30 = vld [vmem:[#allocation3 + $0xf8] sm:$0xff]  ;;  %v3989_v28 = vadd.f32 %v3838_v8, %v3628_v60  ;;  %17450 = vmatprep.subr.bf16.mxu1 %v17449_v26  ;;  %v17461_v60 = vpack.c.bf16 %v6542_v6, %v6541_v51 }
 0x290   : > { %v3560_v43 = vadd.f32 %v15976_v52, %v3199_v30  ;;  %v3198_v50 = vld [vmem:[#allocation3 + $0xf0] sm:$0xff]  ;;  %4022 = vst.msk [vmem:[#allocation3 + $0x18] sm:$0xff] %vm336_vm1, %v3990_v54  ;;  %v17453_v52 = vpack.c.bf16 %v6538_v1, %v6537_v2  ;;  %17452 = vmatpush3.bf16.msra.mxu1 %v17449_v26 }
 0x291   : > { %v3559_v49 = vadd.f32 %v3520_v15, %v3198_v50  ;;  %4021 = vst.msk [vmem:[#allocation3 + $0x10] sm:$0xff] %vm336_vm1, %v3989_v28  ;;  %v16001_v7 = vpop.f32.mrb[100].mxu1 }
 0x292   : > { %v19115_v37 = vpop.f32.mrb[132].mxu0  ;;  %3592 = vst.msk [vmem:[#allocation3 + $0xf8] sm:$0xff] %vm336_vm1, %v3560_v43  ;;  %v3992_v40 = vadd.f32 %v16001_v7, %v3631_v4  ;;  %v3848_v44 = vpop.f32.mrb[101].mxu1  ;;  %17454 = vmatprep.subr.bf16.mxu1 %v17453_v52 }
 0x293   : > { %v4305_v41 = vpop.f32.mrb[133].mxu0  ;;  %3591 = vst.msk [vmem:[#allocation3 + $0xf0] sm:$0xff] %vm336_vm1, %v3559_v49  ;;  %v4084_v14 = vld [vmem:[#allocation3 + $0x8] sm:$0xff]  ;;  %v3991_v63 = vadd.f32 %v3848_v44, %v3630_v61 }
 0x294   : > { %v4445_v33 = vadd.f32 %v16059_v31, %v4084_v14  ;;  %v4083_v10 = vld [vmem:[#allocation3] sm:$0xff]  ;;  %4024 = vst.msk [vmem:[#allocation3 + $0x28] sm:$0xff] %vm336_vm1, %v3992_v40  ;;  %17456 = vmatpush3.bf16.msra.mxu1 %v17453_v52 }
 0x295   : > { %v4444_v57 = vadd.f32 %v4285_v17, %v4083_v10  ;;  %4023 = vst.msk [vmem:[#allocation3 + $0x20] sm:$0xff] %vm336_vm1, %v3991_v63  ;;  %v16004_v53 = vpop.f32.mrb[102].mxu1  ;;  %v6993_v17 = vld [vmem:[%s21683_s5 + $0x108] sm:$0xff]  ;;  %17458 = vmatprep.subr.bf16.mxu1 %v17457_v58 }
 0x296   : > { %v16068_v62 = vpop.f32.mrb[134].mxu0  ;;  %4477 = vst.msk [vmem:[#allocation3 + $0x8] sm:$0xff] %vm336_vm1, %v4445_v33  ;;  %v3994_v5 = vadd.f32 %v16004_v53, %v3633_v0  ;;  %v3858_v3 = vpop.f32.mrb[103].mxu1  ;;  %v19163_v19 = vpack.c.bf16 %v6993_v17, %v6992_v9  ;;  %v3640_v53 = vld [vmem:[#allocation3 + $0x70] sm:$0xff] }
 0x297   : > { %v4315_v42 = vpop.f32.mrb[135].mxu0  ;;  %4476 = vst.msk [vmem:[#allocation3] sm:$0xff] %vm336_vm1, %v4444_v57  ;;  %v4086_v11 = vld [vmem:[#allocation3 + $0x18] sm:$0xff]  ;;  %v3993_v15 = vadd.f32 %v3858_v3, %v3632_v29 }
 0x298   : > { %v4447_v13 = vadd.f32 %v16062_v46, %v4086_v11  ;;  %v4085_v22 = vld [vmem:[#allocation3 + $0x10] sm:$0xff]  ;;  %4026 = vst.msk [vmem:[#allocation3 + $0x38] sm:$0xff] %vm336_vm1, %v3994_v5  ;;  %17466 = vmatprep.subr.bf16.mxu0 %v19163_v19  ;;  %17460 = vmatpush3.bf16.msra.mxu1 %v17457_v58  ;;  %v3642_v11 = vld [vmem:[#allocation3 + $0x80] sm:$0xff] }
 0x299   : > { %v4446_v25 = vadd.f32 %v4295_v34, %v4085_v22  ;;  %4025 = vst.msk [vmem:[#allocation3 + $0x30] sm:$0xff] %vm336_vm1, %v3993_v15  ;;  %v16007_v38 = vpop.f32.mrb[104].mxu1  ;;  %v3636_v34 = vld [vmem:[#allocation3 + $0x50] sm:$0xff]  ;;  %17462 = vmatprep.subr.bf16.mxu1 %v17461_v60 }
 0x29a   : > { %v16071_v45 = vpop.f32.mrb[136].mxu0  ;;  %4479 = vst.msk [vmem:[#allocation3 + $0x18] sm:$0xff] %vm336_vm1, %v4447_v13  ;;  %v3996_v27 = vadd.f32 %v16007_v38, %v3635_v35  ;;  %v3868_v31 = vpop.f32.mrb[105].mxu1 }
 0x29b   : > { %v4325_v47 = vpop.f32.mrb[137].mxu0  ;;  %4478 = vst.msk [vmem:[#allocation3 + $0x10] sm:$0xff] %vm336_vm1, %v4446_v25  ;;  %v4088_v39 = vld [vmem:[#allocation3 + $0x28] sm:$0xff]  ;;  %v3995_v21 = vadd.f32 %v3868_v31, %v3634_v48  ;;  %v3645_v48 = vld [vmem:[#allocation3 + $0x98] sm:$0xff]  ;;  %v3644_v31 = vld [vmem:[#allocation3 + $0x90] sm:$0xff] }
 0x29c   : > { %v4449_v23 = vadd.f32 %v19115_v37, %v4088_v39  ;;  %v4087_v55 = vld [vmem:[#allocation3 + $0x20] sm:$0xff]  ;;  %4028 = vst.msk [vmem:[#allocation3 + $0x48] sm:$0xff] %vm336_vm1, %v3996_v27  ;;  %v3639_v37 = vld [vmem:[#allocation3 + $0x68] sm:$0xff]  ;;  %17464 = vmatpush3.bf16.msra.mxu1 %v17461_v60 }
 0x29d   : > { %v4448_v36 = vadd.f32 %v4305_v41, %v4087_v55  ;;  %4027 = vst.msk [vmem:[#allocation3 + $0x40] sm:$0xff] %vm336_vm1, %v3995_v21  ;;  %v16010_v46 = vpop.f32.mrb[106].mxu1  ;;  %v3638_v41 = vld [vmem:[#allocation3 + $0x60] sm:$0xff]  ;;  %v3647_v55 = vld [vmem:[#allocation3 + $0xa8] sm:$0xff] }
 0x29e   : > { %v16074_v54 = vpop.f32.mrb[138].mxu0  ;;  %4481 = vst.msk [vmem:[#allocation3 + $0x28] sm:$0xff] %vm336_vm1, %v4449_v23  ;;  %v3998_v8 = vadd.f32 %v16010_v46, %v3637_v32  ;;  %v3878_v30 = vpop.f32.mrb[107].mxu1 }
 0x29f   : > { %v4335_v28 = vpop.f32.mrb[139].mxu0  ;;  %4480 = vst.msk [vmem:[#allocation3 + $0x20] sm:$0xff] %vm336_vm1, %v4448_v36  ;;  %v4090_v43 = vld [vmem:[#allocation3 + $0x38] sm:$0xff]  ;;  %v3997_v50 = vadd.f32 %v3878_v30, %v3636_v34 }
 0x2a0   : > { %v4451_v49 = vadd.f32 %v16068_v62, %v4090_v43  ;;  %v4089_v4 = vld [vmem:[#allocation3 + $0x30] sm:$0xff]  ;;  %4030 = vst.msk [vmem:[#allocation3 + $0x58] sm:$0xff] %vm336_vm1, %v3998_v8 }
 0x2a1   : > { %v4450_v7 = vadd.f32 %v4315_v42, %v4089_v4  ;;  %4029 = vst.msk [vmem:[#allocation3 + $0x50] sm:$0xff] %vm336_vm1, %v3997_v50  ;;  %v16013_v40 = vpop.f32.mrb[108].mxu1  ;;  %v3643_v42 = vld [vmem:[#allocation3 + $0x88] sm:$0xff] }
 0x2a2   : > { %v16077_v61 = vpop.f32.mrb[140].mxu0  ;;  %4483 = vst.msk [vmem:[#allocation3 + $0x38] sm:$0xff] %vm336_vm1, %v4451_v49  ;;  %v4000_v44 = vadd.f32 %v16013_v40, %v3639_v37  ;;  %v3888_v14 = vpop.f32.mrb[109].mxu1  ;;  %v3649_v49 = vld [vmem:[#allocation3 + $0xb8] sm:$0xff]  ;;  %v3648_v40 = vld [vmem:[#allocation3 + $0xb0] sm:$0xff] }
 0x2a3   : > { %v4345_v63 = vpop.f32.mrb[141].mxu0  ;;  %4482 = vst.msk [vmem:[#allocation3 + $0x30] sm:$0xff] %vm336_vm1, %v4450_v7  ;;  %v4092_v20 = vld [vmem:[#allocation3 + $0x48] sm:$0xff]  ;;  %v3999_v18 = vadd.f32 %v3888_v14, %v3638_v41 }
 0x2a4   : > { %v4453_v33 = vadd.f32 %v16071_v45, %v4092_v20  ;;  %v4091_v10 = vld [vmem:[#allocation3 + $0x40] sm:$0xff]  ;;  %4032 = vst.msk [vmem:[#allocation3 + $0x68] sm:$0xff] %vm336_vm1, %v4000_v44 }
 0x2a5   : > { %v4452_v56 = vadd.f32 %v4325_v47, %v4091_v10  ;;  %4031 = vst.msk [vmem:[#allocation3 + $0x60] sm:$0xff] %vm336_vm1, %v3999_v18  ;;  %v16016_v59 = vpop.f32.mrb[110].mxu1 }
 0x2a6   : > { %v16080_v57 = vpop.f32.mrb[142].mxu0  ;;  %4485 = vst.msk [vmem:[#allocation3 + $0x48] sm:$0xff] %vm336_vm1, %v4453_v33  ;;  %v4002_v0 = vadd.f32 %v16016_v59, %v3641_v24  ;;  %v3898_v62 = vpop.f32.mrb[111].mxu1  ;;  %v3651_v33 = vld [vmem:[#allocation3 + $0xc8] sm:$0xff]  ;;  %v3650_v59 = vld [vmem:[#allocation3 + $0xc0] sm:$0xff] }
 0x2a7   : > { %v4355_v26 = vpop.f32.mrb[143].mxu0  ;;  %4484 = vst.msk [vmem:[#allocation3 + $0x40] sm:$0xff] %vm336_vm1, %v4452_v56  ;;  %v4094_v2 = vld [vmem:[#allocation3 + $0x58] sm:$0xff]  ;;  %v4001_v1 = vadd.f32 %v3898_v62, %v3640_v53 }
 0x2a8   : > { %v4455_v5 = vadd.f32 %v16074_v54, %v4094_v2  ;;  %v4093_v29 = vld [vmem:[#allocation3 + $0x50] sm:$0xff]  ;;  %4034 = vst.msk [vmem:[#allocation3 + $0x78] sm:$0xff] %vm336_vm1, %v4002_v0  ;;  %v3646_v54 = vld [vmem:[#allocation3 + $0xa0] sm:$0xff] }
 0x2a9   : > { %v4454_v3 = vadd.f32 %v4335_v28, %v4093_v29  ;;  %4033 = vst.msk [vmem:[#allocation3 + $0x70] sm:$0xff] %vm336_vm1, %v4001_v1  ;;  %v16019_v52 = vpop.f32.mrb[112].mxu1 }
 0x2aa   : > { %v16083_v12 = vpop.f32.mrb[144].mxu0  ;;  %4487 = vst.msk [vmem:[#allocation3 + $0x58] sm:$0xff] %vm336_vm1, %v4455_v5  ;;  %v4004_v16 = vadd.f32 %v16019_v52, %v3643_v42  ;;  %v3908_v15 = vpop.f32.mrb[113].mxu1  ;;  %v3653_v5 = vld [vmem:[#allocation3 + $0xd8] sm:$0xff]  ;;  %v3652_v52 = vld [vmem:[#allocation3 + $0xd0] sm:$0xff] }
 0x2ab   : > { %v4365_v13 = vpop.f32.mrb[145].mxu0  ;;  %4486 = vst.msk [vmem:[#allocation3 + $0x50] sm:$0xff] %vm336_vm1, %v4454_v3  ;;  %v4096_v22 = vld [vmem:[#allocation3 + $0x68] sm:$0xff]  ;;  %v4003_v25 = vadd.f32 %v3908_v15, %v3642_v11 }
 0x2ac   : > { %v4457_v35 = vadd.f32 %v16077_v61, %v4096_v22  ;;  %v4095_v38 = vld [vmem:[#allocation3 + $0x60] sm:$0xff]  ;;  %4036 = vst.msk [vmem:[#allocation3 + $0x88] sm:$0xff] %vm336_vm1, %v4004_v16 }
 0x2ad   : > { %v4456_v45 = vadd.f32 %v4345_v63, %v4095_v38  ;;  %4035 = vst.msk [vmem:[#allocation3 + $0x80] sm:$0xff] %vm336_vm1, %v4003_v25  ;;  %v16022_v58 = vpop.f32.mrb[114].mxu1 }
 0x2ae   : > { %v16086_v9 = vpop.f32.mrb[146].mxu0  ;;  %4489 = vst.msk [vmem:[#allocation3 + $0x68] sm:$0xff] %vm336_vm1, %v4457_v35  ;;  %v4006_v27 = vadd.f32 %v16022_v58, %v3645_v48  ;;  %v3918_v47 = vpop.f32.mrb[115].mxu1  ;;  %v3655_v35 = vld [vmem:[#allocation3 + $0xe8] sm:$0xff]  ;;  %v3654_v58 = vld [vmem:[#allocation3 + $0xe0] sm:$0xff] }
 0x2af   : > { %v4375_v51 = vpop.f32.mrb[147].mxu0  ;;  %4488 = vst.msk [vmem:[#allocation3 + $0x60] sm:$0xff] %vm336_vm1, %v4456_v45  ;;  %v4098_v6 = vld [vmem:[#allocation3 + $0x78] sm:$0xff]  ;;  %v4005_v17 = vadd.f32 %v3918_v47, %v3644_v31 }
 0x2b0   : > { %v4459_v39 = vadd.f32 %v16080_v57, %v4098_v6  ;;  %v4097_v21 = vld [vmem:[#allocation3 + $0x70] sm:$0xff]  ;;  %4038 = vst.msk [vmem:[#allocation3 + $0x98] sm:$0xff] %vm336_vm1, %v4006_v27 }
 0x2b1   : > { %v4458_v23 = vadd.f32 %v4355_v26, %v4097_v21  ;;  %4037 = vst.msk [vmem:[#allocation3 + $0x90] sm:$0xff] %vm336_vm1, %v4005_v17  ;;  %v16025_v36 = vpop.f32.mrb[116].mxu1 }
 0x2b2   : > { %v16089_v32 = vpop.f32.mrb[148].mxu0  ;;  %4491 = vst.msk [vmem:[#allocation3 + $0x78] sm:$0xff] %vm336_vm1, %v4459_v39  ;;  %v4008_v46 = vadd.f32 %v16025_v36, %v3647_v55  ;;  %v3928_v60 = vpop.f32.mrb[117].mxu1  ;;  %v3657_v39 = vld [vmem:[#allocation3 + $0xf8] sm:$0xff]  ;;  %v3656_v36 = vld [vmem:[#allocation3 + $0xf0] sm:$0xff] }
 0x2b3   : > { %v4385_v8 = vpop.f32.mrb[149].mxu0  ;;  %4490 = vst.msk [vmem:[#allocation3 + $0x70] sm:$0xff] %vm336_vm1, %v4458_v23  ;;  %v4100_v34 = vld [vmem:[#allocation3 + $0x88] sm:$0xff]  ;;  %v4007_v30 = vadd.f32 %v3928_v60, %v3646_v54 }
 0x2b4   : > { %v4461_v28 = vadd.f32 %v16083_v12, %v4100_v34  ;;  %v4099_v43 = vld [vmem:[#allocation3 + $0x80] sm:$0xff]  ;;  %4040 = vst.msk [vmem:[#allocation3 + $0xa8] sm:$0xff] %vm336_vm1, %v4008_v46 }
 0x2b5   : > { %v4460_v50 = vadd.f32 %v4365_v13, %v4099_v43  ;;  %4039 = vst.msk [vmem:[#allocation3 + $0xa0] sm:$0xff] %vm336_vm1, %v4007_v30  ;;  %v16028_v4 = vpop.f32.mrb[118].mxu1 }
 0x2b6   : > { %v16092_v7 = vpop.f32.mrb[150].mxu0  ;;  %4493 = vst.msk [vmem:[#allocation3 + $0x88] sm:$0xff] %vm336_vm1, %v4461_v28  ;;  %v4010_v37 = vadd.f32 %v16028_v4, %v3649_v49  ;;  %v3938_v61 = vpop.f32.mrb[119].mxu1  ;;  %v4541_v28 = vld [vmem:[#allocation3 + $0x8] sm:$0xff]  ;;  %v4540_v49 = vld [vmem:[#allocation3] sm:$0xff] }
 0x2b7   : > { %v4395_v44 = vpop.f32.mrb[151].mxu0  ;;  %4492 = vst.msk [vmem:[#allocation3 + $0x80] sm:$0xff] %vm336_vm1, %v4460_v50  ;;  %v4102_v41 = vld [vmem:[#allocation3 + $0x98] sm:$0xff]  ;;  %v4009_v14 = vadd.f32 %v3938_v61, %v3648_v40 }
 0x2b8   : > { %v4463_v63 = vadd.f32 %v16086_v9, %v4102_v41  ;;  %v4101_v20 = vld [vmem:[#allocation3 + $0x90] sm:$0xff]  ;;  %4042 = vst.msk [vmem:[#allocation3 + $0xb8] sm:$0xff] %vm336_vm1, %v4010_v37  ;;  %v7450_v41 = vld [vmem:[%s21683_s5 + $0x148] sm:$0xff] }
 0x2b9   : > { %v4462_v18 = vadd.f32 %v4375_v51, %v4101_v20  ;;  %4041 = vst.msk [vmem:[#allocation3 + $0xb0] sm:$0xff] %vm336_vm1, %v4009_v14  ;;  %v16031_v10 = vpop.f32.mrb[120].mxu1 }
 0x2ba   : > { %v16095_v56 = vpop.f32.mrb[152].mxu0  ;;  %4495 = vst.msk [vmem:[#allocation3 + $0x98] sm:$0xff] %vm336_vm1, %v4463_v63  ;;  %v4012_v24 = vadd.f32 %v16031_v10, %v3651_v33  ;;  %v3948_v57 = vpop.f32.mrb[121].mxu1  ;;  %v4543_v63 = vld [vmem:[#allocation3 + $0x18] sm:$0xff]  ;;  %v4542_v10 = vld [vmem:[#allocation3 + $0x10] sm:$0xff] }
 0x2bb   : > { %v4405_v0 = vpop.f32.mrb[153].mxu0  ;;  %4494 = vst.msk [vmem:[#allocation3 + $0x90] sm:$0xff] %vm336_vm1, %v4462_v18  ;;  %v4104_v53 = vld [vmem:[#allocation3 + $0xa8] sm:$0xff]  ;;  %v4011_v62 = vadd.f32 %v3948_v57, %v3650_v59 }
 0x2bc   : > { %v4465_v26 = vadd.f32 %v16089_v32, %v4104_v53  ;;  %v4103_v2 = vld [vmem:[#allocation3 + $0xa0] sm:$0xff]  ;;  %4044 = vst.msk [vmem:[#allocation3 + $0xc8] sm:$0xff] %vm336_vm1, %v4012_v24 }
 0x2bd   : > { %v4464_v1 = vadd.f32 %v4385_v8, %v4103_v2  ;;  %4043 = vst.msk [vmem:[#allocation3 + $0xc0] sm:$0xff] %vm336_vm1, %v4011_v62  ;;  %v16034_v29 = vpop.f32.mrb[122].mxu1  ;;  %v4545_v62 = vld [vmem:[#allocation3 + $0x28] sm:$0xff] }
 0x2be   : > { %v16098_v3 = vpop.f32.mrb[154].mxu0  ;;  %4497 = vst.msk [vmem:[#allocation3 + $0xa8] sm:$0xff] %vm336_vm1, %v4465_v26  ;;  %v4014_v42 = vadd.f32 %v16034_v29, %v3653_v5  ;;  %v3958_v12 = vpop.f32.mrb[123].mxu1 }
 0x2bf   : > { %v4415_v16 = vpop.f32.mrb[155].mxu0  ;;  %4496 = vst.msk [vmem:[#allocation3 + $0xa0] sm:$0xff] %vm336_vm1, %v4464_v1  ;;  %v4106_v11 = vld [vmem:[#allocation3 + $0xb8] sm:$0xff]  ;;  %v4013_v15 = vadd.f32 %v3958_v12, %v3652_v52  ;;  %v4544_v1 = vld [vmem:[#allocation3 + $0x20] sm:$0xff] }
 0x2c0   : > { %v4467_v13 = vadd.f32 %v16092_v7, %v4106_v11  ;;  %v4105_v22 = vld [vmem:[#allocation3 + $0xb0] sm:$0xff]  ;;  %4046 = vst.msk [vmem:[#allocation3 + $0xd8] sm:$0xff] %vm336_vm1, %v4014_v42 }
 0x2c1   : > { %v4466_v25 = vadd.f32 %v4395_v44, %v4105_v22  ;;  %4045 = vst.msk [vmem:[#allocation3 + $0xd0] sm:$0xff] %vm336_vm1, %v4013_v15  ;;  %v16037_v38 = vpop.f32.mrb[124].mxu1  ;;  %v7449_v44 = vld [vmem:[%s21683_s5 + $0x140] sm:$0xff] }
 0x2c2   : > { %v16101_v45 = vpop.f32.mrb[156].mxu0  ;;  %4499 = vst.msk [vmem:[#allocation3 + $0xb8] sm:$0xff] %vm336_vm1, %v4467_v13  ;;  %v4016_v48 = vadd.f32 %v16037_v38, %v3655_v35  ;;  %v3968_v9 = vpop.f32.mrb[125].mxu1  ;;  %v19223_v18 = vpack.c.bf16 %v7450_v41, %v7449_v44  ;;  %v4546_v13 = vld [vmem:[#allocation3 + $0x30] sm:$0xff] }
 0x2c3   : > { %v4425_v27 = vpop.f32.mrb[157].mxu0  ;;  %4498 = vst.msk [vmem:[#allocation3 + $0xb0] sm:$0xff] %vm336_vm1, %v4466_v25  ;;  %v4108_v31 = vld [vmem:[#allocation3 + $0xc8] sm:$0xff]  ;;  %v4015_v47 = vadd.f32 %v3968_v9, %v3654_v58 }
 0x2c4   : > { %v4469_v51 = vadd.f32 %v16095_v56, %v4108_v31  ;;  %v4107_v6 = vld [vmem:[#allocation3 + $0xc0] sm:$0xff]  ;;  %4048 = vst.msk [vmem:[#allocation3 + $0xe8] sm:$0xff] %vm336_vm1, %v4016_v48  ;;  %17482 = vmatprep.subr.bf16.mxu1 %v19223_v18  ;;  %v4549_v58 = vld [vmem:[#allocation3 + $0x48] sm:$0xff] }
 0x2c5   : > { %v4468_v17 = vadd.f32 %v4405_v0, %v4107_v6  ;;  %4047 = vst.msk [vmem:[#allocation3 + $0xe0] sm:$0xff] %vm336_vm1, %v4015_v47  ;;  %v16040_v21 = vpop.f32.mrb[126].mxu1  ;;  %v4548_v31 = vld [vmem:[#allocation3 + $0x40] sm:$0xff] }
 0x2c6   : > { %v16104_v23 = vpop.f32.mrb[158].mxu0  ;;  %4501 = vst.msk [vmem:[#allocation3 + $0xc8] sm:$0xff] %vm336_vm1, %v4469_v51  ;;  %v4018_v55 = vadd.f32 %v16040_v21, %v3657_v39  ;;  %v3978_v32 = vpop.f32.mrb[127].mxu1 }
 0x2c7   : > { %v4435_v46 = vpop.f32.mrb[159].mxu0  ;;  %4500 = vst.msk [vmem:[#allocation3 + $0xc0] sm:$0xff] %vm336_vm1, %v4468_v17  ;;  %v4110_v54 = vld [vmem:[#allocation3 + $0xd8] sm:$0xff]  ;;  %v4017_v60 = vadd.f32 %v3978_v32, %v3656_v36  ;;  %v4550_v36 = vld [vmem:[#allocation3 + $0x50] sm:$0xff] }
 0x2c8   : > { %v4471_v8 = vadd.f32 %v16098_v3, %v4110_v54  ;;  %v4109_v34 = vld [vmem:[#allocation3 + $0xd0] sm:$0xff]  ;;  %4050 = vst.msk [vmem:[#allocation3 + $0xf8] sm:$0xff] %vm336_vm1, %v4018_v55 }
 0x2c9   : > { %v4470_v30 = vadd.f32 %v4415_v16, %v4109_v34  ;;  %4049 = vst.msk [vmem:[#allocation3 + $0xf0] sm:$0xff] %vm336_vm1, %v4017_v60  ;;  %v16123_v43 = vpop.f32.mrb[128].mxu1  ;;  %v4547_v16 = vld [vmem:[#allocation3 + $0x38] sm:$0xff] }
 0x2ca   : > { %4503 = vst.msk [vmem:[#allocation3 + $0xd8] sm:$0xff] %vm336_vm1, %v4471_v8  ;;  %v4902_v50 = vadd.f32 %v16123_v43, %v4541_v28  ;;  %v4742_v4 = vpop.f32.mrb[129].mxu1 }
 0x2cb   : > { %4502 = vst.msk [vmem:[#allocation3 + $0xd0] sm:$0xff] %vm336_vm1, %v4470_v30  ;;  %v4112_v7 = vld [vmem:[#allocation3 + $0xe8] sm:$0xff]  ;;  %v4901_v37 = vadd.f32 %v4742_v4, %v4540_v49 }
 0x2cc   : > { %v4473_v40 = vadd.f32 %v16101_v45, %v4112_v7  ;;  %v4111_v61 = vld [vmem:[#allocation3 + $0xe0] sm:$0xff]  ;;  %4934 = vst.msk [vmem:[#allocation3 + $0x8] sm:$0xff] %vm336_vm1, %v4902_v50  ;;  %v4553_v4 = vld [vmem:[#allocation3 + $0x68] sm:$0xff] }
 0x2cd   : > { %v4472_v14 = vadd.f32 %v4425_v27, %v4111_v61  ;;  %4933 = vst.msk [vmem:[#allocation3] sm:$0xff] %vm336_vm1, %v4901_v37  ;;  %v16126_v20 = vpop.f32.mrb[130].mxu1  ;;  %v4552_v37 = vld [vmem:[#allocation3 + $0x60] sm:$0xff] }
 0x2ce   : > { %4505 = vst.msk [vmem:[#allocation3 + $0xe8] sm:$0xff] %vm336_vm1, %v4473_v40  ;;  %v4904_v33 = vadd.f32 %v16126_v20, %v4543_v63  ;;  %v4752_v56 = vpop.f32.mrb[131].mxu1 }
 0x2cf   : > { %4504 = vst.msk [vmem:[#allocation3 + $0xe0] sm:$0xff] %vm336_vm1, %v4472_v14  ;;  %v4903_v24 = vadd.f32 %v4752_v56, %v4542_v10  ;;  %v4114_v59 = vld [vmem:[#allocation3 + $0xf8] sm:$0xff] }
 0x2d0   : > { %4936 = vst.msk [vmem:[#allocation3 + $0x18] sm:$0xff] %vm336_vm1, %v4904_v33  ;;  %v4475_v57 = vadd.f32 %v16104_v23, %v4114_v59  ;;  %v4113_v0 = vld [vmem:[#allocation3 + $0xf0] sm:$0xff]  ;;  %v4551_v23 = vld [vmem:[#allocation3 + $0x58] sm:$0xff] }
 0x2d1   : > { %4935 = vst.msk [vmem:[#allocation3 + $0x10] sm:$0xff] %vm336_vm1, %v4903_v24  ;;  %v4474_v53 = vadd.f32 %v4435_v46, %v4113_v0  ;;  %v16129_v26 = vpop.f32.mrb[132].mxu1  ;;  %v4555_v59 = vld [vmem:[#allocation3 + $0x78] sm:$0xff]  ;;  %v4554_v0 = vld [vmem:[#allocation3 + $0x70] sm:$0xff] }
 0x2d2   : > { %4507 = vst.msk [vmem:[#allocation3 + $0xf8] sm:$0xff] %vm336_vm1, %v4475_v57  ;;  %v4906_v2 = vadd.f32 %v16129_v26, %v4545_v62  ;;  %v4762_v5 = vpop.f32.mrb[133].mxu1 }
 0x2d3   : > { %v4966_v29 = vld [vmem:[#allocation3 + $0x8] sm:$0xff]  ;;  %4506 = vst.msk [vmem:[#allocation3 + $0xf0] sm:$0xff] %vm336_vm1, %v4474_v53  ;;  %v4905_v3 = vadd.f32 %v4762_v5, %v4544_v1 }
 0x2d4   : > { %v4998_v42 = vmax.f32 %v4966_v29, 0.0  ;;  %v4965_v52 = vld [vmem:[#allocation3] sm:$0xff]  ;;  %4938 = vst.msk [vmem:[#allocation3 + $0x28] sm:$0xff] %vm336_vm1, %v4906_v2 }
 0x2d5   : > { %v4997_v12 = vmax.f32 %v4965_v52, 0.0  ;;  %4937 = vst.msk [vmem:[#allocation3 + $0x20] sm:$0xff] %vm336_vm1, %v4905_v3  ;;  %v16132_v11 = vpop.f32.mrb[134].mxu1 }
 0x2d6   : > { %5030 = vst.msk [vmem:[#allocation2 + $0x21] sm:$0xff] %vm336_vm1, %v4998_v42  ;;  %v4908_v15 = vadd.f32 %v16132_v11, %v4547_v16  ;;  %v4772_v22 = vpop.f32.mrb[135].mxu1  ;;  %v4557_v16 = vld [vmem:[#allocation3 + $0x88] sm:$0xff] }
 0x2d7   : > { %5029 = vst.msk [vmem:[#allocation2 + $0x19] sm:$0xff] %vm336_vm1, %v4997_v12  ;;  %v4968_v25 = vld [vmem:[#allocation3 + $0x18] sm:$0xff]  ;;  %v4907_v35 = vadd.f32 %v4772_v22, %v4546_v13 }
 0x2d8   : > { %v5000_v38 = vmax.f32 %v4968_v25, 0.0  ;;  %v4967_v45 = vld [vmem:[#allocation3 + $0x10] sm:$0xff]  ;;  %4940 = vst.msk [vmem:[#allocation3 + $0x38] sm:$0xff] %vm336_vm1, %v4908_v15  ;;  %v4556_v15 = vld [vmem:[#allocation3 + $0x80] sm:$0xff] }
 0x2d9   : > { %v4999_v48 = vmax.f32 %v4967_v45, 0.0  ;;  %4939 = vst.msk [vmem:[#allocation3 + $0x30] sm:$0xff] %vm336_vm1, %v4907_v35  ;;  %v16135_v9 = vpop.f32.mrb[136].mxu1 }
 0x2da   : > { %5032 = vst.msk [vmem:[#allocation2 + $0x39] sm:$0xff] %vm336_vm1, %v5000_v38  ;;  %v4910_v27 = vadd.f32 %v16135_v9, %v4549_v58  ;;  %v4782_v47 = vpop.f32.mrb[137].mxu1 }
 0x2db   : > { %5031 = vst.msk [vmem:[#allocation2 + $0x31] sm:$0xff] %vm336_vm1, %v4999_v48  ;;  %v4970_v51 = vld [vmem:[#allocation3 + $0x28] sm:$0xff]  ;;  %v4909_v6 = vadd.f32 %v4782_v47, %v4548_v31  ;;  %v4559_v47 = vld [vmem:[#allocation3 + $0x98] sm:$0xff] }
 0x2dc   : > { %v5002_v17 = vmax.f32 %v4970_v51, 0.0  ;;  %v4969_v39 = vld [vmem:[#allocation3 + $0x20] sm:$0xff]  ;;  %4942 = vst.msk [vmem:[#allocation3 + $0x48] sm:$0xff] %vm336_vm1, %v4910_v27 }
 0x2dd   : > { %v5001_v21 = vmax.f32 %v4969_v39, 0.0  ;;  %4941 = vst.msk [vmem:[#allocation3 + $0x40] sm:$0xff] %vm336_vm1, %v4909_v6  ;;  %v16138_v55 = vpop.f32.mrb[138].mxu1  ;;  %v19254_v28 = vld [vmem:[#allocation2 + $0x21] sm:$0xff] }
 0x2de   : > { %5034 = vst.msk [vmem:[#allocation2 + $0x51] sm:$0xff] %vm336_vm1, %v5002_v17  ;;  %v4912_v32 = vadd.f32 %v16138_v55, %v4551_v23  ;;  %v4792_v46 = vpop.f32.mrb[139].mxu1  ;;  %v19243_v54 = vld [vmem:[#allocation2 + $0x18] sm:$0xff]  ;;  %v19247_v8 = vld [vmem:[#allocation2 + $0x20] sm:$0xff] }
 0x2df   : > { %v19245_v60 = vld [vmem:[#allocation2 + $0x19] sm:$0xff]  ;;  %5033 = vst.msk [vmem:[#allocation2 + $0x49] sm:$0xff] %vm336_vm1, %v5001_v21  ;;  %v4972_v34 = vld [vmem:[#allocation3 + $0x38] sm:$0xff]  ;;  %v4911_v30 = vadd.f32 %v4792_v46, %v4550_v36  ;;  %16188 = vmatprep.mubr.msk.f32.mxu0 %vm336_vm1, %v19243_v54 }
 0x2e0   : > { %16252 = vmatprep.mubr.msk.f32.mxu1 %vm336_vm1, %v19245_v60  ;;  %v5004_v43 = vmax.f32 %v4972_v34, 0.0  ;;  %v4971_v50 = vld [vmem:[#allocation3 + $0x30] sm:$0xff]  ;;  %4944 = vst.msk [vmem:[#allocation3 + $0x58] sm:$0xff] %vm336_vm1, %v4912_v32  ;;  %16189 = vmatmul.mubr.msk.f32.gmra.mrb[162].mxu0 %vm336_vm1, %v19247_v8 }
 0x2e1   : > { %16253 = vmatmul.mubr.msk.f32.gmra.mrb[162].mxu1 %vm336_vm1, %v19254_v28  ;;  %v5003_v49 = vmax.f32 %v4971_v50, 0.0  ;;  %4943 = vst.msk [vmem:[#allocation3 + $0x50] sm:$0xff] %vm336_vm1, %v4911_v30  ;;  %v16141_v7 = vpop.f32.mrb[140].mxu1  ;;  %v19274_v33 = vld [vmem:[#allocation2 + $0x39] sm:$0xff] }
 0x2e2   : > { %5036 = vst.msk [vmem:[#allocation2 + $0x69] sm:$0xff] %vm336_vm1, %v5004_v43  ;;  %v4914_v40 = vadd.f32 %v16141_v7, %v4553_v4  ;;  %v4802_v61 = vpop.f32.mrb[141].mxu1  ;;  %v19263_v44 = vld [vmem:[#allocation2 + $0x30] sm:$0xff]  ;;  %v19267_v14 = vld [vmem:[#allocation2 + $0x38] sm:$0xff]  ;;  %v4558_v6 = vld [vmem:[#allocation3 + $0x90] sm:$0xff] }
 0x2e3   : > { %v19265_v41 = vld [vmem:[#allocation2 + $0x31] sm:$0xff]  ;;  %5035 = vst.msk [vmem:[#allocation2 + $0x61] sm:$0xff] %vm336_vm1, %v5003_v49  ;;  %v4913_v20 = vadd.f32 %v4802_v61, %v4552_v37  ;;  %16191 = vmatprep.mubr.msk.f32.mxu0 %vm336_vm1, %v19263_v44 }
 0x2e4   : > { %v4974_v63 = vld [vmem:[#allocation3 + $0x48] sm:$0xff]  ;;  %16255 = vmatprep.mubr.msk.f32.mxu1 %vm336_vm1, %v19265_v41  ;;  %v4973_v56 = vld [vmem:[#allocation3 + $0x40] sm:$0xff]  ;;  %4946 = vst.msk [vmem:[#allocation3 + $0x68] sm:$0xff] %vm336_vm1, %v4914_v40  ;;  %16192 = vmatmul.mubr.msk.f32.gmra.mrb[164].mxu0 %vm336_vm1, %v19267_v14 }
 0x2e5   : > { %v5006_v10 = vmax.f32 %v4974_v63, 0.0  ;;  %16256 = vmatmul.mubr.msk.f32.gmra.mrb[164].mxu1 %vm336_vm1, %v19274_v33  ;;  %v5005_v24 = vmax.f32 %v4973_v56, 0.0  ;;  %4945 = vst.msk [vmem:[#allocation3 + $0x60] sm:$0xff] %vm336_vm1, %v4913_v20  ;;  %v16144_v57 = vpop.f32.mrb[142].mxu1  ;;  %v19294_v3 = vld [vmem:[#allocation2 + $0x51] sm:$0xff] }
 0x2e6   : > { %v4916_v53 = vadd.f32 %v16144_v57, %v4555_v59  ;;  %v4812_v62 = vpop.f32.mrb[143].mxu1  ;;  %v19283_v26 = vld [vmem:[#allocation2 + $0x48] sm:$0xff]  ;;  %v19287_v1 = vld [vmem:[#allocation2 + $0x50] sm:$0xff]  ;;  %v4561_v50 = vld [vmem:[#allocation3 + $0xa8] sm:$0xff] }
 0x2e7   : > { %5038 = vst.msk [vmem:[#allocation2 + $0x81] sm:$0xff] %vm336_vm1, %v5006_v10  ;;  %v19285_v2 = vld [vmem:[#allocation2 + $0x49] sm:$0xff]  ;;  %5037 = vst.msk [vmem:[#allocation2 + $0x79] sm:$0xff] %vm336_vm1, %v5005_v24  ;;  %v4915_v29 = vadd.f32 %v4812_v62, %v4554_v0  ;;  %16194 = vmatprep.mubr.msk.f32.mxu0 %vm336_vm1, %v19283_v26  ;;  %v4562_v62 = vld [vmem:[#allocation3 + $0xb0] sm:$0xff] }
 0x2e8   : > { %v4976_v5 = vld [vmem:[#allocation3 + $0x58] sm:$0xff]  ;;  %16258 = vmatprep.mubr.msk.f32.mxu1 %vm336_vm1, %v19285_v2  ;;  %v4975_v52 = vld [vmem:[#allocation3 + $0x50] sm:$0xff]  ;;  %4948 = vst.msk [vmem:[#allocation3 + $0x78] sm:$0xff] %vm336_vm1, %v4916_v53  ;;  %16195 = vmatmul.mubr.msk.f32.gmra.mrb[166].mxu0 %vm336_vm1, %v19287_v1  ;;  %v4560_v4 = vld [vmem:[#allocation3 + $0xa0] sm:$0xff] }
 0x2e9   : > { %v5008_v42 = vmax.f32 %v4976_v5, 0.0  ;;  %16259 = vmatmul.mubr.msk.f32.gmra.mrb[166].mxu1 %vm336_vm1, %v19294_v3  ;;  %v5007_v12 = vmax.f32 %v4975_v52, 0.0  ;;  %4947 = vst.msk [vmem:[#allocation3 + $0x70] sm:$0xff] %vm336_vm1, %v4915_v29  ;;  %v16147_v11 = vpop.f32.mrb[144].mxu1  ;;  %v19314_v58 = vld [vmem:[#allocation2 + $0x69] sm:$0xff] }
 0x2ea   : > { %v4918_v13 = vadd.f32 %v16147_v11, %v4557_v16  ;;  %v4822_v22 = vpop.f32.mrb[145].mxu1  ;;  %v19303_v25 = vld [vmem:[#allocation2 + $0x60] sm:$0xff]  ;;  %v19307_v38 = vld [vmem:[#allocation2 + $0x68] sm:$0xff] }
 0x2eb   : > { %5040 = vst.msk [vmem:[#allocation2 + $0x99] sm:$0xff] %vm336_vm1, %v5008_v42  ;;  %v19305_v35 = vld [vmem:[#allocation2 + $0x61] sm:$0xff]  ;;  %5039 = vst.msk [vmem:[#allocation2 + $0x91] sm:$0xff] %vm336_vm1, %v5007_v12  ;;  %v4978_v45 = vld [vmem:[#allocation3 + $0x68] sm:$0xff]  ;;  %v4917_v48 = vadd.f32 %v4822_v22, %v4556_v15  ;;  %16197 = vmatprep.mubr.msk.f32.mxu0 %vm336_vm1, %v19303_v25 }
 0x2ec   : > { %16261 = vmatprep.mubr.msk.f32.mxu1 %vm336_vm1, %v19305_v35  ;;  %v5010_v9 = vmax.f32 %v4978_v45, 0.0  ;;  %v4977_v27 = vld [vmem:[#allocation3 + $0x60] sm:$0xff]  ;;  %4950 = vst.msk [vmem:[#allocation3 + $0x88] sm:$0xff] %vm336_vm1, %v4918_v13  ;;  %16198 = vmatmul.mubr.msk.f32.gmra.mrb[168].mxu0 %vm336_vm1, %v19307_v38  ;;  %v4563_v0 = vld [vmem:[#allocation3 + $0xb8] sm:$0xff] }
 0x2ed   : > { %16262 = vmatmul.mubr.msk.f32.gmra.mrb[168].mxu1 %vm336_vm1, %v19314_v58  ;;  %v5009_v31 = vmax.f32 %v4977_v27, 0.0  ;;  %4949 = vst.msk [vmem:[#allocation3 + $0x80] sm:$0xff] %vm336_vm1, %v4917_v48  ;;  %v16150_v51 = vpop.f32.mrb[146].mxu1  ;;  %v4565_v48 = vld [vmem:[#allocation3 + $0xc8] sm:$0xff]  ;;  %v4564_v27 = vld [vmem:[#allocation3 + $0xc0] sm:$0xff] }
 0x2ee   : > { %5042 = vst.msk [vmem:[#allocation2 + $0xb1] sm:$0xff] %vm336_vm1, %v5010_v9  ;;  %v4920_v17 = vadd.f32 %v16150_v51, %v4559_v47  ;;  %v4832_v39 = vpop.f32.mrb[147].mxu1  ;;  %v19323_v21 = vld [vmem:[#allocation2 + $0x78] sm:$0xff]  ;;  %v19327_v55 = vld [vmem:[#allocation2 + $0x80] sm:$0xff] }
 0x2ef   : > { %v19325_v23 = vld [vmem:[#allocation2 + $0x79] sm:$0xff]  ;;  %5041 = vst.msk [vmem:[#allocation2 + $0xa9] sm:$0xff] %vm336_vm1, %v5009_v31  ;;  %v4980_v36 = vld [vmem:[#allocation3 + $0x78] sm:$0xff]  ;;  %v4919_v32 = vadd.f32 %v4832_v39, %v4558_v6  ;;  %16200 = vmatprep.mubr.msk.f32.mxu0 %vm336_vm1, %v19323_v21 }
 0x2f0   : > { %16264 = vmatprep.mubr.msk.f32.mxu1 %vm336_vm1, %v19325_v23  ;;  %v19334_v46 = vld [vmem:[#allocation2 + $0x81] sm:$0xff]  ;;  %v5012_v34 = vmax.f32 %v4980_v36, 0.0  ;;  %4952 = vst.msk [vmem:[#allocation3 + $0x98] sm:$0xff] %vm336_vm1, %v4920_v17  ;;  %16201 = vmatmul.mubr.msk.f32.gmra.mrb[170].mxu0 %vm336_vm1, %v19327_v55 }
 0x2f1   : > { %v4979_v30 = vld [vmem:[#allocation3 + $0x70] sm:$0xff]  ;;  %16265 = vmatmul.mubr.msk.f32.gmra.mrb[170].mxu1 %vm336_vm1, %v19334_v46  ;;  %4951 = vst.msk [vmem:[#allocation3 + $0x90] sm:$0xff] %vm336_vm1, %v4919_v32  ;;  %v16153_v49 = vpop.f32.mrb[148].mxu1 }
 0x2f2   : > { %v5011_v43 = vmax.f32 %v4979_v30, 0.0  ;;  %5044 = vst.msk [vmem:[#allocation2 + $0xc9] sm:$0xff] %vm336_vm1, %v5012_v34  ;;  %v4922_v7 = vadd.f32 %v16153_v49, %v4561_v50  ;;  %v4842_v37 = vpop.f32.mrb[149].mxu1  ;;  %v19343_v40 = vld [vmem:[#allocation2 + $0x90] sm:$0xff]  ;;  %v19347_v63 = vld [vmem:[#allocation2 + $0x98] sm:$0xff]  ;;  %v4567_v50 = vld [vmem:[#allocation3 + $0xd8] sm:$0xff] }
 0x2f3   : > { %v19345_v61 = vld [vmem:[#allocation2 + $0x91] sm:$0xff]  ;;  %v4921_v10 = vadd.f32 %v4842_v37, %v4560_v4  ;;  %16203 = vmatprep.mubr.msk.f32.mxu0 %vm336_vm1, %v19343_v40  ;;  %v19354_v56 = vld [vmem:[#allocation2 + $0x99] sm:$0xff] }
 0x2f4   : > { %5043 = vst.msk [vmem:[#allocation2 + $0xc1] sm:$0xff] %vm336_vm1, %v5011_v43  ;;  %v4982_v20 = vld [vmem:[#allocation3 + $0x88] sm:$0xff]  ;;  %16267 = vmatprep.mubr.msk.f32.mxu1 %vm336_vm1, %v19345_v61  ;;  %v4981_v59 = vld [vmem:[#allocation3 + $0x80] sm:$0xff]  ;;  %4954 = vst.msk [vmem:[#allocation3 + $0xa8] sm:$0xff] %vm336_vm1, %v4922_v7  ;;  %16204 = vmatmul.mubr.msk.f32.gmra.mrb[172].mxu0 %vm336_vm1, %v19347_v63 }
 0x2f5   : > { %v5014_v24 = vmax.f32 %v4982_v20, 0.0  ;;  %16268 = vmatmul.mubr.msk.f32.gmra.mrb[172].mxu1 %vm336_vm1, %v19354_v56  ;;  %v5013_v57 = vmax.f32 %v4981_v59, 0.0  ;;  %4953 = vst.msk [vmem:[#allocation3 + $0xa0] sm:$0xff] %vm336_vm1, %v4921_v10  ;;  %v16156_v53 = vpop.f32.mrb[150].mxu1  ;;  %v19374_v15 = vld [vmem:[#allocation2 + $0xb1] sm:$0xff]  ;;  %v4566_v4 = vld [vmem:[#allocation3 + $0xd0] sm:$0xff] }
 0x2f6   : > { %v4924_v5 = vadd.f32 %v16156_v53, %v4563_v0  ;;  %v4852_v29 = vpop.f32.mrb[151].mxu1  ;;  %v19363_v42 = vld [vmem:[#allocation2 + $0xa8] sm:$0xff]  ;;  %v19367_v12 = vld [vmem:[#allocation2 + $0xb0] sm:$0xff] }
 0x2f7   : > { %5046 = vst.msk [vmem:[#allocation2 + $0xe1] sm:$0xff] %vm336_vm1, %v5014_v24  ;;  %v19365_v52 = vld [vmem:[#allocation2 + $0xa9] sm:$0xff]  ;;  %5045 = vst.msk [vmem:[#allocation2 + $0xd9] sm:$0xff] %vm336_vm1, %v5013_v57  ;;  %v4923_v11 = vadd.f32 %v4852_v29, %v4562_v62  ;;  %16206 = vmatprep.mubr.msk.f32.mxu0 %vm336_vm1, %v19363_v42  ;;  %v4569_v29 = vld [vmem:[#allocation3 + $0xe8] sm:$0xff] }
 0x2f8   : > { %v4984_v16 = vld [vmem:[#allocation3 + $0x98] sm:$0xff]  ;;  %16270 = vmatprep.mubr.msk.f32.mxu1 %vm336_vm1, %v19365_v52  ;;  %v4983_v22 = vld [vmem:[#allocation3 + $0x90] sm:$0xff]  ;;  %4956 = vst.msk [vmem:[#allocation3 + $0xb8] sm:$0xff] %vm336_vm1, %v4924_v5  ;;  %16207 = vmatmul.mubr.msk.f32.gmra.mrb[174].mxu0 %vm336_vm1, %v19367_v12 }
 0x2f9   : > { %v5016_v13 = vmax.f32 %v4984_v16, 0.0  ;;  %16271 = vmatmul.mubr.msk.f32.gmra.mrb[174].mxu1 %vm336_vm1, %v19374_v15  ;;  %v5015_v45 = vmax.f32 %v4983_v22, 0.0  ;;  %4955 = vst.msk [vmem:[#allocation3 + $0xb0] sm:$0xff] %vm336_vm1, %v4923_v11  ;;  %v16159_v9 = vpop.f32.mrb[152].mxu1  ;;  %v19394_v32 = vld [vmem:[#allocation2 + $0xc9] sm:$0xff] }
 0x2fa   : > { %v4926_v31 = vadd.f32 %v16159_v9, %v4565_v48  ;;  %v4862_v47 = vpop.f32.mrb[153].mxu1  ;;  %v4568_v11 = vld [vmem:[#allocation3 + $0xe0] sm:$0xff] }
 0x2fb   : > { %5048 = vst.msk [vmem:[#allocation2 + $0xf9] sm:$0xff] %vm336_vm1, %v5016_v13  ;;  %v19383_v51 = vld [vmem:[#allocation2 + $0xc0] sm:$0xff]  ;;  %v19387_v17 = vld [vmem:[#allocation2 + $0xc8] sm:$0xff]  ;;  %5047 = vst.msk [vmem:[#allocation2 + $0xf1] sm:$0xff] %vm336_vm1, %v5015_v45  ;;  %v4925_v36 = vadd.f32 %v4862_v47, %v4564_v27 }
 0x2fc   : > { %v19385_v6 = vld [vmem:[#allocation2 + $0xc1] sm:$0xff]  ;;  %v4986_v39 = vld [vmem:[#allocation3 + $0xa8] sm:$0xff]  ;;  %16209 = vmatprep.mubr.msk.f32.mxu0 %vm336_vm1, %v19383_v51  ;;  %v4985_v30 = vld [vmem:[#allocation3 + $0xa0] sm:$0xff]  ;;  %4958 = vst.msk [vmem:[#allocation3 + $0xc8] sm:$0xff] %vm336_vm1, %v4926_v31 }
 0x2fd   : > { %16273 = vmatprep.mubr.msk.f32.mxu1 %vm336_vm1, %v19385_v6  ;;  %v5018_v34 = vmax.f32 %v4986_v39, 0.0  ;;  %16210 = vmatmul.mubr.msk.f32.gmra.mrb[176].mxu0 %vm336_vm1, %v19387_v17  ;;  %v5017_v43 = vmax.f32 %v4985_v30, 0.0  ;;  %4957 = vst.msk [vmem:[#allocation3 + $0xc0] sm:$0xff] %vm336_vm1, %v4925_v36  ;;  %v16162_v49 = vpop.f32.mrb[154].mxu1  ;;  %v4571_v30 = vld [vmem:[#allocation3 + $0xf8] sm:$0xff] }
 0x2fe   : > { %16274 = vmatmul.mubr.msk.f32.gmra.mrb[176].mxu1 %vm336_vm1, %v19394_v32  ;;  %v4928_v7 = vadd.f32 %v16162_v49, %v4567_v50  ;;  %v4872_v37 = vpop.f32.mrb[155].mxu1  ;;  %v19403_v20 = vld [vmem:[#allocation2 + $0xd8] sm:$0xff]  ;;  %v19407_v24 = vld [vmem:[#allocation2 + $0xe0] sm:$0xff] }
 0x2ff   : > { %5050 = vst.msk [vmem:[#allocation2 + $0x111] sm:$0xff] %vm336_vm1, %v5018_v34  ;;  %v19405_v10 = vld [vmem:[#allocation2 + $0xd9] sm:$0xff]  ;;  %5049 = vst.msk [vmem:[#allocation2 + $0x109] sm:$0xff] %vm336_vm1, %v5017_v43  ;;  %v4988_v59 = vld [vmem:[#allocation3 + $0xb8] sm:$0xff]  ;;  %v4927_v57 = vadd.f32 %v4872_v37, %v4566_v4  ;;  %16212 = vmatprep.mubr.msk.f32.mxu0 %vm336_vm1, %v19403_v20 }
 0x300   : > { %16276 = vmatprep.mubr.msk.f32.mxu1 %vm336_vm1, %v19405_v10  ;;  %v19414_v0 = vld [vmem:[#allocation2 + $0xe1] sm:$0xff]  ;;  %v5020_v53 = vmax.f32 %v4988_v59, 0.0  ;;  %4960 = vst.msk [vmem:[#allocation3 + $0xd8] sm:$0xff] %vm336_vm1, %v4928_v7 }
 0x301   : > { %v4987_v62 = vld [vmem:[#allocation3 + $0xb0] sm:$0xff]  ;;  %16213 = vmatmul.mubr.msk.f32.gmra.mrb[178].mxu0 %vm336_vm1, %v19407_v24  ;;  %4959 = vst.msk [vmem:[#allocation3 + $0xd0] sm:$0xff] %vm336_vm1, %v4927_v57  ;;  %v16165_v16 = vpop.f32.mrb[156].mxu1 }
 0x302   : > { %16277 = vmatmul.mubr.msk.f32.gmra.mrb[178].mxu1 %vm336_vm1, %v19414_v0  ;;  %v5019_v5 = vmax.f32 %v4987_v62, 0.0  ;;  %5052 = vst.msk [vmem:[#allocation2 + $0x129] sm:$0xff] %vm336_vm1, %v5020_v53  ;;  %v4930_v13 = vadd.f32 %v16165_v16, %v4569_v29  ;;  %v4882_v22 = vpop.f32.mrb[157].mxu1  ;;  %v19423_v45 = vld [vmem:[#allocation2 + $0xf0] sm:$0xff]  ;;  %v19427_v9 = vld [vmem:[#allocation2 + $0xf8] sm:$0xff]  ;;  %v4570_v50 = vld [vmem:[#allocation3 + $0xf0] sm:$0xff] }
 0x303   : > { %v19425_v48 = vld [vmem:[#allocation2 + $0xf1] sm:$0xff]  ;;  %v4929_v31 = vadd.f32 %v4882_v22, %v4568_v11  ;;  %16215 = vmatprep.mubr.msk.f32.mxu0 %vm336_vm1, %v19423_v45  ;;  %v19434_v47 = vld [vmem:[#allocation2 + $0xf9] sm:$0xff] }
 0x304   : > { %5051 = vst.msk [vmem:[#allocation2 + $0x121] sm:$0xff] %vm336_vm1, %v5019_v5  ;;  %v4990_v27 = vld [vmem:[#allocation3 + $0xc8] sm:$0xff]  ;;  %16279 = vmatprep.mubr.msk.f32.mxu1 %vm336_vm1, %v19425_v48  ;;  %v4989_v36 = vld [vmem:[#allocation3 + $0xc0] sm:$0xff]  ;;  %4962 = vst.msk [vmem:[#allocation3 + $0xe8] sm:$0xff] %vm336_vm1, %v4930_v13 }
 0x305   : > { %v5022_v39 = vmax.f32 %v4990_v27, 0.0  ;;  %16216 = vmatmul.mubr.msk.f32.gmra.mrb[180].mxu0 %vm336_vm1, %v19427_v9  ;;  %v5021_v34 = vmax.f32 %v4989_v36, 0.0  ;;  %4961 = vst.msk [vmem:[#allocation3 + $0xe0] sm:$0xff] %vm336_vm1, %v4929_v31  ;;  %v16168_v43 = vpop.f32.mrb[158].mxu1 }
 0x306   : > { %16280 = vmatmul.mubr.msk.f32.gmra.mrb[180].mxu1 %vm336_vm1, %v19434_v47  ;;  %v4932_v49 = vadd.f32 %v16168_v43, %v4571_v30  ;;  %v4892_v4 = vpop.f32.mrb[159].mxu1  ;;  %v19443_v7 = vld [vmem:[#allocation2 + $0x108] sm:$0xff]  ;;  %v19447_v59 = vld [vmem:[#allocation2 + $0x110] sm:$0xff] }
 0x307   : > { %5054 = vst.msk [vmem:[#allocation2 + $0x141] sm:$0xff] %vm336_vm1, %v5022_v39  ;;  %v19445_v37 = vld [vmem:[#allocation2 + $0x109] sm:$0xff]  ;;  %5053 = vst.msk [vmem:[#allocation2 + $0x139] sm:$0xff] %vm336_vm1, %v5021_v34  ;;  %v4931_v53 = vadd.f32 %v4892_v4, %v4570_v50  ;;  %16218 = vmatprep.mubr.msk.f32.mxu0 %vm336_vm1, %v19443_v7  ;;  %v19454_v62 = vld [vmem:[#allocation2 + $0x111] sm:$0xff] }
 0x308   : > { %v4992_v57 = vld [vmem:[#allocation3 + $0xd8] sm:$0xff]  ;;  %16282 = vmatprep.mubr.msk.f32.mxu1 %vm336_vm1, %v19445_v37  ;;  %v4991_v29 = vld [vmem:[#allocation3 + $0xd0] sm:$0xff]  ;;  %4964 = vst.msk [vmem:[#allocation3 + $0xf8] sm:$0xff] %vm336_vm1, %v4932_v49 }
 0x309   : > { %v5024_v5 = vmax.f32 %v4992_v57, 0.0  ;;  %16219 = vmatmul.mubr.msk.f32.gmra.mrb[182].mxu0 %vm336_vm1, %v19447_v59  ;;  %v5023_v16 = vmax.f32 %v4991_v29, 0.0  ;;  %4963 = vst.msk [vmem:[#allocation3 + $0xf0] sm:$0xff] %vm336_vm1, %v4931_v53  ;;  %v19474_v31 = vld [vmem:[#allocation2 + $0x129] sm:$0xff] }
 0x30a   : > { %16283 = vmatmul.mubr.msk.f32.gmra.mrb[182].mxu1 %vm336_vm1, %v19454_v62  ;;  %21728 = vst [vmem:[#allocation4_spill] sm:$0xff] %v19474_v31 }
 0x30b   : > { %5056 = vst.msk [vmem:[#allocation2 + $0x159] sm:$0xff] %vm336_vm1, %v5024_v5  ;;  %v19463_v11 = vld [vmem:[#allocation2 + $0x120] sm:$0xff]  ;;  %v19467_v22 = vld [vmem:[#allocation2 + $0x128] sm:$0xff]  ;;  %5055 = vst.msk [vmem:[#allocation2 + $0x151] sm:$0xff] %vm336_vm1, %v5023_v16 }
 0x30c   : > { %v19465_v13 = vld [vmem:[#allocation2 + $0x121] sm:$0xff]  ;;  %v4994_v27 = vld [vmem:[#allocation3 + $0xe8] sm:$0xff]  ;;  %16221 = vmatprep.mubr.msk.f32.mxu0 %vm336_vm1, %v19463_v11  ;;  %v4993_v36 = vld [vmem:[#allocation3 + $0xe0] sm:$0xff] }
 0x30d   : > { %16285 = vmatprep.mubr.msk.f32.mxu1 %vm336_vm1, %v19465_v13  ;;  %v5026_v39 = vmax.f32 %v4994_v27, 0.0  ;;  %16222 = vmatmul.mubr.msk.f32.gmra.mrb[184].mxu0 %vm336_vm1, %v19467_v22  ;;  %v5025_v34 = vmax.f32 %v4993_v36, 0.0  ;;  %v6014_v36 = vld [vmem:[#allocation2 + $0x2] sm:$0xff] }
 0x30e   : > { %16286 = vmatmul.mubr.msk.f32.gmra.mrb[184].mxu1 %vm336_vm1, %v19474_v31  ;;  %v19481_v30 = vld [vmem:[#allocation2 + $0x138] sm:$0xff]  ;;  %v19485_v50 = vld [vmem:[#allocation2 + $0x140] sm:$0xff] }
 0x30f   : > { %5058 = vst.msk [vmem:[#allocation2 + $0x171] sm:$0xff] %vm336_vm1, %v5026_v39  ;;  %v19483_v43 = vld [vmem:[#allocation2 + $0x139] sm:$0xff]  ;;  %5057 = vst.msk [vmem:[#allocation2 + $0x169] sm:$0xff] %vm336_vm1, %v5025_v34  ;;  %v4996_v49 = vld [vmem:[#allocation3 + $0xf8] sm:$0xff]  ;;  %16224 = vmatprep.mubr.msk.f32.mxu0 %vm336_vm1, %v19481_v30 }
 0x310   : > { %21729 = vst [vmem:[#allocation5_spill] sm:$0xff] %v19483_v43  ;;  %16288 = vmatprep.mubr.msk.f32.mxu1 %vm336_vm1, %v19483_v43  ;;  %v19492_v4 = vld [vmem:[#allocation2 + $0x141] sm:$0xff]  ;;  %v5028_v57 = vmax.f32 %v4996_v49, 0.0  ;;  %v7452_v43 = vld [vmem:[%s21683_s5 + $0x158] sm:$0xff] }
 0x311   : > { %21730 = vst [vmem:[#allocation6_spill] sm:$0xff] %v19492_v4  ;;  %v4995_v53 = vld [vmem:[#allocation3 + $0xf0] sm:$0xff]  ;;  %16225 = vmatmul.mubr.msk.f32.gmra.mrb[186].mxu0 %vm336_vm1, %v19485_v50  ;;  %v7456_v31 = vld [vmem:[%s21683_s5 + $0x178] sm:$0xff] }
 0x312   : > { %16289 = vmatmul.mubr.msk.f32.gmra.mrb[186].mxu1 %vm336_vm1, %v19492_v4  ;;  %v5027_v5 = vmax.f32 %v4995_v53, 0.0  ;;  %5060 = vst.msk [vmem:[#allocation2 + $0x189] sm:$0xff] %vm336_vm1, %v5028_v57  ;;  %v19499_v29 = vld [vmem:[#allocation2 + $0x150] sm:$0xff]  ;;  %v19503_v27 = vld [vmem:[#allocation2 + $0x158] sm:$0xff] }
 0x313   : > { %v19501_v16 = vld [vmem:[#allocation2 + $0x151] sm:$0xff]  ;;  %16227 = vmatprep.mubr.msk.f32.mxu0 %vm336_vm1, %v19499_v29  ;;  %v19510_v39 = vld [vmem:[#allocation2 + $0x159] sm:$0xff] }
 0x314   : > { %21731 = vst [vmem:[#allocation7_spill] sm:$0xff] %v19501_v16  ;;  %5059 = vst.msk [vmem:[#allocation2 + $0x181] sm:$0xff] %vm336_vm1, %v5027_v5  ;;  %16291 = vmatprep.mubr.msk.f32.mxu1 %vm336_vm1, %v19501_v16  ;;  %v6994_v5 = vld [vmem:[%s21683_s5 + $0x110] sm:$0xff] }
 0x315   : > { %21732 = vst [vmem:[#allocation8_spill] sm:$0xff] %v19510_v39  ;;  %16228 = vmatmul.mubr.msk.f32.gmra.mrb[188].mxu0 %vm336_vm1, %v19503_v27  ;;  %v7451_v4 = vld [vmem:[%s21683_s5 + $0x150] sm:$0xff] }
 0x316   : > { %16292 = vmatmul.mubr.msk.f32.gmra.mrb[188].mxu1 %vm336_vm1, %v19510_v39  ;;  %v19516_v34 = vld [vmem:[#allocation2 + $0x168] sm:$0xff]  ;;  %v19520_v57 = vld [vmem:[#allocation2 + $0x170] sm:$0xff]  ;;  %v6995_v39 = vld [vmem:[%s21683_s5 + $0x118] sm:$0xff] }
 0x317   : > { %v19518_v49 = vld [vmem:[#allocation2 + $0x169] sm:$0xff]  ;;  %16230 = vmatprep.mubr.msk.f32.mxu0 %vm336_vm1, %v19516_v34  ;;  %v19526_v53 = vld [vmem:[#allocation2 + $0x171] sm:$0xff]  ;;  %v17469_v16 = vpack.c.bf16 %v6995_v39, %v6994_v5  ;;  %v7453_v5 = vld [vmem:[%s21683_s5 + $0x160] sm:$0xff] }
 0x318   : > { %21733 = vst [vmem:[#allocation9_spill] sm:$0xff] %v19518_v49  ;;  %16294 = vmatprep.mubr.msk.f32.mxu1 %vm336_vm1, %v19518_v49  ;;  %21734 = vst [vmem:[#allocation10_spill] sm:$0xff] %v19526_v53  ;;  %v6015_v49 = vld [vmem:[#allocation2 + $0xa] sm:$0xff] }
 0x319   : > { %16231 = vmatmul.mubr.msk.f32.gmra.mrb[190].mxu0 %vm336_vm1, %v19520_v57  ;;  %v6997_v39 = vld [vmem:[%s21683_s5 + $0x128] sm:$0xff] }
 0x31a   : > { %16295 = vmatmul.mubr.msk.f32.gmra.mrb[190].mxu1 %vm336_vm1, %v19526_v53  ;;  %16313 = vmatprep.mubr.msk.f32.mxu0 %vm336_vm1, %v6014_v36  ;;  %v19550_v53 = vld [vmem:[#allocation2 + $0x1a] sm:$0xff]  ;;  %v19563_v36 = vld [vmem:[#allocation2 + $0x22] sm:$0xff] }
 0x31b   : > { %16377 = vmatprep.mubr.msk.f32.mxu1 %vm336_vm1, %v19243_v54  ;;  %v6996_v54 = vld [vmem:[%s21683_s5 + $0x120] sm:$0xff] }
 0x31d   : > { %16314 = vmatmul.mubr.msk.f32.vlgmr.msra.gmra.mrb[192].mxu0 %vm336_vm1, %v6015_v49  ;;  %v17473_v49 = vpack.c.bf16 %v6997_v39, %v6996_v54  ;;  %v7455_v39 = vld [vmem:[%s21683_s5 + $0x170] sm:$0xff] }
 0x31e   : > { %16378 = vmatmul.mubr.msk.f32.vlgmr.msra.gmra.mrb[192].mxu1 %vm336_vm1, %v19247_v8  ;;  %17468 = vmatpush3.bf16.msra.mxu0 %v19163_v19  ;;  %v17485_v8 = vpack.c.bf16 %v7452_v43, %v7451_v4  ;;  %v7454_v19 = vld [vmem:[%s21683_s5 + $0x168] sm:$0xff]  ;;  %v6999_v43 = vld [vmem:[%s21683_s5 + $0x138] sm:$0xff] }
 0x31f   : > { %16316 = vmatprep.mubr.msk.f32.mxu0 %vm336_vm1, %v19550_v53  ;;  %16380 = vmatprep.mubr.msk.f32.mxu1 %vm336_vm1, %v19263_v44  ;;  %v19576_v44 = vld [vmem:[#allocation2 + $0x32] sm:$0xff]  ;;  %v17489_v4 = vpack.c.bf16 %v7454_v19, %v7453_v5  ;;  %v17493_v5 = vpack.c.bf16 %v7456_v31, %v7455_v39  ;;  %v19719_v39 = vld [vmem:[#allocation2 + $0xca] sm:$0xff] }
 0x320   : > { %17470 = vmatprep.subr.bf16.mxu0 %v17469_v16  ;;  %17484 = vmatpush3.bf16.msra.mxu1 %v19223_v18  ;;  %v6998_v18 = vld [vmem:[%s21683_s5 + $0x130] sm:$0xff] }
 0x321   : > { %16317 = vmatmul.mubr.msk.f32.gmra.mrb[194].mxu0 %vm336_vm1, %v19563_v36  ;;  %17486 = vmatprep.subr.bf16.mxu1 %v17485_v8  ;;  %v17477_v54 = vpack.c.bf16 %v6999_v43, %v6998_v18  ;;  %v8363_v18 = vld [vmem:[%s21683_s5 + $0x1c0] sm:$0xff]  ;;  %v8364_v43 = vld [vmem:[%s21683_s5 + $0x1c8] sm:$0xff] }
 0x322   : > { %16381 = vmatmul.mubr.msk.f32.gmra.mrb[194].mxu1 %vm336_vm1, %v19267_v14  ;;  %16319 = vmatprep.mubr.msk.f32.mxu0 %vm336_vm1, %v19576_v44  ;;  %v19588_v14 = vld [vmem:[#allocation2 + $0x3a] sm:$0xff]  ;;  %v19632_v31 = vpack.c.bf16 %v8364_v43, %v8363_v18  ;;  %v19731_v43 = vld [vmem:[#allocation2 + $0xe2] sm:$0xff] }
 0x323   : > { %16383 = vmatprep.mubr.msk.f32.mxu1 %vm336_vm1, %v19283_v26  ;;  %17472 = vmatpush3.bf16.msra.mxu0 %v17469_v16  ;;  %v19600_v26 = vld [vmem:[#allocation2 + $0x4a] sm:$0xff]  ;;  %v7906_v16 = vld [vmem:[%s21683_s5 + $0x180] sm:$0xff] }
 0x324   : > { %17474 = vmatprep.subr.bf16.mxu0 %v17473_v49  ;;  %17488 = vmatpush3.bf16.msra.mxu1 %v17485_v8  ;;  %v7907_v8 = vld [vmem:[%s21683_s5 + $0x188] sm:$0xff] }
 0x325   : > { %16320 = vmatmul.mubr.msk.f32.gmra.mrb[196].mxu0 %vm336_vm1, %v19588_v14  ;;  %17490 = vmatprep.subr.bf16.mxu1 %v17489_v4  ;;  %v19614_v19 = vpack.c.bf16 %v7907_v8, %v7906_v16  ;;  %v19725_v16 = vld [vmem:[#allocation2 + $0xda] sm:$0xff] }
 0x326   : > { %16384 = vmatmul.mubr.msk.f32.gmra.mrb[196].mxu1 %vm336_vm1, %v19287_v1  ;;  %16322 = vmatprep.mubr.msk.f32.mxu0 %vm336_vm1, %v19600_v26  ;;  %v19612_v1 = vld [vmem:[#allocation2 + $0x52] sm:$0xff] }
 0x327   : > { %16386 = vmatprep.mubr.msk.f32.mxu1 %vm336_vm1, %v19303_v25  ;;  %17476 = vmatpush3.bf16.msra.mxu0 %v17473_v49  ;;  %v19626_v25 = vld [vmem:[#allocation2 + $0x62] sm:$0xff]  ;;  %v19634_v49 = vld [vmem:[#allocation2 + $0x6a] sm:$0xff] }
 0x328   : > { %17478 = vmatprep.subr.bf16.mxu0 %v17477_v54  ;;  %17492 = vmatpush3.bf16.msra.mxu1 %v17489_v4  ;;  %v19695_v4 = vld [vmem:[#allocation2 + $0x9a] sm:$0xff] }
 0x329   : > { %16323 = vmatmul.mubr.msk.f32.gmra.mrb[198].mxu0 %vm336_vm1, %v19612_v1  ;;  %17494 = vmatprep.subr.bf16.mxu1 %v17493_v5 }
 0x32a   : > { %16387 = vmatmul.mubr.msk.f32.gmra.mrb[198].mxu1 %vm336_vm1, %v19307_v38  ;;  %16325 = vmatprep.mubr.msk.f32.mxu0 %vm336_vm1, %v19626_v25  ;;  %v19641_v38 = vld [vmem:[#allocation2 + $0x7a] sm:$0xff] }
 0x32b   : > { %16389 = vmatprep.mubr.msk.f32.mxu1 %vm336_vm1, %v19323_v21  ;;  %17480 = vmatpush3.bf16.msra.mxu0 %v17477_v54  ;;  %v13877_v21 = vld [vmem:[%s21684_s6] ss:$0 sm:$0xff]  ;;  %v19701_v54 = vld [vmem:[#allocation2 + $0xaa] sm:$0xff] }
 0x32c   : > { %17496 = vmatpush3.bf16.msra.mxu1 %v17493_v5  ;;  %17498 = vmatprep.subr.bf16.mxu0 %v19614_v19  ;;  %5069 = vst.msk [vmem:[#allocation3 + $0x8] sm:$0xff] %vm425_vm0, %v13877_v21  ;;  %5068 = vst.msk [vmem:[#allocation3] sm:$0xff] %vm425_vm0, %v13877_v21 }
 0x32d   : > { %16326 = vmatmul.mubr.msk.f32.gmra.mrb[200].mxu0 %vm336_vm1, %v19634_v49  ;;  %17514 = vmatprep.subr.bf16.mxu1 %v19632_v31  ;;  %5070 = vst.msk [vmem:[#allocation3 + $0x10] sm:$0xff] %vm425_vm0, %v13877_v21  ;;  %5071 = vst.msk [vmem:[#allocation3 + $0x18] sm:$0xff] %vm425_vm0, %v13877_v21 }
 0x32e   : > { %16390 = vmatmul.mubr.msk.f32.gmra.mrb[200].mxu1 %vm336_vm1, %v19327_v55  ;;  %16328 = vmatprep.mubr.msk.f32.mxu0 %vm336_vm1, %v19641_v38  ;;  %5072 = vst.msk [vmem:[#allocation3 + $0x20] sm:$0xff] %vm425_vm0, %v13877_v21  ;;  %5073 = vst.msk [vmem:[#allocation3 + $0x28] sm:$0xff] %vm425_vm0, %v13877_v21  ;;  %v19683_v55 = vld [vmem:[#allocation2 + $0x82] sm:$0xff] }
 0x32f   : > { %16392 = vmatprep.mubr.msk.f32.mxu1 %vm336_vm1, %v19343_v40  ;;  %5074 = vst.msk [vmem:[#allocation3 + $0x30] sm:$0xff] %vm425_vm0, %v13877_v21  ;;  %5075 = vst.msk [vmem:[#allocation3 + $0x38] sm:$0xff] %vm425_vm0, %v13877_v21  ;;  %v19689_v40 = vld [vmem:[#allocation2 + $0x92] sm:$0xff] }
 0x330   : > { %5076 = vst.msk [vmem:[#allocation3 + $0x40] sm:$0xff] %vm425_vm0, %v13877_v21  ;;  %5077 = vst.msk [vmem:[#allocation3 + $0x48] sm:$0xff] %vm425_vm0, %v13877_v21 }
 0x331   : > { %5078 = vst.msk [vmem:[#allocation3 + $0x50] sm:$0xff] %vm425_vm0, %v13877_v21  ;;  %5079 = vst.msk [vmem:[#allocation3 + $0x58] sm:$0xff] %vm425_vm0, %v13877_v21  ;;  %16329 = vmatmul.mubr.msk.f32.gmra.mrb[202].mxu0 %vm336_vm1, %v19683_v55 }
 0x332   : > { %5080 = vst.msk [vmem:[#allocation3 + $0x60] sm:$0xff] %vm425_vm0, %v13877_v21  ;;  %5081 = vst.msk [vmem:[#allocation3 + $0x68] sm:$0xff] %vm425_vm0, %v13877_v21  ;;  %16393 = vmatmul.mubr.msk.f32.gmra.mrb[202].mxu1 %vm336_vm1, %v19347_v63  ;;  %16331 = vmatprep.mubr.msk.f32.mxu0 %vm336_vm1, %v19689_v40  ;;  %v19707_v63 = vld [vmem:[#allocation2 + $0xb2] sm:$0xff] }
 0x333   : > { %5082 = vst.msk [vmem:[#allocation3 + $0x70] sm:$0xff] %vm425_vm0, %v13877_v21  ;;  %5083 = vst.msk [vmem:[#allocation3 + $0x78] sm:$0xff] %vm425_vm0, %v13877_v21  ;;  %16395 = vmatprep.mubr.msk.f32.mxu1 %vm336_vm1, %v19363_v42  ;;  %v19713_v42 = vld [vmem:[#allocation2 + $0xc2] sm:$0xff] }
 0x334   : > { %5084 = vst.msk [vmem:[#allocation3 + $0x80] sm:$0xff] %vm425_vm0, %v13877_v21  ;;  %5085 = vst.msk [vmem:[#allocation3 + $0x88] sm:$0xff] %vm425_vm0, %v13877_v21 }
 0x335   : > { %5086 = vst.msk [vmem:[#allocation3 + $0x90] sm:$0xff] %vm425_vm0, %v13877_v21  ;;  %5087 = vst.msk [vmem:[#allocation3 + $0x98] sm:$0xff] %vm425_vm0, %v13877_v21  ;;  %16332 = vmatmul.mubr.msk.f32.gmra.mrb[204].mxu0 %vm336_vm1, %v19695_v4 }
 0x336   : > { %5088 = vst.msk [vmem:[#allocation3 + $0xa0] sm:$0xff] %vm425_vm0, %v13877_v21  ;;  %5089 = vst.msk [vmem:[#allocation3 + $0xa8] sm:$0xff] %vm425_vm0, %v13877_v21  ;;  %16396 = vmatmul.mubr.msk.f32.gmra.mrb[204].mxu1 %vm336_vm1, %v19367_v12  ;;  %16334 = vmatprep.mubr.msk.f32.mxu0 %vm336_vm1, %v19701_v54  ;;  %v5133_v12 = vld [vmem:[#allocation3 + $0x8] sm:$0xff] }
 0x337   : > { %5090 = vst.msk [vmem:[#allocation3 + $0xb0] sm:$0xff] %vm425_vm0, %v13877_v21  ;;  %5091 = vst.msk [vmem:[#allocation3 + $0xb8] sm:$0xff] %vm425_vm0, %v13877_v21  ;;  %16398 = vmatprep.mubr.msk.f32.mxu1 %vm336_vm1, %v19383_v51  ;;  %v5132_v51 = vld [vmem:[#allocation3] sm:$0xff] }
 0x338   : > { %5092 = vst.msk [vmem:[#allocation3 + $0xc0] sm:$0xff] %vm425_vm0, %v13877_v21  ;;  %5093 = vst.msk [vmem:[#allocation3 + $0xc8] sm:$0xff] %vm425_vm0, %v13877_v21 }
 0x339   : > { %5094 = vst.msk [vmem:[#allocation3 + $0xd0] sm:$0xff] %vm425_vm0, %v13877_v21  ;;  %5095 = vst.msk [vmem:[#allocation3 + $0xd8] sm:$0xff] %vm425_vm0, %v13877_v21  ;;  %16335 = vmatmul.mubr.msk.f32.gmra.mrb[206].mxu0 %vm336_vm1, %v19707_v63  ;;  %v16251_v18 = vpop.f32.mrb[160].mxu1 }
 0x33a   : > { %5096 = vst.msk [vmem:[#allocation3 + $0xe0] sm:$0xff] %vm425_vm0, %v13877_v21  ;;  %5097 = vst.msk [vmem:[#allocation3 + $0xe8] sm:$0xff] %vm425_vm0, %v13877_v21  ;;  %16399 = vmatmul.mubr.msk.f32.gmra.mrb[206].mxu1 %vm336_vm1, %v19387_v17  ;;  %16337 = vmatprep.mubr.msk.f32.mxu0 %vm336_vm1, %v19713_v42  ;;  %v16187_v17 = vpop.f32.mrb[160].mxu0 }
 0x33b   : > { %5098 = vst.msk [vmem:[#allocation3 + $0xf0] sm:$0xff] %vm425_vm0, %v13877_v21  ;;  %5099 = vst.msk [vmem:[#allocation3 + $0xf8] sm:$0xff] %vm425_vm0, %v13877_v21  ;;  %16401 = vmatprep.mubr.msk.f32.mxu1 %vm336_vm1, %v19403_v20  ;;  %v5494_v20 = vadd.f32 %v16187_v17, %v5133_v12  ;;  %v5334_v8 = vpop.f32.mrb[161].mxu0  ;;  %v5791_v21 = vpop.f32.mrb[161].mxu1  ;;  %v19751_v12 = vld [vmem:[#allocation2 + $0x10a] sm:$0xff] }
 0x33c   : > { %v5493_v5 = vadd.f32 %v5334_v8, %v5132_v51  ;;  %v19757_v51 = vld [vmem:[#allocation2 + $0x112] sm:$0xff] }
 0x33d   : > { %16338 = vmatmul.mubr.msk.f32.gmra.mrb[208].mxu0 %vm336_vm1, %v19719_v39  ;;  %5526 = vst.msk [vmem:[#allocation3 + $0x8] sm:$0xff] %vm425_vm0, %v5494_v20  ;;  %v19789_v8 = vld [vmem:[#allocation2 + $0x152] sm:$0xff] }
 0x33e   : > { %16402 = vmatmul.mubr.msk.f32.gmra.mrb[208].mxu1 %vm336_vm1, %v19407_v24  ;;  %16340 = vmatprep.mubr.msk.f32.mxu0 %vm336_vm1, %v19725_v16  ;;  %v19738_v24 = vld [vmem:[#allocation2 + $0xf2] sm:$0xff]  ;;  %5525 = vst.msk [vmem:[#allocation3] sm:$0xff] %vm425_vm0, %v5493_v5  ;;  %v19803_v5 = vld [vmem:[#allocation2 + $0x180] sm:$0xff] }
 0x33f   : > { %16404 = vmatprep.mubr.msk.f32.mxu1 %vm336_vm1, %v19423_v45  ;;  %v19745_v45 = vld [vmem:[#allocation2 + $0xfa] sm:$0xff] }
 0x341   : > { %16341 = vmatmul.mubr.msk.f32.gmra.mrb[210].mxu0 %vm336_vm1, %v19731_v43 }
 0x342   : > { %16405 = vmatmul.mubr.msk.f32.gmra.mrb[210].mxu1 %vm336_vm1, %v19427_v9  ;;  %16343 = vmatprep.mubr.msk.f32.mxu0 %vm336_vm1, %v19738_v24 }
 0x343   : > { %16407 = vmatprep.mubr.msk.f32.mxu1 %vm336_vm1, %v19443_v7 }
 0x344   : > { %v5590_v9 = vld [vmem:[#allocation3 + $0x8] sm:$0xff] }
 0x345   : > { %16344 = vmatmul.mubr.msk.f32.gmra.mrb[212].mxu0 %vm336_vm1, %v19745_v45  ;;  %v5951_v7 = vadd.f32 %v16251_v18, %v5590_v9  ;;  %v5589_v17 = vld [vmem:[#allocation3] sm:$0xff]  ;;  %v19814_v18 = vld [vmem:[#allocation2 + $0x188] sm:$0xff] }
 0x346   : > { %16408 = vmatmul.mubr.msk.f32.gmra.mrb[212].mxu1 %vm336_vm1, %v19447_v59  ;;  %16346 = vmatprep.mubr.msk.f32.mxu0 %vm336_vm1, %v19751_v12  ;;  %v19763_v59 = vld [vmem:[#allocation2 + $0x122] sm:$0xff]  ;;  %v5950_v20 = vadd.f32 %v5791_v21, %v5589_v17  ;;  %v8365_v9 = vld [vmem:[%s21683_s5 + $0x1d0] sm:$0xff] }
 0x347   : > { %16410 = vmatprep.mubr.msk.f32.mxu1 %vm336_vm1, %v19463_v11  ;;  %5983 = vst.msk [vmem:[#allocation3 + $0x8] sm:$0xff] %vm425_vm0, %v5951_v7  ;;  %v19771_v11 = vld [vmem:[#allocation2 + $0x12a] sm:$0xff]  ;;  %v8366_v7 = vld [vmem:[%s21683_s5 + $0x1d8] sm:$0xff] }
 0x348   : > { %5982 = vst.msk [vmem:[#allocation3] sm:$0xff] %vm425_vm0, %v5950_v20  ;;  %v8368_v20 = vld [vmem:[%s21683_s5 + $0x1e8] sm:$0xff] }
 0x349   : > { %16347 = vmatmul.mubr.msk.f32.gmra.mrb[214].mxu0 %vm336_vm1, %v19757_v51 }
 0x34a   : > { %16411 = vmatmul.mubr.msk.f32.gmra.mrb[214].mxu1 %vm336_vm1, %v19467_v22  ;;  %16349 = vmatprep.mubr.msk.f32.mxu0 %vm336_vm1, %v19763_v59  ;;  %v19777_v22 = vld [vmem:[#allocation2 + $0x13a] sm:$0xff] }
 0x34b   : > { %16413 = vmatprep.mubr.msk.f32.mxu1 %vm336_vm1, %v19481_v30  ;;  %v19783_v30 = vld [vmem:[#allocation2 + $0x142] sm:$0xff] }
 0x34d   : > { %16350 = vmatmul.mubr.msk.f32.gmra.mrb[216].mxu0 %vm336_vm1, %v19771_v11 }
 0x34e   : > { %16414 = vmatmul.mubr.msk.f32.gmra.mrb[216].mxu1 %vm336_vm1, %v19485_v50  ;;  %16352 = vmatprep.mubr.msk.f32.mxu0 %vm336_vm1, %v19777_v22  ;;  %v19795_v50 = vld [vmem:[#allocation2 + $0x15a] sm:$0xff] }
 0x34f   : > { %16416 = vmatprep.mubr.msk.f32.mxu1 %vm336_vm1, %v19499_v29  ;;  %v19801_v29 = vld [vmem:[#allocation2 + $0x16a] sm:$0xff] }
 0x351   : > { %16353 = vmatmul.mubr.msk.f32.gmra.mrb[218].mxu0 %vm336_vm1, %v19783_v30 }
 0x352   : > { %16417 = vmatmul.mubr.msk.f32.gmra.mrb[218].mxu1 %vm336_vm1, %v19503_v27  ;;  %16355 = vmatprep.mubr.msk.f32.mxu0 %vm336_vm1, %v19789_v8  ;;  %v7908_v27 = vld [vmem:[%s21683_s5 + $0x190] sm:$0xff] }
 0x353   : > { %16419 = vmatprep.mubr.msk.f32.mxu1 %vm336_vm1, %v19516_v34  ;;  %v19812_v34 = vld [vmem:[#allocation2 + $0x172] sm:$0xff] }
 0x355   : > { %16356 = vmatmul.mubr.msk.f32.gmra.mrb[220].mxu0 %vm336_vm1, %v19795_v50 }
 0x356   : > { %16420 = vmatmul.mubr.msk.f32.gmra.mrb[220].mxu1 %vm336_vm1, %v19520_v57  ;;  %16358 = vmatprep.mubr.msk.f32.mxu0 %vm336_vm1, %v19801_v29  ;;  %v7909_v57 = vld [vmem:[%s21683_s5 + $0x198] sm:$0xff] }
 0x357   : > { %16422 = vmatprep.mubr.msk.f32.mxu1 %vm336_vm1, %v19803_v5  ;;  %v17501_v21 = vpack.c.bf16 %v7909_v57, %v7908_v27  ;;  %v7852_v27 = vld [vmem:[#allocation2 + $0xa8] sm:$0xff]  ;;  %v7853_v57 = vld [vmem:[#allocation2 + $0xb0] sm:$0xff] }
 0x359   : > { %16359 = vmatmul.mubr.msk.f32.gmra.mrb[222].mxu0 %vm336_vm1, %v19812_v34 }
 0x35a   : > { %16423 = vmatmul.mubr.msk.f32.gmra.mrb[222].mxu1 %vm336_vm1, %v19814_v18  ;;  %16441 = vmatprep.mubr.msk.f32.mxu0 %vm336_vm1, %v19245_v60  ;;  %v7910_v60 = vld [vmem:[%s21683_s5 + $0x1a0] sm:$0xff] }
 0x35b   : > { %16505 = vmatprep.mubr.msk.f32.mxu1 %vm336_vm1, %v19550_v53  ;;  %v7911_v53 = vld [vmem:[%s21683_s5 + $0x1a8] sm:$0xff] }
 0x35c   : > { %v17505_v17 = vpack.c.bf16 %v7911_v53, %v7910_v60  ;;  %v5135_v60 = vld [vmem:[#allocation3 + $0x18] sm:$0xff]  ;;  %v5134_v53 = vld [vmem:[#allocation3 + $0x10] sm:$0xff] }
 0x35d   : > { %16442 = vmatmul.mubr.msk.f32.vlgmr.msra.gmra.mrb[224].mxu0 %vm336_vm1, %v19254_v28  ;;  %v17517_v28 = vpack.c.bf16 %v8366_v7, %v8365_v9  ;;  %v7854_v9 = vld [vmem:[#allocation2 + $0xc0] sm:$0xff] }
 0x35e   : > { %16506 = vmatmul.mubr.msk.f32.vlgmr.msra.gmra.mrb[224].mxu1 %vm336_vm1, %v19563_v36  ;;  %17500 = vmatpush3.bf16.msra.mxu0 %v19614_v19  ;;  %v8367_v36 = vld [vmem:[%s21683_s5 + $0x1e0] sm:$0xff] }
 0x35f   : > { %16444 = vmatprep.mubr.msk.f32.mxu0 %vm336_vm1, %v19265_v41  ;;  %16508 = vmatprep.mubr.msk.f32.mxu1 %vm336_vm1, %v19576_v44  ;;  %v7912_v41 = vld [vmem:[%s21683_s5 + $0x1b0] sm:$0xff]  ;;  %v7913_v44 = vld [vmem:[%s21683_s5 + $0x1b8] sm:$0xff]  ;;  %v8311_v7 = vld [vmem:[#allocation2 + $0xc1] sm:$0xff] }
 0x360   : > { %17502 = vmatprep.subr.bf16.mxu0 %v17501_v21  ;;  %17516 = vmatpush3.bf16.msra.mxu1 %v19632_v31  ;;  %v17509_v19 = vpack.c.bf16 %v7913_v44, %v7912_v41  ;;  %v8370_v31 = vld [vmem:[%s21683_s5 + $0x1f8] sm:$0xff] }
 0x361   : > { %16445 = vmatmul.mubr.msk.f32.gmra.mrb[226].mxu0 %vm336_vm1, %v19274_v33  ;;  %17518 = vmatprep.subr.bf16.mxu1 %v17517_v28  ;;  %v17521_v33 = vpack.c.bf16 %v8368_v20, %v8367_v36  ;;  %v7855_v36 = vld [vmem:[#allocation2 + $0xc8] sm:$0xff] }
 0x362   : > { %16509 = vmatmul.mubr.msk.f32.gmra.mrb[226].mxu1 %vm336_vm1, %v19588_v14  ;;  %16447 = vmatprep.mubr.msk.f32.mxu0 %vm336_vm1, %v19285_v2  ;;  %v8369_v14 = vld [vmem:[%s21683_s5 + $0x1f0] sm:$0xff]  ;;  %v8820_v2 = vld [vmem:[%s21683_s5 + $0x200] sm:$0xff] }
 0x363   : > { %16511 = vmatprep.mubr.msk.f32.mxu1 %vm336_vm1, %v19600_v26  ;;  %17504 = vmatpush3.bf16.msra.mxu0 %v17501_v21  ;;  %v8821_v26 = vld [vmem:[%s21683_s5 + $0x208] sm:$0xff]  ;;  %v8310_v21 = vld [vmem:[#allocation2 + $0xb1] sm:$0xff] }
 0x364   : > { %17506 = vmatprep.subr.bf16.mxu0 %v17505_v17  ;;  %17520 = vmatpush3.bf16.msra.mxu1 %v17517_v28  ;;  %v8312_v20 = vld [vmem:[#allocation2 + $0xc9] sm:$0xff] }
 0x365   : > { %16448 = vmatmul.mubr.msk.f32.gmra.mrb[228].mxu0 %vm336_vm1, %v19294_v3  ;;  %17522 = vmatprep.subr.bf16.mxu1 %v17521_v33  ;;  %v17525_v3 = vpack.c.bf16 %v8370_v31, %v8369_v14  ;;  %v8313_v14 = vld [vmem:[#allocation2 + $0xd9] sm:$0xff] }
 0x366   : > { %16512 = vmatmul.mubr.msk.f32.gmra.mrb[228].mxu1 %vm336_vm1, %v19612_v1  ;;  %16450 = vmatprep.mubr.msk.f32.mxu0 %vm336_vm1, %v19305_v35  ;;  %v19889_v1 = vpack.c.bf16 %v8821_v26, %v8820_v2  ;;  %v21735_v35 = vld [vmem:[#allocation4_spill] sm:$0xff]  ;;  %v5137_v2 = vld [vmem:[#allocation3 + $0x28] sm:$0xff] }
 0x367   : > { %16514 = vmatprep.mubr.msk.f32.mxu1 %vm336_vm1, %v19626_v25  ;;  %17508 = vmatpush3.bf16.msra.mxu0 %v17505_v17  ;;  %v8300_v25 = vld [vmem:[#allocation2 + $0x39] sm:$0xff]  ;;  %v5136_v26 = vld [vmem:[#allocation3 + $0x20] sm:$0xff] }
 0x368   : > { %17510 = vmatprep.subr.bf16.mxu0 %v17509_v19  ;;  %17524 = vmatpush3.bf16.msra.mxu1 %v17521_v33 }
 0x369   : > { %16451 = vmatmul.mubr.msk.f32.gmra.mrb[230].mxu0 %vm336_vm1, %v19314_v58  ;;  %17526 = vmatprep.subr.bf16.mxu1 %v17525_v3  ;;  %v21736_v58 = vld [vmem:[#allocation5_spill] sm:$0xff] }
 0x36a   : > { %16515 = vmatmul.mubr.msk.f32.gmra.mrb[230].mxu1 %vm336_vm1, %v19634_v49  ;;  %16453 = vmatprep.mubr.msk.f32.mxu0 %vm336_vm1, %v19325_v23  ;;  %v21737_v23 = vld [vmem:[#allocation6_spill] sm:$0xff]  ;;  %v7844_v49 = vld [vmem:[#allocation2 + $0x48] sm:$0xff] }
 0x36b   : > { %16517 = vmatprep.mubr.msk.f32.mxu1 %vm336_vm1, %v19641_v38  ;;  %17512 = vmatpush3.bf16.msra.mxu0 %v17509_v19  ;;  %v8824_v38 = vld [vmem:[%s21683_s5 + $0x220] sm:$0xff]  ;;  %v7856_v19 = vld [vmem:[#allocation2 + $0xd8] sm:$0xff] }
 0x36c   : > { %17528 = vmatpush3.bf16.msra.mxu1 %v17525_v3  ;;  %17530 = vmatprep.subr.bf16.mxu0 %v19889_v1 }
 0x36d   : > { %16454 = vmatmul.mubr.msk.f32.gmra.mrb[232].mxu0 %vm336_vm1, %v19334_v46  ;;  %v21738_v46 = vld [vmem:[#allocation7_spill] sm:$0xff] }
 0x36e   : > { %16518 = vmatmul.mubr.msk.f32.gmra.mrb[232].mxu1 %vm336_vm1, %v19683_v55  ;;  %16456 = vmatprep.mubr.msk.f32.mxu0 %vm336_vm1, %v19345_v61  ;;  %v21739_v61 = vld [vmem:[#allocation8_spill] sm:$0xff]  ;;  %v8825_v55 = vld [vmem:[%s21683_s5 + $0x228] sm:$0xff] }
 0x36f   : > { %16520 = vmatprep.mubr.msk.f32.mxu1 %vm336_vm1, %v19689_v40  ;;  %v8301_v40 = vld [vmem:[#allocation2 + $0x49] sm:$0xff] }
 0x371   : > { %16457 = vmatmul.mubr.msk.f32.gmra.mrb[234].mxu0 %vm336_vm1, %v19354_v56  ;;  %v21740_v56 = vld [vmem:[#allocation9_spill] sm:$0xff] }
 0x372   : > { %16521 = vmatmul.mubr.msk.f32.gmra.mrb[234].mxu1 %vm336_vm1, %v19695_v4  ;;  %16459 = vmatprep.mubr.msk.f32.mxu0 %vm336_vm1, %v19365_v52  ;;  %v21741_v52 = vld [vmem:[#allocation10_spill] sm:$0xff]  ;;  %v7845_v4 = vld [vmem:[#allocation2 + $0x50] sm:$0xff] }
 0x373   : > { %16523 = vmatprep.mubr.msk.f32.mxu1 %vm336_vm1, %v19701_v54  ;;  %v8302_v54 = vld [vmem:[#allocation2 + $0x51] sm:$0xff] }
 0x375   : > { %16460 = vmatmul.mubr.msk.f32.gmra.mrb[236].mxu0 %vm336_vm1, %v19374_v15  ;;  %v19984_v15 = vld [vmem:[#allocation2 + $0x181] sm:$0xff] }
 0x376   : > { %16524 = vmatmul.mubr.msk.f32.gmra.mrb[236].mxu1 %vm336_vm1, %v19707_v63  ;;  %16462 = vmatprep.mubr.msk.f32.mxu0 %vm336_vm1, %v19385_v6  ;;  %v7415_v6 = vld [vmem:[#allocation2 + $0x182] sm:$0xff] }
 0x377   : > { %16526 = vmatprep.mubr.msk.f32.mxu1 %vm336_vm1, %v19713_v42  ;;  %v7846_v63 = vld [vmem:[#allocation2 + $0x60] sm:$0xff]  ;;  %v17537_v42 = vpack.c.bf16 %v8825_v55, %v8824_v38  ;;  %v7860_v38 = vld [vmem:[#allocation2 + $0x108] sm:$0xff] }
 0x378   : > { %v8317_v55 = vld [vmem:[#allocation2 + $0x109] sm:$0xff] }
 0x379   : > { %16463 = vmatmul.mubr.msk.f32.gmra.mrb[238].mxu0 %vm336_vm1, %v19394_v32  ;;  %v19989_v32 = vld [vmem:[#allocation2 + $0x189] sm:$0xff] }
 0x37a   : > { %16527 = vmatmul.mubr.msk.f32.gmra.mrb[238].mxu1 %vm336_vm1, %v19719_v39  ;;  %16465 = vmatprep.mubr.msk.f32.mxu0 %vm336_vm1, %v19405_v10  ;;  %v7416_v10 = vld [vmem:[#allocation2 + $0x18a] sm:$0xff]  ;;  %v8303_v39 = vld [vmem:[#allocation2 + $0x61] sm:$0xff] }
 0x37b   : > { %16529 = vmatprep.mubr.msk.f32.mxu1 %vm336_vm1, %v19725_v16  ;;  %v8826_v16 = vld [vmem:[%s21683_s5 + $0x230] sm:$0xff] }
 0x37d   : > { %16466 = vmatmul.mubr.msk.f32.gmra.mrb[240].mxu0 %vm336_vm1, %v19414_v0  ;;  %v8822_v0 = vld [vmem:[%s21683_s5 + $0x210] sm:$0xff] }
 0x37e   : > { %16530 = vmatmul.mubr.msk.f32.gmra.mrb[240].mxu1 %vm336_vm1, %v19731_v43  ;;  %16468 = vmatprep.mubr.msk.f32.mxu0 %vm336_vm1, %v19425_v48  ;;  %v8823_v48 = vld [vmem:[%s21683_s5 + $0x218] sm:$0xff] }
 0x37f   : > { %16532 = vmatprep.mubr.msk.f32.mxu1 %vm336_vm1, %v19738_v24  ;;  %v8827_v43 = vld [vmem:[%s21683_s5 + $0x238] sm:$0xff]  ;;  %v7847_v24 = vld [vmem:[#allocation2 + $0x68] sm:$0xff] }
 0x381   : > { %16469 = vmatmul.mubr.msk.f32.gmra.mrb[242].mxu0 %vm336_vm1, %v19434_v47  ;;  %v7842_v47 = vld [vmem:[#allocation2 + $0x30] sm:$0xff] }
 0x382   : > { %16533 = vmatmul.mubr.msk.f32.gmra.mrb[242].mxu1 %vm336_vm1, %v19745_v45  ;;  %16471 = vmatprep.mubr.msk.f32.mxu0 %vm336_vm1, %v19445_v37  ;;  %v8299_v37 = vld [vmem:[#allocation2 + $0x31] sm:$0xff]  ;;  %v8304_v45 = vld [vmem:[#allocation2 + $0x69] sm:$0xff] }
 0x383   : > { %16535 = vmatprep.mubr.msk.f32.mxu1 %vm336_vm1, %v19751_v12  ;;  %v17541_v12 = vpack.c.bf16 %v8827_v43, %v8826_v16 }
 0x385   : > { %16472 = vmatmul.mubr.msk.f32.gmra.mrb[244].mxu0 %vm336_vm1, %v19454_v62  ;;  %v17533_v62 = vpack.c.bf16 %v8823_v48, %v8822_v0  ;;  %v5138_v0 = vld [vmem:[#allocation3 + $0x30] sm:$0xff] }
 0x386   : > { %16536 = vmatmul.mubr.msk.f32.gmra.mrb[244].mxu1 %vm336_vm1, %v19757_v51  ;;  %16474 = vmatprep.mubr.msk.f32.mxu0 %vm336_vm1, %v19465_v13  ;;  %v7843_v13 = vld [vmem:[#allocation2 + $0x38] sm:$0xff] }
 0x387   : > { %16538 = vmatprep.mubr.msk.f32.mxu1 %vm336_vm1, %v19763_v59  ;;  %v7848_v51 = vld [vmem:[#allocation2 + $0x78] sm:$0xff] }
 0x388   : > { %v8305_v59 = vld [vmem:[#allocation2 + $0x79] sm:$0xff] }
 0x389   : > { %16475 = vmatmul.mubr.msk.f32.gmra.mrb[246].mxu0 %vm336_vm1, %v21735_v35  ;;  %v7857_v35 = vld [vmem:[#allocation2 + $0xe0] sm:$0xff] }
 0x38a   : > { %16539 = vmatmul.mubr.msk.f32.gmra.mrb[246].mxu1 %vm336_vm1, %v19771_v11  ;;  %16477 = vmatprep.mubr.msk.f32.mxu0 %vm336_vm1, %v21736_v58  ;;  %v7849_v11 = vld [vmem:[#allocation2 + $0x80] sm:$0xff] }
 0x38b   : > { %16541 = vmatprep.mubr.msk.f32.mxu1 %vm336_vm1, %v19777_v22  ;;  %v8306_v22 = vld [vmem:[#allocation2 + $0x81] sm:$0xff] }
 0x38c   : > { %v8314_v58 = vld [vmem:[#allocation2 + $0xe1] sm:$0xff] }
 0x38d   : > { %16478 = vmatmul.mubr.msk.f32.gmra.mrb[248].mxu0 %vm336_vm1, %v21737_v23 }
 0x38e   : > { %16542 = vmatmul.mubr.msk.f32.gmra.mrb[248].mxu1 %vm336_vm1, %v19783_v30  ;;  %16480 = vmatprep.mubr.msk.f32.mxu0 %vm336_vm1, %v21738_v46  ;;  %v7850_v30 = vld [vmem:[#allocation2 + $0x90] sm:$0xff] }
 0x38f   : > { %16544 = vmatprep.mubr.msk.f32.mxu1 %vm336_vm1, %v19789_v8  ;;  %v8307_v8 = vld [vmem:[#allocation2 + $0x91] sm:$0xff] }
 0x391   : > { %16481 = vmatmul.mubr.msk.f32.gmra.mrb[250].mxu0 %vm336_vm1, %v21739_v61 }
 0x392   : > { %16545 = vmatmul.mubr.msk.f32.gmra.mrb[250].mxu1 %vm336_vm1, %v19795_v50  ;;  %16483 = vmatprep.mubr.msk.f32.mxu0 %vm336_vm1, %v21740_v56  ;;  %v7851_v50 = vld [vmem:[#allocation2 + $0x98] sm:$0xff]  ;;  %v7858_v56 = vld [vmem:[#allocation2 + $0xf0] sm:$0xff] }
 0x393   : > { %16547 = vmatprep.mubr.msk.f32.mxu1 %vm336_vm1, %v19801_v29  ;;  %v8308_v29 = vld [vmem:[#allocation2 + $0x99] sm:$0xff] }
 0x395   : > { %16484 = vmatmul.mubr.msk.f32.gmra.mrb[252].mxu0 %vm336_vm1, %v21741_v52  ;;  %v8315_v52 = vld [vmem:[#allocation2 + $0xf1] sm:$0xff] }
 0x396   : > { %16548 = vmatmul.mubr.msk.f32.gmra.mrb[252].mxu1 %vm336_vm1, %v19812_v34  ;;  %16486 = vmatprep.mubr.msk.f32.mxu0 %vm336_vm1, %v19984_v15  ;;  %v8309_v34 = vld [vmem:[#allocation2 + $0xa9] sm:$0xff] }
 0x397   : > { %16550 = vmatprep.mubr.msk.f32.mxu1 %vm336_vm1, %v7415_v6 }
 0x399   : > { %16487 = vmatmul.mubr.msk.f32.gmra.mrb[254].mxu0 %vm336_vm1, %v19989_v32 }
 0x39a   : > { %16551 = vmatmul.mubr.msk.f32.gmra.mrb[254].mxu1 %vm336_vm1, %v7416_v10  ;;  %16569 = vmatprep.mubr.msk.f32.mxu0 %vm336_vm1, %v7842_v47  ;;  %v5139_v10 = vld [vmem:[#allocation3 + $0x38] sm:$0xff] }
 0x39b   : > { %16633 = vmatprep.mubr.msk.f32.mxu1 %vm336_vm1, %v8299_v37  ;;  %v7859_v37 = vld [vmem:[#allocation2 + $0xf8] sm:$0xff] }
 0x39d   : > { %16570 = vmatmul.mubr.msk.f32.vlgmr.msra.gmra.mrb[0].mxu0 %vm336_vm1, %v7843_v13 }
 0x39e   : > { %16634 = vmatmul.mubr.msk.f32.vlgmr.msra.gmra.mrb[0].mxu1 %vm336_vm1, %v8300_v25  ;;  %17532 = vmatpush3.bf16.msra.mxu0 %v19889_v1 }
 0x39f   : > { %16572 = vmatprep.mubr.msk.f32.mxu0 %vm336_vm1, %v7844_v49  ;;  %16636 = vmatprep.mubr.msk.f32.mxu1 %vm336_vm1, %v8301_v40 }
 0x3a0   : > { %17534 = vmatprep.subr.bf16.mxu0 %v17533_v62 }
 0x3a1   : > { %16573 = vmatmul.mubr.msk.f32.gmra.mrb[2].mxu0 %vm336_vm1, %v7845_v4 }
 0x3a2   : > { %16637 = vmatmul.mubr.msk.f32.gmra.mrb[2].mxu1 %vm336_vm1, %v8302_v54  ;;  %16575 = vmatprep.mubr.msk.f32.mxu0 %vm336_vm1, %v7846_v63  ;;  %v5141_v54 = vld [vmem:[#allocation3 + $0x48] sm:$0xff] }
 0x3a3   : > { %16639 = vmatprep.mubr.msk.f32.mxu1 %vm336_vm1, %v8303_v39  ;;  %17536 = vmatpush3.bf16.msra.mxu0 %v17533_v62  ;;  %v8316_v62 = vld [vmem:[#allocation2 + $0xf9] sm:$0xff]  ;;  %v5140_v39 = vld [vmem:[#allocation3 + $0x40] sm:$0xff] }
 0x3a4   : > { %17538 = vmatprep.subr.bf16.mxu0 %v17537_v42 }
 0x3a5   : > { %16576 = vmatmul.mubr.msk.f32.gmra.mrb[4].mxu0 %vm336_vm1, %v7847_v24 }
 0x3a6   : > { %16640 = vmatmul.mubr.msk.f32.gmra.mrb[4].mxu1 %vm336_vm1, %v8304_v45  ;;  %16578 = vmatprep.mubr.msk.f32.mxu0 %vm336_vm1, %v7848_v51  ;;  %v7861_v45 = vld [vmem:[#allocation2 + $0x110] sm:$0xff] }
 0x3a7   : > { %16642 = vmatprep.mubr.msk.f32.mxu1 %vm336_vm1, %v8305_v59  ;;  %17540 = vmatpush3.bf16.msra.mxu0 %v17537_v42 }
 0x3a8   : > { %17542 = vmatprep.subr.bf16.mxu0 %v17541_v12 }
 0x3a9   : > { %16579 = vmatmul.mubr.msk.f32.gmra.mrb[6].mxu0 %vm336_vm1, %v7849_v11 }
 0x3aa   : > { %16643 = vmatmul.mubr.msk.f32.gmra.mrb[6].mxu1 %vm336_vm1, %v8306_v22  ;;  %16581 = vmatprep.mubr.msk.f32.mxu0 %vm336_vm1, %v7850_v30  ;;  %v7862_v22 = vld [vmem:[#allocation2 + $0x120] sm:$0xff] }
 0x3ab   : > { %16645 = vmatprep.mubr.msk.f32.mxu1 %vm336_vm1, %v8307_v8  ;;  %17544 = vmatpush3.bf16.msra.mxu0 %v17541_v12  ;;  %v8318_v12 = vld [vmem:[#allocation2 + $0x111] sm:$0xff]  ;;  %v8319_v30 = vld [vmem:[#allocation2 + $0x121] sm:$0xff] }
 0x3ad   : > { %16582 = vmatmul.mubr.msk.f32.gmra.mrb[8].mxu0 %vm336_vm1, %v7851_v50 }
 0x3ae   : > { %16646 = vmatmul.mubr.msk.f32.gmra.mrb[8].mxu1 %vm336_vm1, %v8308_v29  ;;  %16584 = vmatprep.mubr.msk.f32.mxu0 %vm336_vm1, %v7852_v27  ;;  %v5143_v29 = vld [vmem:[#allocation3 + $0x58] sm:$0xff] }
 0x3af   : > { %16648 = vmatprep.mubr.msk.f32.mxu1 %vm336_vm1, %v8309_v34 }
 0x3b1   : > { %16585 = vmatmul.mubr.msk.f32.gmra.mrb[10].mxu0 %vm336_vm1, %v7853_v57  ;;  %v5142_v57 = vld [vmem:[#allocation3 + $0x50] sm:$0xff] }
 0x3b2   : > { %16649 = vmatmul.mubr.msk.f32.gmra.mrb[10].mxu1 %vm336_vm1, %v8310_v21  ;;  %16587 = vmatprep.mubr.msk.f32.mxu0 %vm336_vm1, %v7854_v9 }
 0x3b3   : > { %16651 = vmatprep.mubr.msk.f32.mxu1 %vm336_vm1, %v8311_v7  ;;  %v16190_v28 = vpop.f32.mrb[162].mxu0 }
 0x3b4   : > { %v16254_v17 = vpop.f32.mrb[162].mxu1  ;;  %v5496_v41 = vadd.f32 %v16190_v28, %v5135_v60  ;;  %v5344_v44 = vpop.f32.mrb[163].mxu0  ;;  %v7863_v60 = vld [vmem:[#allocation2 + $0x128] sm:$0xff] }
 0x3b5   : > { %v5801_v33 = vpop.f32.mrb[163].mxu1  ;;  %16588 = vmatmul.mubr.msk.f32.gmra.mrb[12].mxu0 %vm336_vm1, %v7855_v36  ;;  %v5495_v31 = vadd.f32 %v5344_v44, %v5134_v53  ;;  %v8320_v53 = vld [vmem:[#allocation2 + $0x129] sm:$0xff] }
 0x3b6   : > { %16652 = vmatmul.mubr.msk.f32.gmra.mrb[12].mxu1 %vm336_vm1, %v8312_v20  ;;  %16590 = vmatprep.mubr.msk.f32.mxu0 %vm336_vm1, %v7856_v19  ;;  %5528 = vst.msk [vmem:[#allocation3 + $0x18] sm:$0xff] %vm425_vm0, %v5496_v41  ;;  %v7864_v20 = vld [vmem:[#allocation2 + $0x138] sm:$0xff] }
 0x3b7   : > { %16654 = vmatprep.mubr.msk.f32.mxu1 %vm336_vm1, %v8313_v14  ;;  %5527 = vst.msk [vmem:[#allocation3 + $0x10] sm:$0xff] %vm425_vm0, %v5495_v31  ;;  %v16193_v3 = vpop.f32.mrb[164].mxu0  ;;  %v8321_v41 = vld [vmem:[#allocation2 + $0x139] sm:$0xff] }
 0x3b8   : > { %v16257_v1 = vpop.f32.mrb[164].mxu1  ;;  %v5498_v23 = vadd.f32 %v16193_v3, %v5137_v2  ;;  %v5354_v46 = vpop.f32.mrb[165].mxu0  ;;  %v5145_v19 = vld [vmem:[#allocation3 + $0x68] sm:$0xff]  ;;  %v5144_v2 = vld [vmem:[#allocation3 + $0x60] sm:$0xff] }
 0x3b9   : > { %v5811_v61 = vpop.f32.mrb[165].mxu1  ;;  %16591 = vmatmul.mubr.msk.f32.gmra.mrb[14].mxu0 %vm336_vm1, %v7857_v35  ;;  %v5497_v6 = vadd.f32 %v5354_v46, %v5136_v26  ;;  %v7865_v35 = vld [vmem:[#allocation2 + $0x140] sm:$0xff] }
 0x3ba   : > { %16655 = vmatmul.mubr.msk.f32.gmra.mrb[14].mxu1 %vm336_vm1, %v8314_v58  ;;  %16593 = vmatprep.mubr.msk.f32.mxu0 %vm336_vm1, %v7858_v56  ;;  %5530 = vst.msk [vmem:[#allocation3 + $0x28] sm:$0xff] %vm425_vm0, %v5498_v23  ;;  %v8322_v58 = vld [vmem:[#allocation2 + $0x141] sm:$0xff]  ;;  %v7866_v56 = vld [vmem:[#allocation2 + $0x150] sm:$0xff] }
 0x3bb   : > { %16657 = vmatprep.mubr.msk.f32.mxu1 %vm336_vm1, %v8315_v52  ;;  %5529 = vst.msk [vmem:[#allocation3 + $0x20] sm:$0xff] %vm425_vm0, %v5497_v6  ;;  %v16196_v48 = vpop.f32.mrb[166].mxu0  ;;  %v8323_v52 = vld [vmem:[#allocation2 + $0x151] sm:$0xff] }
 0x3bc   : > { %v20051_v47 = vpop.f32.mrb[166].mxu1  ;;  %v5500_v13 = vadd.f32 %v16196_v48, %v5139_v10  ;;  %v5364_v25 = vpop.f32.mrb[167].mxu0 }
 0x3bd   : > { %v5821_v49 = vpop.f32.mrb[167].mxu1  ;;  %16594 = vmatmul.mubr.msk.f32.gmra.mrb[16].mxu0 %vm336_vm1, %v7859_v37  ;;  %v5592_v40 = vld [vmem:[#allocation3 + $0x18] sm:$0xff]  ;;  %v5499_v4 = vadd.f32 %v5364_v25, %v5138_v0  ;;  %v5146_v37 = vld [vmem:[#allocation3 + $0x70] sm:$0xff] }
 0x3be   : > { %16658 = vmatmul.mubr.msk.f32.gmra.mrb[16].mxu1 %vm336_vm1, %v8316_v62  ;;  %16596 = vmatprep.mubr.msk.f32.mxu0 %vm336_vm1, %v7860_v38  ;;  %v5953_v63 = vadd.f32 %v16254_v17, %v5592_v40  ;;  %v5591_v42 = vld [vmem:[#allocation3 + $0x10] sm:$0xff]  ;;  %5532 = vst.msk [vmem:[#allocation3 + $0x38] sm:$0xff] %vm425_vm0, %v5500_v13  ;;  %v5147_v0 = vld [vmem:[#allocation3 + $0x78] sm:$0xff] }
 0x3bf   : > { %16660 = vmatprep.mubr.msk.f32.mxu1 %vm336_vm1, %v8317_v55  ;;  %v5952_v16 = vadd.f32 %v5801_v33, %v5591_v42  ;;  %5531 = vst.msk [vmem:[#allocation3 + $0x30] sm:$0xff] %vm425_vm0, %v5499_v4  ;;  %v16199_v43 = vpop.f32.mrb[168].mxu0  ;;  %v8324_v38 = vld [vmem:[#allocation2 + $0x159] sm:$0xff] }
 0x3c0   : > { %v20059_v24 = vpop.f32.mrb[168].mxu1  ;;  %5985 = vst.msk [vmem:[#allocation3 + $0x18] sm:$0xff] %vm425_vm0, %v5953_v63  ;;  %v5502_v51 = vadd.f32 %v16199_v43, %v5141_v54  ;;  %v5374_v59 = vpop.f32.mrb[169].mxu0  ;;  %v7868_v54 = vld [vmem:[#allocation2 + $0x168] sm:$0xff] }
 0x3c1   : > { %v20062_v11 = vpop.f32.mrb[169].mxu1  ;;  %16597 = vmatmul.mubr.msk.f32.gmra.mrb[18].mxu0 %vm336_vm1, %v7861_v45  ;;  %5984 = vst.msk [vmem:[#allocation3 + $0x10] sm:$0xff] %vm425_vm0, %v5952_v16  ;;  %v5594_v8 = vld [vmem:[#allocation3 + $0x28] sm:$0xff]  ;;  %v5501_v50 = vadd.f32 %v5374_v59, %v5140_v39  ;;  %v8325_v63 = vld [vmem:[#allocation2 + $0x169] sm:$0xff] }
 0x3c2   : > { %16661 = vmatmul.mubr.msk.f32.gmra.mrb[18].mxu1 %vm336_vm1, %v8318_v12  ;;  %16599 = vmatprep.mubr.msk.f32.mxu0 %vm336_vm1, %v7862_v22  ;;  %v5955_v27 = vadd.f32 %v16257_v1, %v5594_v8  ;;  %v5593_v34 = vld [vmem:[#allocation3 + $0x20] sm:$0xff]  ;;  %5534 = vst.msk [vmem:[#allocation3 + $0x48] sm:$0xff] %vm425_vm0, %v5502_v51  ;;  %v5149_v16 = vld [vmem:[#allocation3 + $0x88] sm:$0xff] }
 0x3c3   : > { %16663 = vmatprep.mubr.msk.f32.mxu1 %vm336_vm1, %v8319_v30  ;;  %v5954_v21 = vadd.f32 %v5811_v61, %v5593_v34  ;;  %5533 = vst.msk [vmem:[#allocation3 + $0x40] sm:$0xff] %vm425_vm0, %v5501_v50  ;;  %v16202_v9 = vpop.f32.mrb[170].mxu0  ;;  %v5148_v45 = vld [vmem:[#allocation3 + $0x80] sm:$0xff]  ;;  %v5151_v34 = vld [vmem:[#allocation3 + $0x98] sm:$0xff] }
 0x3c4   : > { %v20071_v7 = vpop.f32.mrb[170].mxu1  ;;  %5987 = vst.msk [vmem:[#allocation3 + $0x28] sm:$0xff] %vm425_vm0, %v5955_v27  ;;  %v5504_v28 = vadd.f32 %v16202_v9, %v5143_v29  ;;  %v5384_v17 = vpop.f32.mrb[171].mxu0  ;;  %v8326_v22 = vld [vmem:[#allocation2 + $0x171] sm:$0xff] }
 0x3c5   : > { %v20074_v36 = vpop.f32.mrb[171].mxu1  ;;  %16600 = vmatmul.mubr.msk.f32.gmra.mrb[20].mxu0 %vm336_vm1, %v7863_v60  ;;  %5986 = vst.msk [vmem:[#allocation3 + $0x20] sm:$0xff] %vm425_vm0, %v5954_v21  ;;  %v5596_v44 = vld [vmem:[#allocation3 + $0x38] sm:$0xff]  ;;  %v5503_v33 = vadd.f32 %v5384_v17, %v5142_v57  ;;  %v5150_v57 = vld [vmem:[#allocation3 + $0x90] sm:$0xff] }
 0x3c6   : > { %16664 = vmatmul.mubr.msk.f32.gmra.mrb[20].mxu1 %vm336_vm1, %v8320_v53  ;;  %16602 = vmatprep.mubr.msk.f32.mxu0 %vm336_vm1, %v7864_v20  ;;  %v5957_v14 = vadd.f32 %v20051_v47, %v5596_v44  ;;  %v5595_v31 = vld [vmem:[#allocation3 + $0x30] sm:$0xff]  ;;  %5536 = vst.msk [vmem:[#allocation3 + $0x58] sm:$0xff] %vm425_vm0, %v5504_v28  ;;  %v5153_v20 = vld [vmem:[#allocation3 + $0xa8] sm:$0xff] }
 0x3c7   : > { %16666 = vmatprep.mubr.msk.f32.mxu1 %vm336_vm1, %v8321_v41  ;;  %v5956_v26 = vadd.f32 %v5821_v49, %v5595_v31  ;;  %5535 = vst.msk [vmem:[#allocation3 + $0x50] sm:$0xff] %vm425_vm0, %v5503_v33  ;;  %v16205_v3 = vpop.f32.mrb[172].mxu0  ;;  %v7867_v49 = vld [vmem:[#allocation2 + $0x158] sm:$0xff]  ;;  %v7873_v33 = vld [vmem:[#allocation2 + $0x1a0] sm:$0xff] }
 0x3c8   : > { %v20084_v1 = vpop.f32.mrb[172].mxu1  ;;  %5989 = vst.msk [vmem:[#allocation3 + $0x38] sm:$0xff] %vm425_vm0, %v5957_v14  ;;  %v5506_v23 = vadd.f32 %v16205_v3, %v5145_v19  ;;  %v5394_v46 = vpop.f32.mrb[173].mxu0  ;;  %v8329_v60 = vld [vmem:[#allocation2 + $0x199] sm:$0xff]  ;;  %v8330_v19 = vld [vmem:[#allocation2 + $0x1a1] sm:$0xff] }
 0x3c9   : > { %v20087_v61 = vpop.f32.mrb[173].mxu1  ;;  %16603 = vmatmul.mubr.msk.f32.gmra.mrb[22].mxu0 %vm336_vm1, %v7865_v35  ;;  %5988 = vst.msk [vmem:[#allocation3 + $0x30] sm:$0xff] %vm425_vm0, %v5956_v26  ;;  %v5598_v6 = vld [vmem:[#allocation3 + $0x48] sm:$0xff]  ;;  %v5505_v10 = vadd.f32 %v5394_v46, %v5144_v2 }
 0x3ca   : > { %16667 = vmatmul.mubr.msk.f32.gmra.mrb[22].mxu1 %vm336_vm1, %v8322_v58  ;;  %16605 = vmatprep.mubr.msk.f32.mxu0 %vm336_vm1, %v7866_v56  ;;  %v5959_v48 = vadd.f32 %v20059_v24, %v5598_v6  ;;  %v5597_v47 = vld [vmem:[#allocation3 + $0x40] sm:$0xff]  ;;  %5538 = vst.msk [vmem:[#allocation3 + $0x68] sm:$0xff] %vm425_vm0, %v5506_v23  ;;  %v5154_v6 = vld [vmem:[#allocation3 + $0xb0] sm:$0xff] }
 0x3cb   : > { %16669 = vmatprep.mubr.msk.f32.mxu1 %vm336_vm1, %v8323_v52  ;;  %v5958_v62 = vadd.f32 %v20062_v11, %v5597_v47  ;;  %5537 = vst.msk [vmem:[#allocation3 + $0x60] sm:$0xff] %vm425_vm0, %v5505_v10  ;;  %v16208_v13 = vpop.f32.mrb[174].mxu0  ;;  %v7869_v11 = vld [vmem:[#allocation2 + $0x170] sm:$0xff]  ;;  %v8757_v47 = vld [vmem:[#allocation2 + $0x3a] sm:$0xff] }
 0x3cc   : > { %v20098_v25 = vpop.f32.mrb[174].mxu1  ;;  %5991 = vst.msk [vmem:[#allocation3 + $0x48] sm:$0xff] %vm425_vm0, %v5959_v48  ;;  %v5508_v55 = vadd.f32 %v16208_v13, %v5147_v0  ;;  %v5404_v40 = vpop.f32.mrb[175].mxu0  ;;  %v8756_v58 = vld [vmem:[#allocation2 + $0x32] sm:$0xff] }
 0x3cd   : > { %v5861_v4 = vpop.f32.mrb[175].mxu1  ;;  %16606 = vmatmul.mubr.msk.f32.gmra.mrb[24].mxu0 %vm336_vm1, %v7867_v49  ;;  %5990 = vst.msk [vmem:[#allocation3 + $0x40] sm:$0xff] %vm425_vm0, %v5958_v62  ;;  %v5600_v42 = vld [vmem:[#allocation3 + $0x58] sm:$0xff]  ;;  %v5507_v39 = vadd.f32 %v5404_v40, %v5146_v37 }
 0x3ce   : > { %16670 = vmatmul.mubr.msk.f32.gmra.mrb[24].mxu1 %vm336_vm1, %v8324_v38  ;;  %16608 = vmatprep.mubr.msk.f32.mxu0 %vm336_vm1, %v7868_v54  ;;  %v5961_v43 = vadd.f32 %v20071_v7, %v5600_v42  ;;  %v5599_v24 = vld [vmem:[#allocation3 + $0x50] sm:$0xff]  ;;  %5540 = vst.msk [vmem:[#allocation3 + $0x78] sm:$0xff] %vm425_vm0, %v5508_v55  ;;  %v7872_v7 = vld [vmem:[#allocation2 + $0x198] sm:$0xff]  ;;  %v5156_v54 = vld [vmem:[#allocation3 + $0xc0] sm:$0xff] }
 0x3cf   : > { %16672 = vmatprep.mubr.msk.f32.mxu1 %vm336_vm1, %v8325_v63  ;;  %v5960_v12 = vadd.f32 %v20074_v36, %v5599_v24  ;;  %5539 = vst.msk [vmem:[#allocation3 + $0x70] sm:$0xff] %vm425_vm0, %v5507_v39  ;;  %v5157_v55 = vld [vmem:[#allocation3 + $0xc8] sm:$0xff] }
 0x3d0   : > { %v16211_v51 = vpop.f32.mrb[176].mxu0  ;;  %5993 = vst.msk [vmem:[#allocation3 + $0x58] sm:$0xff] %vm425_vm0, %v5961_v43 }
 0x3d1   : > { %v16275_v59 = vpop.f32.mrb[176].mxu1  ;;  %v5510_v30 = vadd.f32 %v16211_v51, %v5149_v16  ;;  %v5414_v8 = vpop.f32.mrb[177].mxu0  ;;  %16609 = vmatmul.mubr.msk.f32.gmra.mrb[26].mxu0 %vm336_vm1, %v7869_v11  ;;  %5992 = vst.msk [vmem:[#allocation3 + $0x50] sm:$0xff] %vm425_vm0, %v5960_v12  ;;  %v5602_v29 = vld [vmem:[#allocation3 + $0x68] sm:$0xff]  ;;  %v8760_v12 = vld [vmem:[#allocation2 + $0x62] sm:$0xff] }
 0x3d2   : > { %v5871_v50 = vpop.f32.mrb[177].mxu1  ;;  %16673 = vmatmul.mubr.msk.f32.gmra.mrb[26].mxu1 %vm336_vm1, %v8326_v22  ;;  %v5509_v27 = vadd.f32 %v5414_v8, %v5148_v45  ;;  %16611 = vmatprep.mubr.msk.f32.mxu0 %vm336_vm1, %v19803_v5  ;;  %v5963_v21 = vadd.f32 %v20084_v1, %v5602_v29  ;;  %v5601_v9 = vld [vmem:[#allocation3 + $0x60] sm:$0xff]  ;;  %v5159_v11 = vld [vmem:[#allocation3 + $0xd8] sm:$0xff]  ;;  %v5158_v8 = vld [vmem:[#allocation3 + $0xd0] sm:$0xff] }
 0x3d3   : > { %16675 = vmatprep.mubr.msk.f32.mxu1 %vm336_vm1, %v19984_v15  ;;  %5542 = vst.msk [vmem:[#allocation3 + $0x88] sm:$0xff] %vm425_vm0, %v5510_v30  ;;  %v5962_v53 = vadd.f32 %v20087_v61, %v5601_v9  ;;  %v5155_v61 = vld [vmem:[#allocation3 + $0xb8] sm:$0xff]  ;;  %v8759_v16 = vld [vmem:[#allocation2 + $0x52] sm:$0xff] }
 0x3d4   : > { %5541 = vst.msk [vmem:[#allocation3 + $0x80] sm:$0xff] %vm425_vm0, %v5509_v27  ;;  %v16214_v28 = vpop.f32.mrb[178].mxu0  ;;  %5995 = vst.msk [vmem:[#allocation3 + $0x68] sm:$0xff] %vm425_vm0, %v5963_v21 }
 0x3d5   : > { %v16278_v17 = vpop.f32.mrb[178].mxu1  ;;  %v5512_v5 = vadd.f32 %v16214_v28, %v5151_v34  ;;  %v5424_v36 = vpop.f32.mrb[179].mxu0  ;;  %16612 = vmatmul.mubr.msk.f32.gmra.mrb[28].mxu0 %vm336_vm1, %v19814_v18  ;;  %5994 = vst.msk [vmem:[#allocation3 + $0x60] sm:$0xff] %vm425_vm0, %v5962_v53  ;;  %v5604_v41 = vld [vmem:[#allocation3 + $0x78] sm:$0xff]  ;;  %v5152_v18 = vld [vmem:[#allocation3 + $0xa0] sm:$0xff]  ;;  %v5161_v28 = vld [vmem:[#allocation3 + $0xe8] sm:$0xff] }
 0x3d6   : > { %v5881_v15 = vpop.f32.mrb[179].mxu1  ;;  %16676 = vmatmul.mubr.msk.f32.gmra.mrb[28].mxu1 %vm336_vm1, %v19989_v32  ;;  %v5511_v44 = vadd.f32 %v5424_v36, %v5150_v57  ;;  %16614 = vmatprep.mubr.msk.f32.mxu0 %vm336_vm1, %v7872_v7  ;;  %v5965_v14 = vadd.f32 %v20098_v25, %v5604_v41  ;;  %v5603_v31 = vld [vmem:[#allocation3 + $0x70] sm:$0xff]  ;;  %v8758_v25 = vld [vmem:[#allocation2 + $0x4a] sm:$0xff] }
 0x3d7   : > { %16678 = vmatprep.mubr.msk.f32.mxu1 %vm336_vm1, %v8329_v60  ;;  %5544 = vst.msk [vmem:[#allocation3 + $0x98] sm:$0xff] %vm425_vm0, %v5512_v5  ;;  %v5964_v2 = vadd.f32 %v5861_v4, %v5603_v31  ;;  %v8761_v34 = vld [vmem:[#allocation2 + $0x6a] sm:$0xff]  ;;  %v8762_v7 = vld [vmem:[#allocation2 + $0x7a] sm:$0xff]  ;;  %v8764_v31 = vld [vmem:[#allocation2 + $0x92] sm:$0xff] }
 0x3d8   : > { %5543 = vst.msk [vmem:[#allocation3 + $0x90] sm:$0xff] %vm425_vm0, %v5511_v44  ;;  %v16217_v32 = vpop.f32.mrb[180].mxu0  ;;  %5997 = vst.msk [vmem:[#allocation3 + $0x78] sm:$0xff] %vm425_vm0, %v5965_v14  ;;  %v5160_v36 = vld [vmem:[#allocation3 + $0xe0] sm:$0xff]  ;;  %v8763_v44 = vld [vmem:[#allocation2 + $0x82] sm:$0xff] }
 0x3d9   : > { %v16281_v26 = vpop.f32.mrb[180].mxu1  ;;  %v5514_v3 = vadd.f32 %v16217_v32, %v5153_v20  ;;  %v5434_v1 = vpop.f32.mrb[181].mxu0  ;;  %16615 = vmatmul.mubr.msk.f32.gmra.mrb[30].mxu0 %vm336_vm1, %v7873_v33  ;;  %5996 = vst.msk [vmem:[#allocation3 + $0x70] sm:$0xff] %vm425_vm0, %v5964_v2  ;;  %v5163_v32 = vld [vmem:[#allocation3 + $0xf8] sm:$0xff] }
 0x3da   : > { %v5891_v35 = vpop.f32.mrb[181].mxu1  ;;  %16679 = vmatmul.mubr.msk.f32.gmra.mrb[30].mxu1 %vm336_vm1, %v8330_v19  ;;  %v5606_v23 = vld [vmem:[#allocation3 + $0x88] sm:$0xff]  ;;  %v5513_v46 = vadd.f32 %v5434_v1, %v5152_v18  ;;  %16697 = vmatprep.mubr.msk.f32.mxu0 %vm336_vm1, %v8756_v58  ;;  %v5162_v1 = vld [vmem:[#allocation3 + $0xf0] sm:$0xff] }
 0x3db   : > { %v5967_v56 = vadd.f32 %v16275_v59, %v5606_v23  ;;  %v5605_v52 = vld [vmem:[#allocation3 + $0x80] sm:$0xff]  ;;  %5546 = vst.msk [vmem:[#allocation3 + $0xa8] sm:$0xff] %vm425_vm0, %v5514_v3 }
 0x3dc   : > { %v5966_v10 = vadd.f32 %v5871_v50, %v5605_v52  ;;  %5545 = vst.msk [vmem:[#allocation3 + $0xa0] sm:$0xff] %vm425_vm0, %v5513_v46  ;;  %v16220_v0 = vpop.f32.mrb[182].mxu0  ;;  %v8765_v46 = vld [vmem:[#allocation2 + $0x9a] sm:$0xff] }
 0x3dd   : > { %v16284_v48 = vpop.f32.mrb[182].mxu1  ;;  %5999 = vst.msk [vmem:[#allocation3 + $0x88] sm:$0xff] %vm425_vm0, %v5967_v56  ;;  %v5516_v37 = vadd.f32 %v16220_v0, %v5155_v61  ;;  %v5444_v62 = vpop.f32.mrb[183].mxu0  ;;  %16698 = vmatmul.mubr.msk.f32.vlgmr.msra.gmra.mrb[32].mxu0 %vm336_vm1, %v8757_v47 }
 0x3de   : > { %v5901_v13 = vpop.f32.mrb[183].mxu1  ;;  %5998 = vst.msk [vmem:[#allocation3 + $0x80] sm:$0xff] %vm425_vm0, %v5966_v10  ;;  %v5608_v49 = vld [vmem:[#allocation3 + $0x98] sm:$0xff]  ;;  %v5515_v38 = vadd.f32 %v5444_v62, %v5154_v6  ;;  %16700 = vmatprep.mubr.msk.f32.mxu0 %vm336_vm1, %v8758_v25  ;;  %v6047_v62 = vld [vmem:[#allocation3 + $0x8] sm:$0xff] }
 0x3df   : > { %v5969_v40 = vadd.f32 %v16278_v17, %v5608_v49  ;;  %v5607_v4 = vld [vmem:[#allocation3 + $0x90] sm:$0xff]  ;;  %5548 = vst.msk [vmem:[#allocation3 + $0xb8] sm:$0xff] %vm425_vm0, %v5516_v37  ;;  %v8766_v6 = vld [vmem:[#allocation2 + $0xaa] sm:$0xff]  ;;  %v8767_v49 = vld [vmem:[#allocation2 + $0xb2] sm:$0xff] }
 0x3e0   : > { %v5968_v63 = vadd.f32 %v5881_v15, %v5607_v4  ;;  %5547 = vst.msk [vmem:[#allocation3 + $0xb0] sm:$0xff] %vm425_vm0, %v5515_v38  ;;  %v16223_v42 = vpop.f32.mrb[184].mxu0 }
 0x3e1   : > { %v16287_v39 = vpop.f32.mrb[184].mxu1  ;;  %6001 = vst.msk [vmem:[#allocation3 + $0x98] sm:$0xff] %vm425_vm0, %v5969_v40  ;;  %v5518_v43 = vadd.f32 %v16223_v42, %v5157_v55  ;;  %v5454_v24 = vpop.f32.mrb[185].mxu0  ;;  %16701 = vmatmul.mubr.msk.f32.gmra.mrb[34].mxu0 %vm336_vm1, %v8759_v16  ;;  %v6046_v55 = vld [vmem:[#allocation3] sm:$0xff] }
 0x3e2   : > { %v5911_v45 = vpop.f32.mrb[185].mxu1  ;;  %6000 = vst.msk [vmem:[#allocation3 + $0x90] sm:$0xff] %vm425_vm0, %v5968_v63  ;;  %v5610_v51 = vld [vmem:[#allocation3 + $0xa8] sm:$0xff]  ;;  %v5517_v59 = vadd.f32 %v5454_v24, %v5156_v54  ;;  %16703 = vmatprep.mubr.msk.f32.mxu0 %vm336_vm1, %v8760_v12  ;;  %v8768_v54 = vld [vmem:[#allocation2 + $0xc2] sm:$0xff] }
 0x3e3   : > { %v5971_v22 = vadd.f32 %v16281_v26, %v5610_v51  ;;  %v5609_v30 = vld [vmem:[#allocation3 + $0xa0] sm:$0xff]  ;;  %5550 = vst.msk [vmem:[#allocation3 + $0xc8] sm:$0xff] %vm425_vm0, %v5518_v43  ;;  %v6049_v24 = vld [vmem:[#allocation3 + $0x18] sm:$0xff] }
 0x3e4   : > { %v5970_v50 = vadd.f32 %v5891_v35, %v5609_v30  ;;  %5549 = vst.msk [vmem:[#allocation3 + $0xc0] sm:$0xff] %vm425_vm0, %v5517_v59  ;;  %v16226_v29 = vpop.f32.mrb[186].mxu0  ;;  %v8769_v51 = vld [vmem:[#allocation2 + $0xca] sm:$0xff] }
 0x3e5   : > { %v16290_v27 = vpop.f32.mrb[186].mxu1  ;;  %6003 = vst.msk [vmem:[#allocation3 + $0xa8] sm:$0xff] %vm425_vm0, %v5971_v22  ;;  %v5520_v57 = vadd.f32 %v16226_v29, %v5159_v11  ;;  %v5464_v21 = vpop.f32.mrb[187].mxu0  ;;  %16704 = vmatmul.mubr.msk.f32.gmra.mrb[36].mxu0 %vm336_vm1, %v8761_v34  ;;  %v6048_v11 = vld [vmem:[#allocation3 + $0x10] sm:$0xff] }
 0x3e6   : > { %v5921_v9 = vpop.f32.mrb[187].mxu1  ;;  %6002 = vst.msk [vmem:[#allocation3 + $0xa0] sm:$0xff] %vm425_vm0, %v5970_v50  ;;  %v5612_v60 = vld [vmem:[#allocation3 + $0xb8] sm:$0xff]  ;;  %v5519_v53 = vadd.f32 %v5464_v21, %v5158_v8  ;;  %16706 = vmatprep.mubr.msk.f32.mxu0 %vm336_vm1, %v8762_v7  ;;  %v8770_v8 = vld [vmem:[#allocation2 + $0xda] sm:$0xff] }
 0x3e7   : > { %v5973_v17 = vadd.f32 %v16284_v48, %v5612_v60  ;;  %v5611_v5 = vld [vmem:[#allocation3 + $0xb0] sm:$0xff]  ;;  %5552 = vst.msk [vmem:[#allocation3 + $0xd8] sm:$0xff] %vm425_vm0, %v5520_v57  ;;  %v6051_v21 = vld [vmem:[#allocation3 + $0x28] sm:$0xff] }
 0x3e8   : > { %v5972_v15 = vadd.f32 %v5901_v13, %v5611_v5  ;;  %5551 = vst.msk [vmem:[#allocation3 + $0xd0] sm:$0xff] %vm425_vm0, %v5519_v53  ;;  %v16229_v20 = vpop.f32.mrb[188].mxu0  ;;  %v8771_v60 = vld [vmem:[#allocation2 + $0xe2] sm:$0xff] }
 0x3e9   : > { %v16293_v41 = vpop.f32.mrb[188].mxu1  ;;  %6005 = vst.msk [vmem:[#allocation3 + $0xb8] sm:$0xff] %vm425_vm0, %v5973_v17  ;;  %v5522_v33 = vadd.f32 %v16229_v20, %v5161_v28  ;;  %v5474_v19 = vpop.f32.mrb[189].mxu0  ;;  %16707 = vmatmul.mubr.msk.f32.gmra.mrb[38].mxu0 %vm336_vm1, %v8763_v44  ;;  %v6050_v28 = vld [vmem:[#allocation3 + $0x20] sm:$0xff] }
 0x3ea   : > { %v5931_v14 = vpop.f32.mrb[189].mxu1  ;;  %6004 = vst.msk [vmem:[#allocation3 + $0xb0] sm:$0xff] %vm425_vm0, %v5972_v15  ;;  %v5614_v18 = vld [vmem:[#allocation3 + $0xc8] sm:$0xff]  ;;  %v5521_v2 = vadd.f32 %v5474_v19, %v5160_v36  ;;  %16709 = vmatprep.mubr.msk.f32.mxu0 %vm336_vm1, %v8764_v31  ;;  %v6053_v19 = vld [vmem:[#allocation3 + $0x38] sm:$0xff] }
 0x3eb   : > { %v5975_v26 = vadd.f32 %v16287_v39, %v5614_v18  ;;  %v5613_v3 = vld [vmem:[#allocation3 + $0xc0] sm:$0xff]  ;;  %5554 = vst.msk [vmem:[#allocation3 + $0xe8] sm:$0xff] %vm425_vm0, %v5522_v33  ;;  %v8773_v18 = vld [vmem:[#allocation2 + $0xfa] sm:$0xff] }
 0x3ec   : > { %v5974_v35 = vadd.f32 %v5911_v45, %v5613_v3  ;;  %5553 = vst.msk [vmem:[#allocation3 + $0xe0] sm:$0xff] %vm425_vm0, %v5521_v2  ;;  %v16232_v58 = vpop.f32.mrb[190].mxu0  ;;  %v8772_v36 = vld [vmem:[#allocation2 + $0xf2] sm:$0xff] }
 0x3ed   : > { %v16296_v23 = vpop.f32.mrb[190].mxu1  ;;  %6007 = vst.msk [vmem:[#allocation3 + $0xc8] sm:$0xff] %vm425_vm0, %v5975_v26  ;;  %v5524_v61 = vadd.f32 %v16232_v58, %v5163_v32  ;;  %v5484_v56 = vpop.f32.mrb[191].mxu0  ;;  %16710 = vmatmul.mubr.msk.f32.gmra.mrb[40].mxu0 %vm336_vm1, %v8765_v46  ;;  %v6052_v32 = vld [vmem:[#allocation3 + $0x30] sm:$0xff] }
 0x3ee   : > { %v5941_v52 = vpop.f32.mrb[191].mxu1  ;;  %6006 = vst.msk [vmem:[#allocation3 + $0xc0] sm:$0xff] %vm425_vm0, %v5974_v35  ;;  %v5616_v10 = vld [vmem:[#allocation3 + $0xd8] sm:$0xff]  ;;  %v5523_v0 = vadd.f32 %v5484_v56, %v5162_v1  ;;  %16712 = vmatprep.mubr.msk.f32.mxu0 %vm336_vm1, %v8766_v6  ;;  %v6055_v56 = vld [vmem:[#allocation3 + $0x48] sm:$0xff] }
 0x3ef   : > { %v5977_v48 = vadd.f32 %v16290_v27, %v5616_v10  ;;  %v5615_v47 = vld [vmem:[#allocation3 + $0xd0] sm:$0xff]  ;;  %5556 = vst.msk [vmem:[#allocation3 + $0xf8] sm:$0xff] %vm425_vm0, %v5524_v61  ;;  %v8774_v1 = vld [vmem:[#allocation2 + $0x10a] sm:$0xff]  ;;  %v8775_v10 = vld [vmem:[#allocation2 + $0x112] sm:$0xff] }
 0x3f0   : > { %v5976_v37 = vadd.f32 %v5921_v9, %v5615_v47  ;;  %5555 = vst.msk [vmem:[#allocation3 + $0xf0] sm:$0xff] %vm425_vm0, %v5523_v0  ;;  %v16315_v13 = vpop.f32.mrb[192].mxu0 }
 0x3f1   : > { %v16379_v25 = vpop.f32.mrb[192].mxu1  ;;  %6009 = vst.msk [vmem:[#allocation3 + $0xd8] sm:$0xff] %vm425_vm0, %v5977_v48  ;;  %v6408_v38 = vadd.f32 %v16315_v13, %v6047_v62  ;;  %v6248_v40 = vpop.f32.mrb[193].mxu0  ;;  %16713 = vmatmul.mubr.msk.f32.gmra.mrb[42].mxu0 %vm336_vm1, %v8767_v49  ;;  %v6054_v48 = vld [vmem:[#allocation3 + $0x40] sm:$0xff]  ;;  %v8776_v62 = vld [vmem:[#allocation2 + $0x122] sm:$0xff] }
 0x3f2   : > { %v6705_v4 = vpop.f32.mrb[193].mxu1  ;;  %6008 = vst.msk [vmem:[#allocation3 + $0xd0] sm:$0xff] %vm425_vm0, %v5976_v37  ;;  %v5618_v63 = vld [vmem:[#allocation3 + $0xe8] sm:$0xff]  ;;  %v6407_v42 = vadd.f32 %v6248_v40, %v6046_v55  ;;  %16715 = vmatprep.mubr.msk.f32.mxu0 %vm336_vm1, %v8768_v54  ;;  %v6057_v40 = vld [vmem:[#allocation3 + $0x58] sm:$0xff] }
 0x3f3   : > { %v5979_v39 = vadd.f32 %v16293_v41, %v5618_v63  ;;  %v5617_v16 = vld [vmem:[#allocation3 + $0xe0] sm:$0xff]  ;;  %6440 = vst.msk [vmem:[#allocation3 + $0x8] sm:$0xff] %vm425_vm0, %v6408_v38 }
 0x3f4   : > { %v5978_v43 = vadd.f32 %v5931_v14, %v5617_v16  ;;  %6439 = vst.msk [vmem:[#allocation3] sm:$0xff] %vm425_vm0, %v6407_v42  ;;  %v16318_v45 = vpop.f32.mrb[194].mxu0  ;;  %v8777_v63 = vld [vmem:[#allocation2 + $0x12a] sm:$0xff] }
 0x3f5   : > { %v16382_v12 = vpop.f32.mrb[194].mxu1  ;;  %6011 = vst.msk [vmem:[#allocation3 + $0xe8] sm:$0xff] %vm425_vm0, %v5979_v39  ;;  %v6410_v59 = vadd.f32 %v16318_v45, %v6049_v24  ;;  %v6258_v22 = vpop.f32.mrb[195].mxu0  ;;  %16716 = vmatmul.mubr.msk.f32.gmra.mrb[44].mxu0 %vm336_vm1, %v8769_v51  ;;  %v6056_v39 = vld [vmem:[#allocation3 + $0x50] sm:$0xff] }
 0x3f6   : > { %v6715_v30 = vpop.f32.mrb[195].mxu1  ;;  %6010 = vst.msk [vmem:[#allocation3 + $0xe0] sm:$0xff] %vm425_vm0, %v5978_v43  ;;  %v5620_v50 = vld [vmem:[#allocation3 + $0xf8] sm:$0xff]  ;;  %v6409_v29 = vadd.f32 %v6258_v22, %v6048_v11  ;;  %16718 = vmatprep.mubr.msk.f32.mxu0 %vm336_vm1, %v8770_v8  ;;  %v8778_v24 = vld [vmem:[#allocation2 + $0x13a] sm:$0xff] }
 0x3f7   : > { %v5981_v27 = vadd.f32 %v16296_v23, %v5620_v50  ;;  %v5619_v34 = vld [vmem:[#allocation3 + $0xf0] sm:$0xff]  ;;  %6442 = vst.msk [vmem:[#allocation3 + $0x18] sm:$0xff] %vm425_vm0, %v6410_v59  ;;  %v6059_v22 = vld [vmem:[#allocation3 + $0x68] sm:$0xff] }
 0x3f8   : > { %v5980_v57 = vadd.f32 %v5941_v52, %v5619_v34  ;;  %6441 = vst.msk [vmem:[#allocation3 + $0x10] sm:$0xff] %vm425_vm0, %v6409_v29  ;;  %v16321_v9 = vpop.f32.mrb[196].mxu0  ;;  %v8779_v50 = vld [vmem:[#allocation2 + $0x142] sm:$0xff] }
 0x3f9   : > { %v16385_v7 = vpop.f32.mrb[196].mxu1  ;;  %6013 = vst.msk [vmem:[#allocation3 + $0xf8] sm:$0xff] %vm425_vm0, %v5981_v27  ;;  %v6412_v53 = vadd.f32 %v16321_v9, %v6051_v21  ;;  %v6268_v17 = vpop.f32.mrb[197].mxu0  ;;  %16719 = vmatmul.mubr.msk.f32.gmra.mrb[46].mxu0 %vm336_vm1, %v8771_v60  ;;  %v6058_v27 = vld [vmem:[#allocation3 + $0x60] sm:$0xff] }
 0x3fa   : > { %v6725_v5 = vpop.f32.mrb[197].mxu1  ;;  %6012 = vst.msk [vmem:[#allocation3 + $0xf0] sm:$0xff] %vm425_vm0, %v5980_v57  ;;  %v6504_v15 = vld [vmem:[#allocation3 + $0x8] sm:$0xff]  ;;  %v6411_v20 = vadd.f32 %v6268_v17, %v6050_v28  ;;  %16721 = vmatprep.mubr.msk.f32.mxu0 %vm336_vm1, %v8772_v36  ;;  %v6061_v17 = vld [vmem:[#allocation3 + $0x78] sm:$0xff] }
 0x3fb   : > { %v6865_v41 = vadd.f32 %v16379_v25, %v6504_v15  ;;  %v6503_v44 = vld [vmem:[#allocation3] sm:$0xff]  ;;  %6444 = vst.msk [vmem:[#allocation3 + $0x28] sm:$0xff] %vm425_vm0, %v6412_v53  ;;  %v8781_v15 = vld [vmem:[#allocation2 + $0x15a] sm:$0xff] }
 0x3fc   : > { %v6864_v33 = vadd.f32 %v6705_v4, %v6503_v44  ;;  %6443 = vst.msk [vmem:[#allocation3 + $0x20] sm:$0xff] %vm425_vm0, %v6411_v20  ;;  %v16324_v14 = vpop.f32.mrb[198].mxu0  ;;  %v8780_v21 = vld [vmem:[#allocation2 + $0x152] sm:$0xff] }
 0x3fd   : > { %v16388_v31 = vpop.f32.mrb[198].mxu1  ;;  %6897 = vst.msk [vmem:[#allocation3 + $0x8] sm:$0xff] %vm425_vm0, %v6865_v41  ;;  %v6414_v2 = vadd.f32 %v16324_v14, %v6053_v19  ;;  %v6278_v26 = vpop.f32.mrb[199].mxu0  ;;  %16722 = vmatmul.mubr.msk.f32.gmra.mrb[48].mxu0 %vm336_vm1, %v8773_v18  ;;  %v6060_v41 = vld [vmem:[#allocation3 + $0x70] sm:$0xff]  ;;  %v8782_v19 = vld [vmem:[#allocation2 + $0x16a] sm:$0xff] }
 0x3fe   : > { %v6735_v3 = vpop.f32.mrb[199].mxu1  ;;  %6896 = vst.msk [vmem:[#allocation3] sm:$0xff] %vm425_vm0, %v6864_v33  ;;  %v6506_v35 = vld [vmem:[#allocation3 + $0x18] sm:$0xff]  ;;  %v6413_v58 = vadd.f32 %v6278_v26, %v6052_v32  ;;  %16724 = vmatprep.mubr.msk.f32.mxu0 %vm336_vm1, %v8774_v1  ;;  %v9413_v18 = vld [vmem:[%s21685_s7] sm:$0xff] }
 0x3ff   : > { %v6867_v23 = vadd.f32 %v16382_v12, %v6506_v35  ;;  %v6505_v46 = vld [vmem:[#allocation3 + $0x10] sm:$0xff]  ;;  %6446 = vst.msk [vmem:[#allocation3 + $0x38] sm:$0xff] %vm425_vm0, %v6414_v2  ;;  %v9414_v2 = vld [vmem:[%s21685_s7 + $0x8] sm:$0xff]  ;;  %v6063_v35 = vld [vmem:[#allocation3 + $0x88] sm:$0xff] }
 0x400   : > { %v6866_v61 = vadd.f32 %v6715_v30, %v6505_v46  ;;  %6445 = vst.msk [vmem:[#allocation3 + $0x30] sm:$0xff] %vm425_vm0, %v6413_v58  ;;  %v16327_v52 = vpop.f32.mrb[200].mxu0  ;;  %v8783_v46 = vld [vmem:[#allocation2 + $0x172] sm:$0xff] }
 0x401   : > { %v16391_v6 = vpop.f32.mrb[200].mxu1  ;;  %6899 = vst.msk [vmem:[#allocation3 + $0x18] sm:$0xff] %vm425_vm0, %v6867_v23  ;;  %v6416_v0 = vadd.f32 %v16327_v52, %v6055_v56  ;;  %v6288_v47 = vpop.f32.mrb[201].mxu0  ;;  %16725 = vmatmul.mubr.msk.f32.gmra.mrb[50].mxu0 %vm336_vm1, %v8775_v10  ;;  %v6062_v56 = vld [vmem:[#allocation3 + $0x80] sm:$0xff]  ;;  %v8784_v10 = vld [vmem:[#allocation2 + $0x182] sm:$0xff] }
 0x402   : > { %v6745_v37 = vpop.f32.mrb[201].mxu1  ;;  %6898 = vst.msk [vmem:[#allocation3 + $0x10] sm:$0xff] %vm425_vm0, %v6866_v61  ;;  %v6508_v13 = vld [vmem:[#allocation3 + $0x28] sm:$0xff]  ;;  %v6415_v25 = vadd.f32 %v6288_v47, %v6054_v48  ;;  %16727 = vmatprep.mubr.msk.f32.mxu0 %vm336_vm1, %v8776_v62 }
 0x403   : > { %v6869_v49 = vadd.f32 %v16385_v7, %v6508_v13  ;;  %v6507_v38 = vld [vmem:[#allocation3 + $0x20] sm:$0xff]  ;;  %6448 = vst.msk [vmem:[#allocation3 + $0x48] sm:$0xff] %vm425_vm0, %v6416_v0  ;;  %v8786_v62 = vld [vmem:[#allocation2 + $0x19a] sm:$0xff] }
 0x404   : > { %v6868_v55 = vadd.f32 %v6725_v5, %v6507_v38  ;;  %6447 = vst.msk [vmem:[#allocation3 + $0x40] sm:$0xff] %vm425_vm0, %v6415_v25  ;;  %v16330_v4 = vpop.f32.mrb[202].mxu0  ;;  %v6065_v25 = vld [vmem:[#allocation3 + $0x98] sm:$0xff] }
 0x405   : > { %v16394_v54 = vpop.f32.mrb[202].mxu1  ;;  %6901 = vst.msk [vmem:[#allocation3 + $0x28] sm:$0xff] %vm425_vm0, %v6869_v49  ;;  %v6418_v42 = vadd.f32 %v16330_v4, %v6057_v40  ;;  %v6298_v16 = vpop.f32.mrb[203].mxu0  ;;  %16728 = vmatmul.mubr.msk.f32.gmra.mrb[52].mxu0 %vm336_vm1, %v8777_v63  ;;  %v6064_v4 = vld [vmem:[#allocation3 + $0x90] sm:$0xff] }
 0x406   : > { %v6755_v43 = vpop.f32.mrb[203].mxu1  ;;  %6900 = vst.msk [vmem:[#allocation3 + $0x20] sm:$0xff] %vm425_vm0, %v6868_v55  ;;  %v6510_v45 = vld [vmem:[#allocation3 + $0x38] sm:$0xff]  ;;  %v6417_v12 = vadd.f32 %v6298_v16, %v6056_v39  ;;  %16730 = vmatprep.mubr.msk.f32.mxu0 %vm336_vm1, %v8778_v24 }
 0x407   : > { %v6871_v51 = vadd.f32 %v16388_v31, %v6510_v45  ;;  %v6509_v59 = vld [vmem:[#allocation3 + $0x30] sm:$0xff]  ;;  %6450 = vst.msk [vmem:[#allocation3 + $0x58] sm:$0xff] %vm425_vm0, %v6418_v42  ;;  %v8785_v55 = vld [vmem:[#allocation2 + $0x18a] sm:$0xff] }
 0x408   : > { %v6870_v11 = vadd.f32 %v6735_v3, %v6509_v59  ;;  %6449 = vst.msk [vmem:[#allocation3 + $0x50] sm:$0xff] %vm425_vm0, %v6417_v12  ;;  %v16333_v30 = vpop.f32.mrb[204].mxu0  ;;  %v17545_v3 = vpack.c.bf16 %v9414_v2, %v9413_v18  ;;  %v8787_v16 = vld [vmem:[#allocation2 + $0x1a2] sm:$0xff]  ;;  %v6067_v12 = vld [vmem:[#allocation3 + $0xa8] sm:$0xff] }
 0x409   : > { %v16397_v8 = vpop.f32.mrb[204].mxu1  ;;  %6903 = vst.msk [vmem:[#allocation3 + $0x38] sm:$0xff] %vm425_vm0, %v6871_v51  ;;  %v6420_v29 = vadd.f32 %v16333_v30, %v6059_v22  ;;  %v6308_v34 = vpop.f32.mrb[205].mxu0  ;;  %16731 = vmatmul.mubr.msk.f32.gmra.mrb[54].mxu0 %vm336_vm1, %v8779_v50  ;;  %v6066_v22 = vld [vmem:[#allocation3 + $0xa0] sm:$0xff] }
 0x40a   : > { %v6765_v57 = vpop.f32.mrb[205].mxu1  ;;  %6902 = vst.msk [vmem:[#allocation3 + $0x30] sm:$0xff] %vm425_vm0, %v6870_v11  ;;  %v6512_v9 = vld [vmem:[#allocation3 + $0x48] sm:$0xff]  ;;  %v6419_v7 = vadd.f32 %v6308_v34, %v6058_v27  ;;  %16733 = vmatprep.mubr.msk.f32.mxu0 %vm336_vm1, %v8780_v21  ;;  %17546 = vmatprep.subr.bf16.mxu1 %v17545_v3  ;;  %v6069_v21 = vld [vmem:[#allocation3 + $0xb8] sm:$0xff] }
 0x40b   : > { %v6873_v60 = vadd.f32 %v16391_v6, %v6512_v9  ;;  %v6511_v53 = vld [vmem:[#allocation3 + $0x40] sm:$0xff]  ;;  %6452 = vst.msk [vmem:[#allocation3 + $0x68] sm:$0xff] %vm425_vm0, %v6420_v29  ;;  %17548 = vmatpush3.bf16.msra.mxu1 %v17545_v3 }
 0x40c   : > { %v6872_v28 = vadd.f32 %v6745_v37, %v6511_v53  ;;  %6451 = vst.msk [vmem:[#allocation3 + $0x60] sm:$0xff] %vm425_vm0, %v6419_v7  ;;  %v16336_v5 = vpop.f32.mrb[206].mxu0  ;;  %v6068_v53 = vld [vmem:[#allocation3 + $0xb0] sm:$0xff] }
 0x40d   : > { %v16400_v36 = vpop.f32.mrb[206].mxu1  ;;  %6905 = vst.msk [vmem:[#allocation3 + $0x48] sm:$0xff] %vm425_vm0, %v6873_v60  ;;  %v6422_v20 = vadd.f32 %v16336_v5, %v6061_v17  ;;  %v6318_v44 = vpop.f32.mrb[207].mxu0  ;;  %16734 = vmatmul.mubr.msk.f32.gmra.mrb[56].mxu0 %vm336_vm1, %v8781_v15 }
 0x40e   : > { %v6775_v33 = vpop.f32.mrb[207].mxu1  ;;  %6904 = vst.msk [vmem:[#allocation3 + $0x40] sm:$0xff] %vm425_vm0, %v6872_v28  ;;  %v6514_v14 = vld [vmem:[#allocation3 + $0x58] sm:$0xff]  ;;  %v6421_v31 = vadd.f32 %v6318_v44, %v6060_v41  ;;  %16736 = vmatprep.mubr.msk.f32.mxu0 %vm336_vm1, %v8782_v19  ;;  %v6071_v44 = vld [vmem:[#allocation3 + $0xc8] sm:$0xff] }
 0x40f   : > { %v6875_v32 = vadd.f32 %v16394_v54, %v6514_v14  ;;  %v6513_v26 = vld [vmem:[#allocation3 + $0x50] sm:$0xff]  ;;  %6454 = vst.msk [vmem:[#allocation3 + $0x78] sm:$0xff] %vm425_vm0, %v6422_v20 }
 0x410   : > { %v6874_v1 = vadd.f32 %v6755_v43, %v6513_v26  ;;  %6453 = vst.msk [vmem:[#allocation3 + $0x70] sm:$0xff] %vm425_vm0, %v6421_v31  ;;  %v16339_v58 = vpop.f32.mrb[208].mxu0  ;;  %v6070_v31 = vld [vmem:[#allocation3 + $0xc0] sm:$0xff] }
 0x411   : > { %v16403_v23 = vpop.f32.mrb[208].mxu1  ;;  %6907 = vst.msk [vmem:[#allocation3 + $0x58] sm:$0xff] %vm425_vm0, %v6875_v32  ;;  %v6424_v61 = vadd.f32 %v16339_v58, %v6063_v35  ;;  %v6328_v52 = vpop.f32.mrb[209].mxu0  ;;  %16737 = vmatmul.mubr.msk.f32.gmra.mrb[58].mxu0 %vm336_vm1, %v8783_v46  ;;  %v6073_v58 = vld [vmem:[#allocation3 + $0xd8] sm:$0xff] }
 0x412   : > { %v6785_v6 = vpop.f32.mrb[209].mxu1  ;;  %6906 = vst.msk [vmem:[#allocation3 + $0x50] sm:$0xff] %vm425_vm0, %v6874_v1  ;;  %v6516_v0 = vld [vmem:[#allocation3 + $0x68] sm:$0xff]  ;;  %v6423_v48 = vadd.f32 %v6328_v52, %v6062_v56  ;;  %16739 = vmatprep.mubr.msk.f32.mxu0 %vm336_vm1, %v8784_v10  ;;  %v6072_v56 = vld [vmem:[#allocation3 + $0xd0] sm:$0xff] }
 0x413   : > { %v6877_v47 = vadd.f32 %v16397_v8, %v6516_v0  ;;  %v6515_v37 = vld [vmem:[#allocation3 + $0x60] sm:$0xff]  ;;  %6456 = vst.msk [vmem:[#allocation3 + $0x88] sm:$0xff] %vm425_vm0, %v6424_v61 }
 0x414   : > { %v6876_v13 = vadd.f32 %v6765_v57, %v6515_v37  ;;  %6455 = vst.msk [vmem:[#allocation3 + $0x80] sm:$0xff] %vm425_vm0, %v6423_v48  ;;  %v16342_v49 = vpop.f32.mrb[210].mxu0 }
 0x415   : > { %v16406_v38 = vpop.f32.mrb[210].mxu1  ;;  %6909 = vst.msk [vmem:[#allocation3 + $0x68] sm:$0xff] %vm425_vm0, %v6877_v47  ;;  %v6426_v40 = vadd.f32 %v16342_v49, %v6065_v25  ;;  %v6338_v54 = vpop.f32.mrb[211].mxu0  ;;  %16740 = vmatmul.mubr.msk.f32.gmra.mrb[60].mxu0 %vm336_vm1, %v8785_v55 }
 0x416   : > { %v6795_v63 = vpop.f32.mrb[211].mxu1  ;;  %6908 = vst.msk [vmem:[#allocation3 + $0x60] sm:$0xff] %vm425_vm0, %v6876_v13  ;;  %v6518_v42 = vld [vmem:[#allocation3 + $0x78] sm:$0xff]  ;;  %v6425_v39 = vadd.f32 %v6338_v54, %v6064_v4  ;;  %16742 = vmatprep.mubr.msk.f32.mxu0 %vm336_vm1, %v8786_v62  ;;  %v6075_v62 = vld [vmem:[#allocation3 + $0xe8] sm:$0xff] }
 0x417   : > { %v6879_v43 = vadd.f32 %v16400_v36, %v6518_v42  ;;  %v6517_v24 = vld [vmem:[#allocation3 + $0x70] sm:$0xff]  ;;  %6458 = vst.msk [vmem:[#allocation3 + $0x98] sm:$0xff] %vm425_vm0, %v6426_v40 }
 0x418   : > { %v6878_v45 = vadd.f32 %v6775_v33, %v6517_v24  ;;  %6457 = vst.msk [vmem:[#allocation3 + $0x90] sm:$0xff] %vm425_vm0, %v6425_v39  ;;  %v16345_v51 = vpop.f32.mrb[212].mxu0 }
 0x419   : > { %v16409_v59 = vpop.f32.mrb[212].mxu1  ;;  %6911 = vst.msk [vmem:[#allocation3 + $0x78] sm:$0xff] %vm425_vm0, %v6879_v43  ;;  %v6428_v11 = vadd.f32 %v16345_v51, %v6067_v12  ;;  %v6348_v30 = vpop.f32.mrb[213].mxu0  ;;  %16743 = vmatmul.mubr.msk.f32.gmra.mrb[62].mxu0 %vm336_vm1, %v8787_v16  ;;  %v6077_v16 = vld [vmem:[#allocation3 + $0xf8] sm:$0xff]  ;;  %v6076_v12 = vld [vmem:[#allocation3 + $0xf0] sm:$0xff] }
 0x41a   : > { %v6805_v8 = vpop.f32.mrb[213].mxu1  ;;  %6910 = vst.msk [vmem:[#allocation3 + $0x70] sm:$0xff] %vm425_vm0, %v6878_v45  ;;  %v6520_v50 = vld [vmem:[#allocation3 + $0x88] sm:$0xff]  ;;  %v6427_v29 = vadd.f32 %v6348_v30, %v6066_v22  ;;  %v9415_v30 = vld [vmem:[%s21685_s7 + $0x10] sm:$0xff] }
 0x41b   : > { %v6881_v27 = vadd.f32 %v16403_v23, %v6520_v50  ;;  %v6519_v34 = vld [vmem:[#allocation3 + $0x80] sm:$0xff]  ;;  %6460 = vst.msk [vmem:[#allocation3 + $0xa8] sm:$0xff] %vm425_vm0, %v6428_v11 }
 0x41c   : > { %v6880_v57 = vadd.f32 %v6785_v6, %v6519_v34  ;;  %6459 = vst.msk [vmem:[#allocation3 + $0xa0] sm:$0xff] %vm425_vm0, %v6427_v29  ;;  %v16348_v9 = vpop.f32.mrb[214].mxu0 }
 0x41d   : > { %v16412_v7 = vpop.f32.mrb[214].mxu1  ;;  %6913 = vst.msk [vmem:[#allocation3 + $0x88] sm:$0xff] %vm425_vm0, %v6881_v27  ;;  %v6430_v60 = vadd.f32 %v16348_v9, %v6069_v21  ;;  %v6358_v28 = vpop.f32.mrb[215].mxu0 }
 0x41e   : > { %v6815_v17 = vpop.f32.mrb[215].mxu1  ;;  %6912 = vst.msk [vmem:[#allocation3 + $0x80] sm:$0xff] %vm425_vm0, %v6880_v57  ;;  %v6522_v5 = vld [vmem:[#allocation3 + $0x98] sm:$0xff]  ;;  %v6429_v36 = vadd.f32 %v6358_v28, %v6068_v53  ;;  %v6961_v57 = vld [vmem:[#allocation3 + $0x8] sm:$0xff] }
 0x41f   : > { %v6883_v15 = vadd.f32 %v16406_v38, %v6522_v5  ;;  %v6521_v20 = vld [vmem:[#allocation3 + $0x90] sm:$0xff]  ;;  %6462 = vst.msk [vmem:[#allocation3 + $0xb8] sm:$0xff] %vm425_vm0, %v6430_v60  ;;  %v6074_v38 = vld [vmem:[#allocation3 + $0xe0] sm:$0xff] }
 0x420   : > { %v6882_v41 = vadd.f32 %v6795_v63, %v6521_v20  ;;  %6461 = vst.msk [vmem:[#allocation3 + $0xb0] sm:$0xff] %vm425_vm0, %v6429_v36  ;;  %v16351_v33 = vpop.f32.mrb[216].mxu0  ;;  %v6960_v60 = vld [vmem:[#allocation3] sm:$0xff] }
 0x421   : > { %v16415_v19 = vpop.f32.mrb[216].mxu1  ;;  %6915 = vst.msk [vmem:[#allocation3 + $0x98] sm:$0xff] %vm425_vm0, %v6883_v15  ;;  %v6432_v14 = vadd.f32 %v16351_v33, %v6071_v44  ;;  %v6368_v18 = vpop.f32.mrb[217].mxu0 }
 0x422   : > { %v6825_v2 = vpop.f32.mrb[217].mxu1  ;;  %6914 = vst.msk [vmem:[#allocation3 + $0x90] sm:$0xff] %vm425_vm0, %v6882_v41  ;;  %v6524_v32 = vld [vmem:[#allocation3 + $0xa8] sm:$0xff]  ;;  %v6431_v26 = vadd.f32 %v6368_v18, %v6070_v31  ;;  %v6963_v41 = vld [vmem:[#allocation3 + $0x18] sm:$0xff] }
 0x423   : > { %v6885_v3 = vadd.f32 %v16409_v59, %v6524_v32  ;;  %v6523_v1 = vld [vmem:[#allocation3 + $0xa0] sm:$0xff]  ;;  %6464 = vst.msk [vmem:[#allocation3 + $0xc8] sm:$0xff] %vm425_vm0, %v6432_v14  ;;  %v6962_v14 = vld [vmem:[#allocation3 + $0x10] sm:$0xff] }
 0x424   : > { %v6884_v35 = vadd.f32 %v6805_v8, %v6523_v1  ;;  %6463 = vst.msk [vmem:[#allocation3 + $0xc0] sm:$0xff] %vm425_vm0, %v6431_v26  ;;  %v16354_v23 = vpop.f32.mrb[218].mxu0  ;;  %v9416_v8 = vld [vmem:[%s21685_s7 + $0x18] sm:$0xff] }
 0x425   : > { %v16418_v46 = vpop.f32.mrb[218].mxu1  ;;  %6917 = vst.msk [vmem:[#allocation3 + $0xa8] sm:$0xff] %vm425_vm0, %v6885_v3  ;;  %v6434_v61 = vadd.f32 %v16354_v23, %v6073_v58  ;;  %v6378_v52 = vpop.f32.mrb[219].mxu0  ;;  %v17549_v27 = vpack.c.bf16 %v9416_v8, %v9415_v30 }
 0x426   : > { %v6835_v6 = vpop.f32.mrb[219].mxu1  ;;  %6916 = vst.msk [vmem:[#allocation3 + $0xa0] sm:$0xff] %vm425_vm0, %v6884_v35  ;;  %v6526_v10 = vld [vmem:[#allocation3 + $0xb8] sm:$0xff]  ;;  %v6433_v0 = vadd.f32 %v6378_v52, %v6072_v56  ;;  %v6965_v35 = vld [vmem:[#allocation3 + $0x28] sm:$0xff] }
 0x427   : > { %v6887_v48 = vadd.f32 %v16412_v7, %v6526_v10  ;;  %v6525_v47 = vld [vmem:[#allocation3 + $0xb0] sm:$0xff]  ;;  %6466 = vst.msk [vmem:[#allocation3 + $0xd8] sm:$0xff] %vm425_vm0, %v6434_v61  ;;  %17550 = vmatprep.subr.bf16.mxu1 %v17549_v27  ;;  %v6964_v61 = vld [vmem:[#allocation3 + $0x20] sm:$0xff] }
 0x428   : > { %v6886_v37 = vadd.f32 %v6815_v17, %v6525_v47  ;;  %6465 = vst.msk [vmem:[#allocation3 + $0xd0] sm:$0xff] %vm425_vm0, %v6433_v0  ;;  %v16357_v13 = vpop.f32.mrb[220].mxu0  ;;  %17552 = vmatpush3.bf16.msra.mxu1 %v17549_v27 }
 0x429   : > { %v16421_v25 = vpop.f32.mrb[220].mxu1  ;;  %6919 = vst.msk [vmem:[#allocation3 + $0xb8] sm:$0xff] %vm425_vm0, %v6887_v48  ;;  %v6436_v49 = vadd.f32 %v16357_v13, %v6075_v62  ;;  %v6388_v55 = vpop.f32.mrb[221].mxu0 }
 0x42a   : > { %v6845_v40 = vpop.f32.mrb[221].mxu1  ;;  %6918 = vst.msk [vmem:[#allocation3 + $0xb0] sm:$0xff] %vm425_vm0, %v6886_v37  ;;  %v6528_v4 = vld [vmem:[#allocation3 + $0xc8] sm:$0xff]  ;;  %v6435_v54 = vadd.f32 %v6388_v55, %v6074_v38  ;;  %v6967_v37 = vld [vmem:[#allocation3 + $0x38] sm:$0xff] }
 0x42b   : > { %v6889_v63 = vadd.f32 %v16415_v19, %v6528_v4  ;;  %v6527_v42 = vld [vmem:[#allocation3 + $0xc0] sm:$0xff]  ;;  %6468 = vst.msk [vmem:[#allocation3 + $0xe8] sm:$0xff] %vm425_vm0, %v6436_v49  ;;  %v6966_v49 = vld [vmem:[#allocation3 + $0x30] sm:$0xff] }
 0x42c   : > { %v6888_v39 = vadd.f32 %v6825_v2, %v6527_v42  ;;  %6467 = vst.msk [vmem:[#allocation3 + $0xe0] sm:$0xff] %vm425_vm0, %v6435_v54  ;;  %v16360_v43 = vpop.f32.mrb[222].mxu0 }
 0x42d   : > { %v16424_v24 = vpop.f32.mrb[222].mxu1  ;;  %6921 = vst.msk [vmem:[#allocation3 + $0xc8] sm:$0xff] %vm425_vm0, %v6889_v63  ;;  %v6438_v45 = vadd.f32 %v16360_v43, %v6077_v16  ;;  %v6398_v51 = vpop.f32.mrb[223].mxu0 }
 0x42e   : > { %v6855_v59 = vpop.f32.mrb[223].mxu1  ;;  %6920 = vst.msk [vmem:[#allocation3 + $0xc0] sm:$0xff] %vm425_vm0, %v6888_v39  ;;  %v6530_v11 = vld [vmem:[#allocation3 + $0xd8] sm:$0xff]  ;;  %v6437_v22 = vadd.f32 %v6398_v51, %v6076_v12  ;;  %v6969_v39 = vld [vmem:[#allocation3 + $0x48] sm:$0xff] }
 0x42f   : > { %v6891_v50 = vadd.f32 %v16418_v46, %v6530_v11  ;;  %v6529_v29 = vld [vmem:[#allocation3 + $0xd0] sm:$0xff]  ;;  %6470 = vst.msk [vmem:[#allocation3 + $0xf8] sm:$0xff] %vm425_vm0, %v6438_v45  ;;  %v6968_v45 = vld [vmem:[#allocation3 + $0x40] sm:$0xff]  ;;  %v9867_v11 = vld [vmem:[%s21685_s7 + $0x28] sm:$0xff] }
 0x430   : > { %v6890_v34 = vadd.f32 %v6835_v6, %v6529_v29  ;;  %6469 = vst.msk [vmem:[#allocation3 + $0xf0] sm:$0xff] %vm425_vm0, %v6437_v22  ;;  %v16443_v21 = vpop.f32.mrb[224].mxu0 }
 0x431   : > { %v16507_v9 = vpop.f32.mrb[224].mxu1  ;;  %6923 = vst.msk [vmem:[#allocation3 + $0xd8] sm:$0xff] %vm425_vm0, %v6891_v50  ;;  %v7322_v7 = vadd.f32 %v16443_v21, %v6961_v57  ;;  %v7162_v53 = vpop.f32.mrb[225].mxu0 }
 0x432   : > { %v7619_v28 = vpop.f32.mrb[225].mxu1  ;;  %6922 = vst.msk [vmem:[#allocation3 + $0xd0] sm:$0xff] %vm425_vm0, %v6890_v34  ;;  %v6532_v17 = vld [vmem:[#allocation3 + $0xe8] sm:$0xff]  ;;  %v7321_v5 = vadd.f32 %v7162_v53, %v6960_v60  ;;  %v6971_v34 = vld [vmem:[#allocation3 + $0x58] sm:$0xff] }
 0x433   : > { %v6893_v36 = vadd.f32 %v16421_v25, %v6532_v17  ;;  %v6531_v15 = vld [vmem:[#allocation3 + $0xe0] sm:$0xff]  ;;  %7354 = vst.msk [vmem:[#allocation3 + $0x8] sm:$0xff] %vm425_vm0, %v7322_v7  ;;  %v6970_v7 = vld [vmem:[#allocation3 + $0x50] sm:$0xff] }
 0x434   : > { %v6892_v20 = vadd.f32 %v6845_v40, %v6531_v15  ;;  %7353 = vst.msk [vmem:[#allocation3] sm:$0xff] %vm425_vm0, %v7321_v5  ;;  %v16446_v44 = vpop.f32.mrb[226].mxu0 }
 0x435   : > { %v16510_v33 = vpop.f32.mrb[226].mxu1  ;;  %6925 = vst.msk [vmem:[#allocation3 + $0xe8] sm:$0xff] %vm425_vm0, %v6893_v36  ;;  %v7324_v19 = vadd.f32 %v16446_v44, %v6963_v41  ;;  %v7172_v31 = vpop.f32.mrb[227].mxu0 }
 0x436   : > { %v7629_v18 = vpop.f32.mrb[227].mxu1  ;;  %6924 = vst.msk [vmem:[#allocation3 + $0xe0] sm:$0xff] %vm425_vm0, %v6892_v20  ;;  %v6534_v2 = vld [vmem:[#allocation3 + $0xf8] sm:$0xff]  ;;  %v7323_v32 = vadd.f32 %v7172_v31, %v6962_v14  ;;  %v6973_v20 = vld [vmem:[#allocation3 + $0x68] sm:$0xff] }
 0x437   : > { %v6895_v26 = vadd.f32 %v16424_v24, %v6534_v2  ;;  %v6533_v3 = vld [vmem:[#allocation3 + $0xf0] sm:$0xff]  ;;  %7356 = vst.msk [vmem:[#allocation3 + $0x18] sm:$0xff] %vm425_vm0, %v7324_v19  ;;  %v6972_v19 = vld [vmem:[#allocation3 + $0x60] sm:$0xff] }
 0x438   : > { %v6894_v1 = vadd.f32 %v6855_v59, %v6533_v3  ;;  %7355 = vst.msk [vmem:[#allocation3 + $0x10] sm:$0xff] %vm425_vm0, %v7323_v32  ;;  %v16449_v58 = vpop.f32.mrb[228].mxu0  ;;  %v9866_v59 = vld [vmem:[%s21685_s7 + $0x20] sm:$0xff]  ;;  %v9868_v32 = vld [vmem:[%s21685_s7 + $0x30] sm:$0xff] }
 0x439   : > { %v16513_v23 = vpop.f32.mrb[228].mxu1  ;;  %6927 = vst.msk [vmem:[#allocation3 + $0xf8] sm:$0xff] %vm425_vm0, %v6895_v26  ;;  %v7326_v46 = vadd.f32 %v16449_v58, %v6965_v35  ;;  %v7182_v56 = vpop.f32.mrb[229].mxu0  ;;  %v17553_v8 = vpack.c.bf16 %v9867_v11, %v9866_v59  ;;  %v9869_v26 = vld [vmem:[%s21685_s7 + $0x38] sm:$0xff] }
 0x43a   : > { %v7639_v52 = vpop.f32.mrb[229].mxu1  ;;  %6926 = vst.msk [vmem:[#allocation3 + $0xf0] sm:$0xff] %vm425_vm0, %v6894_v1  ;;  %v7418_v6 = vld [vmem:[#allocation3 + $0x8] sm:$0xff]  ;;  %v7325_v10 = vadd.f32 %v7182_v56, %v6964_v61  ;;  %v17557_v35 = vpack.c.bf16 %v9869_v26, %v9868_v32  ;;  %v6982_v26 = vld [vmem:[#allocation3 + $0xb0] sm:$0xff] }
 0x43b   : > { %v7779_v0 = vadd.f32 %v16507_v9, %v7418_v6  ;;  %v7417_v48 = vld [vmem:[#allocation3] sm:$0xff]  ;;  %7358 = vst.msk [vmem:[#allocation3 + $0x28] sm:$0xff] %vm425_vm0, %v7326_v46  ;;  %17554 = vmatprep.subr.bf16.mxu0 %v17553_v8 }
 0x43c   : > { %v7778_v47 = vadd.f32 %v7619_v28, %v7417_v48  ;;  %7357 = vst.msk [vmem:[#allocation3 + $0x20] sm:$0xff] %vm425_vm0, %v7325_v10  ;;  %v16452_v62 = vpop.f32.mrb[230].mxu0  ;;  %17556 = vmatpush3.bf16.msra.mxu0 %v17553_v8 }
 0x43d   : > { %v16516_v13 = vpop.f32.mrb[230].mxu1  ;;  %7811 = vst.msk [vmem:[#allocation3 + $0x8] sm:$0xff] %vm425_vm0, %v7779_v0  ;;  %v7328_v25 = vadd.f32 %v16452_v62, %v6967_v37  ;;  %v7192_v38 = vpop.f32.mrb[231].mxu0  ;;  %17558 = vmatprep.subr.bf16.mxu0 %v17557_v35  ;;  %v9350_v37 = vld [vmem:[#allocation2 + $0x8] sm:$0xff] }
 0x43e   : > { %v7649_v55 = vpop.f32.mrb[231].mxu1  ;;  %7810 = vst.msk [vmem:[#allocation3] sm:$0xff] %vm425_vm0, %v7778_v47  ;;  %v7420_v40 = vld [vmem:[#allocation3 + $0x18] sm:$0xff]  ;;  %v7327_v4 = vadd.f32 %v7192_v38, %v6966_v49  ;;  %v9349_v47 = vld [vmem:[#allocation2] sm:$0xff] }
 0x43f   : > { %v7781_v54 = vadd.f32 %v16510_v33, %v7420_v40  ;;  %v7419_v63 = vld [vmem:[#allocation3 + $0x10] sm:$0xff]  ;;  %7360 = vst.msk [vmem:[#allocation3 + $0x38] sm:$0xff] %vm425_vm0, %v7328_v25  ;;  %16753 = vmatprep.mubr.msk.f32.mxu1 %vm425_vm0, %v9349_v47 }
 0x440   : > { %v7780_v42 = vadd.f32 %v7629_v18, %v7419_v63  ;;  %7359 = vst.msk [vmem:[#allocation3 + $0x30] sm:$0xff] %vm425_vm0, %v7327_v4  ;;  %v16455_v16 = vpop.f32.mrb[232].mxu0  ;;  %17560 = vmatpush3.bf16.msra.mxu0 %v17557_v35  ;;  %v9802_v25 = vld [vmem:[#allocation2 + $0x1] sm:$0xff]  ;;  %16754 = vmatmul.mubr.msk.f32.vlgmr.msra.gmra.mrb[32].mxu1 %vm425_vm0, %v9350_v37  ;;  %v9803_v63 = vld [vmem:[#allocation2 + $0x9] sm:$0xff] }
 0x441   : > { %v16519_v43 = vpop.f32.mrb[232].mxu1  ;;  %7813 = vst.msk [vmem:[#allocation3 + $0x18] sm:$0xff] %vm425_vm0, %v7781_v54  ;;  %v7330_v24 = vadd.f32 %v16455_v16, %v6969_v39  ;;  %v7202_v12 = vpop.f32.mrb[233].mxu0  ;;  %v10319_v49 = vld [vmem:[%s21685_s7 + $0x40] sm:$0xff]  ;;  %16809 = vmatprep.mubr.msk.f32.mxu0 %vm425_vm0, %v9802_v25  ;;  %v10320_v54 = vld [vmem:[%s21685_s7 + $0x48] sm:$0xff]  ;;  %v6976_v39 = vld [vmem:[#allocation3 + $0x80] sm:$0xff] }
 0x442   : > { %v7659_v51 = vpop.f32.mrb[233].mxu1  ;;  %7812 = vst.msk [vmem:[#allocation3 + $0x10] sm:$0xff] %vm425_vm0, %v7780_v42  ;;  %v7422_v22 = vld [vmem:[#allocation3 + $0x28] sm:$0xff]  ;;  %v7329_v30 = vadd.f32 %v7202_v12, %v6968_v45 }
 0x443   : > { %v7783_v50 = vadd.f32 %v16513_v23, %v7422_v22  ;;  %v7421_v29 = vld [vmem:[#allocation3 + $0x20] sm:$0xff]  ;;  %7362 = vst.msk [vmem:[#allocation3 + $0x48] sm:$0xff] %vm425_vm0, %v7330_v24  ;;  %v6975_v23 = vld [vmem:[#allocation3 + $0x78] sm:$0xff]  ;;  %v17561_v24 = vpack.c.bf16 %v10320_v54, %v10319_v49  ;;  %16810 = vmatmul.mubr.msk.f32.vlgmr.msra.gmra.mrb[64].mxu0 %vm425_vm0, %v9803_v63  ;;  %v6986_v54 = vld [vmem:[#allocation3 + $0xd0] sm:$0xff] }
 0x444   : > { %v7782_v27 = vadd.f32 %v7639_v52, %v7421_v29  ;;  %7361 = vst.msk [vmem:[#allocation3 + $0x40] sm:$0xff] %vm425_vm0, %v7329_v30  ;;  %v16458_v57 = vpop.f32.mrb[234].mxu0  ;;  %v6974_v52 = vld [vmem:[#allocation3 + $0x70] sm:$0xff]  ;;  %v6979_v22 = vld [vmem:[#allocation3 + $0x98] sm:$0xff] }
 0x445   : > { %v16522_v21 = vpop.f32.mrb[234].mxu1  ;;  %7815 = vst.msk [vmem:[#allocation3 + $0x28] sm:$0xff] %vm425_vm0, %v7783_v50  ;;  %v7332_v9 = vadd.f32 %v16458_v57, %v6971_v34  ;;  %v7212_v60 = vpop.f32.mrb[235].mxu0  ;;  %17562 = vmatprep.subr.bf16.mxu1 %v17561_v24  ;;  %v6978_v29 = vld [vmem:[#allocation3 + $0x90] sm:$0xff] }
 0x446   : > { %v7669_v53 = vpop.f32.mrb[235].mxu1  ;;  %7814 = vst.msk [vmem:[#allocation3 + $0x20] sm:$0xff] %vm425_vm0, %v7782_v27  ;;  %v7424_v28 = vld [vmem:[#allocation3 + $0x38] sm:$0xff]  ;;  %v7331_v17 = vadd.f32 %v7212_v60, %v6970_v7  ;;  %17564 = vmatpush3.bf16.msra.mxu1 %v17561_v24 }
 0x447   : > { %v7785_v5 = vadd.f32 %v16516_v13, %v7424_v28  ;;  %v7423_v36 = vld [vmem:[#allocation3 + $0x30] sm:$0xff]  ;;  %7364 = vst.msk [vmem:[#allocation3 + $0x58] sm:$0xff] %vm425_vm0, %v7332_v9 }
 0x448   : > { %v7784_v15 = vadd.f32 %v7649_v55, %v7423_v36  ;;  %7363 = vst.msk [vmem:[#allocation3 + $0x50] sm:$0xff] %vm425_vm0, %v7331_v17  ;;  %v16461_v41 = vpop.f32.mrb[236].mxu0  ;;  %v6977_v55 = vld [vmem:[#allocation3 + $0x88] sm:$0xff]  ;;  %v6980_v36 = vld [vmem:[#allocation3 + $0xa0] sm:$0xff] }
 0x449   : > { %v16525_v44 = vpop.f32.mrb[236].mxu1  ;;  %7817 = vst.msk [vmem:[#allocation3 + $0x38] sm:$0xff] %vm425_vm0, %v7785_v5  ;;  %v7334_v33 = vadd.f32 %v16461_v41, %v6973_v20  ;;  %v7222_v14 = vpop.f32.mrb[237].mxu0 }
 0x44a   : > { %v7679_v31 = vpop.f32.mrb[237].mxu1  ;;  %7816 = vst.msk [vmem:[#allocation3 + $0x30] sm:$0xff] %vm425_vm0, %v7784_v15  ;;  %v7426_v18 = vld [vmem:[#allocation3 + $0x48] sm:$0xff]  ;;  %v7333_v2 = vadd.f32 %v7222_v14, %v6972_v19 }
 0x44b   : > { %v7787_v3 = vadd.f32 %v16519_v43, %v7426_v18  ;;  %v7425_v1 = vld [vmem:[#allocation3 + $0x40] sm:$0xff]  ;;  %7366 = vst.msk [vmem:[#allocation3 + $0x68] sm:$0xff] %vm425_vm0, %v7334_v33 }
 0x44c   : > { %v7786_v58 = vadd.f32 %v7659_v51, %v7425_v1  ;;  %7365 = vst.msk [vmem:[#allocation3 + $0x60] sm:$0xff] %vm425_vm0, %v7333_v2  ;;  %v16464_v46 = vpop.f32.mrb[238].mxu0 }
 0x44d   : > { %v16528_v61 = vpop.f32.mrb[238].mxu1  ;;  %7819 = vst.msk [vmem:[#allocation3 + $0x48] sm:$0xff] %vm425_vm0, %v7787_v3  ;;  %v7336_v56 = vadd.f32 %v16464_v46, %v6975_v23  ;;  %v7232_v6 = vpop.f32.mrb[239].mxu0 }
 0x44e   : > { %v7689_v10 = vpop.f32.mrb[239].mxu1  ;;  %7818 = vst.msk [vmem:[#allocation3 + $0x40] sm:$0xff] %vm425_vm0, %v7786_v58  ;;  %v7428_v0 = vld [vmem:[#allocation3 + $0x58] sm:$0xff]  ;;  %v7335_v48 = vadd.f32 %v7232_v6, %v6974_v52 }
 0x44f   : > { %v7789_v62 = vadd.f32 %v16522_v21, %v7428_v0  ;;  %v7427_v13 = vld [vmem:[#allocation3 + $0x50] sm:$0xff]  ;;  %7368 = vst.msk [vmem:[#allocation3 + $0x78] sm:$0xff] %vm425_vm0, %v7336_v56  ;;  %v6985_v56 = vld [vmem:[#allocation3 + $0xc8] sm:$0xff]  ;;  %v6984_v0 = vld [vmem:[#allocation3 + $0xc0] sm:$0xff] }
 0x450   : > { %v7788_v38 = vadd.f32 %v7669_v53, %v7427_v13  ;;  %7367 = vst.msk [vmem:[#allocation3 + $0x70] sm:$0xff] %vm425_vm0, %v7335_v48  ;;  %v16467_v40 = vpop.f32.mrb[240].mxu0  ;;  %v6981_v53 = vld [vmem:[#allocation3 + $0xa8] sm:$0xff] }
 0x451   : > { %v16531_v4 = vpop.f32.mrb[240].mxu1  ;;  %7821 = vst.msk [vmem:[#allocation3 + $0x58] sm:$0xff] %vm425_vm0, %v7789_v62  ;;  %v7338_v42 = vadd.f32 %v16467_v40, %v6977_v55  ;;  %v7242_v16 = vpop.f32.mrb[241].mxu0 }
 0x452   : > { %v7699_v43 = vpop.f32.mrb[241].mxu1  ;;  %7820 = vst.msk [vmem:[#allocation3 + $0x50] sm:$0xff] %vm425_vm0, %v7788_v38  ;;  %v7430_v45 = vld [vmem:[#allocation3 + $0x68] sm:$0xff]  ;;  %v7337_v12 = vadd.f32 %v7242_v16, %v6976_v39  ;;  %v6987_v38 = vld [vmem:[#allocation3 + $0xd8] sm:$0xff] }
 0x453   : > { %v7791_v51 = vadd.f32 %v16525_v44, %v7430_v45  ;;  %v7429_v59 = vld [vmem:[#allocation3 + $0x60] sm:$0xff]  ;;  %7370 = vst.msk [vmem:[#allocation3 + $0x88] sm:$0xff] %vm425_vm0, %v7338_v42 }
 0x454   : > { %v7790_v11 = vadd.f32 %v7679_v31, %v7429_v59  ;;  %7369 = vst.msk [vmem:[#allocation3 + $0x80] sm:$0xff] %vm425_vm0, %v7337_v12  ;;  %v16470_v30 = vpop.f32.mrb[242].mxu0  ;;  %v6983_v31 = vld [vmem:[#allocation3 + $0xb8] sm:$0xff]  ;;  %v6989_v12 = vld [vmem:[#allocation3 + $0xe8] sm:$0xff] }
 0x455   : > { %v16534_v8 = vpop.f32.mrb[242].mxu1  ;;  %7823 = vst.msk [vmem:[#allocation3 + $0x68] sm:$0xff] %vm425_vm0, %v7791_v51  ;;  %v7340_v50 = vadd.f32 %v16470_v30, %v6979_v22  ;;  %v7252_v27 = vpop.f32.mrb[243].mxu0  ;;  %v6988_v22 = vld [vmem:[#allocation3 + $0xe0] sm:$0xff] }
 0x456   : > { %v7709_v34 = vpop.f32.mrb[243].mxu1  ;;  %7822 = vst.msk [vmem:[#allocation3 + $0x60] sm:$0xff] %vm425_vm0, %v7790_v11  ;;  %v7432_v57 = vld [vmem:[#allocation3 + $0x78] sm:$0xff]  ;;  %v7339_v21 = vadd.f32 %v7252_v27, %v6978_v29 }
 0x457   : > { %v7793_v9 = vadd.f32 %v16528_v61, %v7432_v57  ;;  %v7431_v7 = vld [vmem:[#allocation3 + $0x70] sm:$0xff]  ;;  %7372 = vst.msk [vmem:[#allocation3 + $0x98] sm:$0xff] %vm425_vm0, %v7340_v50 }
 0x458   : > { %v7792_v60 = vadd.f32 %v7689_v10, %v7431_v7  ;;  %7371 = vst.msk [vmem:[#allocation3 + $0x90] sm:$0xff] %vm425_vm0, %v7339_v21  ;;  %v16473_v28 = vpop.f32.mrb[244].mxu0  ;;  %v6991_v21 = vld [vmem:[#allocation3 + $0xf8] sm:$0xff] }
 0x459   : > { %v16537_v17 = vpop.f32.mrb[244].mxu1  ;;  %7825 = vst.msk [vmem:[#allocation3 + $0x78] sm:$0xff] %vm425_vm0, %v7793_v9  ;;  %v7342_v5 = vadd.f32 %v16473_v28, %v6981_v53  ;;  %v7262_v15 = vpop.f32.mrb[245].mxu0  ;;  %v6990_v53 = vld [vmem:[#allocation3 + $0xf0] sm:$0xff] }
 0x45a   : > { %v7719_v20 = vpop.f32.mrb[245].mxu1  ;;  %7824 = vst.msk [vmem:[#allocation3 + $0x70] sm:$0xff] %vm425_vm0, %v7792_v60  ;;  %v7434_v41 = vld [vmem:[#allocation3 + $0x88] sm:$0xff]  ;;  %v7341_v44 = vadd.f32 %v7262_v15, %v6980_v36  ;;  %v10321_v15 = vld [vmem:[%s21685_s7 + $0x50] sm:$0xff] }
 0x45b   : > { %v7795_v33 = vadd.f32 %v16531_v4, %v7434_v41  ;;  %v7433_v19 = vld [vmem:[#allocation3 + $0x80] sm:$0xff]  ;;  %7374 = vst.msk [vmem:[#allocation3 + $0xa8] sm:$0xff] %vm425_vm0, %v7342_v5 }
 0x45c   : > { %v7794_v14 = vadd.f32 %v7699_v43, %v7433_v19  ;;  %7373 = vst.msk [vmem:[#allocation3 + $0xa0] sm:$0xff] %vm425_vm0, %v7341_v44  ;;  %v16476_v18 = vpop.f32.mrb[246].mxu0 }
 0x45d   : > { %v16540_v2 = vpop.f32.mrb[246].mxu1  ;;  %7827 = vst.msk [vmem:[#allocation3 + $0x88] sm:$0xff] %vm425_vm0, %v7795_v33  ;;  %v7344_v32 = vadd.f32 %v16476_v18, %v6983_v31  ;;  %v7272_v3 = vpop.f32.mrb[247].mxu0 }
 0x45e   : > { %v7729_v1 = vpop.f32.mrb[247].mxu1  ;;  %7826 = vst.msk [vmem:[#allocation3 + $0x80] sm:$0xff] %vm425_vm0, %v7794_v14  ;;  %v7436_v35 = vld [vmem:[#allocation3 + $0x98] sm:$0xff]  ;;  %v7343_v58 = vadd.f32 %v7272_v3, %v6982_v26  ;;  %v7875_v14 = vld [vmem:[#allocation3 + $0x8] sm:$0xff] }
 0x45f   : > { %v7797_v23 = vadd.f32 %v16534_v8, %v7436_v35  ;;  %v7435_v46 = vld [vmem:[#allocation3 + $0x90] sm:$0xff]  ;;  %7376 = vst.msk [vmem:[#allocation3 + $0xb8] sm:$0xff] %vm425_vm0, %v7344_v32  ;;  %v7874_v32 = vld [vmem:[#allocation3] sm:$0xff] }
 0x460   : > { %v7796_v61 = vadd.f32 %v7709_v34, %v7435_v46  ;;  %7375 = vst.msk [vmem:[#allocation3 + $0xb0] sm:$0xff] %vm425_vm0, %v7343_v58  ;;  %v16479_v52 = vpop.f32.mrb[248].mxu0 }
 0x461   : > { %v16543_v6 = vpop.f32.mrb[248].mxu1  ;;  %7829 = vst.msk [vmem:[#allocation3 + $0x98] sm:$0xff] %vm425_vm0, %v7797_v23  ;;  %v7346_v10 = vadd.f32 %v16479_v52, %v6985_v56  ;;  %v7282_v48 = vpop.f32.mrb[249].mxu0 }
 0x462   : > { %v7739_v47 = vpop.f32.mrb[249].mxu1  ;;  %7828 = vst.msk [vmem:[#allocation3 + $0x90] sm:$0xff] %vm425_vm0, %v7796_v61  ;;  %v7438_v37 = vld [vmem:[#allocation3 + $0xa8] sm:$0xff]  ;;  %v7345_v62 = vadd.f32 %v7282_v48, %v6984_v0  ;;  %v7877_v61 = vld [vmem:[#allocation3 + $0x18] sm:$0xff] }
 0x463   : > { %v7799_v13 = vadd.f32 %v16537_v17, %v7438_v37  ;;  %v7437_v25 = vld [vmem:[#allocation3 + $0xa0] sm:$0xff]  ;;  %7378 = vst.msk [vmem:[#allocation3 + $0xc8] sm:$0xff] %vm425_vm0, %v7346_v10  ;;  %v7876_v10 = vld [vmem:[#allocation3 + $0x10] sm:$0xff] }
 0x464   : > { %v7798_v49 = vadd.f32 %v7719_v20, %v7437_v25  ;;  %7377 = vst.msk [vmem:[#allocation3 + $0xc0] sm:$0xff] %vm425_vm0, %v7345_v62  ;;  %v16482_v55 = vpop.f32.mrb[250].mxu0  ;;  %v10322_v20 = vld [vmem:[%s21685_s7 + $0x58] sm:$0xff] }
 0x465   : > { %v16546_v40 = vpop.f32.mrb[250].mxu1  ;;  %7831 = vst.msk [vmem:[#allocation3 + $0xa8] sm:$0xff] %vm425_vm0, %v7799_v13  ;;  %v7348_v4 = vadd.f32 %v16482_v55, %v6987_v38  ;;  %v7292_v63 = vpop.f32.mrb[251].mxu0  ;;  %v17565_v33 = vpack.c.bf16 %v10322_v20, %v10321_v15  ;;  %v7882_v20 = vld [vmem:[#allocation3 + $0x40] sm:$0xff] }
 0x466   : > { %v7749_v42 = vpop.f32.mrb[251].mxu1  ;;  %7830 = vst.msk [vmem:[#allocation3 + $0xa0] sm:$0xff] %vm425_vm0, %v7798_v49  ;;  %v7440_v39 = vld [vmem:[#allocation3 + $0xb8] sm:$0xff]  ;;  %v7347_v16 = vadd.f32 %v7292_v63, %v6986_v54  ;;  %v7879_v49 = vld [vmem:[#allocation3 + $0x28] sm:$0xff] }
 0x467   : > { %v7801_v43 = vadd.f32 %v16540_v2, %v7440_v39  ;;  %v7439_v24 = vld [vmem:[#allocation3 + $0xb0] sm:$0xff]  ;;  %7380 = vst.msk [vmem:[#allocation3 + $0xd8] sm:$0xff] %vm425_vm0, %v7348_v4  ;;  %17566 = vmatprep.subr.bf16.mxu1 %v17565_v33  ;;  %v7878_v4 = vld [vmem:[#allocation3 + $0x20] sm:$0xff] }
 0x468   : > { %v7800_v45 = vadd.f32 %v7729_v1, %v7439_v24  ;;  %7379 = vst.msk [vmem:[#allocation3 + $0xd0] sm:$0xff] %vm425_vm0, %v7347_v16  ;;  %v16485_v51 = vpop.f32.mrb[252].mxu0  ;;  %17568 = vmatpush3.bf16.msra.mxu1 %v17565_v33  ;;  %v10772_v16 = vld [vmem:[%s21685_s7 + $0x60] sm:$0xff]  ;;  %v11226_v33 = vld [vmem:[%s21685_s7 + $0x88] sm:$0xff] }
 0x469   : > { %v16549_v59 = vpop.f32.mrb[252].mxu1  ;;  %7833 = vst.msk [vmem:[#allocation3 + $0xb8] sm:$0xff] %vm425_vm0, %v7801_v43  ;;  %v7350_v11 = vadd.f32 %v16485_v51, %v6989_v12  ;;  %v7302_v30 = vpop.f32.mrb[253].mxu0  ;;  %v10773_v43 = vld [vmem:[%s21685_s7 + $0x68] sm:$0xff] }
 0x46a   : > { %v7759_v8 = vpop.f32.mrb[253].mxu1  ;;  %7832 = vst.msk [vmem:[#allocation3 + $0xb0] sm:$0xff] %vm425_vm0, %v7800_v45  ;;  %v7442_v50 = vld [vmem:[#allocation3 + $0xc8] sm:$0xff]  ;;  %v7349_v29 = vadd.f32 %v7302_v30, %v6988_v22  ;;  %v17569_v12 = vpack.c.bf16 %v10773_v43, %v10772_v16  ;;  %v7888_v16 = vld [vmem:[#allocation3 + $0x70] sm:$0xff] }
 0x46b   : > { %v7803_v27 = vadd.f32 %v16543_v6, %v7442_v50  ;;  %v7441_v34 = vld [vmem:[#allocation3 + $0xc0] sm:$0xff]  ;;  %7382 = vst.msk [vmem:[#allocation3 + $0xe8] sm:$0xff] %vm425_vm0, %v7350_v11 }
 0x46c   : > { %v7802_v57 = vadd.f32 %v7739_v47, %v7441_v34  ;;  %7381 = vst.msk [vmem:[#allocation3 + $0xe0] sm:$0xff] %vm425_vm0, %v7349_v29  ;;  %v16488_v9 = vpop.f32.mrb[254].mxu0  ;;  %17570 = vmatprep.subr.bf16.mxu0 %v17569_v12 }
 0x46d   : > { %v16552_v7 = vpop.f32.mrb[254].mxu1  ;;  %7835 = vst.msk [vmem:[#allocation3 + $0xc8] sm:$0xff] %vm425_vm0, %v7803_v27  ;;  %v7352_v60 = vadd.f32 %v16488_v9, %v6991_v21  ;;  %v7312_v28 = vpop.f32.mrb[255].mxu0  ;;  %17572 = vmatpush3.bf16.msra.mxu0 %v17569_v12  ;;  %v10774_v9 = vld [vmem:[%s21685_s7 + $0x70] sm:$0xff] }
 0x46e   : > { %v7769_v17 = vpop.f32.mrb[255].mxu1  ;;  %7834 = vst.msk [vmem:[#allocation3 + $0xc0] sm:$0xff] %vm425_vm0, %v7802_v57  ;;  %v7444_v5 = vld [vmem:[#allocation3 + $0xd8] sm:$0xff]  ;;  %v7351_v36 = vadd.f32 %v7312_v28, %v6990_v53  ;;  %v7883_v53 = vld [vmem:[#allocation3 + $0x48] sm:$0xff] }
 0x46f   : > { %v7805_v41 = vadd.f32 %v16546_v40, %v7444_v5  ;;  %v7443_v44 = vld [vmem:[#allocation3 + $0xd0] sm:$0xff]  ;;  %7384 = vst.msk [vmem:[#allocation3 + $0xf8] sm:$0xff] %vm425_vm0, %v7352_v60 }
 0x470   : > { %v7804_v19 = vadd.f32 %v7749_v42, %v7443_v44  ;;  %7383 = vst.msk [vmem:[#allocation3 + $0xf0] sm:$0xff] %vm425_vm0, %v7351_v36  ;;  %v16571_v31 = vpop.f32.mrb[0].mxu0  ;;  %v11225_v36 = vld [vmem:[%s21685_s7 + $0x80] sm:$0xff] }
 0x471   : > { %v16635_v18 = vpop.f32.mrb[0].mxu1  ;;  %7837 = vst.msk [vmem:[#allocation3 + $0xd8] sm:$0xff] %vm425_vm0, %v7805_v41  ;;  %v8236_v2 = vadd.f32 %v16571_v31, %v7875_v14  ;;  %v8076_v26 = vpop.f32.mrb[1].mxu0  ;;  %v20395_v31 = vpack.c.bf16 %v11226_v33, %v11225_v36  ;;  %v7892_v36 = vld [vmem:[#allocation3 + $0x90] sm:$0xff] }
 0x472   : > { %v8533_v3 = vpop.f32.mrb[1].mxu1  ;;  %7836 = vst.msk [vmem:[#allocation3 + $0xd0] sm:$0xff] %vm425_vm0, %v7804_v19  ;;  %v7446_v1 = vld [vmem:[#allocation3 + $0xe8] sm:$0xff]  ;;  %v8235_v35 = vadd.f32 %v8076_v26, %v7874_v32  ;;  %v7885_v26 = vld [vmem:[#allocation3 + $0x58] sm:$0xff] }
 0x473   : > { %v7807_v58 = vadd.f32 %v16549_v59, %v7446_v1  ;;  %v7445_v23 = vld [vmem:[#allocation3 + $0xe0] sm:$0xff]  ;;  %8268 = vst.msk [vmem:[#allocation3 + $0x8] sm:$0xff] %vm425_vm0, %v8236_v2  ;;  %v7881_v59 = vld [vmem:[#allocation3 + $0x38] sm:$0xff]  ;;  %17578 = vmatprep.subr.bf16.mxu1 %v20395_v31 }
 0x474   : > { %v7806_v46 = vadd.f32 %v7759_v8, %v7445_v23  ;;  %8267 = vst.msk [vmem:[#allocation3] sm:$0xff] %vm425_vm0, %v8235_v35  ;;  %v16574_v56 = vpop.f32.mrb[2].mxu0  ;;  %v7880_v8 = vld [vmem:[#allocation3 + $0x30] sm:$0xff] }
 0x475   : > { %v16638_v52 = vpop.f32.mrb[2].mxu1  ;;  %7839 = vst.msk [vmem:[#allocation3 + $0xe8] sm:$0xff] %vm425_vm0, %v7807_v58  ;;  %v8238_v6 = vadd.f32 %v16574_v56, %v7877_v61  ;;  %v8086_v0 = vpop.f32.mrb[3].mxu0  ;;  %v7884_v58 = vld [vmem:[#allocation3 + $0x50] sm:$0xff] }
 0x476   : > { %v8543_v48 = vpop.f32.mrb[3].mxu1  ;;  %7838 = vst.msk [vmem:[#allocation3 + $0xe0] sm:$0xff] %vm425_vm0, %v7806_v46  ;;  %v7448_v47 = vld [vmem:[#allocation3 + $0xf8] sm:$0xff]  ;;  %v8237_v37 = vadd.f32 %v8086_v0, %v7876_v10  ;;  %v7887_v0 = vld [vmem:[#allocation3 + $0x68] sm:$0xff] }
 0x477   : > { %v7809_v62 = vadd.f32 %v16552_v7, %v7448_v47  ;;  %v7447_v13 = vld [vmem:[#allocation3 + $0xf0] sm:$0xff]  ;;  %8270 = vst.msk [vmem:[#allocation3 + $0x18] sm:$0xff] %vm425_vm0, %v8238_v6  ;;  %v10775_v7 = vld [vmem:[%s21685_s7 + $0x78] sm:$0xff] }
 0x478   : > { %v7808_v25 = vadd.f32 %v7769_v17, %v7447_v13  ;;  %8269 = vst.msk [vmem:[#allocation3 + $0x10] sm:$0xff] %vm425_vm0, %v8237_v37  ;;  %v16577_v38 = vpop.f32.mrb[4].mxu0  ;;  %v17573_v5 = vpack.c.bf16 %v10775_v7, %v10774_v9 }
 0x479   : > { %v16641_v55 = vpop.f32.mrb[4].mxu1  ;;  %7841 = vst.msk [vmem:[#allocation3 + $0xf8] sm:$0xff] %vm425_vm0, %v7809_v62  ;;  %v8240_v40 = vadd.f32 %v16577_v38, %v7879_v49  ;;  %v8096_v54 = vpop.f32.mrb[5].mxu0  ;;  %v7886_v62 = vld [vmem:[#allocation3 + $0x60] sm:$0xff] }
 0x47a   : > { %v8553_v63 = vpop.f32.mrb[5].mxu1  ;;  %7840 = vst.msk [vmem:[#allocation3 + $0xf0] sm:$0xff] %vm425_vm0, %v7808_v25  ;;  %v8332_v42 = vld [vmem:[#allocation3 + $0x8] sm:$0xff]  ;;  %v8239_v39 = vadd.f32 %v8096_v54, %v7878_v4  ;;  %17574 = vmatprep.subr.bf16.mxu0 %v17573_v5  ;;  %v7889_v54 = vld [vmem:[#allocation3 + $0x78] sm:$0xff] }
 0x47b   : > { %v8693_v24 = vadd.f32 %v16635_v18, %v8332_v42  ;;  %v8331_v45 = vld [vmem:[#allocation3] sm:$0xff]  ;;  %8272 = vst.msk [vmem:[#allocation3 + $0x28] sm:$0xff] %vm425_vm0, %v8240_v40  ;;  %17576 = vmatpush3.bf16.msra.mxu0 %v17573_v5 }
 0x47c   : > { %v8692_v51 = vadd.f32 %v8533_v3, %v8331_v45  ;;  %8271 = vst.msk [vmem:[#allocation3 + $0x20] sm:$0xff] %vm425_vm0, %v8239_v39  ;;  %v16580_v11 = vpop.f32.mrb[6].mxu0 }
 0x47d   : > { %v16644_v22 = vpop.f32.mrb[6].mxu1  ;;  %8725 = vst.msk [vmem:[#allocation3 + $0x8] sm:$0xff] %vm425_vm0, %v8693_v24  ;;  %v8242_v30 = vadd.f32 %v16580_v11, %v7881_v59  ;;  %v8106_v50 = vpop.f32.mrb[7].mxu0 }
 0x47e   : > { %v8563_v29 = vpop.f32.mrb[7].mxu1  ;;  %8724 = vst.msk [vmem:[#allocation3] sm:$0xff] %vm425_vm0, %v8692_v51  ;;  %v8334_v27 = vld [vmem:[#allocation3 + $0x18] sm:$0xff]  ;;  %v8241_v34 = vadd.f32 %v8106_v50, %v7880_v8 }
 0x47f   : > { %v8695_v57 = vadd.f32 %v16638_v52, %v8334_v27  ;;  %v8333_v21 = vld [vmem:[#allocation3 + $0x10] sm:$0xff]  ;;  %8274 = vst.msk [vmem:[#allocation3 + $0x38] sm:$0xff] %vm425_vm0, %v8242_v30 }
 0x480   : > { %v8694_v60 = vadd.f32 %v8543_v48, %v8333_v21  ;;  %8273 = vst.msk [vmem:[#allocation3 + $0x30] sm:$0xff] %vm425_vm0, %v8241_v34  ;;  %v16583_v28 = vpop.f32.mrb[8].mxu0 }
 0x481   : > { %v16647_v17 = vpop.f32.mrb[8].mxu1  ;;  %8727 = vst.msk [vmem:[#allocation3 + $0x18] sm:$0xff] %vm425_vm0, %v8695_v57  ;;  %v8244_v15 = vadd.f32 %v16583_v28, %v7883_v53  ;;  %v8116_v41 = vpop.f32.mrb[9].mxu0  ;;  %v7893_v53 = vld [vmem:[#allocation3 + $0x98] sm:$0xff] }
 0x482   : > { %v8573_v44 = vpop.f32.mrb[9].mxu1  ;;  %8726 = vst.msk [vmem:[#allocation3 + $0x10] sm:$0xff] %vm425_vm0, %v8694_v60  ;;  %v8336_v19 = vld [vmem:[#allocation3 + $0x28] sm:$0xff]  ;;  %v8243_v14 = vadd.f32 %v8116_v41, %v7882_v20 }
 0x483   : > { %v8697_v18 = vadd.f32 %v16641_v55, %v8336_v19  ;;  %v8335_v2 = vld [vmem:[#allocation3 + $0x20] sm:$0xff]  ;;  %8276 = vst.msk [vmem:[#allocation3 + $0x48] sm:$0xff] %vm425_vm0, %v8244_v15 }
 0x484   : > { %v8696_v32 = vadd.f32 %v8553_v63, %v8335_v2  ;;  %8275 = vst.msk [vmem:[#allocation3 + $0x40] sm:$0xff] %vm425_vm0, %v8243_v14  ;;  %v16586_v3 = vpop.f32.mrb[10].mxu0 }
 0x485   : > { %v16650_v1 = vpop.f32.mrb[10].mxu1  ;;  %8729 = vst.msk [vmem:[#allocation3 + $0x28] sm:$0xff] %vm425_vm0, %v8697_v18  ;;  %v8246_v35 = vadd.f32 %v16586_v3, %v7885_v26  ;;  %v8126_v23 = vpop.f32.mrb[11].mxu0  ;;  %v7895_v18 = vld [vmem:[#allocation3 + $0xa8] sm:$0xff]  ;;  %v7894_v3 = vld [vmem:[#allocation3 + $0xa0] sm:$0xff] }
 0x486   : > { %v8583_v46 = vpop.f32.mrb[11].mxu1  ;;  %8728 = vst.msk [vmem:[#allocation3 + $0x20] sm:$0xff] %vm425_vm0, %v8696_v32  ;;  %v8338_v61 = vld [vmem:[#allocation3 + $0x38] sm:$0xff]  ;;  %v8245_v56 = vadd.f32 %v8126_v23, %v7884_v58 }
 0x487   : > { %v8699_v52 = vadd.f32 %v16644_v22, %v8338_v61  ;;  %v8337_v6 = vld [vmem:[#allocation3 + $0x30] sm:$0xff]  ;;  %8278 = vst.msk [vmem:[#allocation3 + $0x58] sm:$0xff] %vm425_vm0, %v8246_v35  ;;  %v7891_v22 = vld [vmem:[#allocation3 + $0x88] sm:$0xff] }
 0x488   : > { %v8698_v10 = vadd.f32 %v8563_v29, %v8337_v6  ;;  %8277 = vst.msk [vmem:[#allocation3 + $0x50] sm:$0xff] %vm425_vm0, %v8245_v56  ;;  %v16589_v48 = vpop.f32.mrb[12].mxu0  ;;  %v7890_v29 = vld [vmem:[#allocation3 + $0x80] sm:$0xff] }
 0x489   : > { %v16653_v47 = vpop.f32.mrb[12].mxu1  ;;  %8731 = vst.msk [vmem:[#allocation3 + $0x38] sm:$0xff] %vm425_vm0, %v8699_v52  ;;  %v8248_v37 = vadd.f32 %v16589_v48, %v7887_v0  ;;  %v8136_v13 = vpop.f32.mrb[13].mxu0  ;;  %v7897_v52 = vld [vmem:[#allocation3 + $0xb8] sm:$0xff]  ;;  %v7896_v48 = vld [vmem:[#allocation3 + $0xb0] sm:$0xff] }
 0x48a   : > { %v8593_v25 = vpop.f32.mrb[13].mxu1  ;;  %8730 = vst.msk [vmem:[#allocation3 + $0x30] sm:$0xff] %vm425_vm0, %v8698_v10  ;;  %v8340_v49 = vld [vmem:[#allocation3 + $0x48] sm:$0xff]  ;;  %v8247_v38 = vadd.f32 %v8136_v13, %v7886_v62 }
 0x48b   : > { %v8701_v55 = vadd.f32 %v16647_v17, %v8340_v49  ;;  %v8339_v40 = vld [vmem:[#allocation3 + $0x40] sm:$0xff]  ;;  %8280 = vst.msk [vmem:[#allocation3 + $0x68] sm:$0xff] %vm425_vm0, %v8248_v37 }
 0x48c   : > { %v8700_v4 = vadd.f32 %v8573_v44, %v8339_v40  ;;  %8279 = vst.msk [vmem:[#allocation3 + $0x60] sm:$0xff] %vm425_vm0, %v8247_v38  ;;  %v16592_v63 = vpop.f32.mrb[14].mxu0 }
 0x48d   : > { %v16656_v42 = vpop.f32.mrb[14].mxu1  ;;  %8733 = vst.msk [vmem:[#allocation3 + $0x48] sm:$0xff] %vm425_vm0, %v8701_v55  ;;  %v8250_v39 = vadd.f32 %v16592_v63, %v7889_v54  ;;  %v8146_v43 = vpop.f32.mrb[15].mxu0  ;;  %v7899_v55 = vld [vmem:[#allocation3 + $0xc8] sm:$0xff]  ;;  %v7898_v63 = vld [vmem:[#allocation3 + $0xc0] sm:$0xff] }
 0x48e   : > { %v8603_v24 = vpop.f32.mrb[15].mxu1  ;;  %8732 = vst.msk [vmem:[#allocation3 + $0x40] sm:$0xff] %vm425_vm0, %v8700_v4  ;;  %v8342_v45 = vld [vmem:[#allocation3 + $0x58] sm:$0xff]  ;;  %v8249_v12 = vadd.f32 %v8146_v43, %v7888_v16 }
 0x48f   : > { %v8703_v51 = vadd.f32 %v16650_v1, %v8342_v45  ;;  %v8341_v59 = vld [vmem:[#allocation3 + $0x50] sm:$0xff]  ;;  %8282 = vst.msk [vmem:[#allocation3 + $0x78] sm:$0xff] %vm425_vm0, %v8250_v39 }
 0x490   : > { %v8702_v11 = vadd.f32 %v8583_v46, %v8341_v59  ;;  %8281 = vst.msk [vmem:[#allocation3 + $0x70] sm:$0xff] %vm425_vm0, %v8249_v12  ;;  %v16595_v30 = vpop.f32.mrb[16].mxu0 }
 0x491   : > { %v16659_v8 = vpop.f32.mrb[16].mxu1  ;;  %8735 = vst.msk [vmem:[#allocation3 + $0x58] sm:$0xff] %vm425_vm0, %v8703_v51  ;;  %v8252_v50 = vadd.f32 %v16595_v30, %v7891_v22  ;;  %v8156_v27 = vpop.f32.mrb[17].mxu0  ;;  %v7901_v51 = vld [vmem:[#allocation3 + $0xd8] sm:$0xff]  ;;  %v7900_v30 = vld [vmem:[#allocation3 + $0xd0] sm:$0xff] }
 0x492   : > { %v8613_v34 = vpop.f32.mrb[17].mxu1  ;;  %8734 = vst.msk [vmem:[#allocation3 + $0x50] sm:$0xff] %vm425_vm0, %v8702_v11  ;;  %v8344_v57 = vld [vmem:[#allocation3 + $0x68] sm:$0xff]  ;;  %v8251_v21 = vadd.f32 %v8156_v27, %v7890_v29 }
 0x493   : > { %v8705_v9 = vadd.f32 %v16653_v47, %v8344_v57  ;;  %v8343_v7 = vld [vmem:[#allocation3 + $0x60] sm:$0xff]  ;;  %8284 = vst.msk [vmem:[#allocation3 + $0x88] sm:$0xff] %vm425_vm0, %v8252_v50 }
 0x494   : > { %v8704_v60 = vadd.f32 %v8593_v25, %v8343_v7  ;;  %8283 = vst.msk [vmem:[#allocation3 + $0x80] sm:$0xff] %vm425_vm0, %v8251_v21  ;;  %v16598_v28 = vpop.f32.mrb[18].mxu0 }
 0x495   : > { %v16662_v17 = vpop.f32.mrb[18].mxu1  ;;  %8737 = vst.msk [vmem:[#allocation3 + $0x68] sm:$0xff] %vm425_vm0, %v8705_v9  ;;  %v8254_v5 = vadd.f32 %v16598_v28, %v7893_v53  ;;  %v8166_v15 = vpop.f32.mrb[19].mxu0  ;;  %v7903_v9 = vld [vmem:[#allocation3 + $0xe8] sm:$0xff]  ;;  %v7902_v28 = vld [vmem:[#allocation3 + $0xe0] sm:$0xff] }
 0x496   : > { %v8623_v20 = vpop.f32.mrb[19].mxu1  ;;  %8736 = vst.msk [vmem:[#allocation3 + $0x60] sm:$0xff] %vm425_vm0, %v8704_v60  ;;  %v8346_v41 = vld [vmem:[#allocation3 + $0x78] sm:$0xff]  ;;  %v8253_v44 = vadd.f32 %v8166_v15, %v7892_v36 }
 0x497   : > { %v8707_v33 = vadd.f32 %v16656_v42, %v8346_v41  ;;  %v8345_v19 = vld [vmem:[#allocation3 + $0x70] sm:$0xff]  ;;  %8286 = vst.msk [vmem:[#allocation3 + $0x98] sm:$0xff] %vm425_vm0, %v8254_v5 }
 0x498   : > { %v8706_v14 = vadd.f32 %v8603_v24, %v8345_v19  ;;  %8285 = vst.msk [vmem:[#allocation3 + $0x90] sm:$0xff] %vm425_vm0, %v8253_v44  ;;  %v16601_v2 = vpop.f32.mrb[20].mxu0 }
 0x499   : > { %v16665_v32 = vpop.f32.mrb[20].mxu1  ;;  %8739 = vst.msk [vmem:[#allocation3 + $0x78] sm:$0xff] %vm425_vm0, %v8707_v33  ;;  %v8256_v26 = vadd.f32 %v16601_v2, %v7895_v18  ;;  %v8176_v1 = vpop.f32.mrb[21].mxu0  ;;  %v7905_v33 = vld [vmem:[#allocation3 + $0xf8] sm:$0xff]  ;;  %v7904_v2 = vld [vmem:[#allocation3 + $0xf0] sm:$0xff] }
 0x49a   : > { %v8633_v35 = vpop.f32.mrb[21].mxu1  ;;  %8738 = vst.msk [vmem:[#allocation3 + $0x70] sm:$0xff] %vm425_vm0, %v8706_v14  ;;  %v8348_v58 = vld [vmem:[#allocation3 + $0x88] sm:$0xff]  ;;  %v8255_v23 = vadd.f32 %v8176_v1, %v7894_v3 }
 0x49b   : > { %v8709_v46 = vadd.f32 %v16659_v8, %v8348_v58  ;;  %v8347_v61 = vld [vmem:[#allocation3 + $0x80] sm:$0xff]  ;;  %8288 = vst.msk [vmem:[#allocation3 + $0xa8] sm:$0xff] %vm425_vm0, %v8256_v26 }
 0x49c   : > { %v8708_v56 = vadd.f32 %v8613_v34, %v8347_v61  ;;  %8287 = vst.msk [vmem:[#allocation3 + $0xa0] sm:$0xff] %vm425_vm0, %v8255_v23  ;;  %v16604_v6 = vpop.f32.mrb[22].mxu0 }
 0x49d   : > { %v16668_v10 = vpop.f32.mrb[22].mxu1  ;;  %8741 = vst.msk [vmem:[#allocation3 + $0x88] sm:$0xff] %vm425_vm0, %v8709_v46  ;;  %v8258_v0 = vadd.f32 %v16604_v6, %v7897_v52  ;;  %v8186_v47 = vpop.f32.mrb[23].mxu0  ;;  %v8789_v46 = vld [vmem:[#allocation3 + $0x8] sm:$0xff]  ;;  %v8788_v52 = vld [vmem:[#allocation3] sm:$0xff] }
 0x49e   : > { %v8643_v37 = vpop.f32.mrb[23].mxu1  ;;  %8740 = vst.msk [vmem:[#allocation3 + $0x80] sm:$0xff] %vm425_vm0, %v8708_v56  ;;  %v8350_v62 = vld [vmem:[#allocation3 + $0x98] sm:$0xff]  ;;  %v8257_v13 = vadd.f32 %v8186_v47, %v7896_v48 }
 0x49f   : > { %v8711_v25 = vadd.f32 %v16662_v17, %v8350_v62  ;;  %v8349_v49 = vld [vmem:[#allocation3 + $0x90] sm:$0xff]  ;;  %8290 = vst.msk [vmem:[#allocation3 + $0xb8] sm:$0xff] %vm425_vm0, %v8258_v0  ;;  %v8791_v62 = vld [vmem:[#allocation3 + $0x18] sm:$0xff] }
 0x4a0   : > { %v8710_v38 = vadd.f32 %v8623_v20, %v8349_v49  ;;  %8289 = vst.msk [vmem:[#allocation3 + $0xb0] sm:$0xff] %vm425_vm0, %v8257_v13  ;;  %v16607_v40 = vpop.f32.mrb[24].mxu0  ;;  %v11679_v49 = vld [vmem:[%s21685_s7 + $0xa8] sm:$0xff] }
 0x4a1   : > { %v16671_v4 = vpop.f32.mrb[24].mxu1  ;;  %8743 = vst.msk [vmem:[#allocation3 + $0x98] sm:$0xff] %vm425_vm0, %v8711_v25  ;;  %v8260_v54 = vadd.f32 %v16607_v40, %v7899_v55  ;;  %v8196_v42 = vpop.f32.mrb[25].mxu0  ;;  %v11678_v25 = vld [vmem:[%s21685_s7 + $0xa0] sm:$0xff] }
 0x4a2   : > { %v8653_v39 = vpop.f32.mrb[25].mxu1  ;;  %8742 = vst.msk [vmem:[#allocation3 + $0x90] sm:$0xff] %vm425_vm0, %v8710_v38  ;;  %v8352_v16 = vld [vmem:[#allocation3 + $0xa8] sm:$0xff]  ;;  %v8259_v43 = vadd.f32 %v8196_v42, %v7898_v63  ;;  %v8790_v55 = vld [vmem:[#allocation3 + $0x10] sm:$0xff] }
 0x4a3   : > { %v8713_v24 = vadd.f32 %v16665_v32, %v8352_v16  ;;  %v8351_v45 = vld [vmem:[#allocation3 + $0xa0] sm:$0xff]  ;;  %8292 = vst.msk [vmem:[#allocation3 + $0xc8] sm:$0xff] %vm425_vm0, %v8260_v54 }
 0x4a4   : > { %v8712_v12 = vadd.f32 %v8633_v35, %v8351_v45  ;;  %8291 = vst.msk [vmem:[#allocation3 + $0xc0] sm:$0xff] %vm425_vm0, %v8259_v43  ;;  %v16610_v59 = vpop.f32.mrb[26].mxu0  ;;  %v8793_v43 = vld [vmem:[#allocation3 + $0x28] sm:$0xff] }
 0x4a5   : > { %v16674_v11 = vpop.f32.mrb[26].mxu1  ;;  %8745 = vst.msk [vmem:[#allocation3 + $0xa8] sm:$0xff] %vm425_vm0, %v8713_v24  ;;  %v8262_v22 = vadd.f32 %v16610_v59, %v7901_v51  ;;  %v8206_v8 = vpop.f32.mrb[27].mxu0 }
 0x4a6   : > { %v8663_v50 = vpop.f32.mrb[27].mxu1  ;;  %8744 = vst.msk [vmem:[#allocation3 + $0xa0] sm:$0xff] %vm425_vm0, %v8712_v12  ;;  %v8354_v29 = vld [vmem:[#allocation3 + $0xb8] sm:$0xff]  ;;  %v8261_v27 = vadd.f32 %v8206_v8, %v7900_v30  ;;  %v8792_v12 = vld [vmem:[#allocation3 + $0x20] sm:$0xff] }
 0x4a7   : > { %v8715_v34 = vadd.f32 %v16668_v10, %v8354_v29  ;;  %v8353_v57 = vld [vmem:[#allocation3 + $0xb0] sm:$0xff]  ;;  %8294 = vst.msk [vmem:[#allocation3 + $0xd8] sm:$0xff] %vm425_vm0, %v8262_v22 }
 0x4a8   : > { %v8714_v21 = vadd.f32 %v8643_v37, %v8353_v57  ;;  %8293 = vst.msk [vmem:[#allocation3 + $0xd0] sm:$0xff] %vm425_vm0, %v8261_v27  ;;  %v16613_v7 = vpop.f32.mrb[28].mxu0 }
 0x4a9   : > { %v16677_v60 = vpop.f32.mrb[28].mxu1  ;;  %8747 = vst.msk [vmem:[#allocation3 + $0xb8] sm:$0xff] %vm425_vm0, %v8715_v34  ;;  %v8264_v53 = vadd.f32 %v16613_v7, %v7903_v9  ;;  %v8216_v17 = vpop.f32.mrb[29].mxu0  ;;  %v8794_v34 = vld [vmem:[#allocation3 + $0x30] sm:$0xff] }
 0x4aa   : > { %v8673_v5 = vpop.f32.mrb[29].mxu1  ;;  %8746 = vst.msk [vmem:[#allocation3 + $0xb0] sm:$0xff] %vm425_vm0, %v8714_v21  ;;  %v8356_v36 = vld [vmem:[#allocation3 + $0xc8] sm:$0xff]  ;;  %v8263_v15 = vadd.f32 %v8216_v17, %v7902_v28 }
 0x4ab   : > { %v8717_v20 = vadd.f32 %v16671_v4, %v8356_v36  ;;  %v8355_v41 = vld [vmem:[#allocation3 + $0xc0] sm:$0xff]  ;;  %8296 = vst.msk [vmem:[#allocation3 + $0xe8] sm:$0xff] %vm425_vm0, %v8264_v53  ;;  %v20455_v4 = vpack.c.bf16 %v11679_v49, %v11678_v25  ;;  %v8797_v28 = vld [vmem:[#allocation3 + $0x48] sm:$0xff] }
 0x4ac   : > { %v8716_v44 = vadd.f32 %v8653_v39, %v8355_v41  ;;  %8295 = vst.msk [vmem:[#allocation3 + $0xe0] sm:$0xff] %vm425_vm0, %v8263_v15  ;;  %v16616_v19 = vpop.f32.mrb[30].mxu0  ;;  %v8796_v36 = vld [vmem:[#allocation3 + $0x40] sm:$0xff] }
 0x4ad   : > { %v16680_v14 = vpop.f32.mrb[30].mxu1  ;;  %8749 = vst.msk [vmem:[#allocation3 + $0xc8] sm:$0xff] %vm425_vm0, %v8717_v20  ;;  %v8266_v18 = vadd.f32 %v16616_v19, %v7905_v33  ;;  %v8226_v32 = vpop.f32.mrb[31].mxu0  ;;  %17586 = vmatprep.subr.bf16.mxu0 %v20455_v4 }
 0x4ae   : > { %v8683_v26 = vpop.f32.mrb[31].mxu1  ;;  %8748 = vst.msk [vmem:[#allocation3 + $0xc0] sm:$0xff] %vm425_vm0, %v8716_v44  ;;  %v8358_v3 = vld [vmem:[#allocation3 + $0xd8] sm:$0xff]  ;;  %v8265_v1 = vadd.f32 %v8226_v32, %v7904_v2  ;;  %v8798_v2 = vld [vmem:[#allocation3 + $0x50] sm:$0xff] }
 0x4af   : > { %v8719_v35 = vadd.f32 %v16674_v11, %v8358_v3  ;;  %v8357_v58 = vld [vmem:[#allocation3 + $0xd0] sm:$0xff]  ;;  %8298 = vst.msk [vmem:[#allocation3 + $0xf8] sm:$0xff] %vm425_vm0, %v8266_v18 }
 0x4b0   : > { %v8718_v23 = vadd.f32 %v8663_v50, %v8357_v58  ;;  %8297 = vst.msk [vmem:[#allocation3 + $0xf0] sm:$0xff] %vm425_vm0, %v8265_v1  ;;  %v16699_v61 = vpop.f32.mrb[32].mxu0  ;;  %v8795_v50 = vld [vmem:[#allocation3 + $0x38] sm:$0xff] }
 0x4b1   : > { %8751 = vst.msk [vmem:[#allocation3 + $0xd8] sm:$0xff] %vm425_vm0, %v8719_v35  ;;  %v9150_v56 = vadd.f32 %v16699_v61, %v8789_v46  ;;  %v8990_v6 = vpop.f32.mrb[33].mxu0 }
 0x4b2   : > { %8750 = vst.msk [vmem:[#allocation3 + $0xd0] sm:$0xff] %vm425_vm0, %v8718_v23  ;;  %v8360_v10 = vld [vmem:[#allocation3 + $0xe8] sm:$0xff]  ;;  %v9149_v0 = vadd.f32 %v8990_v6, %v8788_v52 }
 0x4b3   : > { %v8721_v48 = vadd.f32 %v16677_v60, %v8360_v10  ;;  %v8359_v47 = vld [vmem:[#allocation3 + $0xe0] sm:$0xff]  ;;  %9182 = vst.msk [vmem:[#allocation3 + $0x8] sm:$0xff] %vm425_vm0, %v9150_v56  ;;  %v8801_v6 = vld [vmem:[#allocation3 + $0x68] sm:$0xff] }
 0x4b4   : > { %v8720_v37 = vadd.f32 %v8673_v5, %v8359_v47  ;;  %9181 = vst.msk [vmem:[#allocation3] sm:$0xff] %vm425_vm0, %v9149_v0  ;;  %v16702_v13 = vpop.f32.mrb[34].mxu0  ;;  %v8800_v0 = vld [vmem:[#allocation3 + $0x60] sm:$0xff] }
 0x4b5   : > { %8753 = vst.msk [vmem:[#allocation3 + $0xe8] sm:$0xff] %vm425_vm0, %v8721_v48  ;;  %v9152_v38 = vadd.f32 %v16702_v13, %v8791_v62  ;;  %v9000_v40 = vpop.f32.mrb[35].mxu0 }
 0x4b6   : > { %8752 = vst.msk [vmem:[#allocation3 + $0xe0] sm:$0xff] %vm425_vm0, %v8720_v37  ;;  %v9151_v54 = vadd.f32 %v9000_v40, %v8790_v55  ;;  %v8362_v63 = vld [vmem:[#allocation3 + $0xf8] sm:$0xff] }
 0x4b7   : > { %9184 = vst.msk [vmem:[#allocation3 + $0x18] sm:$0xff] %vm425_vm0, %v9152_v38  ;;  %v8723_v42 = vadd.f32 %v16680_v14, %v8362_v63  ;;  %v8361_v39 = vld [vmem:[#allocation3 + $0xf0] sm:$0xff]  ;;  %v8799_v14 = vld [vmem:[#allocation3 + $0x58] sm:$0xff] }
 0x4b8   : > { %9183 = vst.msk [vmem:[#allocation3 + $0x10] sm:$0xff] %vm425_vm0, %v9151_v54  ;;  %v8722_v16 = vadd.f32 %v8683_v26, %v8361_v39  ;;  %v16705_v24 = vpop.f32.mrb[36].mxu0  ;;  %v8803_v63 = vld [vmem:[#allocation3 + $0x78] sm:$0xff]  ;;  %v8802_v39 = vld [vmem:[#allocation3 + $0x70] sm:$0xff] }
 0x4b9   : > { %8755 = vst.msk [vmem:[#allocation3 + $0xf8] sm:$0xff] %vm425_vm0, %v8723_v42  ;;  %v9154_v45 = vadd.f32 %v16705_v24, %v8793_v43  ;;  %v9010_v51 = vpop.f32.mrb[37].mxu0 }
 0x4ba   : > { %v9214_v59 = vld [vmem:[#allocation3 + $0x8] sm:$0xff]  ;;  %8754 = vst.msk [vmem:[#allocation3 + $0xf0] sm:$0xff] %vm425_vm0, %v8722_v16  ;;  %v9153_v11 = vadd.f32 %v9010_v51, %v8792_v12 }
 0x4bb   : > { %v9246_v22 = vmax.f32 %v9214_v59, 0.0  ;;  %v9213_v30 = vld [vmem:[#allocation3] sm:$0xff]  ;;  %9186 = vst.msk [vmem:[#allocation3 + $0x28] sm:$0xff] %vm425_vm0, %v9154_v45 }
 0x4bc   : > { %v9245_v8 = vmax.f32 %v9213_v30, 0.0  ;;  %9185 = vst.msk [vmem:[#allocation3 + $0x20] sm:$0xff] %vm425_vm0, %v9153_v11  ;;  %v16708_v29 = vpop.f32.mrb[38].mxu0 }
 0x4bd   : > { %9278 = vst.msk [vmem:[#allocation2 + $0x21] sm:$0xff] %vm425_vm0, %v9246_v22  ;;  %v9156_v27 = vadd.f32 %v16708_v29, %v8795_v50  ;;  %v9020_v57 = vpop.f32.mrb[39].mxu0  ;;  %v8805_v50 = vld [vmem:[#allocation3 + $0x88] sm:$0xff] }
 0x4be   : > { %9277 = vst.msk [vmem:[#allocation2 + $0x19] sm:$0xff] %vm425_vm0, %v9245_v8  ;;  %v9216_v21 = vld [vmem:[#allocation3 + $0x18] sm:$0xff]  ;;  %v9155_v9 = vadd.f32 %v9020_v57, %v8794_v34 }
 0x4bf   : > { %v9248_v7 = vmax.f32 %v9216_v21, 0.0  ;;  %v9215_v60 = vld [vmem:[#allocation3 + $0x10] sm:$0xff]  ;;  %9188 = vst.msk [vmem:[#allocation3 + $0x38] sm:$0xff] %vm425_vm0, %v9156_v27  ;;  %v8804_v27 = vld [vmem:[#allocation3 + $0x80] sm:$0xff] }
 0x4c0   : > { %v9247_v53 = vmax.f32 %v9215_v60, 0.0  ;;  %9187 = vst.msk [vmem:[#allocation3 + $0x30] sm:$0xff] %vm425_vm0, %v9155_v9  ;;  %v16711_v17 = vpop.f32.mrb[40].mxu0 }
 0x4c1   : > { %9280 = vst.msk [vmem:[#allocation2 + $0x39] sm:$0xff] %vm425_vm0, %v9248_v7  ;;  %v9158_v5 = vadd.f32 %v16711_v17, %v8797_v28  ;;  %v9030_v15 = vpop.f32.mrb[41].mxu0 }
 0x4c2   : > { %9279 = vst.msk [vmem:[#allocation2 + $0x31] sm:$0xff] %vm425_vm0, %v9247_v53  ;;  %v9218_v20 = vld [vmem:[#allocation3 + $0x28] sm:$0xff]  ;;  %v9157_v41 = vadd.f32 %v9030_v15, %v8796_v36  ;;  %v8807_v15 = vld [vmem:[#allocation3 + $0x98] sm:$0xff] }
 0x4c3   : > { %v9250_v44 = vmax.f32 %v9218_v20, 0.0  ;;  %v9217_v33 = vld [vmem:[#allocation3 + $0x20] sm:$0xff]  ;;  %9190 = vst.msk [vmem:[#allocation3 + $0x48] sm:$0xff] %vm425_vm0, %v9158_v5 }
 0x4c4   : > { %v9249_v19 = vmax.f32 %v9217_v33, 0.0  ;;  %9189 = vst.msk [vmem:[#allocation3 + $0x40] sm:$0xff] %vm425_vm0, %v9157_v41  ;;  %v16714_v18 = vpop.f32.mrb[42].mxu0  ;;  %v20485_v46 = vld [vmem:[#allocation2 + $0x21] sm:$0xff] }
 0x4c5   : > { %9282 = vst.msk [vmem:[#allocation2 + $0x51] sm:$0xff] %vm425_vm0, %v9250_v44  ;;  %v9160_v32 = vadd.f32 %v16714_v18, %v8799_v14  ;;  %v9040_v26 = vpop.f32.mrb[43].mxu0  ;;  %v20474_v3 = vld [vmem:[#allocation2 + $0x18] sm:$0xff]  ;;  %v20478_v35 = vld [vmem:[#allocation2 + $0x20] sm:$0xff] }
 0x4c6   : > { %v20476_v1 = vld [vmem:[#allocation2 + $0x19] sm:$0xff]  ;;  %9281 = vst.msk [vmem:[#allocation2 + $0x49] sm:$0xff] %vm425_vm0, %v9249_v19  ;;  %v9220_v58 = vld [vmem:[#allocation3 + $0x38] sm:$0xff]  ;;  %v9159_v23 = vadd.f32 %v9040_v26, %v8798_v2  ;;  %16756 = vmatprep.mubr.msk.f32.mxu1 %vm425_vm0, %v20474_v3 }
 0x4c7   : > { %16812 = vmatprep.mubr.msk.f32.mxu0 %vm425_vm0, %v20476_v1  ;;  %v9252_v61 = vmax.f32 %v9220_v58, 0.0  ;;  %v9219_v56 = vld [vmem:[#allocation3 + $0x30] sm:$0xff]  ;;  %9192 = vst.msk [vmem:[#allocation3 + $0x58] sm:$0xff] %vm425_vm0, %v9160_v32  ;;  %16757 = vmatmul.mubr.msk.f32.gmra.mrb[34].mxu1 %vm425_vm0, %v20478_v35 }
 0x4c8   : > { %16813 = vmatmul.mubr.msk.f32.gmra.mrb[66].mxu0 %vm425_vm0, %v20485_v46  ;;  %v9251_v52 = vmax.f32 %v9219_v56, 0.0  ;;  %9191 = vst.msk [vmem:[#allocation3 + $0x50] sm:$0xff] %vm425_vm0, %v9159_v23  ;;  %v16717_v10 = vpop.f32.mrb[44].mxu0  ;;  %v20505_v38 = vld [vmem:[#allocation2 + $0x39] sm:$0xff] }
 0x4c9   : > { %9284 = vst.msk [vmem:[#allocation2 + $0x69] sm:$0xff] %vm425_vm0, %v9252_v61  ;;  %v9162_v48 = vadd.f32 %v16717_v10, %v8801_v6  ;;  %v9050_v47 = vpop.f32.mrb[45].mxu0  ;;  %v20494_v37 = vld [vmem:[#allocation2 + $0x30] sm:$0xff]  ;;  %v20498_v13 = vld [vmem:[#allocation2 + $0x38] sm:$0xff]  ;;  %v8806_v41 = vld [vmem:[#allocation3 + $0x90] sm:$0xff] }
 0x4ca   : > { %v20496_v62 = vld [vmem:[#allocation2 + $0x31] sm:$0xff]  ;;  %9283 = vst.msk [vmem:[#allocation2 + $0x61] sm:$0xff] %vm425_vm0, %v9251_v52  ;;  %v9161_v49 = vadd.f32 %v9050_v47, %v8800_v0  ;;  %16759 = vmatprep.mubr.msk.f32.mxu1 %vm425_vm0, %v20494_v37 }
 0x4cb   : > { %v9222_v25 = vld [vmem:[#allocation3 + $0x48] sm:$0xff]  ;;  %16815 = vmatprep.mubr.msk.f32.mxu0 %vm425_vm0, %v20496_v62  ;;  %v9221_v40 = vld [vmem:[#allocation3 + $0x40] sm:$0xff]  ;;  %9194 = vst.msk [vmem:[#allocation3 + $0x68] sm:$0xff] %vm425_vm0, %v9162_v48  ;;  %16760 = vmatmul.mubr.msk.f32.gmra.mrb[36].mxu1 %vm425_vm0, %v20498_v13 }
 0x4cc   : > { %v9254_v55 = vmax.f32 %v9222_v25, 0.0  ;;  %16816 = vmatmul.mubr.msk.f32.gmra.mrb[68].mxu0 %vm425_vm0, %v20505_v38  ;;  %v9253_v54 = vmax.f32 %v9221_v40, 0.0  ;;  %9193 = vst.msk [vmem:[#allocation3 + $0x60] sm:$0xff] %vm425_vm0, %v9161_v49  ;;  %v16720_v42 = vpop.f32.mrb[46].mxu0  ;;  %v20525_v11 = vld [vmem:[#allocation2 + $0x51] sm:$0xff] }
 0x4cd   : > { %v9164_v16 = vadd.f32 %v16720_v42, %v8803_v63  ;;  %v9060_v43 = vpop.f32.mrb[47].mxu0  ;;  %v20514_v24 = vld [vmem:[#allocation2 + $0x48] sm:$0xff]  ;;  %v20518_v12 = vld [vmem:[#allocation2 + $0x50] sm:$0xff]  ;;  %v8809_v56 = vld [vmem:[#allocation3 + $0xa8] sm:$0xff] }
 0x4ce   : > { %9286 = vst.msk [vmem:[#allocation2 + $0x81] sm:$0xff] %vm425_vm0, %v9254_v55  ;;  %v20516_v45 = vld [vmem:[#allocation2 + $0x49] sm:$0xff]  ;;  %9285 = vst.msk [vmem:[#allocation2 + $0x79] sm:$0xff] %vm425_vm0, %v9253_v54  ;;  %v9163_v59 = vadd.f32 %v9060_v43, %v8802_v39  ;;  %16762 = vmatprep.mubr.msk.f32.mxu1 %vm425_vm0, %v20514_v24  ;;  %v8810_v43 = vld [vmem:[#allocation3 + $0xb0] sm:$0xff] }
 0x4cf   : > { %v9224_v51 = vld [vmem:[#allocation3 + $0x58] sm:$0xff]  ;;  %16818 = vmatprep.mubr.msk.f32.mxu0 %vm425_vm0, %v20516_v45  ;;  %v9223_v30 = vld [vmem:[#allocation3 + $0x50] sm:$0xff]  ;;  %9196 = vst.msk [vmem:[#allocation3 + $0x78] sm:$0xff] %vm425_vm0, %v9164_v16  ;;  %16763 = vmatmul.mubr.msk.f32.gmra.mrb[38].mxu1 %vm425_vm0, %v20518_v12  ;;  %v8808_v6 = vld [vmem:[#allocation3 + $0xa0] sm:$0xff] }
 0x4d0   : > { %v9256_v22 = vmax.f32 %v9224_v51, 0.0  ;;  %16819 = vmatmul.mubr.msk.f32.gmra.mrb[70].mxu0 %vm425_vm0, %v20525_v11  ;;  %v9255_v8 = vmax.f32 %v9223_v30, 0.0  ;;  %9195 = vst.msk [vmem:[#allocation3 + $0x70] sm:$0xff] %vm425_vm0, %v9163_v59  ;;  %v16723_v29 = vpop.f32.mrb[48].mxu0  ;;  %v20545_v28 = vld [vmem:[#allocation2 + $0x69] sm:$0xff] }
 0x4d1   : > { %v9166_v34 = vadd.f32 %v16723_v29, %v8805_v50  ;;  %v9070_v57 = vpop.f32.mrb[49].mxu0  ;;  %v20534_v21 = vld [vmem:[#allocation2 + $0x60] sm:$0xff]  ;;  %v20538_v7 = vld [vmem:[#allocation2 + $0x68] sm:$0xff] }
 0x4d2   : > { %9288 = vst.msk [vmem:[#allocation2 + $0x99] sm:$0xff] %vm425_vm0, %v9256_v22  ;;  %v20536_v9 = vld [vmem:[#allocation2 + $0x61] sm:$0xff]  ;;  %9287 = vst.msk [vmem:[#allocation2 + $0x91] sm:$0xff] %vm425_vm0, %v9255_v8  ;;  %v9226_v60 = vld [vmem:[#allocation3 + $0x68] sm:$0xff]  ;;  %v9165_v53 = vadd.f32 %v9070_v57, %v8804_v27  ;;  %16765 = vmatprep.mubr.msk.f32.mxu1 %vm425_vm0, %v20534_v21 }
 0x4d3   : > { %16821 = vmatprep.mubr.msk.f32.mxu0 %vm425_vm0, %v20536_v9  ;;  %v9258_v17 = vmax.f32 %v9226_v60, 0.0  ;;  %v9225_v5 = vld [vmem:[#allocation3 + $0x60] sm:$0xff]  ;;  %9198 = vst.msk [vmem:[#allocation3 + $0x88] sm:$0xff] %vm425_vm0, %v9166_v34  ;;  %16766 = vmatmul.mubr.msk.f32.gmra.mrb[40].mxu1 %vm425_vm0, %v20538_v7  ;;  %v8811_v39 = vld [vmem:[#allocation3 + $0xb8] sm:$0xff] }
 0x4d4   : > { %16822 = vmatmul.mubr.msk.f32.gmra.mrb[72].mxu0 %vm425_vm0, %v20545_v28  ;;  %v9257_v36 = vmax.f32 %v9225_v5, 0.0  ;;  %9197 = vst.msk [vmem:[#allocation3 + $0x80] sm:$0xff] %vm425_vm0, %v9165_v53  ;;  %v16726_v20 = vpop.f32.mrb[50].mxu0  ;;  %v8813_v53 = vld [vmem:[#allocation3 + $0xc8] sm:$0xff]  ;;  %v8812_v5 = vld [vmem:[#allocation3 + $0xc0] sm:$0xff] }
 0x4d5   : > { %9290 = vst.msk [vmem:[#allocation2 + $0xb1] sm:$0xff] %vm425_vm0, %v9258_v17  ;;  %v9168_v44 = vadd.f32 %v16726_v20, %v8807_v15  ;;  %v9080_v33 = vpop.f32.mrb[51].mxu0  ;;  %v20554_v19 = vld [vmem:[#allocation2 + $0x78] sm:$0xff]  ;;  %v20558_v18 = vld [vmem:[#allocation2 + $0x80] sm:$0xff] }
 0x4d6   : > { %21742 = vst [vmem:[#allocation4_spill] sm:$0xff] %v20554_v19  ;;  %v20556_v14 = vld [vmem:[#allocation2 + $0x79] sm:$0xff]  ;;  %21743 = vst [vmem:[#allocation5_spill] sm:$0xff] %v20558_v18  ;;  %v9228_v2 = vld [vmem:[#allocation3 + $0x78] sm:$0xff]  ;;  %v9167_v32 = vadd.f32 %v9080_v33, %v8806_v41  ;;  %16768 = vmatprep.mubr.msk.f32.mxu1 %vm425_vm0, %v20554_v19 }
 0x4d7   : > { %9289 = vst.msk [vmem:[#allocation2 + $0xa9] sm:$0xff] %vm425_vm0, %v9257_v36  ;;  %16824 = vmatprep.mubr.msk.f32.mxu0 %vm425_vm0, %v20556_v14  ;;  %v20565_v26 = vld [vmem:[#allocation2 + $0x81] sm:$0xff]  ;;  %v9260_v58 = vmax.f32 %v9228_v2, 0.0  ;;  %9200 = vst.msk [vmem:[#allocation3 + $0x98] sm:$0xff] %vm425_vm0, %v9168_v44  ;;  %16769 = vmatmul.mubr.msk.f32.gmra.mrb[42].mxu1 %vm425_vm0, %v20558_v18 }
 0x4d8   : > { %v9227_v23 = vld [vmem:[#allocation3 + $0x70] sm:$0xff]  ;;  %16825 = vmatmul.mubr.msk.f32.gmra.mrb[74].mxu0 %vm425_vm0, %v20565_v26  ;;  %9199 = vst.msk [vmem:[#allocation3 + $0x90] sm:$0xff] %vm425_vm0, %v9167_v32  ;;  %v16729_v52 = vpop.f32.mrb[52].mxu0 }
 0x4d9   : > { %v9259_v61 = vmax.f32 %v9227_v23, 0.0  ;;  %9292 = vst.msk [vmem:[#allocation2 + $0xc9] sm:$0xff] %vm425_vm0, %v9260_v58  ;;  %v9170_v10 = vadd.f32 %v16729_v52, %v8809_v56  ;;  %v9090_v0 = vpop.f32.mrb[53].mxu0  ;;  %v20574_v48 = vld [vmem:[#allocation2 + $0x90] sm:$0xff]  ;;  %v20578_v25 = vld [vmem:[#allocation2 + $0x98] sm:$0xff]  ;;  %v8815_v56 = vld [vmem:[#allocation3 + $0xd8] sm:$0xff] }
 0x4da   : > { %21744 = vst [vmem:[#allocation6_spill] sm:$0xff] %v20574_v48  ;;  %v20576_v47 = vld [vmem:[#allocation2 + $0x91] sm:$0xff]  ;;  %21745 = vst [vmem:[#allocation7_spill] sm:$0xff] %v20578_v25  ;;  %v9169_v55 = vadd.f32 %v9090_v0, %v8808_v6  ;;  %16771 = vmatprep.mubr.msk.f32.mxu1 %vm425_vm0, %v20574_v48  ;;  %v20585_v40 = vld [vmem:[#allocation2 + $0x99] sm:$0xff] }
 0x4db   : > { %9291 = vst.msk [vmem:[#allocation2 + $0xc1] sm:$0xff] %vm425_vm0, %v9259_v61  ;;  %v9230_v49 = vld [vmem:[#allocation3 + $0x88] sm:$0xff]  ;;  %16827 = vmatprep.mubr.msk.f32.mxu0 %vm425_vm0, %v20576_v47  ;;  %v9229_v63 = vld [vmem:[#allocation3 + $0x80] sm:$0xff]  ;;  %9202 = vst.msk [vmem:[#allocation3 + $0xa8] sm:$0xff] %vm425_vm0, %v9170_v10  ;;  %16772 = vmatmul.mubr.msk.f32.gmra.mrb[44].mxu1 %vm425_vm0, %v20578_v25 }
 0x4dc   : > { %v9262_v54 = vmax.f32 %v9230_v49, 0.0  ;;  %16828 = vmatmul.mubr.msk.f32.gmra.mrb[76].mxu0 %vm425_vm0, %v20585_v40  ;;  %v9261_v42 = vmax.f32 %v9229_v63, 0.0  ;;  %9201 = vst.msk [vmem:[#allocation3 + $0xa0] sm:$0xff] %vm425_vm0, %v9169_v55  ;;  %v16732_v16 = vpop.f32.mrb[54].mxu0  ;;  %v20605_v27 = vld [vmem:[#allocation2 + $0xb1] sm:$0xff]  ;;  %v8814_v6 = vld [vmem:[#allocation3 + $0xd0] sm:$0xff] }
 0x4dd   : > { %v9172_v51 = vadd.f32 %v16732_v16, %v8811_v39  ;;  %v9100_v59 = vpop.f32.mrb[55].mxu0 }
 0x4de   : > { %9294 = vst.msk [vmem:[#allocation2 + $0xe1] sm:$0xff] %vm425_vm0, %v9262_v54  ;;  %v20594_v22 = vld [vmem:[#allocation2 + $0xa8] sm:$0xff]  ;;  %v20598_v8 = vld [vmem:[#allocation2 + $0xb0] sm:$0xff]  ;;  %9293 = vst.msk [vmem:[#allocation2 + $0xd9] sm:$0xff] %vm425_vm0, %v9261_v42  ;;  %v9171_v29 = vadd.f32 %v9100_v59, %v8810_v43 }
 0x4df   : > { %21746 = vst [vmem:[#allocation8_spill] sm:$0xff] %v20594_v22  ;;  %v20596_v30 = vld [vmem:[#allocation2 + $0xa9] sm:$0xff]  ;;  %16774 = vmatprep.mubr.msk.f32.mxu1 %vm425_vm0, %v20594_v22  ;;  %v9231_v57 = vld [vmem:[#allocation3 + $0x90] sm:$0xff]  ;;  %9204 = vst.msk [vmem:[#allocation3 + $0xb8] sm:$0xff] %vm425_vm0, %v9172_v51 }
 0x4e0   : > { %v9232_v50 = vld [vmem:[#allocation3 + $0x98] sm:$0xff]  ;;  %16830 = vmatprep.mubr.msk.f32.mxu0 %vm425_vm0, %v20596_v30  ;;  %16775 = vmatmul.mubr.msk.f32.gmra.mrb[46].mxu1 %vm425_vm0, %v20598_v8  ;;  %v9263_v60 = vmax.f32 %v9231_v57, 0.0  ;;  %9203 = vst.msk [vmem:[#allocation3 + $0xb0] sm:$0xff] %vm425_vm0, %v9171_v29  ;;  %v16735_v17 = vpop.f32.mrb[56].mxu0  ;;  %v8817_v59 = vld [vmem:[#allocation3 + $0xe8] sm:$0xff]  ;;  %v8816_v29 = vld [vmem:[#allocation3 + $0xe0] sm:$0xff] }
 0x4e1   : > { %v9264_v34 = vmax.f32 %v9232_v50, 0.0  ;;  %16831 = vmatmul.mubr.msk.f32.gmra.mrb[78].mxu0 %vm425_vm0, %v20605_v27  ;;  %v9174_v36 = vadd.f32 %v16735_v17, %v8813_v53  ;;  %v9110_v15 = vpop.f32.mrb[57].mxu0  ;;  %v20625_v32 = vld [vmem:[#allocation2 + $0xc9] sm:$0xff] }
 0x4e2   : > { %v20614_v20 = vld [vmem:[#allocation2 + $0xc0] sm:$0xff]  ;;  %v20618_v44 = vld [vmem:[#allocation2 + $0xc8] sm:$0xff]  ;;  %9295 = vst.msk [vmem:[#allocation2 + $0xf1] sm:$0xff] %vm425_vm0, %v9263_v60  ;;  %v9234_v33 = vld [vmem:[#allocation3 + $0xa8] sm:$0xff]  ;;  %v9173_v2 = vadd.f32 %v9110_v15, %v8812_v5 }
 0x4e3   : > { %9296 = vst.msk [vmem:[#allocation2 + $0xf9] sm:$0xff] %vm425_vm0, %v9264_v34  ;;  %v20616_v41 = vld [vmem:[#allocation2 + $0xc1] sm:$0xff]  ;;  %16777 = vmatprep.mubr.msk.f32.mxu1 %vm425_vm0, %v20614_v20  ;;  %v9266_v58 = vmax.f32 %v9234_v33, 0.0  ;;  %v9233_v23 = vld [vmem:[#allocation3 + $0xa0] sm:$0xff]  ;;  %9206 = vst.msk [vmem:[#allocation3 + $0xc8] sm:$0xff] %vm425_vm0, %v9174_v36 }
 0x4e4   : > { %16833 = vmatprep.mubr.msk.f32.mxu0 %vm425_vm0, %v20616_v41  ;;  %16778 = vmatmul.mubr.msk.f32.gmra.mrb[48].mxu1 %vm425_vm0, %v20618_v44  ;;  %v9265_v61 = vmax.f32 %v9233_v23, 0.0  ;;  %9205 = vst.msk [vmem:[#allocation3 + $0xc0] sm:$0xff] %vm425_vm0, %v9173_v2  ;;  %v16738_v52 = vpop.f32.mrb[58].mxu0  ;;  %v8819_v23 = vld [vmem:[#allocation3 + $0xf8] sm:$0xff] }
 0x4e5   : > { %16834 = vmatmul.mubr.msk.f32.gmra.mrb[80].mxu0 %vm425_vm0, %v20625_v32  ;;  %9298 = vst.msk [vmem:[#allocation2 + $0x111] sm:$0xff] %vm425_vm0, %v9266_v58  ;;  %v9176_v10 = vadd.f32 %v16738_v52, %v8815_v56  ;;  %v9120_v0 = vpop.f32.mrb[59].mxu0  ;;  %v20634_v49 = vld [vmem:[#allocation2 + $0xd8] sm:$0xff]  ;;  %v20638_v54 = vld [vmem:[#allocation2 + $0xe0] sm:$0xff] }
 0x4e6   : > { %v20636_v55 = vld [vmem:[#allocation2 + $0xd9] sm:$0xff]  ;;  %9297 = vst.msk [vmem:[#allocation2 + $0x109] sm:$0xff] %vm425_vm0, %v9265_v61  ;;  %v9236_v63 = vld [vmem:[#allocation3 + $0xb8] sm:$0xff]  ;;  %v9175_v42 = vadd.f32 %v9120_v0, %v8814_v6  ;;  %16780 = vmatprep.mubr.msk.f32.mxu1 %vm425_vm0, %v20634_v49 }
 0x4e7   : > { %16836 = vmatprep.mubr.msk.f32.mxu0 %vm425_vm0, %v20636_v55  ;;  %v20645_v39 = vld [vmem:[#allocation2 + $0xe1] sm:$0xff]  ;;  %v9268_v16 = vmax.f32 %v9236_v63, 0.0  ;;  %9208 = vst.msk [vmem:[#allocation3 + $0xd8] sm:$0xff] %vm425_vm0, %v9176_v10 }
 0x4e8   : > { %v9235_v43 = vld [vmem:[#allocation3 + $0xb0] sm:$0xff]  ;;  %16781 = vmatmul.mubr.msk.f32.gmra.mrb[50].mxu1 %vm425_vm0, %v20638_v54  ;;  %9207 = vst.msk [vmem:[#allocation3 + $0xd0] sm:$0xff] %vm425_vm0, %v9175_v42  ;;  %v16741_v50 = vpop.f32.mrb[60].mxu0 }
 0x4e9   : > { %16837 = vmatmul.mubr.msk.f32.gmra.mrb[82].mxu0 %vm425_vm0, %v20645_v39  ;;  %v9267_v51 = vmax.f32 %v9235_v43, 0.0  ;;  %9300 = vst.msk [vmem:[#allocation2 + $0x129] sm:$0xff] %vm425_vm0, %v9268_v16  ;;  %v9178_v34 = vadd.f32 %v16741_v50, %v8817_v59  ;;  %v9130_v57 = vpop.f32.mrb[61].mxu0  ;;  %v20654_v60 = vld [vmem:[#allocation2 + $0xf0] sm:$0xff]  ;;  %v8818_v56 = vld [vmem:[#allocation3 + $0xf0] sm:$0xff] }
 0x4ea   : > { %v20656_v53 = vld [vmem:[#allocation2 + $0xf1] sm:$0xff]  ;;  %v9177_v36 = vadd.f32 %v9130_v57, %v8816_v29  ;;  %16783 = vmatprep.mubr.msk.f32.mxu1 %vm425_vm0, %v20654_v60  ;;  %v20665_v15 = vld [vmem:[#allocation2 + $0xf9] sm:$0xff] }
 0x4eb   : > { %v20658_v17 = vld [vmem:[#allocation2 + $0xf8] sm:$0xff]  ;;  %9299 = vst.msk [vmem:[#allocation2 + $0x121] sm:$0xff] %vm425_vm0, %v9267_v51  ;;  %16839 = vmatprep.mubr.msk.f32.mxu0 %vm425_vm0, %v20656_v53  ;;  %v9237_v2 = vld [vmem:[#allocation3 + $0xc0] sm:$0xff]  ;;  %9210 = vst.msk [vmem:[#allocation3 + $0xe8] sm:$0xff] %vm425_vm0, %v9178_v34 }
 0x4ec   : > { %v9238_v5 = vld [vmem:[#allocation3 + $0xc8] sm:$0xff]  ;;  %16784 = vmatmul.mubr.msk.f32.gmra.mrb[52].mxu1 %vm425_vm0, %v20658_v17  ;;  %v9269_v58 = vmax.f32 %v9237_v2, 0.0  ;;  %9209 = vst.msk [vmem:[#allocation3 + $0xe0] sm:$0xff] %vm425_vm0, %v9177_v36  ;;  %v16744_v61 = vpop.f32.mrb[62].mxu0 }
 0x4ed   : > { %v9270_v33 = vmax.f32 %v9238_v5, 0.0  ;;  %16840 = vmatmul.mubr.msk.f32.gmra.mrb[84].mxu0 %vm425_vm0, %v20665_v15  ;;  %v9180_v52 = vadd.f32 %v16744_v61, %v8819_v23  ;;  %v9140_v6 = vpop.f32.mrb[63].mxu0  ;;  %v20674_v10 = vld [vmem:[#allocation2 + $0x108] sm:$0xff]  ;;  %v20678_v63 = vld [vmem:[#allocation2 + $0x110] sm:$0xff] }
 0x4ee   : > { %v20676_v0 = vld [vmem:[#allocation2 + $0x109] sm:$0xff]  ;;  %9301 = vst.msk [vmem:[#allocation2 + $0x139] sm:$0xff] %vm425_vm0, %v9269_v58  ;;  %v9179_v16 = vadd.f32 %v9140_v6, %v8818_v56  ;;  %16786 = vmatprep.mubr.msk.f32.mxu1 %vm425_vm0, %v20674_v10  ;;  %v20685_v43 = vld [vmem:[#allocation2 + $0x111] sm:$0xff] }
 0x4ef   : > { %9302 = vst.msk [vmem:[#allocation2 + $0x141] sm:$0xff] %vm425_vm0, %v9270_v33  ;;  %v9240_v42 = vld [vmem:[#allocation3 + $0xd8] sm:$0xff]  ;;  %16842 = vmatprep.mubr.msk.f32.mxu0 %vm425_vm0, %v20676_v0  ;;  %v9239_v59 = vld [vmem:[#allocation3 + $0xd0] sm:$0xff]  ;;  %9212 = vst.msk [vmem:[#allocation3 + $0xf8] sm:$0xff] %vm425_vm0, %v9180_v52 }
 0x4f0   : > { %v9272_v51 = vmax.f32 %v9240_v42, 0.0  ;;  %16787 = vmatmul.mubr.msk.f32.gmra.mrb[54].mxu1 %vm425_vm0, %v20678_v63  ;;  %v9271_v50 = vmax.f32 %v9239_v59, 0.0  ;;  %9211 = vst.msk [vmem:[#allocation3 + $0xf0] sm:$0xff] %vm425_vm0, %v9179_v16  ;;  %v20705_v36 = vld [vmem:[#allocation2 + $0x129] sm:$0xff] }
 0x4f1   : > { %16843 = vmatmul.mubr.msk.f32.gmra.mrb[86].mxu0 %vm425_vm0, %v20685_v43  ;;  %21747 = vst [vmem:[#allocation9_spill] sm:$0xff] %v20705_v36 }
 0x4f2   : > { %9304 = vst.msk [vmem:[#allocation2 + $0x159] sm:$0xff] %vm425_vm0, %v9272_v51  ;;  %v20694_v29 = vld [vmem:[#allocation2 + $0x120] sm:$0xff]  ;;  %v20698_v57 = vld [vmem:[#allocation2 + $0x128] sm:$0xff]  ;;  %9303 = vst.msk [vmem:[#allocation2 + $0x151] sm:$0xff] %vm425_vm0, %v9271_v50 }
 0x4f3   : > { %v20696_v34 = vld [vmem:[#allocation2 + $0x121] sm:$0xff]  ;;  %v9242_v5 = vld [vmem:[#allocation3 + $0xe8] sm:$0xff]  ;;  %16789 = vmatprep.mubr.msk.f32.mxu1 %vm425_vm0, %v20694_v29  ;;  %v9241_v2 = vld [vmem:[#allocation3 + $0xe0] sm:$0xff] }
 0x4f4   : > { %16845 = vmatprep.mubr.msk.f32.mxu0 %vm425_vm0, %v20696_v34  ;;  %v9274_v33 = vmax.f32 %v9242_v5, 0.0  ;;  %16790 = vmatmul.mubr.msk.f32.gmra.mrb[56].mxu1 %vm425_vm0, %v20698_v57  ;;  %v9273_v58 = vmax.f32 %v9241_v2, 0.0  ;;  %v10255_v2 = vld [vmem:[#allocation2 + $0x2] sm:$0xff] }
 0x4f5   : > { %16846 = vmatmul.mubr.msk.f32.gmra.mrb[88].mxu0 %vm425_vm0, %v20705_v36  ;;  %v20712_v23 = vld [vmem:[#allocation2 + $0x138] sm:$0xff]  ;;  %v20938_v36 = vld [vmem:[#allocation2 + $0xe2] sm:$0xff] }
 0x4f6   : > { %9306 = vst.msk [vmem:[#allocation2 + $0x171] sm:$0xff] %vm425_vm0, %v9274_v33  ;;  %v20714_v61 = vld [vmem:[#allocation2 + $0x139] sm:$0xff]  ;;  %9305 = vst.msk [vmem:[#allocation2 + $0x169] sm:$0xff] %vm425_vm0, %v9273_v58  ;;  %v9244_v52 = vld [vmem:[#allocation3 + $0xf8] sm:$0xff]  ;;  %16792 = vmatprep.mubr.msk.f32.mxu1 %vm425_vm0, %v20712_v23 }
 0x4f7   : > { %21748 = vst [vmem:[#allocation10_spill] sm:$0xff] %v20714_v61  ;;  %v20716_v56 = vld [vmem:[#allocation2 + $0x140] sm:$0xff]  ;;  %16848 = vmatprep.mubr.msk.f32.mxu0 %vm425_vm0, %v20714_v61  ;;  %v9276_v42 = vmax.f32 %v9244_v52, 0.0  ;;  %v11681_v61 = vld [vmem:[%s21685_s7 + $0xb8] sm:$0xff] }
 0x4f8   : > { %v20723_v6 = vld [vmem:[#allocation2 + $0x141] sm:$0xff]  ;;  %16793 = vmatmul.mubr.msk.f32.gmra.mrb[58].mxu1 %vm425_vm0, %v20716_v56 }
 0x4f9   : > { %21749 = vst [vmem:[#allocation11_spill] sm:$0xff] %v20723_v6  ;;  %v9243_v16 = vld [vmem:[#allocation3 + $0xf0] sm:$0xff]  ;;  %16849 = vmatmul.mubr.msk.f32.gmra.mrb[90].mxu0 %vm425_vm0, %v20723_v6  ;;  %9308 = vst.msk [vmem:[#allocation2 + $0x189] sm:$0xff] %vm425_vm0, %v9276_v42  ;;  %v20730_v59 = vld [vmem:[#allocation2 + $0x150] sm:$0xff] }
 0x4fa   : > { %v9275_v51 = vmax.f32 %v9243_v16, 0.0  ;;  %v20732_v50 = vld [vmem:[#allocation2 + $0x151] sm:$0xff]  ;;  %16795 = vmatprep.mubr.msk.f32.mxu1 %vm425_vm0, %v20730_v59  ;;  %v20741_v33 = vld [vmem:[#allocation2 + $0x159] sm:$0xff] }
 0x4fb   : > { %21750 = vst [vmem:[#allocation12_spill] sm:$0xff] %v20732_v50  ;;  %v20734_v5 = vld [vmem:[#allocation2 + $0x158] sm:$0xff]  ;;  %16851 = vmatprep.mubr.msk.f32.mxu0 %vm425_vm0, %v20732_v50  ;;  %21751 = vst [vmem:[#allocation13_spill] sm:$0xff] %v20741_v33  ;;  %v11680_v6 = vld [vmem:[%s21685_s7 + $0xb0] sm:$0xff] }
 0x4fc   : > { %9307 = vst.msk [vmem:[#allocation2 + $0x181] sm:$0xff] %vm425_vm0, %v9275_v51  ;;  %16796 = vmatmul.mubr.msk.f32.gmra.mrb[60].mxu1 %vm425_vm0, %v20734_v5  ;;  %v11227_v51 = vld [vmem:[%s21685_s7 + $0x90] sm:$0xff] }
 0x4fd   : > { %16852 = vmatmul.mubr.msk.f32.gmra.mrb[92].mxu0 %vm425_vm0, %v20741_v33  ;;  %v20747_v58 = vld [vmem:[#allocation2 + $0x168] sm:$0xff]  ;;  %v20751_v42 = vld [vmem:[#allocation2 + $0x170] sm:$0xff]  ;;  %v11228_v33 = vld [vmem:[%s21685_s7 + $0x98] sm:$0xff] }
 0x4fe   : > { %v20749_v52 = vld [vmem:[#allocation2 + $0x169] sm:$0xff]  ;;  %16798 = vmatprep.mubr.msk.f32.mxu1 %vm425_vm0, %v20747_v58  ;;  %v20757_v16 = vld [vmem:[#allocation2 + $0x171] sm:$0xff]  ;;  %v17581_v50 = vpack.c.bf16 %v11228_v33, %v11227_v51  ;;  %v12584_v51 = vld [vmem:[%s21685_s7 + $0xe0] sm:$0xff] }
 0x4ff   : > { %21752 = vst [vmem:[#allocation14_spill] sm:$0xff] %v20749_v52  ;;  %16854 = vmatprep.mubr.msk.f32.mxu0 %vm425_vm0, %v20749_v52  ;;  %21753 = vst [vmem:[#allocation15_spill] sm:$0xff] %v20757_v16  ;;  %v10256_v52 = vld [vmem:[#allocation2 + $0xa] sm:$0xff] }
 0x500   : > { %16799 = vmatmul.mubr.msk.f32.gmra.mrb[62].mxu1 %vm425_vm0, %v20751_v42  ;;  %v12132_v33 = vld [vmem:[%s21685_s7 + $0xc8] sm:$0xff] }
 0x501   : > { %16855 = vmatmul.mubr.msk.f32.gmra.mrb[94].mxu0 %vm425_vm0, %v20757_v16  ;;  %16865 = vmatprep.mubr.msk.f32.mxu1 %vm425_vm0, %v10255_v2  ;;  %v20781_v16 = vld [vmem:[#allocation2 + $0x1a] sm:$0xff]  ;;  %v20794_v2 = vld [vmem:[#allocation2 + $0x22] sm:$0xff] }
 0x502   : > { %16921 = vmatprep.mubr.msk.f32.mxu0 %vm425_vm0, %v20474_v3  ;;  %v12131_v3 = vld [vmem:[%s21685_s7 + $0xc0] sm:$0xff] }
 0x504   : > { %16866 = vmatmul.mubr.msk.f32.vlgmr.msra.gmra.mrb[64].mxu1 %vm425_vm0, %v10256_v52  ;;  %v20797_v52 = vpack.c.bf16 %v12132_v33, %v12131_v3  ;;  %v20896_v3 = vld [vmem:[#allocation2 + $0x92] sm:$0xff]  ;;  %v20902_v33 = vld [vmem:[#allocation2 + $0x9a] sm:$0xff] }
 0x505   : > { %16922 = vmatmul.mubr.msk.f32.vlgmr.msra.gmra.mrb[96].mxu0 %vm425_vm0, %v20478_v35  ;;  %17580 = vmatpush3.bf16.msra.mxu1 %v20395_v31  ;;  %v17589_v35 = vpack.c.bf16 %v11681_v61, %v11680_v6  ;;  %v12585_v31 = vld [vmem:[%s21685_s7 + $0xe8] sm:$0xff]  ;;  %v20817_v61 = vld [vmem:[#allocation2 + $0x3a] sm:$0xff] }
 0x506   : > { %16868 = vmatprep.mubr.msk.f32.mxu1 %vm425_vm0, %v20781_v16  ;;  %16924 = vmatprep.mubr.msk.f32.mxu0 %vm425_vm0, %v20494_v37  ;;  %v20809_v37 = vld [vmem:[#allocation2 + $0x32] sm:$0xff]  ;;  %v20837_v6 = vld [vmem:[#allocation2 + $0x62] sm:$0xff] }
 0x507   : > { %17582 = vmatprep.subr.bf16.mxu1 %v17581_v50  ;;  %17588 = vmatpush3.bf16.msra.mxu0 %v20455_v4  ;;  %v20815_v4 = vpack.c.bf16 %v12585_v31, %v12584_v51  ;;  %v20914_v51 = vld [vmem:[#allocation2 + $0xb2] sm:$0xff]  ;;  %v20920_v31 = vld [vmem:[#allocation2 + $0xc2] sm:$0xff] }
 0x508   : > { %16869 = vmatmul.mubr.msk.f32.gmra.mrb[66].mxu1 %vm425_vm0, %v20794_v2  ;;  %17590 = vmatprep.subr.bf16.mxu0 %v17589_v35 }
 0x509   : > { %16925 = vmatmul.mubr.msk.f32.gmra.mrb[98].mxu0 %vm425_vm0, %v20498_v13  ;;  %16871 = vmatprep.mubr.msk.f32.mxu1 %vm425_vm0, %v20809_v37  ;;  %v20824_v13 = vld [vmem:[#allocation2 + $0x4a] sm:$0xff] }
 0x50a   : > { %16927 = vmatprep.mubr.msk.f32.mxu0 %vm425_vm0, %v20514_v24  ;;  %17584 = vmatpush3.bf16.msra.mxu1 %v17581_v50  ;;  %v20831_v24 = vld [vmem:[#allocation2 + $0x52] sm:$0xff]  ;;  %v20890_v50 = vld [vmem:[#allocation2 + $0x82] sm:$0xff] }
 0x50b   : > { %17592 = vmatpush3.bf16.msra.mxu0 %v17589_v35  ;;  %17594 = vmatprep.subr.bf16.mxu1 %v20797_v52  ;;  %v20908_v35 = vld [vmem:[#allocation2 + $0xaa] sm:$0xff] }
 0x50c   : > { %16872 = vmatmul.mubr.msk.f32.gmra.mrb[68].mxu1 %vm425_vm0, %v20817_v61  ;;  %17602 = vmatprep.subr.bf16.mxu0 %v20815_v4 }
 0x50d   : > { %16928 = vmatmul.mubr.msk.f32.gmra.mrb[100].mxu0 %vm425_vm0, %v20518_v12  ;;  %16874 = vmatprep.mubr.msk.f32.mxu1 %vm425_vm0, %v20824_v13  ;;  %v20843_v12 = vld [vmem:[#allocation2 + $0x6a] sm:$0xff] }
 0x50e   : > { %16930 = vmatprep.mubr.msk.f32.mxu0 %vm425_vm0, %v20534_v21  ;;  %v20849_v21 = vld [vmem:[#allocation2 + $0x7a] sm:$0xff] }
 0x510   : > { %16875 = vmatmul.mubr.msk.f32.gmra.mrb[70].mxu1 %vm425_vm0, %v20831_v24 }
 0x511   : > { %16931 = vmatmul.mubr.msk.f32.gmra.mrb[102].mxu0 %vm425_vm0, %v20538_v7  ;;  %16877 = vmatprep.mubr.msk.f32.mxu1 %vm425_vm0, %v20837_v6  ;;  %v14166_v7 = vld [vmem:[%s21686_s8] ss:$0 sm:$0xff] }
 0x512   : > { %16933 = vmatprep.mubr.msk.f32.mxu0 %vm425_vm0, %v20554_v19  ;;  %9318 = vst.msk [vmem:[#allocation3 + $0x8] sm:$0xff] %vm9316_vm4, %v14166_v7  ;;  %9317 = vst.msk [vmem:[#allocation3] sm:$0xff] %vm9316_vm4, %v14166_v7 }
 0x513   : > { %9319 = vst.msk [vmem:[#allocation3 + $0x10] sm:$0xff] %vm9316_vm4, %v14166_v7  ;;  %9320 = vst.msk [vmem:[#allocation3 + $0x18] sm:$0xff] %vm9316_vm4, %v14166_v7 }
 0x514   : > { %16878 = vmatmul.mubr.msk.f32.gmra.mrb[72].mxu1 %vm425_vm0, %v20843_v12  ;;  %9321 = vst.msk [vmem:[#allocation3 + $0x20] sm:$0xff] %vm9316_vm4, %v14166_v7  ;;  %9322 = vst.msk [vmem:[#allocation3 + $0x28] sm:$0xff] %vm9316_vm4, %v14166_v7 }
 0x515   : > { %16934 = vmatmul.mubr.msk.f32.gmra.mrb[104].mxu0 %vm425_vm0, %v20558_v18  ;;  %16880 = vmatprep.mubr.msk.f32.mxu1 %vm425_vm0, %v20849_v21  ;;  %9323 = vst.msk [vmem:[#allocation3 + $0x30] sm:$0xff] %vm9316_vm4, %v14166_v7  ;;  %9324 = vst.msk [vmem:[#allocation3 + $0x38] sm:$0xff] %vm9316_vm4, %v14166_v7 }
 0x516   : > { %16936 = vmatprep.mubr.msk.f32.mxu0 %vm425_vm0, %v20574_v48  ;;  %9325 = vst.msk [vmem:[#allocation3 + $0x40] sm:$0xff] %vm9316_vm4, %v14166_v7  ;;  %9326 = vst.msk [vmem:[#allocation3 + $0x48] sm:$0xff] %vm9316_vm4, %v14166_v7  ;;  %v16811_v48 = vpop.f32.mrb[64].mxu0 }
 0x517   : > { %9327 = vst.msk [vmem:[#allocation3 + $0x50] sm:$0xff] %vm9316_vm4, %v14166_v7  ;;  %9328 = vst.msk [vmem:[#allocation3 + $0x58] sm:$0xff] %vm9316_vm4, %v14166_v7  ;;  %v10032_v19 = vpop.f32.mrb[65].mxu0 }
 0x518   : > { %9329 = vst.msk [vmem:[#allocation3 + $0x60] sm:$0xff] %vm9316_vm4, %v14166_v7  ;;  %9330 = vst.msk [vmem:[#allocation3 + $0x68] sm:$0xff] %vm9316_vm4, %v14166_v7  ;;  %16881 = vmatmul.mubr.msk.f32.gmra.mrb[74].mxu1 %vm425_vm0, %v20890_v50 }
 0x519   : > { %9331 = vst.msk [vmem:[#allocation3 + $0x70] sm:$0xff] %vm9316_vm4, %v14166_v7  ;;  %9332 = vst.msk [vmem:[#allocation3 + $0x78] sm:$0xff] %vm9316_vm4, %v14166_v7  ;;  %16937 = vmatmul.mubr.msk.f32.gmra.mrb[106].mxu0 %vm425_vm0, %v20578_v25  ;;  %16883 = vmatprep.mubr.msk.f32.mxu1 %vm425_vm0, %v20896_v3 }
 0x51a   : > { %9333 = vst.msk [vmem:[#allocation3 + $0x80] sm:$0xff] %vm9316_vm4, %v14166_v7  ;;  %9334 = vst.msk [vmem:[#allocation3 + $0x88] sm:$0xff] %vm9316_vm4, %v14166_v7  ;;  %16939 = vmatprep.mubr.msk.f32.mxu0 %vm425_vm0, %v20594_v22  ;;  %v20932_v22 = vld [vmem:[#allocation2 + $0xda] sm:$0xff] }
 0x51b   : > { %9335 = vst.msk [vmem:[#allocation3 + $0x90] sm:$0xff] %vm9316_vm4, %v14166_v7  ;;  %9336 = vst.msk [vmem:[#allocation3 + $0x98] sm:$0xff] %vm9316_vm4, %v14166_v7 }
 0x51c   : > { %9337 = vst.msk [vmem:[#allocation3 + $0xa0] sm:$0xff] %vm9316_vm4, %v14166_v7  ;;  %9338 = vst.msk [vmem:[#allocation3 + $0xa8] sm:$0xff] %vm9316_vm4, %v14166_v7  ;;  %16884 = vmatmul.mubr.msk.f32.gmra.mrb[76].mxu1 %vm425_vm0, %v20902_v33 }
 0x51d   : > { %9339 = vst.msk [vmem:[#allocation3 + $0xb0] sm:$0xff] %vm9316_vm4, %v14166_v7  ;;  %9340 = vst.msk [vmem:[#allocation3 + $0xb8] sm:$0xff] %vm9316_vm4, %v14166_v7  ;;  %16940 = vmatmul.mubr.msk.f32.gmra.mrb[108].mxu0 %vm425_vm0, %v20598_v8  ;;  %16886 = vmatprep.mubr.msk.f32.mxu1 %vm425_vm0, %v20908_v35  ;;  %v9382_v8 = vld [vmem:[#allocation3 + $0x8] sm:$0xff] }
 0x51e   : > { %9341 = vst.msk [vmem:[#allocation3 + $0xc0] sm:$0xff] %vm9316_vm4, %v14166_v7  ;;  %9342 = vst.msk [vmem:[#allocation3 + $0xc8] sm:$0xff] %vm9316_vm4, %v14166_v7  ;;  %16942 = vmatprep.mubr.msk.f32.mxu0 %vm425_vm0, %v20614_v20  ;;  %v9381_v20 = vld [vmem:[#allocation3] sm:$0xff] }
 0x51f   : > { %9343 = vst.msk [vmem:[#allocation3 + $0xd0] sm:$0xff] %vm9316_vm4, %v14166_v7  ;;  %9344 = vst.msk [vmem:[#allocation3 + $0xd8] sm:$0xff] %vm9316_vm4, %v14166_v7 }
 0x520   : > { %9345 = vst.msk [vmem:[#allocation3 + $0xe0] sm:$0xff] %vm9316_vm4, %v14166_v7  ;;  %9346 = vst.msk [vmem:[#allocation3 + $0xe8] sm:$0xff] %vm9316_vm4, %v14166_v7  ;;  %16887 = vmatmul.mubr.msk.f32.gmra.mrb[78].mxu1 %vm425_vm0, %v20914_v51 }
 0x521   : > { %9347 = vst.msk [vmem:[#allocation3 + $0xf0] sm:$0xff] %vm9316_vm4, %v14166_v7  ;;  %9348 = vst.msk [vmem:[#allocation3 + $0xf8] sm:$0xff] %vm9316_vm4, %v14166_v7  ;;  %16943 = vmatmul.mubr.msk.f32.gmra.mrb[110].mxu0 %vm425_vm0, %v20618_v44  ;;  %16889 = vmatprep.mubr.msk.f32.mxu1 %vm425_vm0, %v20920_v31  ;;  %v20926_v7 = vld [vmem:[#allocation2 + $0xca] sm:$0xff]  ;;  %v16755_v44 = vpop.f32.mrb[32].mxu1 }
 0x522   : > { %16945 = vmatprep.mubr.msk.f32.mxu0 %vm425_vm0, %v20634_v49  ;;  %v9739_v49 = vadd.f32 %v16755_v44, %v9382_v8  ;;  %v9579_v25 = vpop.f32.mrb[33].mxu1  ;;  %v21021_v44 = vld [vmem:[#allocation2 + $0x188] sm:$0xff] }
 0x523   : > { %v9738_v18 = vadd.f32 %v9579_v25, %v9381_v20  ;;  %v20952_v25 = vld [vmem:[#allocation2 + $0xfa] sm:$0xff] }
 0x524   : > { %16890 = vmatmul.mubr.msk.f32.gmra.mrb[80].mxu1 %vm425_vm0, %v20926_v7  ;;  %9771 = vst.msk [vmem:[#allocation3 + $0x8] sm:$0xff] %vm9316_vm4, %v9739_v49 }
 0x525   : > { %16946 = vmatmul.mubr.msk.f32.gmra.mrb[112].mxu0 %vm425_vm0, %v20638_v54  ;;  %16892 = vmatprep.mubr.msk.f32.mxu1 %vm425_vm0, %v20932_v22  ;;  %v20945_v54 = vld [vmem:[#allocation2 + $0xf2] sm:$0xff]  ;;  %9770 = vst.msk [vmem:[#allocation3] sm:$0xff] %vm9316_vm4, %v9738_v18 }
 0x526   : > { %16948 = vmatprep.mubr.msk.f32.mxu0 %vm425_vm0, %v20654_v60  ;;  %v20958_v60 = vld [vmem:[#allocation2 + $0x10a] sm:$0xff] }
 0x528   : > { %16893 = vmatmul.mubr.msk.f32.gmra.mrb[82].mxu1 %vm425_vm0, %v20938_v36 }
 0x529   : > { %16949 = vmatmul.mubr.msk.f32.gmra.mrb[114].mxu0 %vm425_vm0, %v20658_v17  ;;  %16895 = vmatprep.mubr.msk.f32.mxu1 %vm425_vm0, %v20945_v54  ;;  %v20964_v17 = vld [vmem:[#allocation2 + $0x112] sm:$0xff] }
 0x52a   : > { %16951 = vmatprep.mubr.msk.f32.mxu0 %vm425_vm0, %v20674_v10 }
 0x52b   : > { %v9835_v18 = vld [vmem:[#allocation3 + $0x8] sm:$0xff] }
 0x52c   : > { %16896 = vmatmul.mubr.msk.f32.gmra.mrb[84].mxu1 %vm425_vm0, %v20952_v25  ;;  %v10192_v10 = vadd.f32 %v16811_v48, %v9835_v18  ;;  %v9834_v8 = vld [vmem:[#allocation3] sm:$0xff] }
 0x52d   : > { %16952 = vmatmul.mubr.msk.f32.gmra.mrb[116].mxu0 %vm425_vm0, %v20678_v63  ;;  %16898 = vmatprep.mubr.msk.f32.mxu1 %vm425_vm0, %v20958_v60  ;;  %v20970_v63 = vld [vmem:[#allocation2 + $0x122] sm:$0xff]  ;;  %v10191_v20 = vadd.f32 %v10032_v19, %v9834_v8  ;;  %v20978_v48 = vld [vmem:[#allocation2 + $0x12a] sm:$0xff] }
 0x52e   : > { %16954 = vmatprep.mubr.msk.f32.mxu0 %vm425_vm0, %v20694_v29  ;;  %10224 = vst.msk [vmem:[#allocation3 + $0x8] sm:$0xff] %vm9316_vm4, %v10192_v10  ;;  %v20984_v29 = vld [vmem:[#allocation2 + $0x13a] sm:$0xff]  ;;  %v20990_v19 = vld [vmem:[#allocation2 + $0x142] sm:$0xff]  ;;  %v12586_v18 = vld [vmem:[%s21685_s7 + $0xf0] sm:$0xff] }
 0x52f   : > { %10223 = vst.msk [vmem:[#allocation3] sm:$0xff] %vm9316_vm4, %v10191_v20  ;;  %v12587_v10 = vld [vmem:[%s21685_s7 + $0xf8] sm:$0xff] }
 0x530   : > { %16899 = vmatmul.mubr.msk.f32.gmra.mrb[86].mxu1 %vm425_vm0, %v20964_v17  ;;  %v12534_v20 = vld [vmem:[#allocation2 + $0xd9] sm:$0xff] }
 0x531   : > { %16955 = vmatmul.mubr.msk.f32.gmra.mrb[118].mxu0 %vm425_vm0, %v20698_v57  ;;  %16901 = vmatprep.mubr.msk.f32.mxu1 %vm425_vm0, %v20970_v63  ;;  %v20996_v57 = vld [vmem:[#allocation2 + $0x152] sm:$0xff] }
 0x532   : > { %16957 = vmatprep.mubr.msk.f32.mxu0 %vm425_vm0, %v20712_v23  ;;  %v21002_v23 = vld [vmem:[#allocation2 + $0x15a] sm:$0xff] }
 0x534   : > { %16902 = vmatmul.mubr.msk.f32.gmra.mrb[88].mxu1 %vm425_vm0, %v20978_v48 }
 0x535   : > { %16958 = vmatmul.mubr.msk.f32.gmra.mrb[120].mxu0 %vm425_vm0, %v20716_v56  ;;  %16904 = vmatprep.mubr.msk.f32.mxu1 %vm425_vm0, %v20984_v29  ;;  %v21008_v56 = vld [vmem:[#allocation2 + $0x16a] sm:$0xff] }
 0x536   : > { %16960 = vmatprep.mubr.msk.f32.mxu0 %vm425_vm0, %v20730_v59  ;;  %v21010_v59 = vld [vmem:[#allocation2 + $0x180] sm:$0xff] }
 0x538   : > { %16905 = vmatmul.mubr.msk.f32.gmra.mrb[90].mxu1 %vm425_vm0, %v20990_v19 }
 0x539   : > { %16961 = vmatmul.mubr.msk.f32.gmra.mrb[122].mxu0 %vm425_vm0, %v20734_v5  ;;  %16907 = vmatprep.mubr.msk.f32.mxu1 %vm425_vm0, %v20996_v57  ;;  %v12133_v5 = vld [vmem:[%s21685_s7 + $0xd0] sm:$0xff] }
 0x53a   : > { %16963 = vmatprep.mubr.msk.f32.mxu0 %vm425_vm0, %v20747_v58  ;;  %v21019_v58 = vld [vmem:[#allocation2 + $0x172] sm:$0xff] }
 0x53c   : > { %16908 = vmatmul.mubr.msk.f32.gmra.mrb[92].mxu1 %vm425_vm0, %v21002_v23 }
 0x53d   : > { %16964 = vmatmul.mubr.msk.f32.gmra.mrb[124].mxu0 %vm425_vm0, %v20751_v42  ;;  %16910 = vmatprep.mubr.msk.f32.mxu1 %vm425_vm0, %v21008_v56  ;;  %v12134_v42 = vld [vmem:[%s21685_s7 + $0xd8] sm:$0xff] }
 0x53e   : > { %16966 = vmatprep.mubr.msk.f32.mxu0 %vm425_vm0, %v21010_v59  ;;  %v17597_v49 = vpack.c.bf16 %v12134_v42, %v12133_v5  ;;  %v12535_v5 = vld [vmem:[#allocation2 + $0xe1] sm:$0xff] }
 0x540   : > { %16911 = vmatmul.mubr.msk.f32.gmra.mrb[94].mxu1 %vm425_vm0, %v21019_v58 }
 0x541   : > { %16967 = vmatmul.mubr.msk.f32.gmra.mrb[126].mxu0 %vm425_vm0, %v21021_v44  ;;  %16977 = vmatprep.mubr.msk.f32.mxu1 %vm425_vm0, %v20476_v1  ;;  %v13037_v1 = vld [vmem:[%s21685_s7 + $0x100] sm:$0xff] }
 0x542   : > { %17033 = vmatprep.mubr.msk.f32.mxu0 %vm425_vm0, %v20781_v16  ;;  %v13038_v16 = vld [vmem:[%s21685_s7 + $0x108] sm:$0xff] }
 0x544   : > { %16978 = vmatmul.mubr.msk.f32.vlgmr.msra.gmra.mrb[96].mxu1 %vm425_vm0, %v20485_v46  ;;  %v17605_v46 = vpack.c.bf16 %v12587_v10, %v12586_v18  ;;  %v12083_v18 = vld [vmem:[#allocation2 + $0xf0] sm:$0xff] }
 0x545   : > { %17034 = vmatmul.mubr.msk.f32.vlgmr.msra.gmra.mrb[128].mxu0 %vm425_vm0, %v20794_v2  ;;  %17596 = vmatpush3.bf16.msra.mxu1 %v20797_v52  ;;  %v21056_v2 = vpack.c.bf16 %v13038_v16, %v13037_v1  ;;  %v12069_v52 = vld [vmem:[#allocation2 + $0x48] sm:$0xff]  ;;  %v12536_v10 = vld [vmem:[#allocation2 + $0xf1] sm:$0xff] }
 0x546   : > { %16980 = vmatprep.mubr.msk.f32.mxu1 %vm425_vm0, %v20496_v62  ;;  %17036 = vmatprep.mubr.msk.f32.mxu0 %vm425_vm0, %v20809_v37  ;;  %v21754_v62 = vld [vmem:[#allocation9_spill] sm:$0xff]  ;;  %v12522_v37 = vld [vmem:[#allocation2 + $0x49] sm:$0xff] }
 0x547   : > { %17598 = vmatprep.subr.bf16.mxu1 %v17597_v49  ;;  %17604 = vmatpush3.bf16.msra.mxu0 %v20815_v4  ;;  %v12070_v4 = vld [vmem:[#allocation2 + $0x50] sm:$0xff]  ;;  %v9388_v16 = vld [vmem:[#allocation3 + $0x38] sm:$0xff] }
 0x548   : > { %16981 = vmatmul.mubr.msk.f32.gmra.mrb[98].mxu1 %vm425_vm0, %v20505_v38  ;;  %17606 = vmatprep.subr.bf16.mxu0 %v17605_v46  ;;  %v21755_v38 = vld [vmem:[#allocation10_spill] sm:$0xff] }
 0x549   : > { %17037 = vmatmul.mubr.msk.f32.gmra.mrb[130].mxu0 %vm425_vm0, %v20817_v61  ;;  %16983 = vmatprep.mubr.msk.f32.mxu1 %vm425_vm0, %v20516_v45  ;;  %v21756_v45 = vld [vmem:[#allocation11_spill] sm:$0xff]  ;;  %v12523_v61 = vld [vmem:[#allocation2 + $0x51] sm:$0xff] }
 0x54a   : > { %17039 = vmatprep.mubr.msk.f32.mxu0 %vm425_vm0, %v20824_v13  ;;  %17600 = vmatpush3.bf16.msra.mxu1 %v17597_v49  ;;  %v12071_v13 = vld [vmem:[#allocation2 + $0x60] sm:$0xff] }
 0x54b   : > { %17608 = vmatpush3.bf16.msra.mxu0 %v17605_v46  ;;  %17617 = vmatprep.subr.bf16.mxu1 %v21056_v2  ;;  %v9387_v46 = vld [vmem:[#allocation3 + $0x30] sm:$0xff] }
 0x54c   : > { %16984 = vmatmul.mubr.msk.f32.gmra.mrb[100].mxu1 %vm425_vm0, %v20525_v11  ;;  %17610 = vmatprep.subr.bf16.mxu0 %v21056_v2  ;;  %v21757_v11 = vld [vmem:[#allocation12_spill] sm:$0xff] }
 0x54d   : > { %17040 = vmatmul.mubr.msk.f32.gmra.mrb[132].mxu0 %vm425_vm0, %v20831_v24  ;;  %16986 = vmatprep.mubr.msk.f32.mxu1 %vm425_vm0, %v20536_v9  ;;  %v21758_v9 = vld [vmem:[#allocation13_spill] sm:$0xff]  ;;  %v12524_v24 = vld [vmem:[#allocation2 + $0x61] sm:$0xff] }
 0x54e   : > { %17042 = vmatprep.mubr.msk.f32.mxu0 %vm425_vm0, %v20837_v6  ;;  %v12072_v6 = vld [vmem:[#allocation2 + $0x68] sm:$0xff] }
 0x550   : > { %16987 = vmatmul.mubr.msk.f32.gmra.mrb[102].mxu1 %vm425_vm0, %v20545_v28  ;;  %v21759_v28 = vld [vmem:[#allocation14_spill] sm:$0xff] }
 0x551   : > { %17043 = vmatmul.mubr.msk.f32.gmra.mrb[134].mxu0 %vm425_vm0, %v20843_v12  ;;  %16989 = vmatprep.mubr.msk.f32.mxu1 %vm425_vm0, %v20556_v14  ;;  %v12525_v12 = vld [vmem:[#allocation2 + $0x69] sm:$0xff] }
 0x552   : > { %17045 = vmatprep.mubr.msk.f32.mxu0 %vm425_vm0, %v20849_v21  ;;  %v21761_v21 = vld [vmem:[#allocation4_spill] sm:$0xff] }
 0x554   : > { %16990 = vmatmul.mubr.msk.f32.gmra.mrb[104].mxu1 %vm425_vm0, %v20565_v26 }
 0x555   : > { %17046 = vmatmul.mubr.msk.f32.gmra.mrb[136].mxu0 %vm425_vm0, %v20890_v50  ;;  %16992 = vmatprep.mubr.msk.f32.mxu1 %vm425_vm0, %v20576_v47  ;;  %v21762_v50 = vld [vmem:[#allocation5_spill] sm:$0xff] }
 0x556   : > { %17048 = vmatprep.mubr.msk.f32.mxu0 %vm425_vm0, %v20896_v3  ;;  %v21763_v3 = vld [vmem:[#allocation6_spill] sm:$0xff] }
 0x558   : > { %16993 = vmatmul.mubr.msk.f32.gmra.mrb[106].mxu1 %vm425_vm0, %v20585_v40 }
 0x559   : > { %17049 = vmatmul.mubr.msk.f32.gmra.mrb[138].mxu0 %vm425_vm0, %v20902_v33  ;;  %16995 = vmatprep.mubr.msk.f32.mxu1 %vm425_vm0, %v20596_v30  ;;  %v21764_v33 = vld [vmem:[#allocation7_spill] sm:$0xff] }
 0x55a   : > { %17051 = vmatprep.mubr.msk.f32.mxu0 %vm425_vm0, %v20908_v35  ;;  %v21765_v35 = vld [vmem:[#allocation8_spill] sm:$0xff] }
 0x55c   : > { %16996 = vmatmul.mubr.msk.f32.gmra.mrb[108].mxu1 %vm425_vm0, %v20605_v27  ;;  %v21168_v27 = vld [vmem:[#allocation2 + $0x181] sm:$0xff] }
 0x55d   : > { %17052 = vmatmul.mubr.msk.f32.gmra.mrb[140].mxu0 %vm425_vm0, %v20914_v51  ;;  %16998 = vmatprep.mubr.msk.f32.mxu1 %vm425_vm0, %v20616_v41  ;;  %v11644_v41 = vld [vmem:[#allocation2 + $0x182] sm:$0xff] }
 0x55e   : > { %17054 = vmatprep.mubr.msk.f32.mxu0 %vm425_vm0, %v20920_v31  ;;  %v12079_v51 = vld [vmem:[#allocation2 + $0xc0] sm:$0xff]  ;;  %v9384_v31 = vld [vmem:[#allocation3 + $0x18] sm:$0xff] }
 0x560   : > { %16999 = vmatmul.mubr.msk.f32.gmra.mrb[110].mxu1 %vm425_vm0, %v20625_v32  ;;  %v21173_v32 = vld [vmem:[#allocation2 + $0x189] sm:$0xff] }
 0x561   : > { %17055 = vmatmul.mubr.msk.f32.gmra.mrb[142].mxu0 %vm425_vm0, %v20926_v7  ;;  %17001 = vmatprep.mubr.msk.f32.mxu1 %vm425_vm0, %v20636_v55  ;;  %v11645_v55 = vld [vmem:[#allocation2 + $0x18a] sm:$0xff] }
 0x562   : > { %17057 = vmatprep.mubr.msk.f32.mxu0 %vm425_vm0, %v20932_v22  ;;  %v21760_v22 = vld [vmem:[#allocation15_spill] sm:$0xff] }
 0x564   : > { %17002 = vmatmul.mubr.msk.f32.gmra.mrb[112].mxu1 %vm425_vm0, %v20645_v39  ;;  %v13039_v39 = vld [vmem:[%s21685_s7 + $0x110] sm:$0xff] }
 0x565   : > { %17058 = vmatmul.mubr.msk.f32.gmra.mrb[144].mxu0 %vm425_vm0, %v20938_v36  ;;  %17004 = vmatprep.mubr.msk.f32.mxu1 %vm425_vm0, %v20656_v53  ;;  %v13040_v53 = vld [vmem:[%s21685_s7 + $0x118] sm:$0xff] }
 0x566   : > { %17060 = vmatprep.mubr.msk.f32.mxu0 %vm425_vm0, %v20945_v54  ;;  %v12521_v36 = vld [vmem:[#allocation2 + $0x39] sm:$0xff] }
 0x568   : > { %17005 = vmatmul.mubr.msk.f32.gmra.mrb[114].mxu1 %vm425_vm0, %v20665_v15  ;;  %v12067_v15 = vld [vmem:[#allocation2 + $0x30] sm:$0xff] }
 0x569   : > { %17061 = vmatmul.mubr.msk.f32.gmra.mrb[146].mxu0 %vm425_vm0, %v20952_v25  ;;  %17007 = vmatprep.mubr.msk.f32.mxu1 %vm425_vm0, %v20676_v0  ;;  %v12520_v0 = vld [vmem:[#allocation2 + $0x31] sm:$0xff]  ;;  %v12080_v25 = vld [vmem:[#allocation2 + $0xc8] sm:$0xff] }
 0x56a   : > { %17063 = vmatprep.mubr.msk.f32.mxu0 %vm425_vm0, %v20958_v60  ;;  %v12533_v60 = vld [vmem:[#allocation2 + $0xc9] sm:$0xff] }
 0x56c   : > { %17008 = vmatmul.mubr.msk.f32.gmra.mrb[116].mxu1 %vm425_vm0, %v20685_v43  ;;  %v17613_v43 = vpack.c.bf16 %v13040_v53, %v13039_v39  ;;  %v9390_v53 = vld [vmem:[#allocation3 + $0x48] sm:$0xff] }
 0x56d   : > { %17064 = vmatmul.mubr.msk.f32.gmra.mrb[148].mxu0 %vm425_vm0, %v20964_v17  ;;  %17010 = vmatprep.mubr.msk.f32.mxu1 %vm425_vm0, %v20696_v34  ;;  %v12068_v34 = vld [vmem:[#allocation2 + $0x38] sm:$0xff] }
 0x56e   : > { %17066 = vmatprep.mubr.msk.f32.mxu0 %vm425_vm0, %v20970_v63  ;;  %v12081_v63 = vld [vmem:[#allocation2 + $0xd8] sm:$0xff] }
 0x570   : > { %17011 = vmatmul.mubr.msk.f32.gmra.mrb[118].mxu1 %vm425_vm0, %v21754_v62 }
 0x571   : > { %17067 = vmatmul.mubr.msk.f32.gmra.mrb[150].mxu0 %vm425_vm0, %v20978_v48  ;;  %17013 = vmatprep.mubr.msk.f32.mxu1 %vm425_vm0, %v21755_v38  ;;  %v12084_v38 = vld [vmem:[#allocation2 + $0xf8] sm:$0xff] }
 0x572   : > { %17069 = vmatprep.mubr.msk.f32.mxu0 %vm425_vm0, %v20984_v29  ;;  %v9386_v29 = vld [vmem:[#allocation3 + $0x28] sm:$0xff] }
 0x574   : > { %17014 = vmatmul.mubr.msk.f32.gmra.mrb[120].mxu1 %vm425_vm0, %v21756_v45  ;;  %v12537_v45 = vld [vmem:[#allocation2 + $0xf9] sm:$0xff] }
 0x575   : > { %17070 = vmatmul.mubr.msk.f32.gmra.mrb[152].mxu0 %vm425_vm0, %v20990_v19  ;;  %17016 = vmatprep.mubr.msk.f32.mxu1 %vm425_vm0, %v21757_v11  ;;  %v9385_v19 = vld [vmem:[#allocation3 + $0x20] sm:$0xff] }
 0x576   : > { %17072 = vmatprep.mubr.msk.f32.mxu0 %vm425_vm0, %v20996_v57 }
 0x578   : > { %17017 = vmatmul.mubr.msk.f32.gmra.mrb[122].mxu1 %vm425_vm0, %v21758_v9 }
 0x579   : > { %17073 = vmatmul.mubr.msk.f32.gmra.mrb[154].mxu0 %vm425_vm0, %v21002_v23  ;;  %17019 = vmatprep.mubr.msk.f32.mxu1 %vm425_vm0, %v21759_v28 }
 0x57a   : > { %17075 = vmatprep.mubr.msk.f32.mxu0 %vm425_vm0, %v21008_v56  ;;  %v12082_v56 = vld [vmem:[#allocation2 + $0xe0] sm:$0xff] }
 0x57c   : > { %17020 = vmatmul.mubr.msk.f32.gmra.mrb[124].mxu1 %vm425_vm0, %v21760_v22  ;;  %v12085_v22 = vld [vmem:[#allocation2 + $0x108] sm:$0xff] }
 0x57d   : > { %17076 = vmatmul.mubr.msk.f32.gmra.mrb[156].mxu0 %vm425_vm0, %v21019_v58  ;;  %17022 = vmatprep.mubr.msk.f32.mxu1 %vm425_vm0, %v21168_v27 }
 0x57e   : > { %17078 = vmatprep.mubr.msk.f32.mxu0 %vm425_vm0, %v11644_v41  ;;  %v12538_v41 = vld [vmem:[#allocation2 + $0x109] sm:$0xff] }
 0x580   : > { %17023 = vmatmul.mubr.msk.f32.gmra.mrb[126].mxu1 %vm425_vm0, %v21173_v32 }
 0x581   : > { %17079 = vmatmul.mubr.msk.f32.gmra.mrb[158].mxu0 %vm425_vm0, %v11645_v55  ;;  %17089 = vmatprep.mubr.msk.f32.mxu1 %vm425_vm0, %v12067_v15 }
 0x582   : > { %17145 = vmatprep.mubr.msk.f32.mxu0 %vm425_vm0, %v12520_v0 }
 0x584   : > { %17090 = vmatmul.mubr.msk.f32.vlgmr.msra.gmra.mrb[128].mxu1 %vm425_vm0, %v12068_v34 }
 0x585   : > { %17146 = vmatmul.mubr.msk.f32.vlgmr.msra.gmra.mrb[160].mxu0 %vm425_vm0, %v12521_v36  ;;  %17619 = vmatpush3.bf16.msra.mxu1 %v21056_v2 }
 0x586   : > { %17092 = vmatprep.mubr.msk.f32.mxu1 %vm425_vm0, %v12069_v52  ;;  %17148 = vmatprep.mubr.msk.f32.mxu0 %vm425_vm0, %v12522_v37  ;;  %v12086_v37 = vld [vmem:[#allocation2 + $0x110] sm:$0xff] }
 0x587   : > { %17618 = vmatprep.subr.bf16.mxu1 %v17613_v43  ;;  %17612 = vmatpush3.bf16.msra.mxu0 %v21056_v2 }
 0x588   : > { %17093 = vmatmul.mubr.msk.f32.gmra.mrb[130].mxu1 %vm425_vm0, %v12070_v4  ;;  %17614 = vmatprep.subr.bf16.mxu0 %v17613_v43  ;;  %v12539_v4 = vld [vmem:[#allocation2 + $0x111] sm:$0xff] }
 0x589   : > { %17149 = vmatmul.mubr.msk.f32.gmra.mrb[162].mxu0 %vm425_vm0, %v12523_v61  ;;  %17095 = vmatprep.mubr.msk.f32.mxu1 %vm425_vm0, %v12071_v13 }
 0x58a   : > { %17151 = vmatprep.mubr.msk.f32.mxu0 %vm425_vm0, %v12524_v24  ;;  %17620 = vmatpush3.bf16.msra.mxu1 %v17613_v43 }
 0x58b   : > { %17616 = vmatpush3.bf16.msra.mxu0 %v17613_v43  ;;  %v9389_v43 = vld [vmem:[#allocation3 + $0x40] sm:$0xff] }
 0x58c   : > { %17096 = vmatmul.mubr.msk.f32.gmra.mrb[132].mxu1 %vm425_vm0, %v12072_v6  ;;  %v12087_v6 = vld [vmem:[#allocation2 + $0x120] sm:$0xff] }
 0x58d   : > { %17152 = vmatmul.mubr.msk.f32.gmra.mrb[164].mxu0 %vm425_vm0, %v12525_v12  ;;  %17098 = vmatprep.mubr.msk.f32.mxu1 %vm425_vm0, %v21761_v21  ;;  %v12540_v12 = vld [vmem:[#allocation2 + $0x121] sm:$0xff] }
 0x58e   : > { %17154 = vmatprep.mubr.msk.f32.mxu0 %vm425_vm0, %v20556_v14  ;;  %v12078_v14 = vld [vmem:[#allocation2 + $0xb0] sm:$0xff] }
 0x590   : > { %17099 = vmatmul.mubr.msk.f32.gmra.mrb[134].mxu1 %vm425_vm0, %v21762_v50 }
 0x591   : > { %17155 = vmatmul.mubr.msk.f32.gmra.mrb[166].mxu0 %vm425_vm0, %v20565_v26  ;;  %17101 = vmatprep.mubr.msk.f32.mxu1 %vm425_vm0, %v21763_v3  ;;  %v12531_v26 = vld [vmem:[#allocation2 + $0xb1] sm:$0xff]  ;;  %v9392_v3 = vld [vmem:[#allocation3 + $0x58] sm:$0xff] }
 0x592   : > { %17157 = vmatprep.mubr.msk.f32.mxu0 %vm425_vm0, %v20576_v47  ;;  %v12532_v47 = vld [vmem:[#allocation2 + $0xc1] sm:$0xff] }
 0x594   : > { %17102 = vmatmul.mubr.msk.f32.gmra.mrb[136].mxu1 %vm425_vm0, %v21764_v33 }
 0x595   : > { %17158 = vmatmul.mubr.msk.f32.gmra.mrb[168].mxu0 %vm425_vm0, %v20585_v40  ;;  %17104 = vmatprep.mubr.msk.f32.mxu1 %vm425_vm0, %v21765_v35  ;;  %v9383_v40 = vld [vmem:[#allocation3 + $0x10] sm:$0xff] }
 0x596   : > { %17160 = vmatprep.mubr.msk.f32.mxu0 %vm425_vm0, %v20596_v30 }
 0x598   : > { %17105 = vmatmul.mubr.msk.f32.gmra.mrb[138].mxu1 %vm425_vm0, %v12078_v14  ;;  %v9391_v14 = vld [vmem:[#allocation3 + $0x50] sm:$0xff] }
 0x599   : > { %17161 = vmatmul.mubr.msk.f32.gmra.mrb[170].mxu0 %vm425_vm0, %v12531_v26  ;;  %17107 = vmatprep.mubr.msk.f32.mxu1 %vm425_vm0, %v12079_v51 }
 0x59a   : > { %17163 = vmatprep.mubr.msk.f32.mxu0 %vm425_vm0, %v12532_v47  ;;  %v16758_v7 = vpop.f32.mrb[34].mxu1 }
 0x59b   : > { %v16814_v54 = vpop.f32.mrb[66].mxu0  ;;  %v9741_v17 = vadd.f32 %v16758_v7, %v9384_v31  ;;  %v9589_v30 = vpop.f32.mrb[35].mxu1  ;;  %v12088_v31 = vld [vmem:[#allocation2 + $0x128] sm:$0xff] }
 0x59c   : > { %v10042_v8 = vpop.f32.mrb[67].mxu0  ;;  %17108 = vmatmul.mubr.msk.f32.gmra.mrb[140].mxu1 %vm425_vm0, %v12080_v25  ;;  %v9740_v48 = vadd.f32 %v9589_v30, %v9383_v40  ;;  %v12541_v40 = vld [vmem:[#allocation2 + $0x129] sm:$0xff] }
 0x59d   : > { %17164 = vmatmul.mubr.msk.f32.gmra.mrb[172].mxu0 %vm425_vm0, %v12533_v60  ;;  %17110 = vmatprep.mubr.msk.f32.mxu1 %vm425_vm0, %v12081_v63  ;;  %9773 = vst.msk [vmem:[#allocation3 + $0x18] sm:$0xff] %vm9316_vm4, %v9741_v17  ;;  %v12089_v60 = vld [vmem:[#allocation2 + $0x138] sm:$0xff] }
 0x59e   : > { %17166 = vmatprep.mubr.msk.f32.mxu0 %vm425_vm0, %v12534_v20  ;;  %9772 = vst.msk [vmem:[#allocation3 + $0x10] sm:$0xff] %vm9316_vm4, %v9740_v48  ;;  %v16761_v57 = vpop.f32.mrb[36].mxu1  ;;  %v12542_v17 = vld [vmem:[#allocation2 + $0x139] sm:$0xff] }
 0x59f   : > { %v16817_v23 = vpop.f32.mrb[68].mxu0  ;;  %v9743_v58 = vadd.f32 %v16761_v57, %v9386_v29  ;;  %v9599_v42 = vpop.f32.mrb[37].mxu1  ;;  %v9394_v63 = vld [vmem:[#allocation3 + $0x68] sm:$0xff]  ;;  %v9393_v29 = vld [vmem:[#allocation3 + $0x60] sm:$0xff] }
 0x5a0   : > { %v10052_v49 = vpop.f32.mrb[69].mxu0  ;;  %17111 = vmatmul.mubr.msk.f32.gmra.mrb[142].mxu1 %vm425_vm0, %v12082_v56  ;;  %v9742_v1 = vadd.f32 %v9599_v42, %v9385_v19  ;;  %v12090_v56 = vld [vmem:[#allocation2 + $0x140] sm:$0xff] }
 0x5a1   : > { %17167 = vmatmul.mubr.msk.f32.gmra.mrb[174].mxu0 %vm425_vm0, %v12535_v5  ;;  %17113 = vmatprep.mubr.msk.f32.mxu1 %vm425_vm0, %v12083_v18  ;;  %9775 = vst.msk [vmem:[#allocation3 + $0x28] sm:$0xff] %vm9316_vm4, %v9743_v58  ;;  %v12543_v5 = vld [vmem:[#allocation2 + $0x141] sm:$0xff]  ;;  %v12091_v18 = vld [vmem:[#allocation2 + $0x150] sm:$0xff] }
 0x5a2   : > { %17169 = vmatprep.mubr.msk.f32.mxu0 %vm425_vm0, %v12536_v10  ;;  %9774 = vst.msk [vmem:[#allocation3 + $0x20] sm:$0xff] %vm9316_vm4, %v9742_v1  ;;  %v16764_v2 = vpop.f32.mrb[38].mxu1  ;;  %v12544_v10 = vld [vmem:[#allocation2 + $0x151] sm:$0xff] }
 0x5a3   : > { %v21234_v62 = vpop.f32.mrb[70].mxu0  ;;  %v9745_v11 = vadd.f32 %v16764_v2, %v9388_v16  ;;  %v9609_v9 = vpop.f32.mrb[39].mxu1 }
 0x5a4   : > { %v10062_v28 = vpop.f32.mrb[71].mxu0  ;;  %17114 = vmatmul.mubr.msk.f32.gmra.mrb[144].mxu1 %vm425_vm0, %v12084_v38  ;;  %v9837_v55 = vld [vmem:[#allocation3 + $0x18] sm:$0xff]  ;;  %v9744_v39 = vadd.f32 %v9609_v9, %v9387_v46  ;;  %v9395_v38 = vld [vmem:[#allocation3 + $0x70] sm:$0xff] }
 0x5a5   : > { %17170 = vmatmul.mubr.msk.f32.gmra.mrb[176].mxu0 %vm425_vm0, %v12537_v45  ;;  %17116 = vmatprep.mubr.msk.f32.mxu1 %vm425_vm0, %v12085_v22  ;;  %v10194_v15 = vadd.f32 %v16814_v54, %v9837_v55  ;;  %v9836_v0 = vld [vmem:[#allocation3 + $0x10] sm:$0xff]  ;;  %9777 = vst.msk [vmem:[#allocation3 + $0x38] sm:$0xff] %vm9316_vm4, %v9745_v11  ;;  %v9396_v46 = vld [vmem:[#allocation3 + $0x78] sm:$0xff] }
 0x5a6   : > { %17172 = vmatprep.mubr.msk.f32.mxu0 %vm425_vm0, %v12538_v41  ;;  %v10193_v34 = vadd.f32 %v10042_v8, %v9836_v0  ;;  %9776 = vst.msk [vmem:[#allocation3 + $0x30] sm:$0xff] %vm9316_vm4, %v9744_v39  ;;  %v16767_v36 = vpop.f32.mrb[40].mxu1  ;;  %v12545_v22 = vld [vmem:[#allocation2 + $0x159] sm:$0xff] }
 0x5a7   : > { %v21242_v52 = vpop.f32.mrb[72].mxu0  ;;  %10226 = vst.msk [vmem:[#allocation3 + $0x18] sm:$0xff] %vm9316_vm4, %v10194_v15  ;;  %v9747_v61 = vadd.f32 %v16767_v36, %v9390_v53  ;;  %v9619_v13 = vpop.f32.mrb[41].mxu1  ;;  %v12093_v53 = vld [vmem:[#allocation2 + $0x168] sm:$0xff] }
 0x5a8   : > { %v21245_v24 = vpop.f32.mrb[73].mxu0  ;;  %17117 = vmatmul.mubr.msk.f32.gmra.mrb[146].mxu1 %vm425_vm0, %v12086_v37  ;;  %10225 = vst.msk [vmem:[#allocation3 + $0x10] sm:$0xff] %vm9316_vm4, %v10193_v34  ;;  %v9839_v21 = vld [vmem:[#allocation3 + $0x28] sm:$0xff]  ;;  %v9746_v50 = vadd.f32 %v9619_v13, %v9389_v43  ;;  %v12546_v15 = vld [vmem:[#allocation2 + $0x169] sm:$0xff] }
 0x5a9   : > { %17173 = vmatmul.mubr.msk.f32.gmra.mrb[178].mxu0 %vm425_vm0, %v12539_v4  ;;  %17119 = vmatprep.mubr.msk.f32.mxu1 %vm425_vm0, %v12087_v6  ;;  %v10196_v33 = vadd.f32 %v16817_v23, %v9839_v21  ;;  %v9838_v35 = vld [vmem:[#allocation3 + $0x20] sm:$0xff]  ;;  %9779 = vst.msk [vmem:[#allocation3 + $0x48] sm:$0xff] %vm9316_vm4, %v9747_v61  ;;  %v9398_v34 = vld [vmem:[#allocation3 + $0x88] sm:$0xff] }
 0x5aa   : > { %17175 = vmatprep.mubr.msk.f32.mxu0 %vm425_vm0, %v12540_v12  ;;  %v10195_v26 = vadd.f32 %v10052_v49, %v9838_v35  ;;  %9778 = vst.msk [vmem:[#allocation3 + $0x40] sm:$0xff] %vm9316_vm4, %v9746_v50  ;;  %v16770_v51 = vpop.f32.mrb[42].mxu1  ;;  %v9397_v37 = vld [vmem:[#allocation3 + $0x80] sm:$0xff]  ;;  %v9400_v35 = vld [vmem:[#allocation3 + $0x98] sm:$0xff] }
 0x5ab   : > { %v21254_v47 = vpop.f32.mrb[74].mxu0  ;;  %10228 = vst.msk [vmem:[#allocation3 + $0x28] sm:$0xff] %vm9316_vm4, %v10196_v33  ;;  %v9749_v7 = vadd.f32 %v16770_v51, %v9392_v3  ;;  %v9629_v54 = vpop.f32.mrb[43].mxu1  ;;  %v12547_v6 = vld [vmem:[#allocation2 + $0x171] sm:$0xff] }
 0x5ac   : > { %v21257_v25 = vpop.f32.mrb[75].mxu0  ;;  %17120 = vmatmul.mubr.msk.f32.gmra.mrb[148].mxu1 %vm425_vm0, %v12088_v31  ;;  %10227 = vst.msk [vmem:[#allocation3 + $0x20] sm:$0xff] %vm9316_vm4, %v10195_v26  ;;  %v9841_v30 = vld [vmem:[#allocation3 + $0x38] sm:$0xff]  ;;  %v9748_v8 = vadd.f32 %v9629_v54, %v9391_v14  ;;  %v9399_v14 = vld [vmem:[#allocation3 + $0x90] sm:$0xff] }
 0x5ad   : > { %17176 = vmatmul.mubr.msk.f32.gmra.mrb[180].mxu0 %vm425_vm0, %v12541_v40  ;;  %17122 = vmatprep.mubr.msk.f32.mxu1 %vm425_vm0, %v12089_v60  ;;  %v10198_v20 = vadd.f32 %v21234_v62, %v9841_v30  ;;  %v9840_v48 = vld [vmem:[#allocation3 + $0x30] sm:$0xff]  ;;  %9781 = vst.msk [vmem:[#allocation3 + $0x58] sm:$0xff] %vm9316_vm4, %v9749_v7  ;;  %v9402_v60 = vld [vmem:[#allocation3 + $0xa8] sm:$0xff] }
 0x5ae   : > { %17178 = vmatprep.mubr.msk.f32.mxu0 %vm425_vm0, %v12542_v17  ;;  %v10197_v19 = vadd.f32 %v10062_v28, %v9840_v48  ;;  %9780 = vst.msk [vmem:[#allocation3 + $0x50] sm:$0xff] %vm9316_vm4, %v9748_v8  ;;  %v16773_v57 = vpop.f32.mrb[44].mxu1  ;;  %v12092_v28 = vld [vmem:[#allocation2 + $0x158] sm:$0xff]  ;;  %v12098_v8 = vld [vmem:[#allocation2 + $0x1a0] sm:$0xff] }
 0x5af   : > { %v21267_v23 = vpop.f32.mrb[76].mxu0  ;;  %10230 = vst.msk [vmem:[#allocation3 + $0x38] sm:$0xff] %vm9316_vm4, %v10198_v20  ;;  %v9751_v58 = vadd.f32 %v16773_v57, %v9394_v63  ;;  %v9639_v42 = vpop.f32.mrb[45].mxu1  ;;  %v12550_v31 = vld [vmem:[#allocation2 + $0x199] sm:$0xff]  ;;  %v12551_v63 = vld [vmem:[#allocation2 + $0x1a1] sm:$0xff] }
 0x5b0   : > { %v21270_v49 = vpop.f32.mrb[77].mxu0  ;;  %17123 = vmatmul.mubr.msk.f32.gmra.mrb[150].mxu1 %vm425_vm0, %v12090_v56  ;;  %10229 = vst.msk [vmem:[#allocation3 + $0x30] sm:$0xff] %vm9316_vm4, %v10197_v19  ;;  %v9843_v1 = vld [vmem:[#allocation3 + $0x48] sm:$0xff]  ;;  %v9750_v16 = vadd.f32 %v9639_v42, %v9393_v29 }
 0x5b1   : > { %17179 = vmatmul.mubr.msk.f32.gmra.mrb[182].mxu0 %vm425_vm0, %v12543_v5  ;;  %17125 = vmatprep.mubr.msk.f32.mxu1 %vm425_vm0, %v12091_v18  ;;  %v10200_v2 = vadd.f32 %v21242_v52, %v9843_v1  ;;  %v9842_v62 = vld [vmem:[#allocation3 + $0x40] sm:$0xff]  ;;  %9783 = vst.msk [vmem:[#allocation3 + $0x68] sm:$0xff] %vm9316_vm4, %v9751_v58  ;;  %v9404_v18 = vld [vmem:[#allocation3 + $0xb8] sm:$0xff] }
 0x5b2   : > { %17181 = vmatprep.mubr.msk.f32.mxu0 %vm425_vm0, %v12544_v10  ;;  %v10199_v45 = vadd.f32 %v21245_v24, %v9842_v62  ;;  %9782 = vst.msk [vmem:[#allocation3 + $0x60] sm:$0xff] %vm9316_vm4, %v9750_v16  ;;  %v12094_v24 = vld [vmem:[#allocation2 + $0x170] sm:$0xff]  ;;  %v9403_v16 = vld [vmem:[#allocation3 + $0xb0] sm:$0xff] }
 0x5b3   : > { %v16776_v11 = vpop.f32.mrb[46].mxu1  ;;  %10232 = vst.msk [vmem:[#allocation3 + $0x48] sm:$0xff] %vm9316_vm4, %v10200_v2  ;;  %v12973_v5 = vld [vmem:[#allocation2 + $0x32] sm:$0xff]  ;;  %v12975_v58 = vld [vmem:[#allocation2 + $0x4a] sm:$0xff] }
 0x5b4   : > { %v21281_v9 = vpop.f32.mrb[78].mxu0  ;;  %v9753_v41 = vadd.f32 %v16776_v11, %v9396_v46  ;;  %v9649_v55 = vpop.f32.mrb[47].mxu1  ;;  %17126 = vmatmul.mubr.msk.f32.gmra.mrb[152].mxu1 %vm425_vm0, %v12092_v28  ;;  %10231 = vst.msk [vmem:[#allocation3 + $0x40] sm:$0xff] %vm9316_vm4, %v10199_v45  ;;  %v9845_v0 = vld [vmem:[#allocation3 + $0x58] sm:$0xff]  ;;  %v12976_v45 = vld [vmem:[#allocation2 + $0x52] sm:$0xff] }
 0x5b5   : > { %v10102_v39 = vpop.f32.mrb[79].mxu0  ;;  %17182 = vmatmul.mubr.msk.f32.gmra.mrb[184].mxu0 %vm425_vm0, %v12545_v22  ;;  %v9752_v43 = vadd.f32 %v9649_v55, %v9395_v38  ;;  %17128 = vmatprep.mubr.msk.f32.mxu1 %vm425_vm0, %v12093_v53  ;;  %v10202_v36 = vadd.f32 %v21254_v47, %v9845_v0  ;;  %v9844_v52 = vld [vmem:[#allocation3 + $0x50] sm:$0xff]  ;;  %v12097_v47 = vld [vmem:[#allocation2 + $0x198] sm:$0xff]  ;;  %v9405_v0 = vld [vmem:[#allocation3 + $0xc0] sm:$0xff] }
 0x5b6   : > { %17184 = vmatprep.mubr.msk.f32.mxu0 %vm425_vm0, %v12546_v15  ;;  %9785 = vst.msk [vmem:[#allocation3 + $0x78] sm:$0xff] %vm9316_vm4, %v9753_v41  ;;  %v10201_v4 = vadd.f32 %v21257_v25, %v9844_v52  ;;  %v12974_v38 = vld [vmem:[#allocation2 + $0x3a] sm:$0xff]  ;;  %v12977_v22 = vld [vmem:[#allocation2 + $0x62] sm:$0xff]  ;;  %v12978_v52 = vld [vmem:[#allocation2 + $0x6a] sm:$0xff] }
 0x5b7   : > { %9784 = vst.msk [vmem:[#allocation3 + $0x70] sm:$0xff] %vm9316_vm4, %v9752_v43  ;;  %v16779_v61 = vpop.f32.mrb[48].mxu1  ;;  %10234 = vst.msk [vmem:[#allocation3 + $0x58] sm:$0xff] %vm9316_vm4, %v10202_v36 }
 0x5b8   : > { %v16835_v13 = vpop.f32.mrb[80].mxu0  ;;  %v9755_v12 = vadd.f32 %v16779_v61, %v9398_v34  ;;  %v9659_v21 = vpop.f32.mrb[49].mxu1  ;;  %17129 = vmatmul.mubr.msk.f32.gmra.mrb[154].mxu1 %vm425_vm0, %v12094_v24  ;;  %10233 = vst.msk [vmem:[#allocation3 + $0x50] sm:$0xff] %vm9316_vm4, %v10201_v4  ;;  %v9847_v3 = vld [vmem:[#allocation3 + $0x68] sm:$0xff] }
 0x5b9   : > { %v10112_v50 = vpop.f32.mrb[81].mxu0  ;;  %17185 = vmatmul.mubr.msk.f32.gmra.mrb[186].mxu0 %vm425_vm0, %v12547_v6  ;;  %v9754_v33 = vadd.f32 %v9659_v21, %v9397_v37  ;;  %17131 = vmatprep.mubr.msk.f32.mxu1 %vm425_vm0, %v21010_v59  ;;  %v10204_v26 = vadd.f32 %v21267_v23, %v9847_v3  ;;  %v9846_v51 = vld [vmem:[#allocation3 + $0x60] sm:$0xff]  ;;  %v9407_v3 = vld [vmem:[#allocation3 + $0xd0] sm:$0xff] }
 0x5ba   : > { %17187 = vmatprep.mubr.msk.f32.mxu0 %vm425_vm0, %v21168_v27  ;;  %9787 = vst.msk [vmem:[#allocation3 + $0x88] sm:$0xff] %vm9316_vm4, %v9755_v12  ;;  %v10203_v40 = vadd.f32 %v21270_v49, %v9846_v51  ;;  %v9408_v12 = vld [vmem:[#allocation3 + $0xd8] sm:$0xff] }
 0x5bb   : > { %9786 = vst.msk [vmem:[#allocation3 + $0x80] sm:$0xff] %vm9316_vm4, %v9754_v33  ;;  %v16782_v7 = vpop.f32.mrb[50].mxu1  ;;  %10236 = vst.msk [vmem:[#allocation3 + $0x68] sm:$0xff] %vm9316_vm4, %v10204_v26  ;;  %v12980_v26 = vld [vmem:[#allocation2 + $0x82] sm:$0xff] }
 0x5bc   : > { %v16838_v54 = vpop.f32.mrb[82].mxu0  ;;  %v9757_v59 = vadd.f32 %v16782_v7, %v9400_v35  ;;  %v9669_v25 = vpop.f32.mrb[51].mxu1  ;;  %17132 = vmatmul.mubr.msk.f32.gmra.mrb[156].mxu1 %vm425_vm0, %v21021_v44  ;;  %10235 = vst.msk [vmem:[#allocation3 + $0x60] sm:$0xff] %vm9316_vm4, %v10203_v40  ;;  %v9401_v44 = vld [vmem:[#allocation3 + $0xa0] sm:$0xff] }
 0x5bd   : > { %v10122_v27 = vpop.f32.mrb[83].mxu0  ;;  %17188 = vmatmul.mubr.msk.f32.gmra.mrb[188].mxu0 %vm425_vm0, %v21173_v32  ;;  %v9849_v17 = vld [vmem:[#allocation3 + $0x78] sm:$0xff]  ;;  %v9756_v30 = vadd.f32 %v9669_v25, %v9399_v14  ;;  %17134 = vmatprep.mubr.msk.f32.mxu1 %vm425_vm0, %v12097_v47  ;;  %v12981_v40 = vld [vmem:[#allocation2 + $0x92] sm:$0xff] }
 0x5be   : > { %17190 = vmatprep.mubr.msk.f32.mxu0 %vm425_vm0, %v12550_v31  ;;  %v10206_v20 = vadd.f32 %v21281_v9, %v9849_v17  ;;  %v9848_v48 = vld [vmem:[#allocation3 + $0x70] sm:$0xff]  ;;  %9789 = vst.msk [vmem:[#allocation3 + $0x98] sm:$0xff] %vm9316_vm4, %v9757_v59  ;;  %v9410_v59 = vld [vmem:[#allocation3 + $0xe8] sm:$0xff] }
 0x5bf   : > { %v10205_v29 = vadd.f32 %v10102_v39, %v9848_v48  ;;  %9788 = vst.msk [vmem:[#allocation3 + $0x90] sm:$0xff] %vm9316_vm4, %v9756_v30  ;;  %v16785_v32 = vpop.f32.mrb[52].mxu1  ;;  %v9406_v39 = vld [vmem:[#allocation3 + $0xc8] sm:$0xff] }
 0x5c0   : > { %v16841_v19 = vpop.f32.mrb[84].mxu0  ;;  %10238 = vst.msk [vmem:[#allocation3 + $0x78] sm:$0xff] %vm9316_vm4, %v10206_v20  ;;  %v9759_v57 = vadd.f32 %v16785_v32, %v9402_v60  ;;  %v9679_v23 = vpop.f32.mrb[53].mxu1  ;;  %17135 = vmatmul.mubr.msk.f32.gmra.mrb[158].mxu1 %vm425_vm0, %v12098_v8  ;;  %v9409_v60 = vld [vmem:[#allocation3 + $0xe0] sm:$0xff] }
 0x5c1   : > { %v10132_v56 = vpop.f32.mrb[85].mxu0  ;;  %17191 = vmatmul.mubr.msk.f32.gmra.mrb[190].mxu0 %vm425_vm0, %v12551_v63  ;;  %10237 = vst.msk [vmem:[#allocation3 + $0x70] sm:$0xff] %vm9316_vm4, %v10205_v29  ;;  %v9851_v42 = vld [vmem:[#allocation3 + $0x88] sm:$0xff]  ;;  %v9758_v49 = vadd.f32 %v9679_v23, %v9401_v44  ;;  %17204 = vmatprep.mubr.msk.f32.mxu1 %vm425_vm0, %v12975_v58  ;;  %v12983_v29 = vld [vmem:[#allocation2 + $0xaa] sm:$0xff] }
 0x5c2   : > { %17201 = vmatprep.mubr.msk.f32.mxu0 %vm425_vm0, %v12973_v5  ;;  %v10208_v10 = vadd.f32 %v16835_v13, %v9851_v42  ;;  %v9850_v1 = vld [vmem:[#allocation3 + $0x80] sm:$0xff]  ;;  %9791 = vst.msk [vmem:[#allocation3 + $0xa8] sm:$0xff] %vm9316_vm4, %v9759_v57  ;;  %v12979_v13 = vld [vmem:[#allocation2 + $0x7a] sm:$0xff]  ;;  %v9412_v57 = vld [vmem:[#allocation3 + $0xf8] sm:$0xff] }
 0x5c3   : > { %v10207_v46 = vadd.f32 %v10112_v50, %v9850_v1  ;;  %9790 = vst.msk [vmem:[#allocation3 + $0xa0] sm:$0xff] %vm9316_vm4, %v9758_v49  ;;  %v16788_v2 = vpop.f32.mrb[54].mxu1  ;;  %v12982_v63 = vld [vmem:[#allocation2 + $0x9a] sm:$0xff] }
 0x5c4   : > { %v16844_v62 = vpop.f32.mrb[86].mxu0  ;;  %10240 = vst.msk [vmem:[#allocation3 + $0x88] sm:$0xff] %vm9316_vm4, %v10208_v10  ;;  %v9761_v11 = vadd.f32 %v16788_v2, %v9404_v18  ;;  %v9689_v9 = vpop.f32.mrb[55].mxu1  ;;  %17205 = vmatmul.mubr.msk.f32.vlgmr.msra.gmra.mrb[160].mxu1 %vm425_vm0, %v12976_v45  ;;  %v9411_v5 = vld [vmem:[#allocation3 + $0xf0] sm:$0xff]  ;;  %v12984_v18 = vld [vmem:[#allocation2 + $0xb2] sm:$0xff] }
 0x5c5   : > { %v10142_v28 = vpop.f32.mrb[87].mxu0  ;;  %17202 = vmatmul.mubr.msk.f32.vlgmr.msra.gmra.mrb[192].mxu0 %vm425_vm0, %v12974_v38  ;;  %10239 = vst.msk [vmem:[#allocation3 + $0x80] sm:$0xff] %vm9316_vm4, %v10207_v46  ;;  %v9853_v41 = vld [vmem:[#allocation3 + $0x98] sm:$0xff]  ;;  %v9760_v55 = vadd.f32 %v9689_v9, %v9403_v16  ;;  %17207 = vmatprep.mubr.msk.f32.mxu1 %vm425_vm0, %v12977_v22  ;;  %v10288_v9 = vld [vmem:[#allocation3 + $0x8] sm:$0xff] }
 0x5c6   : > { %v10210_v53 = vadd.f32 %v16838_v54, %v9853_v41  ;;  %v9852_v15 = vld [vmem:[#allocation3 + $0x90] sm:$0xff]  ;;  %9793 = vst.msk [vmem:[#allocation3 + $0xb8] sm:$0xff] %vm9316_vm4, %v9761_v11  ;;  %v12986_v41 = vld [vmem:[#allocation2 + $0xca] sm:$0xff] }
 0x5c7   : > { %v10209_v43 = vadd.f32 %v10122_v27, %v9852_v15  ;;  %9792 = vst.msk [vmem:[#allocation3 + $0xb0] sm:$0xff] %vm9316_vm4, %v9760_v55  ;;  %v16791_v34 = vpop.f32.mrb[56].mxu1  ;;  %v12985_v46 = vld [vmem:[#allocation2 + $0xc2] sm:$0xff] }
 0x5c8   : > { %v16847_v36 = vpop.f32.mrb[88].mxu0  ;;  %10242 = vst.msk [vmem:[#allocation3 + $0x98] sm:$0xff] %vm9316_vm4, %v10210_v53  ;;  %v9763_v37 = vadd.f32 %v16791_v34, %v9406_v39  ;;  %v9699_v4 = vpop.f32.mrb[57].mxu1  ;;  %17208 = vmatmul.mubr.msk.f32.gmra.mrb[162].mxu1 %vm425_vm0, %v12978_v52  ;;  %v10287_v39 = vld [vmem:[#allocation3] sm:$0xff] }
 0x5c9   : > { %v10152_v61 = vpop.f32.mrb[89].mxu0  ;;  %10241 = vst.msk [vmem:[#allocation3 + $0x90] sm:$0xff] %vm9316_vm4, %v10209_v43  ;;  %v9855_v24 = vld [vmem:[#allocation3 + $0xa8] sm:$0xff]  ;;  %v9762_v6 = vadd.f32 %v9699_v4, %v9405_v0  ;;  %17210 = vmatprep.mubr.msk.f32.mxu1 %vm425_vm0, %v12979_v13  ;;  %v10290_v4 = vld [vmem:[#allocation3 + $0x18] sm:$0xff] }
 0x5ca   : > { %v10212_v21 = vadd.f32 %v16841_v19, %v9855_v24  ;;  %v9854_v50 = vld [vmem:[#allocation3 + $0xa0] sm:$0xff]  ;;  %9795 = vst.msk [vmem:[#allocation3 + $0xc8] sm:$0xff] %vm9316_vm4, %v9763_v37  ;;  %v12987_v0 = vld [vmem:[#allocation2 + $0xda] sm:$0xff]  ;;  %v12988_v24 = vld [vmem:[#allocation2 + $0xe2] sm:$0xff] }
 0x5cb   : > { %v10211_v33 = vadd.f32 %v10132_v56, %v9854_v50  ;;  %9794 = vst.msk [vmem:[#allocation3 + $0xc0] sm:$0xff] %vm9316_vm4, %v9762_v6  ;;  %v16794_v35 = vpop.f32.mrb[58].mxu1 }
 0x5cc   : > { %v16850_v14 = vpop.f32.mrb[90].mxu0  ;;  %10244 = vst.msk [vmem:[#allocation3 + $0xa8] sm:$0xff] %vm9316_vm4, %v10212_v21  ;;  %v9765_v51 = vadd.f32 %v16794_v35, %v9408_v12  ;;  %v9709_v47 = vpop.f32.mrb[59].mxu1  ;;  %17211 = vmatmul.mubr.msk.f32.gmra.mrb[164].mxu1 %vm425_vm0, %v12980_v26  ;;  %v10289_v12 = vld [vmem:[#allocation3 + $0x10] sm:$0xff] }
 0x5cd   : > { %v10162_v31 = vpop.f32.mrb[91].mxu0  ;;  %10243 = vst.msk [vmem:[#allocation3 + $0xa0] sm:$0xff] %vm9316_vm4, %v10211_v33  ;;  %v9857_v7 = vld [vmem:[#allocation3 + $0xb8] sm:$0xff]  ;;  %v9764_v54 = vadd.f32 %v9709_v47, %v9407_v3  ;;  %17213 = vmatprep.mubr.msk.f32.mxu1 %vm425_vm0, %v12981_v40  ;;  %v12989_v3 = vld [vmem:[#allocation2 + $0xf2] sm:$0xff] }
 0x5ce   : > { %v10214_v25 = vadd.f32 %v16844_v62, %v9857_v7  ;;  %v9856_v27 = vld [vmem:[#allocation3 + $0xb0] sm:$0xff]  ;;  %9797 = vst.msk [vmem:[#allocation3 + $0xd8] sm:$0xff] %vm9316_vm4, %v9765_v51  ;;  %v10292_v47 = vld [vmem:[#allocation3 + $0x28] sm:$0xff] }
 0x5cf   : > { %v10213_v17 = vadd.f32 %v10142_v28, %v9856_v27  ;;  %9796 = vst.msk [vmem:[#allocation3 + $0xd0] sm:$0xff] %vm9316_vm4, %v9764_v54  ;;  %v16797_v30 = vpop.f32.mrb[60].mxu1  ;;  %v12990_v7 = vld [vmem:[#allocation2 + $0xfa] sm:$0xff] }
 0x5d0   : > { %v16853_v8 = vpop.f32.mrb[92].mxu0  ;;  %10246 = vst.msk [vmem:[#allocation3 + $0xb8] sm:$0xff] %vm9316_vm4, %v10214_v25  ;;  %v9767_v20 = vadd.f32 %v16797_v30, %v9410_v59  ;;  %v9719_v48 = vpop.f32.mrb[61].mxu1  ;;  %17214 = vmatmul.mubr.msk.f32.gmra.mrb[166].mxu1 %vm425_vm0, %v12982_v63  ;;  %v10291_v59 = vld [vmem:[#allocation3 + $0x20] sm:$0xff] }
 0x5d1   : > { %v10172_v44 = vpop.f32.mrb[93].mxu0  ;;  %10245 = vst.msk [vmem:[#allocation3 + $0xb0] sm:$0xff] %vm9316_vm4, %v10213_v17  ;;  %v9859_v32 = vld [vmem:[#allocation3 + $0xc8] sm:$0xff]  ;;  %v9766_v19 = vadd.f32 %v9719_v48, %v9409_v60  ;;  %17216 = vmatprep.mubr.msk.f32.mxu1 %vm425_vm0, %v12983_v29  ;;  %v12991_v60 = vld [vmem:[#allocation2 + $0x10a] sm:$0xff] }
 0x5d2   : > { %v10216_v23 = vadd.f32 %v16847_v36, %v9859_v32  ;;  %v9858_v56 = vld [vmem:[#allocation3 + $0xc0] sm:$0xff]  ;;  %9799 = vst.msk [vmem:[#allocation3 + $0xe8] sm:$0xff] %vm9316_vm4, %v9767_v20  ;;  %v10294_v48 = vld [vmem:[#allocation3 + $0x38] sm:$0xff] }
 0x5d3   : > { %v10215_v58 = vadd.f32 %v10152_v61, %v9858_v56  ;;  %9798 = vst.msk [vmem:[#allocation3 + $0xe0] sm:$0xff] %vm9316_vm4, %v9766_v19  ;;  %v16800_v42 = vpop.f32.mrb[62].mxu1  ;;  %v12992_v32 = vld [vmem:[#allocation2 + $0x112] sm:$0xff] }
 0x5d4   : > { %v16856_v49 = vpop.f32.mrb[94].mxu0  ;;  %10248 = vst.msk [vmem:[#allocation3 + $0xc8] sm:$0xff] %vm9316_vm4, %v10216_v23  ;;  %v9769_v10 = vadd.f32 %v16800_v42, %v9412_v57  ;;  %v9729_v1 = vpop.f32.mrb[63].mxu1  ;;  %17217 = vmatmul.mubr.msk.f32.gmra.mrb[168].mxu1 %vm425_vm0, %v12984_v18  ;;  %v10293_v57 = vld [vmem:[#allocation3 + $0x30] sm:$0xff] }
 0x5d5   : > { %v10182_v16 = vpop.f32.mrb[95].mxu0  ;;  %10247 = vst.msk [vmem:[#allocation3 + $0xc0] sm:$0xff] %vm9316_vm4, %v10215_v58  ;;  %v9861_v2 = vld [vmem:[#allocation3 + $0xd8] sm:$0xff]  ;;  %v9768_v62 = vadd.f32 %v9729_v1, %v9411_v5  ;;  %17219 = vmatprep.mubr.msk.f32.mxu1 %vm425_vm0, %v12985_v46  ;;  %v10296_v1 = vld [vmem:[#allocation3 + $0x48] sm:$0xff] }
 0x5d6   : > { %v10218_v38 = vadd.f32 %v16850_v14, %v9861_v2  ;;  %v9860_v45 = vld [vmem:[#allocation3 + $0xd0] sm:$0xff]  ;;  %9801 = vst.msk [vmem:[#allocation3 + $0xf8] sm:$0xff] %vm9316_vm4, %v9769_v10  ;;  %v12994_v2 = vld [vmem:[#allocation2 + $0x12a] sm:$0xff] }
 0x5d7   : > { %v10217_v11 = vadd.f32 %v10162_v31, %v9860_v45  ;;  %9800 = vst.msk [vmem:[#allocation3 + $0xf0] sm:$0xff] %vm9316_vm4, %v9768_v62  ;;  %v16867_v28 = vpop.f32.mrb[64].mxu1  ;;  %v12993_v5 = vld [vmem:[#allocation2 + $0x122] sm:$0xff] }
 0x5d8   : > { %v16923_v22 = vpop.f32.mrb[96].mxu0  ;;  %10250 = vst.msk [vmem:[#allocation3 + $0xd8] sm:$0xff] %vm9316_vm4, %v10218_v38  ;;  %v10645_v55 = vadd.f32 %v16867_v28, %v10288_v9  ;;  %v10485_v53 = vpop.f32.mrb[65].mxu1  ;;  %17220 = vmatmul.mubr.msk.f32.gmra.mrb[170].mxu1 %vm425_vm0, %v12986_v41  ;;  %v10295_v38 = vld [vmem:[#allocation3 + $0x40] sm:$0xff]  ;;  %v12995_v9 = vld [vmem:[#allocation2 + $0x13a] sm:$0xff] }
 0x5d9   : > { %v10938_v15 = vpop.f32.mrb[97].mxu0  ;;  %10249 = vst.msk [vmem:[#allocation3 + $0xd0] sm:$0xff] %vm9316_vm4, %v10217_v11  ;;  %v9863_v43 = vld [vmem:[#allocation3 + $0xe8] sm:$0xff]  ;;  %v10644_v34 = vadd.f32 %v10485_v53, %v10287_v39  ;;  %17222 = vmatprep.mubr.msk.f32.mxu1 %vm425_vm0, %v12987_v0  ;;  %v10298_v53 = vld [vmem:[#allocation3 + $0x58] sm:$0xff] }
 0x5da   : > { %v10220_v36 = vadd.f32 %v16853_v8, %v9863_v43  ;;  %v9862_v52 = vld [vmem:[#allocation3 + $0xe0] sm:$0xff]  ;;  %10677 = vst.msk [vmem:[#allocation3 + $0x8] sm:$0xff] %vm9316_vm4, %v10645_v55  ;;  %v12996_v43 = vld [vmem:[#allocation2 + $0x142] sm:$0xff] }
 0x5db   : > { %v10219_v37 = vadd.f32 %v10172_v44, %v9862_v52  ;;  %10676 = vst.msk [vmem:[#allocation3] sm:$0xff] %vm9316_vm4, %v10644_v34  ;;  %v16870_v61 = vpop.f32.mrb[66].mxu1 }
 0x5dc   : > { %v16926_v13 = vpop.f32.mrb[98].mxu0  ;;  %10252 = vst.msk [vmem:[#allocation3 + $0xe8] sm:$0xff] %vm9316_vm4, %v10220_v36  ;;  %v10647_v6 = vadd.f32 %v16870_v61, %v10290_v4  ;;  %v10495_v21 = vpop.f32.mrb[67].mxu1  ;;  %17223 = vmatmul.mubr.msk.f32.gmra.mrb[172].mxu1 %vm425_vm0, %v12988_v24  ;;  %v10297_v36 = vld [vmem:[#allocation3 + $0x50] sm:$0xff]  ;;  %v12997_v4 = vld [vmem:[#allocation2 + $0x152] sm:$0xff] }
 0x5dd   : > { %v10948_v50 = vpop.f32.mrb[99].mxu0  ;;  %10251 = vst.msk [vmem:[#allocation3 + $0xe0] sm:$0xff] %vm9316_vm4, %v10219_v37  ;;  %v9865_v33 = vld [vmem:[#allocation3 + $0xf8] sm:$0xff]  ;;  %v10646_v35 = vadd.f32 %v10495_v21, %v10289_v12  ;;  %17225 = vmatprep.mubr.msk.f32.mxu1 %vm425_vm0, %v12989_v3  ;;  %v10300_v21 = vld [vmem:[#allocation3 + $0x68] sm:$0xff] }
 0x5de   : > { %v10222_v14 = vadd.f32 %v16856_v49, %v9865_v33  ;;  %v9864_v26 = vld [vmem:[#allocation3 + $0xf0] sm:$0xff]  ;;  %10679 = vst.msk [vmem:[#allocation3 + $0x18] sm:$0xff] %vm9316_vm4, %v10647_v6 }
 0x5df   : > { %v10221_v51 = vadd.f32 %v10182_v16, %v9864_v26  ;;  %10678 = vst.msk [vmem:[#allocation3 + $0x10] sm:$0xff] %vm9316_vm4, %v10646_v35  ;;  %v16873_v31 = vpop.f32.mrb[68].mxu1  ;;  %v12998_v33 = vld [vmem:[#allocation2 + $0x15a] sm:$0xff] }
 0x5e0   : > { %v16929_v40 = vpop.f32.mrb[100].mxu0  ;;  %10254 = vst.msk [vmem:[#allocation3 + $0xf8] sm:$0xff] %vm9316_vm4, %v10222_v14  ;;  %v10649_v54 = vadd.f32 %v16873_v31, %v10292_v47  ;;  %v10505_v25 = vpop.f32.mrb[69].mxu1  ;;  %17226 = vmatmul.mubr.msk.f32.gmra.mrb[174].mxu1 %vm425_vm0, %v12990_v7  ;;  %v10299_v14 = vld [vmem:[#allocation3 + $0x60] sm:$0xff] }
 0x5e1   : > { %v10958_v27 = vpop.f32.mrb[101].mxu0  ;;  %10253 = vst.msk [vmem:[#allocation3 + $0xf0] sm:$0xff] %vm9316_vm4, %v10221_v51  ;;  %v10741_v17 = vld [vmem:[#allocation3 + $0x8] sm:$0xff]  ;;  %v10648_v30 = vadd.f32 %v10505_v25, %v10291_v59  ;;  %17228 = vmatprep.mubr.msk.f32.mxu1 %vm425_vm0, %v12991_v60  ;;  %v12999_v47 = vld [vmem:[#allocation2 + $0x16a] sm:$0xff] }
 0x5e2   : > { %v11098_v8 = vadd.f32 %v16923_v22, %v10741_v17  ;;  %v10740_v63 = vld [vmem:[#allocation3] sm:$0xff]  ;;  %10681 = vst.msk [vmem:[#allocation3 + $0x28] sm:$0xff] %vm9316_vm4, %v10649_v54  ;;  %v10302_v25 = vld [vmem:[#allocation3 + $0x78] sm:$0xff] }
 0x5e3   : > { %v11097_v20 = vadd.f32 %v10938_v15, %v10740_v63  ;;  %10680 = vst.msk [vmem:[#allocation3 + $0x20] sm:$0xff] %vm9316_vm4, %v10648_v30  ;;  %v16876_v44 = vpop.f32.mrb[70].mxu1  ;;  %v13000_v17 = vld [vmem:[#allocation2 + $0x172] sm:$0xff] }
 0x5e4   : > { %v16932_v29 = vpop.f32.mrb[102].mxu0  ;;  %11130 = vst.msk [vmem:[#allocation3 + $0x8] sm:$0xff] %vm9316_vm4, %v11098_v8  ;;  %v10651_v19 = vadd.f32 %v16876_v44, %v10294_v48  ;;  %v10515_v23 = vpop.f32.mrb[71].mxu1  ;;  %17229 = vmatmul.mubr.msk.f32.gmra.mrb[176].mxu1 %vm425_vm0, %v12992_v32  ;;  %v10301_v8 = vld [vmem:[#allocation3 + $0x70] sm:$0xff] }
 0x5e5   : > { %v10968_v56 = vpop.f32.mrb[103].mxu0  ;;  %11129 = vst.msk [vmem:[#allocation3] sm:$0xff] %vm9316_vm4, %v11097_v20  ;;  %v10743_v58 = vld [vmem:[#allocation3 + $0x18] sm:$0xff]  ;;  %v10650_v42 = vadd.f32 %v10515_v23, %v10293_v57  ;;  %17231 = vmatprep.mubr.msk.f32.mxu1 %vm425_vm0, %v12993_v5  ;;  %v13003_v57 = vld [vmem:[#allocation2 + $0x19a] sm:$0xff] }
 0x5e6   : > { %v11100_v49 = vadd.f32 %v16926_v13, %v10743_v58  ;;  %v10742_v18 = vld [vmem:[#allocation3 + $0x10] sm:$0xff]  ;;  %10683 = vst.msk [vmem:[#allocation3 + $0x38] sm:$0xff] %vm9316_vm4, %v10651_v19 }
 0x5e7   : > { %v11099_v10 = vadd.f32 %v10948_v50, %v10742_v18  ;;  %10682 = vst.msk [vmem:[#allocation3 + $0x30] sm:$0xff] %vm9316_vm4, %v10650_v42  ;;  %v16879_v16 = vpop.f32.mrb[72].mxu1  ;;  %v13001_v48 = vld [vmem:[#allocation2 + $0x182] sm:$0xff]  ;;  %v13002_v42 = vld [vmem:[#allocation2 + $0x18a] sm:$0xff] }
 0x5e8   : > { %v16935_v46 = vpop.f32.mrb[104].mxu0  ;;  %11132 = vst.msk [vmem:[#allocation3 + $0x18] sm:$0xff] %vm9316_vm4, %v11100_v49  ;;  %v10653_v62 = vadd.f32 %v16879_v16, %v10296_v1  ;;  %v10525_v45 = vpop.f32.mrb[73].mxu1  ;;  %17232 = vmatmul.mubr.msk.f32.gmra.mrb[178].mxu1 %vm425_vm0, %v12994_v2  ;;  %v10303_v18 = vld [vmem:[#allocation3 + $0x80] sm:$0xff]  ;;  %v13004_v2 = vld [vmem:[#allocation2 + $0x1a2] sm:$0xff] }
 0x5e9   : > { %v10978_v11 = vpop.f32.mrb[105].mxu0  ;;  %11131 = vst.msk [vmem:[#allocation3 + $0x10] sm:$0xff] %vm9316_vm4, %v11099_v10  ;;  %v10745_v28 = vld [vmem:[#allocation3 + $0x28] sm:$0xff]  ;;  %v10652_v22 = vadd.f32 %v10525_v45, %v10295_v38  ;;  %17234 = vmatprep.mubr.msk.f32.mxu1 %vm425_vm0, %v12995_v9 }
 0x5ea   : > { %v11102_v41 = vadd.f32 %v16929_v40, %v10745_v28  ;;  %v10744_v55 = vld [vmem:[#allocation3 + $0x20] sm:$0xff]  ;;  %10685 = vst.msk [vmem:[#allocation3 + $0x48] sm:$0xff] %vm9316_vm4, %v10653_v62 }
 0x5eb   : > { %v11101_v39 = vadd.f32 %v10958_v27, %v10744_v55  ;;  %10684 = vst.msk [vmem:[#allocation3 + $0x40] sm:$0xff] %vm9316_vm4, %v10652_v22  ;;  %v16882_v15 = vpop.f32.mrb[74].mxu1 }
 0x5ec   : > { %v16938_v0 = vpop.f32.mrb[106].mxu0  ;;  %11134 = vst.msk [vmem:[#allocation3 + $0x28] sm:$0xff] %vm9316_vm4, %v11102_v41  ;;  %v10655_v34 = vadd.f32 %v16882_v15, %v10298_v53  ;;  %v10535_v52 = vpop.f32.mrb[75].mxu1  ;;  %17235 = vmatmul.mubr.msk.f32.gmra.mrb[180].mxu1 %vm425_vm0, %v12996_v43  ;;  %v10305_v41 = vld [vmem:[#allocation3 + $0x90] sm:$0xff] }
 0x5ed   : > { %v10988_v37 = vpop.f32.mrb[107].mxu0  ;;  %11133 = vst.msk [vmem:[#allocation3 + $0x20] sm:$0xff] %vm9316_vm4, %v11101_v39  ;;  %v10747_v61 = vld [vmem:[#allocation3 + $0x38] sm:$0xff]  ;;  %v10654_v13 = vadd.f32 %v10535_v52, %v10297_v36  ;;  %17237 = vmatprep.mubr.msk.f32.mxu1 %vm425_vm0, %v12997_v4  ;;  %v10308_v36 = vld [vmem:[#allocation3 + $0xa8] sm:$0xff] }
 0x5ee   : > { %v11104_v24 = vadd.f32 %v16932_v29, %v10747_v61  ;;  %v10746_v6 = vld [vmem:[#allocation3 + $0x30] sm:$0xff]  ;;  %10687 = vst.msk [vmem:[#allocation3 + $0x58] sm:$0xff] %vm9316_vm4, %v10655_v34  ;;  %v10307_v61 = vld [vmem:[#allocation3 + $0xa0] sm:$0xff] }
 0x5ef   : > { %v11103_v12 = vadd.f32 %v10968_v56, %v10746_v6  ;;  %10686 = vst.msk [vmem:[#allocation3 + $0x50] sm:$0xff] %vm9316_vm4, %v10654_v13  ;;  %v16885_v50 = vpop.f32.mrb[76].mxu1  ;;  %v10304_v56 = vld [vmem:[#allocation3 + $0x88] sm:$0xff] }
 0x5f0   : > { %v16941_v3 = vpop.f32.mrb[108].mxu0  ;;  %11136 = vst.msk [vmem:[#allocation3 + $0x38] sm:$0xff] %vm9316_vm4, %v11104_v24  ;;  %v10657_v35 = vadd.f32 %v16885_v50, %v10300_v21  ;;  %v10545_v26 = vpop.f32.mrb[77].mxu1  ;;  %17238 = vmatmul.mubr.msk.f32.gmra.mrb[182].mxu1 %vm425_vm0, %v12998_v33  ;;  %v10310_v33 = vld [vmem:[#allocation3 + $0xb8] sm:$0xff] }
 0x5f1   : > { %v10998_v51 = vpop.f32.mrb[109].mxu0  ;;  %11135 = vst.msk [vmem:[#allocation3 + $0x30] sm:$0xff] %vm9316_vm4, %v11103_v12  ;;  %v10749_v31 = vld [vmem:[#allocation3 + $0x48] sm:$0xff]  ;;  %v10656_v40 = vadd.f32 %v10545_v26, %v10299_v14  ;;  %17240 = vmatprep.mubr.msk.f32.mxu1 %vm425_vm0, %v12999_v47 }
 0x5f2   : > { %v11106_v7 = vadd.f32 %v16935_v46, %v10749_v31  ;;  %v10748_v54 = vld [vmem:[#allocation3 + $0x40] sm:$0xff]  ;;  %10689 = vst.msk [vmem:[#allocation3 + $0x68] sm:$0xff] %vm9316_vm4, %v10657_v35 }
 0x5f3   : > { %v11105_v59 = vadd.f32 %v10978_v11, %v10748_v54  ;;  %10688 = vst.msk [vmem:[#allocation3 + $0x60] sm:$0xff] %vm9316_vm4, %v10656_v40  ;;  %v16888_v27 = vpop.f32.mrb[78].mxu1  ;;  %v10306_v11 = vld [vmem:[#allocation3 + $0x98] sm:$0xff] }
 0x5f4   : > { %v16944_v60 = vpop.f32.mrb[110].mxu0  ;;  %11138 = vst.msk [vmem:[#allocation3 + $0x48] sm:$0xff] %vm9316_vm4, %v11106_v7  ;;  %v10659_v30 = vadd.f32 %v16888_v27, %v10302_v25  ;;  %v10555_v63 = vpop.f32.mrb[79].mxu1  ;;  %17241 = vmatmul.mubr.msk.f32.gmra.mrb[184].mxu1 %vm425_vm0, %v13000_v17  ;;  %v10312_v27 = vld [vmem:[#allocation3 + $0xc8] sm:$0xff] }
 0x5f5   : > { %v11008_v20 = vpop.f32.mrb[111].mxu0  ;;  %11137 = vst.msk [vmem:[#allocation3 + $0x40] sm:$0xff] %vm9316_vm4, %v11105_v59  ;;  %v10751_v44 = vld [vmem:[#allocation3 + $0x58] sm:$0xff]  ;;  %v10658_v29 = vadd.f32 %v10555_v63, %v10301_v8  ;;  %17243 = vmatprep.mubr.msk.f32.mxu1 %vm425_vm0, %v13001_v48  ;;  %v10311_v8 = vld [vmem:[#allocation3 + $0xc0] sm:$0xff] }
 0x5f6   : > { %v11108_v32 = vadd.f32 %v16938_v0, %v10751_v44  ;;  %v10750_v19 = vld [vmem:[#allocation3 + $0x50] sm:$0xff]  ;;  %10691 = vst.msk [vmem:[#allocation3 + $0x78] sm:$0xff] %vm9316_vm4, %v10659_v30 }
 0x5f7   : > { %v11107_v23 = vadd.f32 %v10988_v37, %v10750_v19  ;;  %10690 = vst.msk [vmem:[#allocation3 + $0x70] sm:$0xff] %vm9316_vm4, %v10658_v29  ;;  %v16891_v5 = vpop.f32.mrb[80].mxu1 }
 0x5f8   : > { %v16947_v58 = vpop.f32.mrb[112].mxu0  ;;  %11140 = vst.msk [vmem:[#allocation3 + $0x58] sm:$0xff] %vm9316_vm4, %v11108_v32  ;;  %v10661_v49 = vadd.f32 %v16891_v5, %v10304_v56  ;;  %v10565_v10 = vpop.f32.mrb[81].mxu1  ;;  %17244 = vmatmul.mubr.msk.f32.gmra.mrb[186].mxu1 %vm425_vm0, %v13002_v42 }
 0x5f9   : > { %v11018_v1 = vpop.f32.mrb[113].mxu0  ;;  %11139 = vst.msk [vmem:[#allocation3 + $0x50] sm:$0xff] %vm9316_vm4, %v11107_v23  ;;  %v10753_v16 = vld [vmem:[#allocation3 + $0x68] sm:$0xff]  ;;  %v10660_v46 = vadd.f32 %v10565_v10, %v10303_v18  ;;  %17246 = vmatprep.mubr.msk.f32.mxu1 %vm425_vm0, %v13003_v57  ;;  %v10314_v57 = vld [vmem:[#allocation3 + $0xd8] sm:$0xff] }
 0x5fa   : > { %v11110_v62 = vadd.f32 %v16941_v3, %v10753_v16  ;;  %v10752_v38 = vld [vmem:[#allocation3 + $0x60] sm:$0xff]  ;;  %10693 = vst.msk [vmem:[#allocation3 + $0x88] sm:$0xff] %vm9316_vm4, %v10661_v49 }
 0x5fb   : > { %v11109_v45 = vadd.f32 %v10998_v51, %v10752_v38  ;;  %10692 = vst.msk [vmem:[#allocation3 + $0x80] sm:$0xff] %vm9316_vm4, %v10660_v46  ;;  %v16894_v9 = vpop.f32.mrb[82].mxu1  ;;  %v10309_v51 = vld [vmem:[#allocation3 + $0xb0] sm:$0xff] }
 0x5fc   : > { %v16950_v28 = vpop.f32.mrb[114].mxu0  ;;  %11142 = vst.msk [vmem:[#allocation3 + $0x68] sm:$0xff] %vm9316_vm4, %v11110_v62  ;;  %v10663_v22 = vadd.f32 %v16894_v9, %v10306_v11  ;;  %v10575_v55 = vpop.f32.mrb[83].mxu1  ;;  %17247 = vmatmul.mubr.msk.f32.gmra.mrb[188].mxu1 %vm425_vm0, %v13004_v2  ;;  %v10316_v2 = vld [vmem:[#allocation3 + $0xe8] sm:$0xff]  ;;  %v10315_v11 = vld [vmem:[#allocation3 + $0xe0] sm:$0xff] }
 0x5fd   : > { %v11028_v39 = vpop.f32.mrb[115].mxu0  ;;  %11141 = vst.msk [vmem:[#allocation3 + $0x60] sm:$0xff] %vm9316_vm4, %v11109_v45  ;;  %v10755_v53 = vld [vmem:[#allocation3 + $0x78] sm:$0xff]  ;;  %v10662_v15 = vadd.f32 %v10575_v55, %v10305_v41 }
 0x5fe   : > { %v11112_v0 = vadd.f32 %v16944_v60, %v10755_v53  ;;  %v10754_v43 = vld [vmem:[#allocation3 + $0x70] sm:$0xff]  ;;  %10695 = vst.msk [vmem:[#allocation3 + $0x98] sm:$0xff] %vm9316_vm4, %v10663_v22 }
 0x5ff   : > { %v11111_v34 = vadd.f32 %v11008_v20, %v10754_v43  ;;  %10694 = vst.msk [vmem:[#allocation3 + $0x90] sm:$0xff] %vm9316_vm4, %v10662_v15  ;;  %v16897_v52 = vpop.f32.mrb[84].mxu1  ;;  %v10318_v15 = vld [vmem:[#allocation3 + $0xf8] sm:$0xff] }
 0x600   : > { %v16953_v37 = vpop.f32.mrb[116].mxu0  ;;  %11144 = vst.msk [vmem:[#allocation3 + $0x78] sm:$0xff] %vm9316_vm4, %v11112_v0  ;;  %v10665_v4 = vadd.f32 %v16897_v52, %v10308_v36  ;;  %v10585_v13 = vpop.f32.mrb[85].mxu1  ;;  %v10317_v36 = vld [vmem:[#allocation3 + $0xf0] sm:$0xff] }
 0x601   : > { %v11038_v24 = vpop.f32.mrb[117].mxu0  ;;  %11143 = vst.msk [vmem:[#allocation3 + $0x70] sm:$0xff] %vm9316_vm4, %v11111_v34  ;;  %v10757_v6 = vld [vmem:[#allocation3 + $0x88] sm:$0xff]  ;;  %v10664_v12 = vadd.f32 %v10585_v13, %v10307_v61 }
 0x602   : > { %v11114_v21 = vadd.f32 %v16947_v58, %v10757_v6  ;;  %v10756_v50 = vld [vmem:[#allocation3 + $0x80] sm:$0xff]  ;;  %10697 = vst.msk [vmem:[#allocation3 + $0xa8] sm:$0xff] %vm9316_vm4, %v10665_v4  ;;  %v10313_v58 = vld [vmem:[#allocation3 + $0xd0] sm:$0xff] }
 0x603   : > { %v11113_v3 = vadd.f32 %v11018_v1, %v10756_v50  ;;  %10696 = vst.msk [vmem:[#allocation3 + $0xa0] sm:$0xff] %vm9316_vm4, %v10664_v12  ;;  %v16900_v35 = vpop.f32.mrb[86].mxu1  ;;  %v11194_v12 = vld [vmem:[#allocation3 + $0x8] sm:$0xff] }
 0x604   : > { %v16956_v14 = vpop.f32.mrb[118].mxu0  ;;  %11146 = vst.msk [vmem:[#allocation3 + $0x88] sm:$0xff] %vm9316_vm4, %v11114_v21  ;;  %v10667_v26 = vadd.f32 %v16900_v35, %v10310_v33  ;;  %v10595_v47 = vpop.f32.mrb[87].mxu1  ;;  %v11193_v33 = vld [vmem:[#allocation3] sm:$0xff] }
 0x605   : > { %v11048_v31 = vpop.f32.mrb[119].mxu0  ;;  %11145 = vst.msk [vmem:[#allocation3 + $0x80] sm:$0xff] %vm9316_vm4, %v11113_v3  ;;  %v10759_v40 = vld [vmem:[#allocation3 + $0x98] sm:$0xff]  ;;  %v10666_v7 = vadd.f32 %v10595_v47, %v10309_v51 }
 0x606   : > { %v11116_v54 = vadd.f32 %v16950_v28, %v10759_v40  ;;  %v10758_v59 = vld [vmem:[#allocation3 + $0x90] sm:$0xff]  ;;  %10699 = vst.msk [vmem:[#allocation3 + $0xb8] sm:$0xff] %vm9316_vm4, %v10667_v26 }
 0x607   : > { %v11115_v25 = vadd.f32 %v11028_v39, %v10758_v59  ;;  %10698 = vst.msk [vmem:[#allocation3 + $0xb0] sm:$0xff] %vm9316_vm4, %v10666_v7  ;;  %v16903_v60 = vpop.f32.mrb[88].mxu1  ;;  %v11196_v7 = vld [vmem:[#allocation3 + $0x18] sm:$0xff] }
 0x608   : > { %v16959_v17 = vpop.f32.mrb[120].mxu0  ;;  %11148 = vst.msk [vmem:[#allocation3 + $0x98] sm:$0xff] %vm9316_vm4, %v11116_v54  ;;  %v10669_v30 = vadd.f32 %v16903_v60, %v10312_v27  ;;  %v10605_v63 = vpop.f32.mrb[89].mxu1  ;;  %v11195_v27 = vld [vmem:[#allocation3 + $0x10] sm:$0xff] }
 0x609   : > { %v11058_v20 = vpop.f32.mrb[121].mxu0  ;;  %11147 = vst.msk [vmem:[#allocation3 + $0x90] sm:$0xff] %vm9316_vm4, %v11115_v25  ;;  %v10761_v48 = vld [vmem:[#allocation3 + $0xa8] sm:$0xff]  ;;  %v10668_v44 = vadd.f32 %v10605_v63, %v10311_v8 }
 0x60a   : > { %v11118_v29 = vadd.f32 %v16953_v37, %v10761_v48  ;;  %v10760_v32 = vld [vmem:[#allocation3 + $0xa0] sm:$0xff]  ;;  %10701 = vst.msk [vmem:[#allocation3 + $0xc8] sm:$0xff] %vm9316_vm4, %v10669_v30 }
 0x60b   : > { %v11117_v19 = vadd.f32 %v11038_v24, %v10760_v32  ;;  %10700 = vst.msk [vmem:[#allocation3 + $0xc0] sm:$0xff] %vm9316_vm4, %v10668_v44  ;;  %v16906_v23 = vpop.f32.mrb[90].mxu1  ;;  %v11198_v44 = vld [vmem:[#allocation3 + $0x28] sm:$0xff] }
 0x60c   : > { %v16962_v56 = vpop.f32.mrb[122].mxu0  ;;  %11150 = vst.msk [vmem:[#allocation3 + $0xa8] sm:$0xff] %vm9316_vm4, %v11118_v29  ;;  %v10671_v5 = vadd.f32 %v16906_v23, %v10314_v57  ;;  %v10615_v42 = vpop.f32.mrb[91].mxu1  ;;  %v11197_v57 = vld [vmem:[#allocation3 + $0x20] sm:$0xff] }
 0x60d   : > { %v11068_v49 = vpop.f32.mrb[123].mxu0  ;;  %11149 = vst.msk [vmem:[#allocation3 + $0xa0] sm:$0xff] %vm9316_vm4, %v11117_v19  ;;  %v10763_v18 = vld [vmem:[#allocation3 + $0xb8] sm:$0xff]  ;;  %v10670_v10 = vadd.f32 %v10615_v42, %v10313_v58 }
 0x60e   : > { %v11120_v1 = vadd.f32 %v16956_v14, %v10763_v18  ;;  %v10762_v16 = vld [vmem:[#allocation3 + $0xb0] sm:$0xff]  ;;  %10703 = vst.msk [vmem:[#allocation3 + $0xd8] sm:$0xff] %vm9316_vm4, %v10671_v5 }
 0x60f   : > { %v11119_v46 = vadd.f32 %v11048_v31, %v10762_v16  ;;  %10702 = vst.msk [vmem:[#allocation3 + $0xd0] sm:$0xff] %vm9316_vm4, %v10670_v10  ;;  %v16909_v62 = vpop.f32.mrb[92].mxu1  ;;  %v11200_v10 = vld [vmem:[#allocation3 + $0x38] sm:$0xff] }
 0x610   : > { %v16965_v38 = vpop.f32.mrb[124].mxu0  ;;  %11152 = vst.msk [vmem:[#allocation3 + $0xb8] sm:$0xff] %vm9316_vm4, %v11120_v1  ;;  %v10673_v45 = vadd.f32 %v16909_v62, %v10316_v2  ;;  %v10625_v9 = vpop.f32.mrb[93].mxu1  ;;  %v11199_v2 = vld [vmem:[#allocation3 + $0x30] sm:$0xff] }
 0x611   : > { %v11078_v28 = vpop.f32.mrb[125].mxu0  ;;  %11151 = vst.msk [vmem:[#allocation3 + $0xb0] sm:$0xff] %vm9316_vm4, %v11119_v46  ;;  %v10765_v22 = vld [vmem:[#allocation3 + $0xc8] sm:$0xff]  ;;  %v10672_v41 = vadd.f32 %v10625_v9, %v10315_v11 }
 0x612   : > { %v11122_v55 = vadd.f32 %v16959_v17, %v10765_v22  ;;  %v10764_v39 = vld [vmem:[#allocation3 + $0xc0] sm:$0xff]  ;;  %10705 = vst.msk [vmem:[#allocation3 + $0xe8] sm:$0xff] %vm9316_vm4, %v10673_v45 }
 0x613   : > { %v11121_v53 = vadd.f32 %v11058_v20, %v10764_v39  ;;  %10704 = vst.msk [vmem:[#allocation3 + $0xe0] sm:$0xff] %vm9316_vm4, %v10672_v41  ;;  %v16912_v0 = vpop.f32.mrb[94].mxu1  ;;  %v11202_v41 = vld [vmem:[#allocation3 + $0x48] sm:$0xff] }
 0x614   : > { %v16968_v43 = vpop.f32.mrb[126].mxu0  ;;  %11154 = vst.msk [vmem:[#allocation3 + $0xc8] sm:$0xff] %vm9316_vm4, %v11122_v55  ;;  %v10675_v34 = vadd.f32 %v16912_v0, %v10318_v15  ;;  %v10635_v52 = vpop.f32.mrb[95].mxu1  ;;  %v11201_v15 = vld [vmem:[#allocation3 + $0x40] sm:$0xff] }
 0x615   : > { %v11088_v37 = vpop.f32.mrb[127].mxu0  ;;  %11153 = vst.msk [vmem:[#allocation3 + $0xc0] sm:$0xff] %vm9316_vm4, %v11121_v53  ;;  %v10767_v4 = vld [vmem:[#allocation3 + $0xd8] sm:$0xff]  ;;  %v10674_v61 = vadd.f32 %v10635_v52, %v10317_v36 }
 0x616   : > { %v11124_v13 = vadd.f32 %v16962_v56, %v10767_v4  ;;  %v10766_v24 = vld [vmem:[#allocation3 + $0xd0] sm:$0xff]  ;;  %10707 = vst.msk [vmem:[#allocation3 + $0xf8] sm:$0xff] %vm9316_vm4, %v10675_v34 }
 0x617   : > { %v11123_v6 = vadd.f32 %v11068_v49, %v10766_v24  ;;  %10706 = vst.msk [vmem:[#allocation3 + $0xf0] sm:$0xff] %vm9316_vm4, %v10674_v61  ;;  %v16979_v21 = vpop.f32.mrb[96].mxu1  ;;  %v11204_v61 = vld [vmem:[#allocation3 + $0x58] sm:$0xff] }
 0x618   : > { %v17035_v50 = vpop.f32.mrb[128].mxu0  ;;  %11156 = vst.msk [vmem:[#allocation3 + $0xd8] sm:$0xff] %vm9316_vm4, %v11124_v13  ;;  %v11551_v3 = vadd.f32 %v16979_v21, %v11194_v12  ;;  %v11391_v35 = vpop.f32.mrb[97].mxu1  ;;  %v11203_v12 = vld [vmem:[#allocation3 + $0x50] sm:$0xff] }
 0x619   : > { %v11844_v14 = vpop.f32.mrb[129].mxu0  ;;  %11155 = vst.msk [vmem:[#allocation3 + $0xd0] sm:$0xff] %vm9316_vm4, %v11123_v6  ;;  %v10769_v26 = vld [vmem:[#allocation3 + $0xe8] sm:$0xff]  ;;  %v11550_v51 = vadd.f32 %v11391_v35, %v11193_v33 }
 0x61a   : > { %v11126_v47 = vadd.f32 %v16965_v38, %v10769_v26  ;;  %v10768_v31 = vld [vmem:[#allocation3 + $0xe0] sm:$0xff]  ;;  %11583 = vst.msk [vmem:[#allocation3 + $0x8] sm:$0xff] %vm9316_vm4, %v11551_v3 }
 0x61b   : > { %v11125_v40 = vadd.f32 %v11078_v28, %v10768_v31  ;;  %11582 = vst.msk [vmem:[#allocation3] sm:$0xff] %vm9316_vm4, %v11550_v51  ;;  %v16982_v54 = vpop.f32.mrb[98].mxu1  ;;  %v11206_v51 = vld [vmem:[#allocation3 + $0x68] sm:$0xff] }
 0x61c   : > { %v17038_v59 = vpop.f32.mrb[130].mxu0  ;;  %11158 = vst.msk [vmem:[#allocation3 + $0xe8] sm:$0xff] %vm9316_vm4, %v11126_v47  ;;  %v11553_v25 = vadd.f32 %v16982_v54, %v11196_v7  ;;  %v11401_v60 = vpop.f32.mrb[99].mxu1  ;;  %v11205_v7 = vld [vmem:[#allocation3 + $0x60] sm:$0xff] }
 0x61d   : > { %v11854_v17 = vpop.f32.mrb[131].mxu0  ;;  %11157 = vst.msk [vmem:[#allocation3 + $0xe0] sm:$0xff] %vm9316_vm4, %v11125_v40  ;;  %v10771_v30 = vld [vmem:[#allocation3 + $0xf8] sm:$0xff]  ;;  %v11552_v8 = vadd.f32 %v11401_v60, %v11195_v27 }
 0x61e   : > { %v11128_v63 = vadd.f32 %v16968_v43, %v10771_v30  ;;  %v10770_v20 = vld [vmem:[#allocation3 + $0xf0] sm:$0xff]  ;;  %11585 = vst.msk [vmem:[#allocation3 + $0x18] sm:$0xff] %vm9316_vm4, %v11553_v25 }
 0x61f   : > { %v11127_v48 = vadd.f32 %v11088_v37, %v10770_v20  ;;  %11584 = vst.msk [vmem:[#allocation3 + $0x10] sm:$0xff] %vm9316_vm4, %v11552_v8  ;;  %v16985_v29 = vpop.f32.mrb[100].mxu1  ;;  %v11208_v8 = vld [vmem:[#allocation3 + $0x78] sm:$0xff] }
 0x620   : > { %v17041_v32 = vpop.f32.mrb[132].mxu0  ;;  %11160 = vst.msk [vmem:[#allocation3 + $0xf8] sm:$0xff] %vm9316_vm4, %v11128_v63  ;;  %v11555_v19 = vadd.f32 %v16985_v29, %v11198_v44  ;;  %v11411_v23 = vpop.f32.mrb[101].mxu1  ;;  %v11207_v44 = vld [vmem:[#allocation3 + $0x70] sm:$0xff] }
 0x621   : > { %v11864_v56 = vpop.f32.mrb[133].mxu0  ;;  %11159 = vst.msk [vmem:[#allocation3 + $0xf0] sm:$0xff] %vm9316_vm4, %v11127_v48  ;;  %v11647_v5 = vld [vmem:[#allocation3 + $0x8] sm:$0xff]  ;;  %v11554_v58 = vadd.f32 %v11411_v23, %v11197_v57 }
 0x622   : > { %v12004_v42 = vadd.f32 %v17035_v50, %v11647_v5  ;;  %v11646_v49 = vld [vmem:[#allocation3] sm:$0xff]  ;;  %11587 = vst.msk [vmem:[#allocation3 + $0x28] sm:$0xff] %vm9316_vm4, %v11555_v19 }
 0x623   : > { %v12003_v18 = vadd.f32 %v11844_v14, %v11646_v49  ;;  %11586 = vst.msk [vmem:[#allocation3 + $0x20] sm:$0xff] %vm9316_vm4, %v11554_v58  ;;  %v16988_v1 = vpop.f32.mrb[102].mxu1  ;;  %v11210_v58 = vld [vmem:[#allocation3 + $0x88] sm:$0xff] }
 0x624   : > { %v17044_v16 = vpop.f32.mrb[134].mxu0  ;;  %12036 = vst.msk [vmem:[#allocation3 + $0x8] sm:$0xff] %vm9316_vm4, %v12004_v42  ;;  %v11557_v46 = vadd.f32 %v16988_v1, %v11200_v10  ;;  %v11421_v62 = vpop.f32.mrb[103].mxu1  ;;  %v11209_v10 = vld [vmem:[#allocation3 + $0x80] sm:$0xff] }
 0x625   : > { %v11874_v38 = vpop.f32.mrb[135].mxu0  ;;  %12035 = vst.msk [vmem:[#allocation3] sm:$0xff] %vm9316_vm4, %v12003_v18  ;;  %v11649_v45 = vld [vmem:[#allocation3 + $0x18] sm:$0xff]  ;;  %v11556_v11 = vadd.f32 %v11421_v62, %v11199_v2 }
 0x626   : > { %v12006_v9 = vadd.f32 %v17038_v59, %v11649_v45  ;;  %v11648_v28 = vld [vmem:[#allocation3 + $0x10] sm:$0xff]  ;;  %11589 = vst.msk [vmem:[#allocation3 + $0x38] sm:$0xff] %vm9316_vm4, %v11557_v46 }
 0x627   : > { %v12005_v22 = vadd.f32 %v11854_v17, %v11648_v28  ;;  %11588 = vst.msk [vmem:[#allocation3 + $0x30] sm:$0xff] %vm9316_vm4, %v11556_v11  ;;  %v16991_v55 = vpop.f32.mrb[104].mxu1  ;;  %v11212_v11 = vld [vmem:[#allocation3 + $0x98] sm:$0xff] }
 0x628   : > { %v17047_v39 = vpop.f32.mrb[136].mxu0  ;;  %12038 = vst.msk [vmem:[#allocation3 + $0x18] sm:$0xff] %vm9316_vm4, %v12006_v9  ;;  %v11559_v53 = vadd.f32 %v16991_v55, %v11202_v41  ;;  %v11431_v0 = vpop.f32.mrb[105].mxu1  ;;  %v11211_v41 = vld [vmem:[#allocation3 + $0x90] sm:$0xff] }
 0x629   : > { %v11884_v43 = vpop.f32.mrb[137].mxu0  ;;  %12037 = vst.msk [vmem:[#allocation3 + $0x10] sm:$0xff] %vm9316_vm4, %v12005_v22  ;;  %v11651_v34 = vld [vmem:[#allocation3 + $0x28] sm:$0xff]  ;;  %v11558_v36 = vadd.f32 %v11431_v0, %v11201_v15 }
 0x62a   : > { %v12008_v52 = vadd.f32 %v17041_v32, %v11651_v34  ;;  %v11650_v37 = vld [vmem:[#allocation3 + $0x20] sm:$0xff]  ;;  %11591 = vst.msk [vmem:[#allocation3 + $0x48] sm:$0xff] %vm9316_vm4, %v11559_v53 }
 0x62b   : > { %v12007_v4 = vadd.f32 %v11864_v56, %v11650_v37  ;;  %11590 = vst.msk [vmem:[#allocation3 + $0x40] sm:$0xff] %vm9316_vm4, %v11558_v36  ;;  %v16994_v13 = vpop.f32.mrb[106].mxu1  ;;  %v11214_v36 = vld [vmem:[#allocation3 + $0xa8] sm:$0xff] }
 0x62c   : > { %v17050_v24 = vpop.f32.mrb[138].mxu0  ;;  %12040 = vst.msk [vmem:[#allocation3 + $0x28] sm:$0xff] %vm9316_vm4, %v12008_v52  ;;  %v11561_v6 = vadd.f32 %v16994_v13, %v11204_v61  ;;  %v11441_v21 = vpop.f32.mrb[107].mxu1  ;;  %v11213_v61 = vld [vmem:[#allocation3 + $0xa0] sm:$0xff] }
 0x62d   : > { %v11894_v50 = vpop.f32.mrb[139].mxu0  ;;  %12039 = vst.msk [vmem:[#allocation3 + $0x20] sm:$0xff] %vm9316_vm4, %v12007_v4  ;;  %v11653_v3 = vld [vmem:[#allocation3 + $0x38] sm:$0xff]  ;;  %v11560_v33 = vadd.f32 %v11441_v21, %v11203_v12 }
 0x62e   : > { %v12010_v35 = vadd.f32 %v17044_v16, %v11653_v3  ;;  %v11652_v14 = vld [vmem:[#allocation3 + $0x30] sm:$0xff]  ;;  %11593 = vst.msk [vmem:[#allocation3 + $0x58] sm:$0xff] %vm9316_vm4, %v11561_v6 }
 0x62f   : > { %v12009_v26 = vadd.f32 %v11874_v38, %v11652_v14  ;;  %11592 = vst.msk [vmem:[#allocation3 + $0x50] sm:$0xff] %vm9316_vm4, %v11560_v33  ;;  %v16997_v47 = vpop.f32.mrb[108].mxu1  ;;  %v11216_v33 = vld [vmem:[#allocation3 + $0xb8] sm:$0xff] }
 0x630   : > { %v17053_v31 = vpop.f32.mrb[140].mxu0  ;;  %12042 = vst.msk [vmem:[#allocation3 + $0x38] sm:$0xff] %vm9316_vm4, %v12010_v35  ;;  %v11563_v40 = vadd.f32 %v16997_v47, %v11206_v51  ;;  %v11451_v54 = vpop.f32.mrb[109].mxu1  ;;  %v11215_v51 = vld [vmem:[#allocation3 + $0xb0] sm:$0xff] }
 0x631   : > { %v11904_v59 = vpop.f32.mrb[141].mxu0  ;;  %12041 = vst.msk [vmem:[#allocation3 + $0x30] sm:$0xff] %vm9316_vm4, %v12009_v26  ;;  %v11655_v25 = vld [vmem:[#allocation3 + $0x48] sm:$0xff]  ;;  %v11562_v27 = vadd.f32 %v11451_v54, %v11205_v7 }
 0x632   : > { %v12012_v60 = vadd.f32 %v17047_v39, %v11655_v25  ;;  %v11654_v17 = vld [vmem:[#allocation3 + $0x40] sm:$0xff]  ;;  %11595 = vst.msk [vmem:[#allocation3 + $0x68] sm:$0xff] %vm9316_vm4, %v11563_v40 }
 0x633   : > { %v12011_v30 = vadd.f32 %v11884_v43, %v11654_v17  ;;  %11594 = vst.msk [vmem:[#allocation3 + $0x60] sm:$0xff] %vm9316_vm4, %v11562_v27  ;;  %v17000_v63 = vpop.f32.mrb[110].mxu1  ;;  %v11218_v27 = vld [vmem:[#allocation3 + $0xc8] sm:$0xff] }
 0x634   : > { %v17056_v20 = vpop.f32.mrb[142].mxu0  ;;  %12044 = vst.msk [vmem:[#allocation3 + $0x48] sm:$0xff] %vm9316_vm4, %v12012_v60  ;;  %v11565_v48 = vadd.f32 %v17000_v63, %v11208_v8  ;;  %v11461_v29 = vpop.f32.mrb[111].mxu1  ;;  %v11217_v8 = vld [vmem:[#allocation3 + $0xc0] sm:$0xff] }
 0x635   : > { %v11914_v32 = vpop.f32.mrb[143].mxu0  ;;  %12043 = vst.msk [vmem:[#allocation3 + $0x40] sm:$0xff] %vm9316_vm4, %v12011_v30  ;;  %v11657_v19 = vld [vmem:[#allocation3 + $0x58] sm:$0xff]  ;;  %v11564_v57 = vadd.f32 %v11461_v29, %v11207_v44 }
 0x636   : > { %v12014_v23 = vadd.f32 %v17050_v24, %v11657_v19  ;;  %v11656_v56 = vld [vmem:[#allocation3 + $0x50] sm:$0xff]  ;;  %11597 = vst.msk [vmem:[#allocation3 + $0x78] sm:$0xff] %vm9316_vm4, %v11565_v48 }
 0x637   : > { %v12013_v5 = vadd.f32 %v11894_v50, %v11656_v56  ;;  %11596 = vst.msk [vmem:[#allocation3 + $0x70] sm:$0xff] %vm9316_vm4, %v11564_v57  ;;  %v17003_v42 = vpop.f32.mrb[112].mxu1  ;;  %v11220_v57 = vld [vmem:[#allocation3 + $0xd8] sm:$0xff] }
 0x638   : > { %v17059_v49 = vpop.f32.mrb[144].mxu0  ;;  %12046 = vst.msk [vmem:[#allocation3 + $0x58] sm:$0xff] %vm9316_vm4, %v12014_v23  ;;  %v11567_v18 = vadd.f32 %v17003_v42, %v11210_v58  ;;  %v11471_v1 = vpop.f32.mrb[113].mxu1  ;;  %v11219_v58 = vld [vmem:[#allocation3 + $0xd0] sm:$0xff] }
 0x639   : > { %v11924_v16 = vpop.f32.mrb[145].mxu0  ;;  %12045 = vst.msk [vmem:[#allocation3 + $0x50] sm:$0xff] %vm9316_vm4, %v12013_v5  ;;  %v11659_v46 = vld [vmem:[#allocation3 + $0x68] sm:$0xff]  ;;  %v11566_v2 = vadd.f32 %v11471_v1, %v11209_v10 }
 0x63a   : > { %v12016_v62 = vadd.f32 %v17053_v31, %v11659_v46  ;;  %v11658_v38 = vld [vmem:[#allocation3 + $0x60] sm:$0xff]  ;;  %11599 = vst.msk [vmem:[#allocation3 + $0x88] sm:$0xff] %vm9316_vm4, %v11567_v18 }
 0x63b   : > { %v12015_v45 = vadd.f32 %v11904_v59, %v11658_v38  ;;  %11598 = vst.msk [vmem:[#allocation3 + $0x80] sm:$0xff] %vm9316_vm4, %v11566_v2  ;;  %v17006_v9 = vpop.f32.mrb[114].mxu1  ;;  %v11222_v2 = vld [vmem:[#allocation3 + $0xe8] sm:$0xff] }
 0x63c   : > { %v17062_v28 = vpop.f32.mrb[146].mxu0  ;;  %12048 = vst.msk [vmem:[#allocation3 + $0x68] sm:$0xff] %vm9316_vm4, %v12016_v62  ;;  %v11569_v22 = vadd.f32 %v17006_v9, %v11212_v11  ;;  %v11481_v55 = vpop.f32.mrb[115].mxu1  ;;  %v11221_v11 = vld [vmem:[#allocation3 + $0xe0] sm:$0xff] }
 0x63d   : > { %v11934_v39 = vpop.f32.mrb[147].mxu0  ;;  %12047 = vst.msk [vmem:[#allocation3 + $0x60] sm:$0xff] %vm9316_vm4, %v12015_v45  ;;  %v11661_v53 = vld [vmem:[#allocation3 + $0x78] sm:$0xff]  ;;  %v11568_v15 = vadd.f32 %v11481_v55, %v11211_v41 }
 0x63e   : > { %v12018_v0 = vadd.f32 %v17056_v20, %v11661_v53  ;;  %v11660_v43 = vld [vmem:[#allocation3 + $0x70] sm:$0xff]  ;;  %11601 = vst.msk [vmem:[#allocation3 + $0x98] sm:$0xff] %vm9316_vm4, %v11569_v22 }
 0x63f   : > { %v12017_v34 = vadd.f32 %v11914_v32, %v11660_v43  ;;  %11600 = vst.msk [vmem:[#allocation3 + $0x90] sm:$0xff] %vm9316_vm4, %v11568_v15  ;;  %v17009_v52 = vpop.f32.mrb[116].mxu1  ;;  %v11224_v15 = vld [vmem:[#allocation3 + $0xf8] sm:$0xff] }
 0x640   : > { %v17065_v37 = vpop.f32.mrb[148].mxu0  ;;  %12050 = vst.msk [vmem:[#allocation3 + $0x78] sm:$0xff] %vm9316_vm4, %v12018_v0  ;;  %v11571_v4 = vadd.f32 %v17009_v52, %v11214_v36  ;;  %v11491_v13 = vpop.f32.mrb[117].mxu1  ;;  %v11223_v36 = vld [vmem:[#allocation3 + $0xf0] sm:$0xff] }
 0x641   : > { %v11944_v24 = vpop.f32.mrb[149].mxu0  ;;  %12049 = vst.msk [vmem:[#allocation3 + $0x70] sm:$0xff] %vm9316_vm4, %v12017_v34  ;;  %v11663_v6 = vld [vmem:[#allocation3 + $0x88] sm:$0xff]  ;;  %v11570_v12 = vadd.f32 %v11491_v13, %v11213_v61 }
 0x642   : > { %v12020_v21 = vadd.f32 %v17059_v49, %v11663_v6  ;;  %v11662_v50 = vld [vmem:[#allocation3 + $0x80] sm:$0xff]  ;;  %11603 = vst.msk [vmem:[#allocation3 + $0xa8] sm:$0xff] %vm9316_vm4, %v11571_v4 }
 0x643   : > { %v12019_v3 = vadd.f32 %v11924_v16, %v11662_v50  ;;  %11602 = vst.msk [vmem:[#allocation3 + $0xa0] sm:$0xff] %vm9316_vm4, %v11570_v12  ;;  %v17012_v35 = vpop.f32.mrb[118].mxu1  ;;  %v12100_v12 = vld [vmem:[#allocation3 + $0x8] sm:$0xff] }
 0x644   : > { %v17068_v14 = vpop.f32.mrb[150].mxu0  ;;  %12052 = vst.msk [vmem:[#allocation3 + $0x88] sm:$0xff] %vm9316_vm4, %v12020_v21  ;;  %v11573_v26 = vadd.f32 %v17012_v35, %v11216_v33  ;;  %v11501_v47 = vpop.f32.mrb[119].mxu1  ;;  %v12099_v33 = vld [vmem:[#allocation3] sm:$0xff] }
 0x645   : > { %v11954_v31 = vpop.f32.mrb[151].mxu0  ;;  %12051 = vst.msk [vmem:[#allocation3 + $0x80] sm:$0xff] %vm9316_vm4, %v12019_v3  ;;  %v11665_v40 = vld [vmem:[#allocation3 + $0x98] sm:$0xff]  ;;  %v11572_v7 = vadd.f32 %v11501_v47, %v11215_v51 }
 0x646   : > { %v12022_v54 = vadd.f32 %v17062_v28, %v11665_v40  ;;  %v11664_v59 = vld [vmem:[#allocation3 + $0x90] sm:$0xff]  ;;  %11605 = vst.msk [vmem:[#allocation3 + $0xb8] sm:$0xff] %vm9316_vm4, %v11573_v26 }
 0x647   : > { %v12021_v25 = vadd.f32 %v11934_v39, %v11664_v59  ;;  %11604 = vst.msk [vmem:[#allocation3 + $0xb0] sm:$0xff] %vm9316_vm4, %v11572_v7  ;;  %v17015_v60 = vpop.f32.mrb[120].mxu1  ;;  %v12102_v7 = vld [vmem:[#allocation3 + $0x18] sm:$0xff] }
 0x648   : > { %v17071_v17 = vpop.f32.mrb[152].mxu0  ;;  %12054 = vst.msk [vmem:[#allocation3 + $0x98] sm:$0xff] %vm9316_vm4, %v12022_v54  ;;  %v11575_v30 = vadd.f32 %v17015_v60, %v11218_v27  ;;  %v11511_v63 = vpop.f32.mrb[121].mxu1  ;;  %v12101_v27 = vld [vmem:[#allocation3 + $0x10] sm:$0xff] }
 0x649   : > { %v11964_v20 = vpop.f32.mrb[153].mxu0  ;;  %12053 = vst.msk [vmem:[#allocation3 + $0x90] sm:$0xff] %vm9316_vm4, %v12021_v25  ;;  %v11667_v48 = vld [vmem:[#allocation3 + $0xa8] sm:$0xff]  ;;  %v11574_v44 = vadd.f32 %v11511_v63, %v11217_v8 }
 0x64a   : > { %v12024_v29 = vadd.f32 %v17065_v37, %v11667_v48  ;;  %v11666_v32 = vld [vmem:[#allocation3 + $0xa0] sm:$0xff]  ;;  %11607 = vst.msk [vmem:[#allocation3 + $0xc8] sm:$0xff] %vm9316_vm4, %v11575_v30 }
 0x64b   : > { %v12023_v19 = vadd.f32 %v11944_v24, %v11666_v32  ;;  %11606 = vst.msk [vmem:[#allocation3 + $0xc0] sm:$0xff] %vm9316_vm4, %v11574_v44  ;;  %v17018_v23 = vpop.f32.mrb[122].mxu1  ;;  %v12104_v44 = vld [vmem:[#allocation3 + $0x28] sm:$0xff] }
 0x64c   : > { %v17074_v56 = vpop.f32.mrb[154].mxu0  ;;  %12056 = vst.msk [vmem:[#allocation3 + $0xa8] sm:$0xff] %vm9316_vm4, %v12024_v29  ;;  %v11577_v5 = vadd.f32 %v17018_v23, %v11220_v57  ;;  %v11521_v42 = vpop.f32.mrb[123].mxu1  ;;  %v12103_v57 = vld [vmem:[#allocation3 + $0x20] sm:$0xff] }
 0x64d   : > { %v11974_v49 = vpop.f32.mrb[155].mxu0  ;;  %12055 = vst.msk [vmem:[#allocation3 + $0xa0] sm:$0xff] %vm9316_vm4, %v12023_v19  ;;  %v11669_v18 = vld [vmem:[#allocation3 + $0xb8] sm:$0xff]  ;;  %v11576_v10 = vadd.f32 %v11521_v42, %v11219_v58 }
 0x64e   : > { %v12026_v1 = vadd.f32 %v17068_v14, %v11669_v18  ;;  %v11668_v16 = vld [vmem:[#allocation3 + $0xb0] sm:$0xff]  ;;  %11609 = vst.msk [vmem:[#allocation3 + $0xd8] sm:$0xff] %vm9316_vm4, %v11577_v5 }
 0x64f   : > { %v12025_v46 = vadd.f32 %v11954_v31, %v11668_v16  ;;  %11608 = vst.msk [vmem:[#allocation3 + $0xd0] sm:$0xff] %vm9316_vm4, %v11576_v10  ;;  %v17021_v62 = vpop.f32.mrb[124].mxu1  ;;  %v12106_v10 = vld [vmem:[#allocation3 + $0x38] sm:$0xff] }
 0x650   : > { %v17077_v38 = vpop.f32.mrb[156].mxu0  ;;  %12058 = vst.msk [vmem:[#allocation3 + $0xb8] sm:$0xff] %vm9316_vm4, %v12026_v1  ;;  %v11579_v45 = vadd.f32 %v17021_v62, %v11222_v2  ;;  %v11531_v9 = vpop.f32.mrb[125].mxu1  ;;  %v12105_v2 = vld [vmem:[#allocation3 + $0x30] sm:$0xff] }
 0x651   : > { %v11984_v28 = vpop.f32.mrb[157].mxu0  ;;  %12057 = vst.msk [vmem:[#allocation3 + $0xb0] sm:$0xff] %vm9316_vm4, %v12025_v46  ;;  %v11671_v22 = vld [vmem:[#allocation3 + $0xc8] sm:$0xff]  ;;  %v11578_v41 = vadd.f32 %v11531_v9, %v11221_v11 }
 0x652   : > { %v12028_v55 = vadd.f32 %v17071_v17, %v11671_v22  ;;  %v11670_v39 = vld [vmem:[#allocation3 + $0xc0] sm:$0xff]  ;;  %11611 = vst.msk [vmem:[#allocation3 + $0xe8] sm:$0xff] %vm9316_vm4, %v11579_v45 }
 0x653   : > { %v12027_v53 = vadd.f32 %v11964_v20, %v11670_v39  ;;  %11610 = vst.msk [vmem:[#allocation3 + $0xe0] sm:$0xff] %vm9316_vm4, %v11578_v41  ;;  %v17024_v0 = vpop.f32.mrb[126].mxu1  ;;  %v12108_v41 = vld [vmem:[#allocation3 + $0x48] sm:$0xff] }
 0x654   : > { %v17080_v43 = vpop.f32.mrb[158].mxu0  ;;  %12060 = vst.msk [vmem:[#allocation3 + $0xc8] sm:$0xff] %vm9316_vm4, %v12028_v55  ;;  %v11581_v34 = vadd.f32 %v17024_v0, %v11224_v15  ;;  %v11541_v52 = vpop.f32.mrb[127].mxu1  ;;  %v12107_v15 = vld [vmem:[#allocation3 + $0x40] sm:$0xff] }
 0x655   : > { %v11994_v37 = vpop.f32.mrb[159].mxu0  ;;  %12059 = vst.msk [vmem:[#allocation3 + $0xc0] sm:$0xff] %vm9316_vm4, %v12027_v53  ;;  %v11673_v4 = vld [vmem:[#allocation3 + $0xd8] sm:$0xff]  ;;  %v11580_v61 = vadd.f32 %v11541_v52, %v11223_v36 }
 0x656   : > { %v12030_v13 = vadd.f32 %v17074_v56, %v11673_v4  ;;  %v11672_v24 = vld [vmem:[#allocation3 + $0xd0] sm:$0xff]  ;;  %11613 = vst.msk [vmem:[#allocation3 + $0xf8] sm:$0xff] %vm9316_vm4, %v11581_v34 }
 0x657   : > { %v12029_v6 = vadd.f32 %v11974_v49, %v11672_v24  ;;  %11612 = vst.msk [vmem:[#allocation3 + $0xf0] sm:$0xff] %vm9316_vm4, %v11580_v61  ;;  %v17091_v21 = vpop.f32.mrb[128].mxu1  ;;  %v12110_v61 = vld [vmem:[#allocation3 + $0x58] sm:$0xff] }
 0x658   : > { %v17147_v50 = vpop.f32.mrb[160].mxu0  ;;  %12062 = vst.msk [vmem:[#allocation3 + $0xd8] sm:$0xff] %vm9316_vm4, %v12030_v13  ;;  %v12457_v3 = vadd.f32 %v17091_v21, %v12100_v12  ;;  %v12297_v35 = vpop.f32.mrb[129].mxu1  ;;  %v12109_v12 = vld [vmem:[#allocation3 + $0x50] sm:$0xff] }
 0x659   : > { %v12750_v14 = vpop.f32.mrb[161].mxu0  ;;  %12061 = vst.msk [vmem:[#allocation3 + $0xd0] sm:$0xff] %vm9316_vm4, %v12029_v6  ;;  %v11675_v26 = vld [vmem:[#allocation3 + $0xe8] sm:$0xff]  ;;  %v12456_v51 = vadd.f32 %v12297_v35, %v12099_v33 }
 0x65a   : > { %v12032_v47 = vadd.f32 %v17077_v38, %v11675_v26  ;;  %v11674_v31 = vld [vmem:[#allocation3 + $0xe0] sm:$0xff]  ;;  %12489 = vst.msk [vmem:[#allocation3 + $0x8] sm:$0xff] %vm9316_vm4, %v12457_v3 }
 0x65b   : > { %v12031_v40 = vadd.f32 %v11984_v28, %v11674_v31  ;;  %12488 = vst.msk [vmem:[#allocation3] sm:$0xff] %vm9316_vm4, %v12456_v51  ;;  %v17094_v54 = vpop.f32.mrb[130].mxu1  ;;  %v12112_v51 = vld [vmem:[#allocation3 + $0x68] sm:$0xff] }
 0x65c   : > { %v17150_v59 = vpop.f32.mrb[162].mxu0  ;;  %12064 = vst.msk [vmem:[#allocation3 + $0xe8] sm:$0xff] %vm9316_vm4, %v12032_v47  ;;  %v12459_v25 = vadd.f32 %v17094_v54, %v12102_v7  ;;  %v12307_v60 = vpop.f32.mrb[131].mxu1  ;;  %v12111_v7 = vld [vmem:[#allocation3 + $0x60] sm:$0xff] }
 0x65d   : > { %v12760_v17 = vpop.f32.mrb[163].mxu0  ;;  %12063 = vst.msk [vmem:[#allocation3 + $0xe0] sm:$0xff] %vm9316_vm4, %v12031_v40  ;;  %v11677_v30 = vld [vmem:[#allocation3 + $0xf8] sm:$0xff]  ;;  %v12458_v8 = vadd.f32 %v12307_v60, %v12101_v27 }
 0x65e   : > { %v12034_v63 = vadd.f32 %v17080_v43, %v11677_v30  ;;  %v11676_v20 = vld [vmem:[#allocation3 + $0xf0] sm:$0xff]  ;;  %12491 = vst.msk [vmem:[#allocation3 + $0x18] sm:$0xff] %vm9316_vm4, %v12459_v25 }
 0x65f   : > { %v12033_v48 = vadd.f32 %v11994_v37, %v11676_v20  ;;  %12490 = vst.msk [vmem:[#allocation3 + $0x10] sm:$0xff] %vm9316_vm4, %v12458_v8  ;;  %v17097_v29 = vpop.f32.mrb[132].mxu1  ;;  %v12114_v8 = vld [vmem:[#allocation3 + $0x78] sm:$0xff] }
 0x660   : > { %v17153_v32 = vpop.f32.mrb[164].mxu0  ;;  %12066 = vst.msk [vmem:[#allocation3 + $0xf8] sm:$0xff] %vm9316_vm4, %v12034_v63  ;;  %v12461_v19 = vadd.f32 %v17097_v29, %v12104_v44  ;;  %v12317_v23 = vpop.f32.mrb[133].mxu1  ;;  %v12113_v44 = vld [vmem:[#allocation3 + $0x70] sm:$0xff] }
 0x661   : > { %v12770_v56 = vpop.f32.mrb[165].mxu0  ;;  %12065 = vst.msk [vmem:[#allocation3 + $0xf0] sm:$0xff] %vm9316_vm4, %v12033_v48  ;;  %v12553_v5 = vld [vmem:[#allocation3 + $0x8] sm:$0xff]  ;;  %v12460_v58 = vadd.f32 %v12317_v23, %v12103_v57 }
 0x662   : > { %v12910_v42 = vadd.f32 %v17147_v50, %v12553_v5  ;;  %v12552_v49 = vld [vmem:[#allocation3] sm:$0xff]  ;;  %12493 = vst.msk [vmem:[#allocation3 + $0x28] sm:$0xff] %vm9316_vm4, %v12461_v19 }
 0x663   : > { %v12909_v18 = vadd.f32 %v12750_v14, %v12552_v49  ;;  %12492 = vst.msk [vmem:[#allocation3 + $0x20] sm:$0xff] %vm9316_vm4, %v12460_v58  ;;  %v17100_v1 = vpop.f32.mrb[134].mxu1  ;;  %v12116_v58 = vld [vmem:[#allocation3 + $0x88] sm:$0xff] }
 0x664   : > { %v17156_v16 = vpop.f32.mrb[166].mxu0  ;;  %12942 = vst.msk [vmem:[#allocation3 + $0x8] sm:$0xff] %vm9316_vm4, %v12910_v42  ;;  %v12463_v46 = vadd.f32 %v17100_v1, %v12106_v10  ;;  %v12327_v62 = vpop.f32.mrb[135].mxu1  ;;  %v12115_v10 = vld [vmem:[#allocation3 + $0x80] sm:$0xff] }
 0x665   : > { %v12780_v38 = vpop.f32.mrb[167].mxu0  ;;  %12941 = vst.msk [vmem:[#allocation3] sm:$0xff] %vm9316_vm4, %v12909_v18  ;;  %v12555_v45 = vld [vmem:[#allocation3 + $0x18] sm:$0xff]  ;;  %v12462_v11 = vadd.f32 %v12327_v62, %v12105_v2 }
 0x666   : > { %v12912_v9 = vadd.f32 %v17150_v59, %v12555_v45  ;;  %v12554_v28 = vld [vmem:[#allocation3 + $0x10] sm:$0xff]  ;;  %12495 = vst.msk [vmem:[#allocation3 + $0x38] sm:$0xff] %vm9316_vm4, %v12463_v46 }
 0x667   : > { %v12911_v22 = vadd.f32 %v12760_v17, %v12554_v28  ;;  %12494 = vst.msk [vmem:[#allocation3 + $0x30] sm:$0xff] %vm9316_vm4, %v12462_v11  ;;  %v17103_v55 = vpop.f32.mrb[136].mxu1  ;;  %v12118_v11 = vld [vmem:[#allocation3 + $0x98] sm:$0xff] }
 0x668   : > { %v17159_v39 = vpop.f32.mrb[168].mxu0  ;;  %12944 = vst.msk [vmem:[#allocation3 + $0x18] sm:$0xff] %vm9316_vm4, %v12912_v9  ;;  %v12465_v53 = vadd.f32 %v17103_v55, %v12108_v41  ;;  %v12337_v0 = vpop.f32.mrb[137].mxu1  ;;  %v12117_v41 = vld [vmem:[#allocation3 + $0x90] sm:$0xff] }
 0x669   : > { %v12790_v43 = vpop.f32.mrb[169].mxu0  ;;  %12943 = vst.msk [vmem:[#allocation3 + $0x10] sm:$0xff] %vm9316_vm4, %v12911_v22  ;;  %v12557_v34 = vld [vmem:[#allocation3 + $0x28] sm:$0xff]  ;;  %v12464_v36 = vadd.f32 %v12337_v0, %v12107_v15 }
 0x66a   : > { %v12914_v52 = vadd.f32 %v17153_v32, %v12557_v34  ;;  %v12556_v37 = vld [vmem:[#allocation3 + $0x20] sm:$0xff]  ;;  %12497 = vst.msk [vmem:[#allocation3 + $0x48] sm:$0xff] %vm9316_vm4, %v12465_v53 }
 0x66b   : > { %v12913_v4 = vadd.f32 %v12770_v56, %v12556_v37  ;;  %12496 = vst.msk [vmem:[#allocation3 + $0x40] sm:$0xff] %vm9316_vm4, %v12464_v36  ;;  %v17106_v13 = vpop.f32.mrb[138].mxu1  ;;  %v12120_v36 = vld [vmem:[#allocation3 + $0xa8] sm:$0xff] }
 0x66c   : > { %v17162_v24 = vpop.f32.mrb[170].mxu0  ;;  %12946 = vst.msk [vmem:[#allocation3 + $0x28] sm:$0xff] %vm9316_vm4, %v12914_v52  ;;  %v12467_v6 = vadd.f32 %v17106_v13, %v12110_v61  ;;  %v12347_v21 = vpop.f32.mrb[139].mxu1  ;;  %v12119_v61 = vld [vmem:[#allocation3 + $0xa0] sm:$0xff] }
 0x66d   : > { %v12800_v50 = vpop.f32.mrb[171].mxu0  ;;  %12945 = vst.msk [vmem:[#allocation3 + $0x20] sm:$0xff] %vm9316_vm4, %v12913_v4  ;;  %v12559_v3 = vld [vmem:[#allocation3 + $0x38] sm:$0xff]  ;;  %v12466_v33 = vadd.f32 %v12347_v21, %v12109_v12 }
 0x66e   : > { %v12916_v35 = vadd.f32 %v17156_v16, %v12559_v3  ;;  %v12558_v14 = vld [vmem:[#allocation3 + $0x30] sm:$0xff]  ;;  %12499 = vst.msk [vmem:[#allocation3 + $0x58] sm:$0xff] %vm9316_vm4, %v12467_v6 }
 0x66f   : > { %v12915_v26 = vadd.f32 %v12780_v38, %v12558_v14  ;;  %12498 = vst.msk [vmem:[#allocation3 + $0x50] sm:$0xff] %vm9316_vm4, %v12466_v33  ;;  %v17109_v47 = vpop.f32.mrb[140].mxu1  ;;  %v12122_v33 = vld [vmem:[#allocation3 + $0xb8] sm:$0xff] }
 0x670   : > { %v17165_v31 = vpop.f32.mrb[172].mxu0  ;;  %12948 = vst.msk [vmem:[#allocation3 + $0x38] sm:$0xff] %vm9316_vm4, %v12916_v35  ;;  %v12469_v40 = vadd.f32 %v17109_v47, %v12112_v51  ;;  %v12357_v54 = vpop.f32.mrb[141].mxu1  ;;  %v12121_v51 = vld [vmem:[#allocation3 + $0xb0] sm:$0xff] }
 0x671   : > { %v12810_v59 = vpop.f32.mrb[173].mxu0  ;;  %12947 = vst.msk [vmem:[#allocation3 + $0x30] sm:$0xff] %vm9316_vm4, %v12915_v26  ;;  %v12561_v25 = vld [vmem:[#allocation3 + $0x48] sm:$0xff]  ;;  %v12468_v27 = vadd.f32 %v12357_v54, %v12111_v7 }
 0x672   : > { %v12918_v60 = vadd.f32 %v17159_v39, %v12561_v25  ;;  %v12560_v17 = vld [vmem:[#allocation3 + $0x40] sm:$0xff]  ;;  %12501 = vst.msk [vmem:[#allocation3 + $0x68] sm:$0xff] %vm9316_vm4, %v12469_v40 }
 0x673   : > { %v12917_v30 = vadd.f32 %v12790_v43, %v12560_v17  ;;  %12500 = vst.msk [vmem:[#allocation3 + $0x60] sm:$0xff] %vm9316_vm4, %v12468_v27  ;;  %v17112_v63 = vpop.f32.mrb[142].mxu1  ;;  %v12124_v27 = vld [vmem:[#allocation3 + $0xc8] sm:$0xff] }
 0x674   : > { %v17168_v20 = vpop.f32.mrb[174].mxu0  ;;  %12950 = vst.msk [vmem:[#allocation3 + $0x48] sm:$0xff] %vm9316_vm4, %v12918_v60  ;;  %v12471_v48 = vadd.f32 %v17112_v63, %v12114_v8  ;;  %v12367_v29 = vpop.f32.mrb[143].mxu1  ;;  %v12123_v8 = vld [vmem:[#allocation3 + $0xc0] sm:$0xff] }
 0x675   : > { %v12820_v32 = vpop.f32.mrb[175].mxu0  ;;  %12949 = vst.msk [vmem:[#allocation3 + $0x40] sm:$0xff] %vm9316_vm4, %v12917_v30  ;;  %v12563_v19 = vld [vmem:[#allocation3 + $0x58] sm:$0xff]  ;;  %v12470_v57 = vadd.f32 %v12367_v29, %v12113_v44 }
 0x676   : > { %v12920_v23 = vadd.f32 %v17162_v24, %v12563_v19  ;;  %v12562_v56 = vld [vmem:[#allocation3 + $0x50] sm:$0xff]  ;;  %12503 = vst.msk [vmem:[#allocation3 + $0x78] sm:$0xff] %vm9316_vm4, %v12471_v48 }
 0x677   : > { %v12919_v5 = vadd.f32 %v12800_v50, %v12562_v56  ;;  %12502 = vst.msk [vmem:[#allocation3 + $0x70] sm:$0xff] %vm9316_vm4, %v12470_v57  ;;  %v17115_v42 = vpop.f32.mrb[144].mxu1  ;;  %v12126_v57 = vld [vmem:[#allocation3 + $0xd8] sm:$0xff] }
 0x678   : > { %v17171_v49 = vpop.f32.mrb[176].mxu0  ;;  %12952 = vst.msk [vmem:[#allocation3 + $0x58] sm:$0xff] %vm9316_vm4, %v12920_v23  ;;  %v12473_v18 = vadd.f32 %v17115_v42, %v12116_v58  ;;  %v12377_v1 = vpop.f32.mrb[145].mxu1  ;;  %v12125_v58 = vld [vmem:[#allocation3 + $0xd0] sm:$0xff] }
 0x679   : > { %v12830_v16 = vpop.f32.mrb[177].mxu0  ;;  %12951 = vst.msk [vmem:[#allocation3 + $0x50] sm:$0xff] %vm9316_vm4, %v12919_v5  ;;  %v12565_v46 = vld [vmem:[#allocation3 + $0x68] sm:$0xff]  ;;  %v12472_v2 = vadd.f32 %v12377_v1, %v12115_v10 }
 0x67a   : > { %v12922_v62 = vadd.f32 %v17165_v31, %v12565_v46  ;;  %v12564_v38 = vld [vmem:[#allocation3 + $0x60] sm:$0xff]  ;;  %12505 = vst.msk [vmem:[#allocation3 + $0x88] sm:$0xff] %vm9316_vm4, %v12473_v18 }
 0x67b   : > { %v12921_v45 = vadd.f32 %v12810_v59, %v12564_v38  ;;  %12504 = vst.msk [vmem:[#allocation3 + $0x80] sm:$0xff] %vm9316_vm4, %v12472_v2  ;;  %v17118_v9 = vpop.f32.mrb[146].mxu1  ;;  %v12128_v2 = vld [vmem:[#allocation3 + $0xe8] sm:$0xff] }
 0x67c   : > { %v17174_v28 = vpop.f32.mrb[178].mxu0  ;;  %12954 = vst.msk [vmem:[#allocation3 + $0x68] sm:$0xff] %vm9316_vm4, %v12922_v62  ;;  %v12475_v22 = vadd.f32 %v17118_v9, %v12118_v11  ;;  %v12387_v55 = vpop.f32.mrb[147].mxu1  ;;  %v12127_v11 = vld [vmem:[#allocation3 + $0xe0] sm:$0xff] }
 0x67d   : > { %v12840_v39 = vpop.f32.mrb[179].mxu0  ;;  %12953 = vst.msk [vmem:[#allocation3 + $0x60] sm:$0xff] %vm9316_vm4, %v12921_v45  ;;  %v12567_v53 = vld [vmem:[#allocation3 + $0x78] sm:$0xff]  ;;  %v12474_v15 = vadd.f32 %v12387_v55, %v12117_v41 }
 0x67e   : > { %v12924_v0 = vadd.f32 %v17168_v20, %v12567_v53  ;;  %v12566_v43 = vld [vmem:[#allocation3 + $0x70] sm:$0xff]  ;;  %12507 = vst.msk [vmem:[#allocation3 + $0x98] sm:$0xff] %vm9316_vm4, %v12475_v22 }
 0x67f   : > { %v12923_v34 = vadd.f32 %v12820_v32, %v12566_v43  ;;  %12506 = vst.msk [vmem:[#allocation3 + $0x90] sm:$0xff] %vm9316_vm4, %v12474_v15  ;;  %v17121_v52 = vpop.f32.mrb[148].mxu1  ;;  %v12130_v15 = vld [vmem:[#allocation3 + $0xf8] sm:$0xff] }
 0x680   : > { %v17177_v37 = vpop.f32.mrb[180].mxu0  ;;  %12956 = vst.msk [vmem:[#allocation3 + $0x78] sm:$0xff] %vm9316_vm4, %v12924_v0  ;;  %v12477_v4 = vadd.f32 %v17121_v52, %v12120_v36  ;;  %v12397_v13 = vpop.f32.mrb[149].mxu1  ;;  %v12129_v36 = vld [vmem:[#allocation3 + $0xf0] sm:$0xff] }
 0x681   : > { %v12850_v24 = vpop.f32.mrb[181].mxu0  ;;  %12955 = vst.msk [vmem:[#allocation3 + $0x70] sm:$0xff] %vm9316_vm4, %v12923_v34  ;;  %v12569_v6 = vld [vmem:[#allocation3 + $0x88] sm:$0xff]  ;;  %v12476_v12 = vadd.f32 %v12397_v13, %v12119_v61 }
 0x682   : > { %v12926_v21 = vadd.f32 %v17171_v49, %v12569_v6  ;;  %v12568_v50 = vld [vmem:[#allocation3 + $0x80] sm:$0xff]  ;;  %12509 = vst.msk [vmem:[#allocation3 + $0xa8] sm:$0xff] %vm9316_vm4, %v12477_v4 }
 0x683   : > { %v12925_v3 = vadd.f32 %v12830_v16, %v12568_v50  ;;  %12508 = vst.msk [vmem:[#allocation3 + $0xa0] sm:$0xff] %vm9316_vm4, %v12476_v12  ;;  %v17124_v35 = vpop.f32.mrb[150].mxu1  ;;  %v13006_v12 = vld [vmem:[#allocation3 + $0x8] sm:$0xff]  ;;  %v13008_v50 = vld [vmem:[#allocation3 + $0x18] sm:$0xff] }
 0x684   : > { %v17180_v14 = vpop.f32.mrb[182].mxu0  ;;  %12958 = vst.msk [vmem:[#allocation3 + $0x88] sm:$0xff] %vm9316_vm4, %v12926_v21  ;;  %v12479_v26 = vadd.f32 %v17124_v35, %v12122_v33  ;;  %v12407_v47 = vpop.f32.mrb[151].mxu1 }
 0x685   : > { %v12860_v31 = vpop.f32.mrb[183].mxu0  ;;  %12957 = vst.msk [vmem:[#allocation3 + $0x80] sm:$0xff] %vm9316_vm4, %v12925_v3  ;;  %v12571_v40 = vld [vmem:[#allocation3 + $0x98] sm:$0xff]  ;;  %v12478_v7 = vadd.f32 %v12407_v47, %v12121_v51  ;;  %v13007_v51 = vld [vmem:[#allocation3 + $0x10] sm:$0xff] }
 0x686   : > { %v12928_v54 = vadd.f32 %v17174_v28, %v12571_v40  ;;  %v12570_v59 = vld [vmem:[#allocation3 + $0x90] sm:$0xff]  ;;  %12511 = vst.msk [vmem:[#allocation3 + $0xb8] sm:$0xff] %vm9316_vm4, %v12479_v26 }
 0x687   : > { %v12927_v25 = vadd.f32 %v12840_v39, %v12570_v59  ;;  %12510 = vst.msk [vmem:[#allocation3 + $0xb0] sm:$0xff] %vm9316_vm4, %v12478_v7  ;;  %v17127_v60 = vpop.f32.mrb[152].mxu1 }
 0x688   : > { %v17183_v17 = vpop.f32.mrb[184].mxu0  ;;  %12960 = vst.msk [vmem:[#allocation3 + $0x98] sm:$0xff] %vm9316_vm4, %v12928_v54  ;;  %v12481_v30 = vadd.f32 %v17127_v60, %v12124_v27  ;;  %v12417_v63 = vpop.f32.mrb[153].mxu1  ;;  %v13010_v27 = vld [vmem:[#allocation3 + $0x28] sm:$0xff] }
 0x689   : > { %v12870_v20 = vpop.f32.mrb[185].mxu0  ;;  %12959 = vst.msk [vmem:[#allocation3 + $0x90] sm:$0xff] %vm9316_vm4, %v12927_v25  ;;  %v12573_v48 = vld [vmem:[#allocation3 + $0xa8] sm:$0xff]  ;;  %v12480_v44 = vadd.f32 %v12417_v63, %v12123_v8 }
 0x68a   : > { %v12930_v29 = vadd.f32 %v17177_v37, %v12573_v48  ;;  %v12572_v32 = vld [vmem:[#allocation3 + $0xa0] sm:$0xff]  ;;  %12513 = vst.msk [vmem:[#allocation3 + $0xc8] sm:$0xff] %vm9316_vm4, %v12481_v30 }
 0x68b   : > { %v12929_v19 = vadd.f32 %v12850_v24, %v12572_v32  ;;  %12512 = vst.msk [vmem:[#allocation3 + $0xc0] sm:$0xff] %vm9316_vm4, %v12480_v44  ;;  %v17130_v23 = vpop.f32.mrb[154].mxu1  ;;  %v13009_v30 = vld [vmem:[#allocation3 + $0x20] sm:$0xff]  ;;  %v13012_v32 = vld [vmem:[#allocation3 + $0x38] sm:$0xff] }
 0x68c   : > { %v17186_v56 = vpop.f32.mrb[186].mxu0  ;;  %12962 = vst.msk [vmem:[#allocation3 + $0xa8] sm:$0xff] %vm9316_vm4, %v12930_v29  ;;  %v12483_v5 = vadd.f32 %v17130_v23, %v12126_v57  ;;  %v12427_v42 = vpop.f32.mrb[155].mxu1  ;;  %v13011_v23 = vld [vmem:[#allocation3 + $0x30] sm:$0xff] }
 0x68d   : > { %v12880_v49 = vpop.f32.mrb[187].mxu0  ;;  %12961 = vst.msk [vmem:[#allocation3 + $0xa0] sm:$0xff] %vm9316_vm4, %v12929_v19  ;;  %v12575_v18 = vld [vmem:[#allocation3 + $0xb8] sm:$0xff]  ;;  %v12482_v10 = vadd.f32 %v12427_v42, %v12125_v58 }
 0x68e   : > { %v12932_v1 = vadd.f32 %v17180_v14, %v12575_v18  ;;  %v12574_v16 = vld [vmem:[#allocation3 + $0xb0] sm:$0xff]  ;;  %12515 = vst.msk [vmem:[#allocation3 + $0xd8] sm:$0xff] %vm9316_vm4, %v12483_v5  ;;  %v13005_v14 = vld [vmem:[#allocation3] sm:$0xff] }
 0x68f   : > { %v12931_v46 = vadd.f32 %v12860_v31, %v12574_v16  ;;  %12514 = vst.msk [vmem:[#allocation3 + $0xd0] sm:$0xff] %vm9316_vm4, %v12482_v10  ;;  %v17133_v62 = vpop.f32.mrb[156].mxu1  ;;  %v13014_v10 = vld [vmem:[#allocation3 + $0x48] sm:$0xff] }
 0x690   : > { %v17189_v38 = vpop.f32.mrb[188].mxu0  ;;  %12964 = vst.msk [vmem:[#allocation3 + $0xb8] sm:$0xff] %vm9316_vm4, %v12932_v1  ;;  %v12485_v45 = vadd.f32 %v17133_v62, %v12128_v2  ;;  %v12437_v9 = vpop.f32.mrb[157].mxu1 }
 0x691   : > { %v12890_v28 = vpop.f32.mrb[189].mxu0  ;;  %12963 = vst.msk [vmem:[#allocation3 + $0xb0] sm:$0xff] %vm9316_vm4, %v12931_v46  ;;  %v12577_v22 = vld [vmem:[#allocation3 + $0xc8] sm:$0xff]  ;;  %v12484_v41 = vadd.f32 %v12437_v9, %v12127_v11  ;;  %v13013_v46 = vld [vmem:[#allocation3 + $0x40] sm:$0xff]  ;;  %v13016_v11 = vld [vmem:[#allocation3 + $0x58] sm:$0xff] }
 0x692   : > { %v12934_v55 = vadd.f32 %v17183_v17, %v12577_v22  ;;  %v12576_v39 = vld [vmem:[#allocation3 + $0xc0] sm:$0xff]  ;;  %12517 = vst.msk [vmem:[#allocation3 + $0xe8] sm:$0xff] %vm9316_vm4, %v12485_v45  ;;  %v13015_v22 = vld [vmem:[#allocation3 + $0x50] sm:$0xff] }
 0x693   : > { %v12933_v53 = vadd.f32 %v12870_v20, %v12576_v39  ;;  %12516 = vst.msk [vmem:[#allocation3 + $0xe0] sm:$0xff] %vm9316_vm4, %v12484_v41  ;;  %v17136_v0 = vpop.f32.mrb[158].mxu1 }
 0x694   : > { %v17192_v43 = vpop.f32.mrb[190].mxu0  ;;  %12966 = vst.msk [vmem:[#allocation3 + $0xc8] sm:$0xff] %vm9316_vm4, %v12934_v55  ;;  %v12487_v34 = vadd.f32 %v17136_v0, %v12130_v15  ;;  %v12447_v52 = vpop.f32.mrb[159].mxu1  ;;  %v13018_v15 = vld [vmem:[#allocation3 + $0x68] sm:$0xff] }
 0x695   : > { %v12900_v37 = vpop.f32.mrb[191].mxu0  ;;  %12965 = vst.msk [vmem:[#allocation3 + $0xc0] sm:$0xff] %vm9316_vm4, %v12933_v53  ;;  %v12579_v4 = vld [vmem:[#allocation3 + $0xd8] sm:$0xff]  ;;  %v12486_v61 = vadd.f32 %v12447_v52, %v12129_v36 }
 0x696   : > { %v12936_v13 = vadd.f32 %v17186_v56, %v12579_v4  ;;  %v12578_v24 = vld [vmem:[#allocation3 + $0xd0] sm:$0xff]  ;;  %12519 = vst.msk [vmem:[#allocation3 + $0xf8] sm:$0xff] %vm9316_vm4, %v12487_v34  ;;  %v13017_v34 = vld [vmem:[#allocation3 + $0x60] sm:$0xff] }
 0x697   : > { %v12935_v6 = vadd.f32 %v12880_v49, %v12578_v24  ;;  %12518 = vst.msk [vmem:[#allocation3 + $0xf0] sm:$0xff] %vm9316_vm4, %v12486_v61  ;;  %v17206_v3 = vpop.f32.mrb[160].mxu1  ;;  %v13020_v61 = vld [vmem:[#allocation3 + $0x78] sm:$0xff] }
 0x698   : > { %v17203_v21 = vpop.f32.mrb[192].mxu0  ;;  %12968 = vst.msk [vmem:[#allocation3 + $0xd8] sm:$0xff] %vm9316_vm4, %v12936_v13  ;;  %v13365_v35 = vadd.f32 %v17206_v3, %v13008_v50  ;;  %v13213_v47 = vpop.f32.mrb[161].mxu1 }
 0x699   : > { %v13363_v33 = vadd.f32 %v17203_v21, %v13006_v12  ;;  %v13203_v26 = vpop.f32.mrb[193].mxu0  ;;  %12967 = vst.msk [vmem:[#allocation3 + $0xd0] sm:$0xff] %vm9316_vm4, %v12935_v6  ;;  %v12581_v31 = vld [vmem:[#allocation3 + $0xe8] sm:$0xff]  ;;  %v13364_v7 = vadd.f32 %v13213_v47, %v13007_v51  ;;  %v13019_v6 = vld [vmem:[#allocation3 + $0x70] sm:$0xff] }
 0x69a   : > { %v13362_v40 = vadd.f32 %v13203_v26, %v13005_v14  ;;  %v12938_v54 = vadd.f32 %v17189_v38, %v12581_v31  ;;  %v12580_v59 = vld [vmem:[#allocation3 + $0xe0] sm:$0xff]  ;;  %13397 = vst.msk [vmem:[#allocation3 + $0x18] sm:$0xff] %vm9316_vm4, %v13365_v35 }
 0x69b   : > { %13395 = vst.msk [vmem:[#allocation3 + $0x8] sm:$0xff] %vm9316_vm4, %v13363_v33  ;;  %v12937_v25 = vadd.f32 %v12890_v28, %v12580_v59  ;;  %13396 = vst.msk [vmem:[#allocation3 + $0x10] sm:$0xff] %vm9316_vm4, %v13364_v7  ;;  %v17209_v60 = vpop.f32.mrb[162].mxu1  ;;  %v13022_v33 = vld [vmem:[#allocation3 + $0x88] sm:$0xff]  ;;  %v13021_v26 = vld [vmem:[#allocation3 + $0x80] sm:$0xff] }
 0x69c   : > { %13394 = vst.msk [vmem:[#allocation3] sm:$0xff] %vm9316_vm4, %v13362_v40  ;;  %12970 = vst.msk [vmem:[#allocation3 + $0xe8] sm:$0xff] %vm9316_vm4, %v12938_v54  ;;  %v13367_v17 = vadd.f32 %v17209_v60, %v13010_v27  ;;  %v13223_v8 = vpop.f32.mrb[163].mxu1  ;;  %v13024_v7 = vld [vmem:[#allocation3 + $0x98] sm:$0xff] }
 0x69d   : > { %12969 = vst.msk [vmem:[#allocation3 + $0xe0] sm:$0xff] %vm9316_vm4, %v12937_v25  ;;  %v12583_v63 = vld [vmem:[#allocation3 + $0xf8] sm:$0xff]  ;;  %v13366_v20 = vadd.f32 %v13223_v8, %v13009_v30  ;;  %v13023_v25 = vld [vmem:[#allocation3 + $0x90] sm:$0xff]  ;;  %v13026_v8 = vld [vmem:[#allocation3 + $0xa8] sm:$0xff] }
 0x69e   : > { %v12940_v48 = vadd.f32 %v17192_v43, %v12583_v63  ;;  %v12582_v44 = vld [vmem:[#allocation3 + $0xf0] sm:$0xff]  ;;  %13399 = vst.msk [vmem:[#allocation3 + $0x28] sm:$0xff] %vm9316_vm4, %v13367_v17 }
 0x69f   : > { %v12939_v29 = vadd.f32 %v12900_v37, %v12582_v44  ;;  %13398 = vst.msk [vmem:[#allocation3 + $0x20] sm:$0xff] %vm9316_vm4, %v13366_v20  ;;  %v17212_v19 = vpop.f32.mrb[164].mxu1 }
 0x6a0   : > { %12972 = vst.msk [vmem:[#allocation3 + $0xf8] sm:$0xff] %vm9316_vm4, %v12940_v48  ;;  %v13369_v57 = vadd.f32 %v17212_v19, %v13012_v32  ;;  %v13233_v56 = vpop.f32.mrb[165].mxu1  ;;  %v13025_v48 = vld [vmem:[#allocation3 + $0xa0] sm:$0xff] }
 0x6a1   : > { %12971 = vst.msk [vmem:[#allocation3 + $0xf0] sm:$0xff] %vm9316_vm4, %v12939_v29  ;;  %v13429_v58 = vld [vmem:[#allocation3 + $0x18] sm:$0xff]  ;;  %v13368_v42 = vadd.f32 %v13233_v56, %v13011_v23 }
 0x6a2   : > { %v13427_v5 = vld [vmem:[#allocation3 + $0x8] sm:$0xff]  ;;  %13461 = vst.msk [vmem:[%s21580_s14 + $0x18] sm:$0xff] %vm9316_vm4, %v13429_v58  ;;  %v13428_v18 = vld [vmem:[#allocation3 + $0x10] sm:$0xff]  ;;  %13401 = vst.msk [vmem:[#allocation3 + $0x38] sm:$0xff] %vm9316_vm4, %v13369_v57 }
 0x6a3   : > { %13459 = vst.msk [vmem:[%s21580_s14 + $0x8] sm:$0xff] %vm9316_vm4, %v13427_v5  ;;  %v13426_v49 = vld [vmem:[#allocation3] sm:$0xff]  ;;  %13460 = vst.msk [vmem:[%s21580_s14 + $0x10] sm:$0xff] %vm9316_vm4, %v13428_v18  ;;  %v17215_v1 = vpop.f32.mrb[166].mxu1  ;;  %v13028_v57 = vld [vmem:[#allocation3 + $0xb8] sm:$0xff] }
 0x6a4   : > { %13458 = vst.msk [vmem:[%s21580_s14] sm:$0xff] %vm9316_vm4, %v13426_v49  ;;  %13400 = vst.msk [vmem:[#allocation3 + $0x30] sm:$0xff] %vm9316_vm4, %v13368_v42  ;;  %v13371_v16 = vadd.f32 %v17215_v1, %v13014_v10  ;;  %v13243_v2 = vpop.f32.mrb[167].mxu1  ;;  %v13027_v5 = vld [vmem:[#allocation3 + $0xb0] sm:$0xff]  ;;  %v13030_v10 = vld [vmem:[#allocation3 + $0xc8] sm:$0xff] }
 0x6a5   : > { %v13431_v62 = vld [vmem:[#allocation3 + $0x28] sm:$0xff]  ;;  %v13370_v38 = vadd.f32 %v13243_v2, %v13013_v46  ;;  %v13029_v46 = vld [vmem:[#allocation3 + $0xc0] sm:$0xff] }
 0x6a6   : > { %13463 = vst.msk [vmem:[%s21580_s14 + $0x28] sm:$0xff] %vm9316_vm4, %v13431_v62  ;;  %v13430_v45 = vld [vmem:[#allocation3 + $0x20] sm:$0xff]  ;;  %13403 = vst.msk [vmem:[#allocation3 + $0x48] sm:$0xff] %vm9316_vm4, %v13371_v16 }
 0x6a7   : > { %13462 = vst.msk [vmem:[%s21580_s14 + $0x20] sm:$0xff] %vm9316_vm4, %v13430_v45  ;;  %13402 = vst.msk [vmem:[#allocation3 + $0x40] sm:$0xff] %vm9316_vm4, %v13370_v38  ;;  %v17218_v9 = vpop.f32.mrb[168].mxu1 }
 0x6a8   : > { %v13373_v28 = vadd.f32 %v17218_v9, %v13016_v11  ;;  %v13253_v41 = vpop.f32.mrb[169].mxu1  ;;  %v13032_v11 = vld [vmem:[#allocation3 + $0xd8] sm:$0xff] }
 0x6a9   : > { %v13433_v55 = vld [vmem:[#allocation3 + $0x38] sm:$0xff]  ;;  %v13372_v39 = vadd.f32 %v13253_v41, %v13015_v22  ;;  %v13031_v22 = vld [vmem:[#allocation3 + $0xd0] sm:$0xff] }
 0x6aa   : > { %13465 = vst.msk [vmem:[%s21580_s14 + $0x38] sm:$0xff] %vm9316_vm4, %v13433_v55  ;;  %13405 = vst.msk [vmem:[#allocation3 + $0x58] sm:$0xff] %vm9316_vm4, %v13373_v28 }
 0x6ab   : > { %v13432_v53 = vld [vmem:[#allocation3 + $0x30] sm:$0xff]  ;;  %13404 = vst.msk [vmem:[#allocation3 + $0x50] sm:$0xff] %vm9316_vm4, %v13372_v39  ;;  %v17221_v0 = vpop.f32.mrb[170].mxu1 }
 0x6ac   : > { %13464 = vst.msk [vmem:[%s21580_s14 + $0x30] sm:$0xff] %vm9316_vm4, %v13432_v53  ;;  %v13375_v43 = vadd.f32 %v17221_v0, %v13018_v15  ;;  %v13263_v36 = vpop.f32.mrb[171].mxu1  ;;  %v13034_v15 = vld [vmem:[#allocation3 + $0xe8] sm:$0xff] }
 0x6ad   : > { %v13435_v52 = vld [vmem:[#allocation3 + $0x48] sm:$0xff]  ;;  %v13374_v37 = vadd.f32 %v13263_v36, %v13017_v34  ;;  %v13033_v34 = vld [vmem:[#allocation3 + $0xe0] sm:$0xff] }
 0x6ae   : > { %13467 = vst.msk [vmem:[%s21580_s14 + $0x48] sm:$0xff] %vm9316_vm4, %v13435_v52  ;;  %v13434_v4 = vld [vmem:[#allocation3 + $0x40] sm:$0xff]  ;;  %13407 = vst.msk [vmem:[#allocation3 + $0x68] sm:$0xff] %vm9316_vm4, %v13375_v43 }
 0x6af   : > { %13466 = vst.msk [vmem:[%s21580_s14 + $0x40] sm:$0xff] %vm9316_vm4, %v13434_v4  ;;  %13406 = vst.msk [vmem:[#allocation3 + $0x60] sm:$0xff] %vm9316_vm4, %v13374_v37  ;;  %v17224_v13 = vpop.f32.mrb[172].mxu1 }
 0x6b0   : > { %v13377_v24 = vadd.f32 %v17224_v13, %v13020_v61  ;;  %v13273_v12 = vpop.f32.mrb[173].mxu1  ;;  %v13036_v61 = vld [vmem:[#allocation3 + $0xf8] sm:$0xff] }
 0x6b1   : > { %v13437_v21 = vld [vmem:[#allocation3 + $0x58] sm:$0xff]  ;;  %v13376_v50 = vadd.f32 %v13273_v12, %v13019_v6  ;;  %v13035_v6 = vld [vmem:[#allocation3 + $0xf0] sm:$0xff] }
 0x6b2   : > { %13469 = vst.msk [vmem:[%s21580_s14 + $0x58] sm:$0xff] %vm9316_vm4, %v13437_v21  ;;  %v13436_v3 = vld [vmem:[#allocation3 + $0x50] sm:$0xff]  ;;  %13409 = vst.msk [vmem:[#allocation3 + $0x78] sm:$0xff] %vm9316_vm4, %v13377_v24 }
 0x6b3   : > { %13468 = vst.msk [vmem:[%s21580_s14 + $0x50] sm:$0xff] %vm9316_vm4, %v13436_v3  ;;  %13408 = vst.msk [vmem:[#allocation3 + $0x70] sm:$0xff] %vm9316_vm4, %v13376_v50  ;;  %v17227_v35 = vpop.f32.mrb[174].mxu1 }
 0x6b4   : > { %v13379_v14 = vadd.f32 %v17227_v35, %v13022_v33  ;;  %v13283_v51 = vpop.f32.mrb[175].mxu1 }
 0x6b5   : > { %v13439_v47 = vld [vmem:[#allocation3 + $0x68] sm:$0xff]  ;;  %v13378_v31 = vadd.f32 %v13283_v51, %v13021_v26 }
 0x6b6   : > { %13471 = vst.msk [vmem:[%s21580_s14 + $0x68] sm:$0xff] %vm9316_vm4, %v13439_v47  ;;  %v13438_v40 = vld [vmem:[#allocation3 + $0x60] sm:$0xff]  ;;  %13411 = vst.msk [vmem:[#allocation3 + $0x88] sm:$0xff] %vm9316_vm4, %v13379_v14 }
 0x6b7   : > { %13470 = vst.msk [vmem:[%s21580_s14 + $0x60] sm:$0xff] %vm9316_vm4, %v13438_v40  ;;  %13410 = vst.msk [vmem:[#allocation3 + $0x80] sm:$0xff] %vm9316_vm4, %v13378_v31  ;;  %v17230_v54 = vpop.f32.mrb[176].mxu1 }
 0x6b8   : > { %v13381_v59 = vadd.f32 %v17230_v54, %v13024_v7  ;;  %v13293_v27 = vpop.f32.mrb[177].mxu1 }
 0x6b9   : > { %v13441_v60 = vld [vmem:[#allocation3 + $0x78] sm:$0xff]  ;;  %v13380_v17 = vadd.f32 %v13293_v27, %v13023_v25 }
 0x6ba   : > { %13473 = vst.msk [vmem:[%s21580_s14 + $0x78] sm:$0xff] %vm9316_vm4, %v13441_v60  ;;  %v13440_v30 = vld [vmem:[#allocation3 + $0x70] sm:$0xff]  ;;  %13413 = vst.msk [vmem:[#allocation3 + $0x98] sm:$0xff] %vm9316_vm4, %v13381_v59 }
 0x6bb   : > { %13472 = vst.msk [vmem:[%s21580_s14 + $0x70] sm:$0xff] %vm9316_vm4, %v13440_v30  ;;  %13412 = vst.msk [vmem:[#allocation3 + $0x90] sm:$0xff] %vm9316_vm4, %v13380_v17  ;;  %v17233_v63 = vpop.f32.mrb[178].mxu1 }
 0x6bc   : > { %v13383_v20 = vadd.f32 %v17233_v63, %v13026_v8  ;;  %v13303_v44 = vpop.f32.mrb[179].mxu1 }
 0x6bd   : > { %v13443_v29 = vld [vmem:[#allocation3 + $0x88] sm:$0xff]  ;;  %v13382_v32 = vadd.f32 %v13303_v44, %v13025_v48 }
 0x6be   : > { %13475 = vst.msk [vmem:[%s21580_s14 + $0x88] sm:$0xff] %vm9316_vm4, %v13443_v29  ;;  %v13442_v19 = vld [vmem:[#allocation3 + $0x80] sm:$0xff]  ;;  %13415 = vst.msk [vmem:[#allocation3 + $0xa8] sm:$0xff] %vm9316_vm4, %v13383_v20 }
 0x6bf   : > { %13474 = vst.msk [vmem:[%s21580_s14 + $0x80] sm:$0xff] %vm9316_vm4, %v13442_v19  ;;  %13414 = vst.msk [vmem:[#allocation3 + $0xa0] sm:$0xff] %vm9316_vm4, %v13382_v32  ;;  %v17236_v23 = vpop.f32.mrb[180].mxu1 }
 0x6c0   : > { %v13385_v56 = vadd.f32 %v17236_v23, %v13028_v57  ;;  %v13313_v58 = vpop.f32.mrb[181].mxu1 }
 0x6c1   : > { %v13445_v42 = vld [vmem:[#allocation3 + $0x98] sm:$0xff]  ;;  %v13384_v49 = vadd.f32 %v13313_v58, %v13027_v5 }
 0x6c2   : > { %13477 = vst.msk [vmem:[%s21580_s14 + $0x98] sm:$0xff] %vm9316_vm4, %v13445_v42  ;;  %v13444_v18 = vld [vmem:[#allocation3 + $0x90] sm:$0xff]  ;;  %13417 = vst.msk [vmem:[#allocation3 + $0xb8] sm:$0xff] %vm9316_vm4, %v13385_v56 }
 0x6c3   : > { %13476 = vst.msk [vmem:[%s21580_s14 + $0x90] sm:$0xff] %vm9316_vm4, %v13444_v18  ;;  %13416 = vst.msk [vmem:[#allocation3 + $0xb0] sm:$0xff] %vm9316_vm4, %v13384_v49  ;;  %v17239_v1 = vpop.f32.mrb[182].mxu1 }
 0x6c4   : > { %v13387_v16 = vadd.f32 %v17239_v1, %v13030_v10  ;;  %v13323_v2 = vpop.f32.mrb[183].mxu1 }
 0x6c5   : > { %v13447_v62 = vld [vmem:[#allocation3 + $0xa8] sm:$0xff]  ;;  %v13386_v38 = vadd.f32 %v13323_v2, %v13029_v46 }
 0x6c6   : > { %13479 = vst.msk [vmem:[%s21580_s14 + $0xa8] sm:$0xff] %vm9316_vm4, %v13447_v62  ;;  %v13446_v45 = vld [vmem:[#allocation3 + $0xa0] sm:$0xff]  ;;  %13419 = vst.msk [vmem:[#allocation3 + $0xc8] sm:$0xff] %vm9316_vm4, %v13387_v16 }
 0x6c7   : > { %13478 = vst.msk [vmem:[%s21580_s14 + $0xa0] sm:$0xff] %vm9316_vm4, %v13446_v45  ;;  %13418 = vst.msk [vmem:[#allocation3 + $0xc0] sm:$0xff] %vm9316_vm4, %v13386_v38  ;;  %v17242_v9 = vpop.f32.mrb[184].mxu1 }
 0x6c8   : > { %v13389_v28 = vadd.f32 %v17242_v9, %v13032_v11  ;;  %v13333_v41 = vpop.f32.mrb[185].mxu1 }
 0x6c9   : > { %v13449_v55 = vld [vmem:[#allocation3 + $0xb8] sm:$0xff]  ;;  %v13388_v39 = vadd.f32 %v13333_v41, %v13031_v22 }
 0x6ca   : > { %13481 = vst.msk [vmem:[%s21580_s14 + $0xb8] sm:$0xff] %vm9316_vm4, %v13449_v55  ;;  %v13448_v53 = vld [vmem:[#allocation3 + $0xb0] sm:$0xff]  ;;  %13421 = vst.msk [vmem:[#allocation3 + $0xd8] sm:$0xff] %vm9316_vm4, %v13389_v28 }
 0x6cb   : > { %13480 = vst.msk [vmem:[%s21580_s14 + $0xb0] sm:$0xff] %vm9316_vm4, %v13448_v53  ;;  %13420 = vst.msk [vmem:[#allocation3 + $0xd0] sm:$0xff] %vm9316_vm4, %v13388_v39  ;;  %v17245_v0 = vpop.f32.mrb[186].mxu1 }
 0x6cc   : > { %v13391_v43 = vadd.f32 %v17245_v0, %v13034_v15  ;;  %v13343_v36 = vpop.f32.mrb[187].mxu1 }
 0x6cd   : > { %v13451_v52 = vld [vmem:[#allocation3 + $0xc8] sm:$0xff]  ;;  %v13390_v37 = vadd.f32 %v13343_v36, %v13033_v34 }
 0x6ce   : > { %13483 = vst.msk [vmem:[%s21580_s14 + $0xc8] sm:$0xff] %vm9316_vm4, %v13451_v52  ;;  %v13450_v4 = vld [vmem:[#allocation3 + $0xc0] sm:$0xff]  ;;  %13423 = vst.msk [vmem:[#allocation3 + $0xe8] sm:$0xff] %vm9316_vm4, %v13391_v43 }
 0x6cf   : > { %13482 = vst.msk [vmem:[%s21580_s14 + $0xc0] sm:$0xff] %vm9316_vm4, %v13450_v4  ;;  %13422 = vst.msk [vmem:[#allocation3 + $0xe0] sm:$0xff] %vm9316_vm4, %v13390_v37  ;;  %v17248_v13 = vpop.f32.mrb[188].mxu1 }
 0x6d0   : > { %v13393_v24 = vadd.f32 %v17248_v13, %v13036_v61  ;;  %v13353_v12 = vpop.f32.mrb[189].mxu1 }
 0x6d1   : > { %v13453_v21 = vld [vmem:[#allocation3 + $0xd8] sm:$0xff]  ;;  %v13392_v50 = vadd.f32 %v13353_v12, %v13035_v6 }
 0x6d2   : > { %13485 = vst.msk [vmem:[%s21580_s14 + $0xd8] sm:$0xff] %vm9316_vm4, %v13453_v21  ;;  %v13452_v3 = vld [vmem:[#allocation3 + $0xd0] sm:$0xff]  ;;  %13425 = vst.msk [vmem:[#allocation3 + $0xf8] sm:$0xff] %vm9316_vm4, %v13393_v24 }
 0x6d3   : > { %13484 = vst.msk [vmem:[%s21580_s14 + $0xd0] sm:$0xff] %vm9316_vm4, %v13452_v3  ;;  %13424 = vst.msk [vmem:[#allocation3 + $0xf0] sm:$0xff] %vm9316_vm4, %v13392_v50 }
 0x6d5   : > { %v13455_v33 = vld [vmem:[#allocation3 + $0xe8] sm:$0xff] }
 0x6d6   : > { %13487 = vst.msk [vmem:[%s21580_s14 + $0xe8] sm:$0xff] %vm9316_vm4, %v13455_v33  ;;  %v13454_v35 = vld [vmem:[#allocation3 + $0xe0] sm:$0xff] }
 0x6d7   : > { %13486 = vst.msk [vmem:[%s21580_s14 + $0xe0] sm:$0xff] %vm9316_vm4, %v13454_v35 }
 0x6d9   : > { %v13457_v14 = vld [vmem:[#allocation3 + $0xf8] sm:$0xff] }
 0x6da   : > { %13489 = vst.msk [vmem:[%s21580_s14 + $0xf8] sm:$0xff] %vm9316_vm4, %v13457_v14  ;;  %v13456_v26 = vld [vmem:[#allocation3 + $0xf0] sm:$0xff] }
 0x6db   : > { %13488 = vst.msk [vmem:[%s21580_s14 + $0xf0] sm:$0xff] %vm9316_vm4, %v13456_v26 }
 0x6dc PF: > { %s19_s30 = sadd.s32 1, %s17636_s30  }
 0x6dd   : > { %p16_p4 = scmp.ge.s32.totalorder %s19_s30, 4  }
 0x6df   :  { %18 = sbr.rel (!%p16_p4) target bundleno = 1 (0x1), region = 89 }

</bundles_post_ra>
